<compile_context>
chip_gen: v5e
topology: v5e:2x2
jax: 0.10.0
libtpu: 0.0.40
codegen_flags: <defaults>
</compile_context>

<pallas_src>
import jax
import jax.numpy as jnp
from jax.experimental import pallas as pl
from jax.experimental.pallas import tpu as pltpu

NUM_CLASSES = 10   # args.num_classes
BB = 16            # images per grid step (multiple of 8; 16 keeps bf16 tiles pure)


# ----------------------------- Pallas kernel --------------------------------

def _cnn_cifar_kernel(xs_ref, c1w_ref, c1b_ref, c2w_ref, c2b_ref,
                      f1w_ref, f1b_ref, f2w_ref, f2b_ref, f3w_ref, f3b_ref,
                      o_ref, lhs1_ref, lhs2_ref, h1_ref):
    """Whole CNNCifar forward for BB images (one grid step).

    xs_ref : (8, BB, 512) bf16   input, lane = (row%4)*128 + c*32 + w,
                                 sublane dim = row//4, second dim = image.
    c1w_ref: (512, 256) bf16     conv1 Toeplitz, rows=(kh*3+c)*32+w_in,
                                 cols = par*128 + cout*16 + jp
    c2w_ref: (512, 256) bf16     conv2 Toeplitz, rows=(kh2*6+c2)*16+w2,
                                 cols = par*128 + cout2*5 + jpp
    c*b_ref: (1, 128) f32        biases replicated over pooled cols
    f1w_ref: (5, 128, 128) bf16  fc1 weights split by pooled-row index ipp
    f2w/f3w: (128, 128) bf16     padded fc2 / fc3 weights; f*b: (1,128) f32
    o_ref  : (BB, 128) f32       padded log-softmax output (10 valid lanes)
    lhs1/lhs2: VMEM bf16 im2col staging; h1: (2, 7*BB, 128) bf16 pooled conv1.
    """
    f32 = jnp.float32
    bf16 = jnp.bfloat16
    n1 = 7 * BB     # rows per conv1 (p, s) block
    n2 = 5 * BB     # rows per conv2 (s) block

    # Pad lanes of the staged LHS are never written below; zero them so
    # stale VMEM (possibly NaN/Inf bit patterns) never reaches the MXU.
    lhs1_ref[:, 480:512] = jnp.zeros((4 * n1, 32), bf16)
    lhs2_ref[:, 480:512] = jnp.zeros((2 * n2, 32), bf16)

    # ---- conv1 im2col LHS, staged in VMEM ----------------------------------
    # lhs1[( (p*2+s)*7 + q)*BB + b, (kh*3+c)*32 + w] = x[b, c, 4q + 2p+s+kh, w]
    for p in range(2):
        for s in range(2):
            r0 = (p * 2 + s) * n1
            for kh in range(5):
                o = 2 * p + s + kh                     # input-row offset 0..7
                piece = xs_ref[o // 4:o // 4 + 7, :,
                               (o % 4) * 128:(o % 4) * 128 + 96]   # (7,BB,96)
                lhs1_ref[r0:r0 + n1, kh * 96:kh * 96 + 96] = \
                    piece.reshape(n1, 96)

    # ---- conv1 matmuls + folded 2x2 max-pool + bias + ReLU ------------------
    for p in range(2):
        m = None
        for s in range(2):
            r0 = (p * 2 + s) * n1
            y = jnp.dot(lhs1_ref[r0:r0 + n1, :], c1w_ref[...],
                        preferred_element_type=f32)            # (7BB, 256)
            mm = jnp.maximum(y[:, :128], y[:, 128:])           # pool: col parity
            m = mm if m is None else jnp.maximum(m, mm)        # pool: row offset
        # h1[p, q*BB+b, cout*16+jp] = pooled ReLU conv1 at pooled row 2q+p
        h1_ref[p] = jnp.maximum(m + c1b_ref[...], 0.0).astype(bf16)

    # ---- conv2 im2col LHS ---------------------------------------------------
    # lhs2[(s*5+ipp)*BB + b, (kh2*6+c2)*16 + w2] = h1[b, 2*ipp+s+kh2, c2, w2]
    for s in range(2):
        r0 = s * n2
        for kh2 in range(5):
            t = s + kh2
            q0 = t // 2
            lhs2_ref[r0:r0 + n2, kh2 * 96:kh2 * 96 + 96] = \
                h1_ref[t % 2, q0 * BB:(q0 + 5) * BB, 0:96]

    # ---- conv2 matmuls + pool + bias + ReLU ---------------------------------
    m2 = None
    for s in range(2):
        r0 = s * n2
        y2 = jnp.dot(lhs2_ref[r0:r0 + n2, :], c2w_ref[...],
                     preferred_element_type=f32)               # (5BB, 256)
        mm2 = jnp.maximum(y2[:, :128], y2[:, 128:])
        m2 = mm2 if m2 is None else jnp.maximum(m2, mm2)
    # h2[ipp*BB + b, cout2*5 + jpp]
    h2 = jnp.maximum(m2 + c2b_ref[...], 0.0).astype(bf16)       # (5BB, 128)

    # ---- fc1 (accumulated over ipp) -> fc2 -> fc3 ---------------------------
    z = jnp.dot(h2[0:BB, :], f1w_ref[0], preferred_element_type=f32)
    for ipp in range(1, 5):
        z = z + jnp.dot(h2[ipp * BB:(ipp + 1) * BB, :], f1w_ref[ipp],
                        preferred_element_type=f32)
    a1 = jnp.maximum(z + f1b_ref[...], 0.0).astype(bf16)        # (BB,128) 120 valid
    a2 = jnp.maximum(jnp.dot(a1, f2w_ref[...], preferred_element_type=f32)
                     + f2b_ref[...], 0.0).astype(bf16)          # 84 valid
    logits = (jnp.dot(a2, f3w_ref[...], preferred_element_type=f32)
              + f3b_ref[...])                                   # (BB,128) f32

    # ---- log_softmax over the NUM_CLASSES valid lanes -----------------------
    lane = jax.lax.broadcasted_iota(jnp.int32, (BB, 128), 1)
    valid = lane < NUM_CLASSES
    neg = jnp.float32(-1e30)
    mx = jnp.max(jnp.where(valid, logits, neg), axis=-1, keepdims=True)
    zc = logits - mx
    e = jnp.exp(jnp.where(valid, zc, neg))        # padded lanes clamped -> exp = 0
    lse = jnp.log(jnp.sum(e, axis=-1, keepdims=True))
    o_ref[...] = zc - lse                          # (BB, 128), first 10 lanes valid


# ------------------------------ wrapper --------------------------------------

def _const_spec(shape):
    zeros = (0,) * len(shape)
    return pl.BlockSpec(shape, lambda i, z=zeros: z)


@jax.jit
def cnn_cifar_forward(x, kparams):
    """x: (B, 3, 32, 32) float32 (NCHW).  Returns (B, NUM_CLASSES) log-probs."""
    bsz = x.shape[0]
    nb = -(-bsz // BB)            # grid steps
    bp = nb * BB
    if bp != bsz:
        x = jnp.pad(x, ((0, bp - bsz), (0, 0), (0, 0), (0, 0)))

    # Lane-dense bf16 input: xs[m, b, (r%4)*128 + c*32 + w] = x[b, c, 4m+r4, w]
    xs = x.astype(jnp.bfloat16).reshape(bp, 3, 8, 4, 32)
    xs = xs.transpose(2, 0, 3, 1, 4).reshape(8, bp, 4, 96)
    xs = jnp.pad(xs, ((0, 0), (0, 0), (0, 0), (0, 32))).reshape(8, bp, 512)

    (c1w, c1b, c2w, c2b, f1w, f1b, f2w, f2b, f3w, f3b) = kparams

    flops = bp * (28 * 512 * 256 * 2 + 10 * 512 * 256 * 2 + 7 * 128 * 128 * 2)
    bytes_accessed = (xs.size * 2
                      + sum(int(p.size) * p.dtype.itemsize for p in kparams)
                      + bp * 128 * 4)

    out = pl.pallas_call(
        _cnn_cifar_kernel,
        out_shape=jax.ShapeDtypeStruct((bp, 128), jnp.float32),
        grid_spec=pltpu.PrefetchScalarGridSpec(
            num_scalar_prefetch=0,
            grid=(nb,),
            in_specs=[
                pl.BlockSpec((8, BB, 512), lambda i: (0, i, 0)),
                _const_spec((512, 256)), _const_spec((1, 128)),
                _const_spec((512, 256)), _const_spec((1, 128)),
                _const_spec((5, 128, 128)), _const_spec((1, 128)),
                _const_spec((128, 128)), _const_spec((1, 128)),
                _const_spec((128, 128)), _const_spec((1, 128)),
            ],
            out_specs=pl.BlockSpec((BB, 128), lambda i: (i, 0)),
            scratch_shapes=[
                pltpu.VMEM((28 * BB, 512), jnp.bfloat16),    # conv1 im2col LHS
                pltpu.VMEM((10 * BB, 512), jnp.bfloat16),    # conv2 im2col LHS
                pltpu.VMEM((2, 7 * BB, 128), jnp.bfloat16),  # pooled conv1 acts
            ],
        ),
        compiler_params=pltpu.CompilerParams(
            dimension_semantics=("parallel",)),
        cost_estimate=pl.CostEstimate(flops=flops, transcendentals=bp * 129,
                                      bytes_accessed=bytes_accessed),
    )(xs, c1w, c1b, c2w, c2b, f1w, f1b, f2w, f2b, f3w, f3b)
    return out[:bsz, :NUM_CLASSES]


# --------------------------- parameter repacking ------------------------------

def prepare_params(torch_params):
    """Repack PyTorch-layout CNNCifar parameters into the kernel layouts."""
    (w1, b1, w2, b2, fw1, fb1, fw2, fb2, fw3, fb3) = torch_params
    f32 = jnp.float32
    bf16 = jnp.bfloat16

    def conv_toeplitz(w, in_w, pool_w, lane_stride):
        # Banded weights so conv + column-pool parity split is one matmul:
        #   rows : (kh*cin + c)*in_w + w_in      (K padded to 512)
        #   cols : par*128 + cout*lane_stride + jp
        cout, cin = int(w.shape[0]), int(w.shape[1])
        w = w.astype(f32)
        kw = jnp.arange(5)[:, None, None, None]
        par = jnp.arange(2)[None, :, None, None]
        wpos = jnp.arange(in_w)[None, None, :, None]
        jp = jnp.arange(pool_w)[None, None, None, :]
        hit = (wpos == 2 * jp + par + kw).astype(f32)        # (5,2,in_w,pool_w)
        m = jnp.einsum('ocak,kpwj->acwpoj', w, hit)          # (kh,c,w_in,par,cout,jp)
        m = m.reshape(5 * cin * in_w, 2, cout, pool_w)
        tmp = jnp.zeros((5 * cin * in_w, 2, cout, lane_stride), f32)
        tmp = tmp.at[:, :, :, :pool_w].set(m)
        full = jnp.zeros((512, 2, 128), f32)
        full = full.at[:5 * cin * in_w, :, :cout * lane_stride].set(
            tmp.reshape(5 * cin * in_w, 2, cout * lane_stride))
        return full.reshape(512, 256).astype(bf16)

    def pooled_bias(b, pool_w, lane_stride):
        cout = int(b.shape[0])
        v = jnp.zeros((cout, lane_stride), f32).at[:, :pool_w].set(
            jnp.broadcast_to(b.astype(f32)[:, None], (cout, pool_w)))
        return jnp.zeros((1, 128), f32).at[0, :cout * lane_stride].set(
            v.reshape(-1))

    c1w = conv_toeplitz(w1, 32, 14, 16)
    c1b = pooled_bias(b1, 14, 16)
    c2w = conv_toeplitz(w2, 16, 5, 5)    # h1 width lanes 14,15 are zero/unused
    c2b = pooled_bias(b2, 5, 5)

    # fc1: PyTorch flattens (16,5,5) as cout*25 + ipp*5 + jpp; kernel h2 lanes
    # are cout*5 + jpp with rows grouped by ipp -> split fc1 weight by ipp.
    f1 = fw1.astype(f32).reshape(120, 16, 5, 5).transpose(2, 1, 3, 0)
    f1 = f1.reshape(5, 80, 120)
    f1w = jnp.zeros((5, 128, 128), f32).at[:, :80, :120].set(f1).astype(bf16)
    f1b = jnp.zeros((1, 128), f32).at[0, :120].set(fb1.astype(f32))

    f2w = jnp.zeros((128, 128), f32).at[:120, :84].set(
        fw2.astype(f32).T).astype(bf16)
    f2b = jnp.zeros((1, 128), f32).at[0, :84].set(fb2.astype(f32))
    f3w = jnp.zeros((128, 128), f32).at[:84, :NUM_CLASSES].set(
        fw3.astype(f32).T).astype(bf16)
    f3b = jnp.zeros((1, 128), f32).at[0, :NUM_CLASSES].set(fb3.astype(f32))

    return (c1w, c1b, c2w, c2b, f1w, f1b, f2w, f2b, f3w, f3b)


def init_torch_params(key):
    """Deterministic synthetic params, PyTorch layouts + uniform(+-1/sqrt(fan_in))."""
    def uni(k, shape, fan_in):
        bound = 1.0 / jnp.sqrt(jnp.float32(fan_in))
        return jax.random.uniform(k, shape, jnp.float32, -bound, bound)

    ks = jax.random.split(key, 10)
    w1 = uni(ks[0], (6, 3, 5, 5), 75)
    b1 = uni(ks[1], (6,), 75)
    w2 = uni(ks[2], (16, 6, 5, 5), 150)
    b2 = uni(ks[3], (16,), 150)
    fw1 = uni(ks[4], (120, 400), 400)
    fb1 = uni(ks[5], (120,), 400)
    fw2 = uni(ks[6], (84, 120), 120)
    fb2 = uni(ks[7], (84,), 120)
    fw3 = uni(ks[8], (NUM_CLASSES, 84), 84)
    fb3 = uni(ks[9], (NUM_CLASSES,), 84)
    return (w1, b1, w2, b2, fw1, fb1, fw2, fb2, fw3, fb3)


# --------------------------- pure-JAX reference -------------------------------

def reference_forward(x, torch_params):
    (w1, b1, w2, b2, fw1, fb1, fw2, fb2, fw3, fb3) = torch_params
    prec = jax.lax.Precision.HIGHEST

    def conv(h, w, b):
        y = jax.lax.conv_general_dilated(
            h, w, window_strides=(1, 1), padding='VALID',
            dimension_numbers=('NCHW', 'OIHW', 'NCHW'), precision=prec)
        return y + b[None, :, None, None]

    def pool(h):
        return jax.lax.reduce_window(h, -jnp.inf, jax.lax.max,
                                     (1, 1, 2, 2), (1, 1, 2, 2), 'VALID')

    h = pool(jax.nn.relu(conv(x, w1, b1)))
    h = pool(jax.nn.relu(conv(h, w2, b2)))
    h = h.reshape(h.shape[0], 16 * 5 * 5)
    h = jax.nn.relu(jnp.dot(h, fw1.T, precision=prec) + fb1)
    h = jax.nn.relu(jnp.dot(h, fw2.T, precision=prec) + fb2)
    z = jnp.dot(h, fw3.T, precision=prec) + fb3
    return jax.nn.log_softmax(z, axis=1)


if __name__ == "__main__":
    key = jax.random.PRNGKey(0)
    k_x, k_p = jax.random.split(key)

    # CIFAR-shaped input (the module's view(-1, 16*5*5) requires 3x32x32);
    # batch = 2*BB gives two grid steps (exercises v7x dual-TC sharding).
    x = jax.random.normal(k_x, (32, 3, 32, 32), dtype=jnp.float32)
    torch_params = init_torch_params(k_p)
    kparams = prepare_params(torch_params)

    out = jax.block_until_ready(cnn_cifar_forward(x, kparams))

    assert out.shape == (32, NUM_CLASSES)
    # sanity: log_softmax rows exponentiate+sum to ~1 (exact up to f32 rounding)
    row_sums = jnp.sum(jnp.exp(out), axis=1)
    assert bool(jnp.all(jnp.abs(row_sums - 1.0) < 1e-4))
    # numerical check against a pure-JAX/XLA f32 reference of the PyTorch module
    # (bf16 MXU operands with f32 accumulation -> slightly relaxed tolerance)
    ref = reference_forward(x, torch_params)
    err = float(jnp.max(jnp.abs(out - ref)))
    assert err < 2e-2, f"mismatch vs reference: max abs err = {err}"

    print("KERNEL_OK")
</pallas_src>

<mosaic_0001>
module attributes {stable_mosaic.version = 11 : i64} {
  func.func @_cnn_cifar_kernel(%arg0: i32, %arg1: memref<8x16x512xbf16, #tpu.memory_space<vmem>>, %arg2: memref<512x256xbf16, #tpu.memory_space<vmem>>, %arg3: memref<1x128xf32, #tpu.memory_space<vmem>>, %arg4: memref<512x256xbf16, #tpu.memory_space<vmem>>, %arg5: memref<1x128xf32, #tpu.memory_space<vmem>>, %arg6: memref<5x128x128xbf16, #tpu.memory_space<vmem>>, %arg7: memref<1x128xf32, #tpu.memory_space<vmem>>, %arg8: memref<128x128xbf16, #tpu.memory_space<vmem>>, %arg9: memref<1x128xf32, #tpu.memory_space<vmem>>, %arg10: memref<128x128xbf16, #tpu.memory_space<vmem>>, %arg11: memref<1x128xf32, #tpu.memory_space<vmem>>, %arg12: memref<16x128xf32, #tpu.memory_space<vmem>>, %arg13: memref<448x512xbf16, #tpu.memory_space<vmem>>, %arg14: memref<160x512xbf16, #tpu.memory_space<vmem>>, %arg15: memref<2x112x128xbf16, #tpu.memory_space<vmem>>) attributes {dimension_semantics = [#tpu.dimension_semantics<parallel>], iteration_bounds = array<i64: 2>, scalar_prefetch = 0 : i64, scratch_operands = 3 : i64, tpu.core_type = #tpu.core_type<tc>, window_params = [{transform_indices = @transform_0, window_bounds = array<i64: 8, 16, 512>}, {pipeline_mode = #tpu.pipeline_mode<synchronous>, transform_indices = @transform_1, window_bounds = array<i64: 512, 256>}, {pipeline_mode = #tpu.pipeline_mode<synchronous>, transform_indices = @transform_2, window_bounds = array<i64: 1, 128>}, {pipeline_mode = #tpu.pipeline_mode<synchronous>, transform_indices = @transform_3, window_bounds = array<i64: 512, 256>}, {pipeline_mode = #tpu.pipeline_mode<synchronous>, transform_indices = @transform_4, window_bounds = array<i64: 1, 128>}, {pipeline_mode = #tpu.pipeline_mode<synchronous>, transform_indices = @transform_5, window_bounds = array<i64: 5, 128, 128>}, {pipeline_mode = #tpu.pipeline_mode<synchronous>, transform_indices = @transform_6, window_bounds = array<i64: 1, 128>}, {pipeline_mode = #tpu.pipeline_mode<synchronous>, transform_indices = @transform_7, window_bounds = array<i64: 128, 128>}, {pipeline_mode = #tpu.pipeline_mode<synchronous>, transform_indices = @transform_8, window_bounds = array<i64: 1, 128>}, {pipeline_mode = #tpu.pipeline_mode<synchronous>, transform_indices = @transform_9, window_bounds = array<i64: 128, 128>}, {pipeline_mode = #tpu.pipeline_mode<synchronous>, transform_indices = @transform_10, window_bounds = array<i64: 1, 128>}, {transform_indices = @transform_11, window_bounds = array<i64: 16, 128>}]} {
    %cst = arith.constant 0.000000e+00 : bf16
    %0 = vector.broadcast %cst : bf16 to vector<448x32xbf16>
    %c0 = arith.constant 0 : index
    %c480 = arith.constant 480 : index
    %1 = vector.load %arg13[%c0, %c480] : memref<448x512xbf16, #tpu.memory_space<vmem>>, vector<448x32xbf16>
    tpu.vector_store %arg13[%c0, %c480], %0 {strides = array<i32>} : memref<448x512xbf16, #tpu.memory_space<vmem>>, vector<448x32xbf16>,
    %cst_0 = arith.constant 0.000000e+00 : bf16
    %2 = vector.broadcast %cst_0 : bf16 to vector<160x32xbf16>
    %c0_1 = arith.constant 0 : index
    %c480_2 = arith.constant 480 : index
    %3 = vector.load %arg14[%c0_1, %c480_2] : memref<160x512xbf16, #tpu.memory_space<vmem>>, vector<160x32xbf16>
    tpu.vector_store %arg14[%c0_1, %c480_2], %2 {strides = array<i32>} : memref<160x512xbf16, #tpu.memory_space<vmem>>, vector<160x32xbf16>,
    %c0_3 = arith.constant 0 : index
    %c0_4 = arith.constant 0 : index
    %c0_5 = arith.constant 0 : index
    %4 = vector.load %arg1[%c0_3, %c0_4, %c0_5] : memref<8x16x512xbf16, #tpu.memory_space<vmem>>, vector<7x16x96xbf16>
    %5 = vector.shape_cast %4 : vector<7x16x96xbf16> to vector<112x96xbf16>
    %c0_6 = arith.constant 0 : index
    %c0_7 = arith.constant 0 : index
    %6 = vector.load %arg13[%c0_6, %c0_7] : memref<448x512xbf16, #tpu.memory_space<vmem>>, vector<112x96xbf16>
    tpu.vector_store %arg13[%c0_6, %c0_7], %5 {strides = array<i32>} : memref<448x512xbf16, #tpu.memory_space<vmem>>, vector<112x96xbf16>,
    %c0_8 = arith.constant 0 : index
    %c0_9 = arith.constant 0 : index
    %c128 = arith.constant 128 : index
    %7 = vector.load %arg1[%c0_8, %c0_9, %c128] : memref<8x16x512xbf16, #tpu.memory_space<vmem>>, vector<7x16x96xbf16>
    %8 = vector.shape_cast %7 : vector<7x16x96xbf16> to vector<112x96xbf16>
    %c0_10 = arith.constant 0 : index
    %c96 = arith.constant 96 : index
    %9 = vector.load %arg13[%c0_10, %c96] : memref<448x512xbf16, #tpu.memory_space<vmem>>, vector<112x96xbf16>
    tpu.vector_store %arg13[%c0_10, %c96], %8 {strides = array<i32>} : memref<448x512xbf16, #tpu.memory_space<vmem>>, vector<112x96xbf16>,
    %c0_11 = arith.constant 0 : index
    %c0_12 = arith.constant 0 : index
    %c256 = arith.constant 256 : index
    %10 = vector.load %arg1[%c0_11, %c0_12, %c256] : memref<8x16x512xbf16, #tpu.memory_space<vmem>>, vector<7x16x96xbf16>
    %11 = vector.shape_cast %10 : vector<7x16x96xbf16> to vector<112x96xbf16>
    %c0_13 = arith.constant 0 : index
    %c192 = arith.constant 192 : index
    %12 = vector.load %arg13[%c0_13, %c192] : memref<448x512xbf16, #tpu.memory_space<vmem>>, vector<112x96xbf16>
    tpu.vector_store %arg13[%c0_13, %c192], %11 {strides = array<i32>} : memref<448x512xbf16, #tpu.memory_space<vmem>>, vector<112x96xbf16>,
    %c0_14 = arith.constant 0 : index
    %c0_15 = arith.constant 0 : index
    %c384 = arith.constant 384 : index
    %13 = vector.load %arg1[%c0_14, %c0_15, %c384] : memref<8x16x512xbf16, #tpu.memory_space<vmem>>, vector<7x16x96xbf16>
    %14 = vector.shape_cast %13 : vector<7x16x96xbf16> to vector<112x96xbf16>
    %c0_16 = arith.constant 0 : index
    %c288 = arith.constant 288 : index
    %15 = vector.load %arg13[%c0_16, %c288] : memref<448x512xbf16, #tpu.memory_space<vmem>>, vector<112x96xbf16>
    tpu.vector_store %arg13[%c0_16, %c288], %14 {strides = array<i32>} : memref<448x512xbf16, #tpu.memory_space<vmem>>, vector<112x96xbf16>,
    %c1 = arith.constant 1 : index
    %c0_17 = arith.constant 0 : index
    %c0_18 = arith.constant 0 : index
    %16 = vector.load %arg1[%c1, %c0_17, %c0_18] : memref<8x16x512xbf16, #tpu.memory_space<vmem>>, vector<7x16x96xbf16>
    %17 = vector.shape_cast %16 : vector<7x16x96xbf16> to vector<112x96xbf16>
    %c0_19 = arith.constant 0 : index
    %c384_20 = arith.constant 384 : index
    %18 = vector.load %arg13[%c0_19, %c384_20] : memref<448x512xbf16, #tpu.memory_space<vmem>>, vector<112x96xbf16>
    tpu.vector_store %arg13[%c0_19, %c384_20], %17 {strides = array<i32>} : memref<448x512xbf16, #tpu.memory_space<vmem>>, vector<112x96xbf16>,
    %c0_21 = arith.constant 0 : index
    %c0_22 = arith.constant 0 : index
    %c128_23 = arith.constant 128 : index
    %19 = vector.load %arg1[%c0_21, %c0_22, %c128_23] : memref<8x16x512xbf16, #tpu.memory_space<vmem>>, vector<7x16x96xbf16>
    %20 = vector.shape_cast %19 : vector<7x16x96xbf16> to vector<112x96xbf16>
    %c112 = arith.constant 112 : index
    %c0_24 = arith.constant 0 : index
    %21 = vector.load %arg13[%c112, %c0_24] : memref<448x512xbf16, #tpu.memory_space<vmem>>, vector<112x96xbf16>
    tpu.vector_store %arg13[%c112, %c0_24], %20 {strides = array<i32>} : memref<448x512xbf16, #tpu.memory_space<vmem>>, vector<112x96xbf16>,
    %c0_25 = arith.constant 0 : index
    %c0_26 = arith.constant 0 : index
    %c256_27 = arith.constant 256 : index
    %22 = vector.load %arg1[%c0_25, %c0_26, %c256_27] : memref<8x16x512xbf16, #tpu.memory_space<vmem>>, vector<7x16x96xbf16>
    %23 = vector.shape_cast %22 : vector<7x16x96xbf16> to vector<112x96xbf16>
    %c112_28 = arith.constant 112 : index
    %c96_29 = arith.constant 96 : index
    %24 = vector.load %arg13[%c112_28, %c96_29] : memref<448x512xbf16, #tpu.memory_space<vmem>>, vector<112x96xbf16>
    tpu.vector_store %arg13[%c112_28, %c96_29], %23 {strides = array<i32>} : memref<448x512xbf16, #tpu.memory_space<vmem>>, vector<112x96xbf16>,
    %c0_30 = arith.constant 0 : index
    %c0_31 = arith.constant 0 : index
    %c384_32 = arith.constant 384 : index
    %25 = vector.load %arg1[%c0_30, %c0_31, %c384_32] : memref<8x16x512xbf16, #tpu.memory_space<vmem>>, vector<7x16x96xbf16>
    %26 = vector.shape_cast %25 : vector<7x16x96xbf16> to vector<112x96xbf16>
    %c112_33 = arith.constant 112 : index
    %c192_34 = arith.constant 192 : index
    %27 = vector.load %arg13[%c112_33, %c192_34] : memref<448x512xbf16, #tpu.memory_space<vmem>>, vector<112x96xbf16>
    tpu.vector_store %arg13[%c112_33, %c192_34], %26 {strides = array<i32>} : memref<448x512xbf16, #tpu.memory_space<vmem>>, vector<112x96xbf16>,
    %c1_35 = arith.constant 1 : index
    %c0_36 = arith.constant 0 : index
    %c0_37 = arith.constant 0 : index
    %28 = vector.load %arg1[%c1_35, %c0_36, %c0_37] : memref<8x16x512xbf16, #tpu.memory_space<vmem>>, vector<7x16x96xbf16>
    %29 = vector.shape_cast %28 : vector<7x16x96xbf16> to vector<112x96xbf16>
    %c112_38 = arith.constant 112 : index
    %c288_39 = arith.constant 288 : index
    %30 = vector.load %arg13[%c112_38, %c288_39] : memref<448x512xbf16, #tpu.memory_space<vmem>>, vector<112x96xbf16>
    tpu.vector_store %arg13[%c112_38, %c288_39], %29 {strides = array<i32>} : memref<448x512xbf16, #tpu.memory_space<vmem>>, vector<112x96xbf16>,
    %c1_40 = arith.constant 1 : index
    %c0_41 = arith.constant 0 : index
    %c128_42 = arith.constant 128 : index
    %31 = vector.load %arg1[%c1_40, %c0_41, %c128_42] : memref<8x16x512xbf16, #tpu.memory_space<vmem>>, vector<7x16x96xbf16>
    %32 = vector.shape_cast %31 : vector<7x16x96xbf16> to vector<112x96xbf16>
    %c112_43 = arith.constant 112 : index
    %c384_44 = arith.constant 384 : index
    %33 = vector.load %arg13[%c112_43, %c384_44] : memref<448x512xbf16, #tpu.memory_space<vmem>>, vector<112x96xbf16>
    tpu.vector_store %arg13[%c112_43, %c384_44], %32 {strides = array<i32>} : memref<448x512xbf16, #tpu.memory_space<vmem>>, vector<112x96xbf16>,
    %c0_45 = arith.constant 0 : index
    %c0_46 = arith.constant 0 : index
    %c256_47 = arith.constant 256 : index
    %34 = vector.load %arg1[%c0_45, %c0_46, %c256_47] : memref<8x16x512xbf16, #tpu.memory_space<vmem>>, vector<7x16x96xbf16>
    %35 = vector.shape_cast %34 : vector<7x16x96xbf16> to vector<112x96xbf16>
    %c224 = arith.constant 224 : index
    %c0_48 = arith.constant 0 : index
    %36 = vector.load %arg13[%c224, %c0_48] : memref<448x512xbf16, #tpu.memory_space<vmem>>, vector<112x96xbf16>
    tpu.vector_store %arg13[%c224, %c0_48], %35 {strides = array<i32>} : memref<448x512xbf16, #tpu.memory_space<vmem>>, vector<112x96xbf16>,
    %c0_49 = arith.constant 0 : index
    %c0_50 = arith.constant 0 : index
    %c384_51 = arith.constant 384 : index
    %37 = vector.load %arg1[%c0_49, %c0_50, %c384_51] : memref<8x16x512xbf16, #tpu.memory_space<vmem>>, vector<7x16x96xbf16>
    %38 = vector.shape_cast %37 : vector<7x16x96xbf16> to vector<112x96xbf16>
    %c224_52 = arith.constant 224 : index
    %c96_53 = arith.constant 96 : index
    %39 = vector.load %arg13[%c224_52, %c96_53] : memref<448x512xbf16, #tpu.memory_space<vmem>>, vector<112x96xbf16>
    tpu.vector_store %arg13[%c224_52, %c96_53], %38 {strides = array<i32>} : memref<448x512xbf16, #tpu.memory_space<vmem>>, vector<112x96xbf16>,
    %c1_54 = arith.constant 1 : index
    %c0_55 = arith.constant 0 : index
    %c0_56 = arith.constant 0 : index
    %40 = vector.load %arg1[%c1_54, %c0_55, %c0_56] : memref<8x16x512xbf16, #tpu.memory_space<vmem>>, vector<7x16x96xbf16>
    %41 = vector.shape_cast %40 : vector<7x16x96xbf16> to vector<112x96xbf16>
    %c224_57 = arith.constant 224 : index
    %c192_58 = arith.constant 192 : index
    %42 = vector.load %arg13[%c224_57, %c192_58] : memref<448x512xbf16, #tpu.memory_space<vmem>>, vector<112x96xbf16>
    tpu.vector_store %arg13[%c224_57, %c192_58], %41 {strides = array<i32>} : memref<448x512xbf16, #tpu.memory_space<vmem>>, vector<112x96xbf16>,
    %c1_59 = arith.constant 1 : index
    %c0_60 = arith.constant 0 : index
    %c128_61 = arith.constant 128 : index
    %43 = vector.load %arg1[%c1_59, %c0_60, %c128_61] : memref<8x16x512xbf16, #tpu.memory_space<vmem>>, vector<7x16x96xbf16>
    %44 = vector.shape_cast %43 : vector<7x16x96xbf16> to vector<112x96xbf16>
    %c224_62 = arith.constant 224 : index
    %c288_63 = arith.constant 288 : index
    %45 = vector.load %arg13[%c224_62, %c288_63] : memref<448x512xbf16, #tpu.memory_space<vmem>>, vector<112x96xbf16>
    tpu.vector_store %arg13[%c224_62, %c288_63], %44 {strides = array<i32>} : memref<448x512xbf16, #tpu.memory_space<vmem>>, vector<112x96xbf16>,
    %c1_64 = arith.constant 1 : index
    %c0_65 = arith.constant 0 : index
    %c256_66 = arith.constant 256 : index
    %46 = vector.load %arg1[%c1_64, %c0_65, %c256_66] : memref<8x16x512xbf16, #tpu.memory_space<vmem>>, vector<7x16x96xbf16>
    %47 = vector.shape_cast %46 : vector<7x16x96xbf16> to vector<112x96xbf16>
    %c224_67 = arith.constant 224 : index
    %c384_68 = arith.constant 384 : index
    %48 = vector.load %arg13[%c224_67, %c384_68] : memref<448x512xbf16, #tpu.memory_space<vmem>>, vector<112x96xbf16>
    tpu.vector_store %arg13[%c224_67, %c384_68], %47 {strides = array<i32>} : memref<448x512xbf16, #tpu.memory_space<vmem>>, vector<112x96xbf16>,
    %c0_69 = arith.constant 0 : index
    %c0_70 = arith.constant 0 : index
    %c384_71 = arith.constant 384 : index
    %49 = vector.load %arg1[%c0_69, %c0_70, %c384_71] : memref<8x16x512xbf16, #tpu.memory_space<vmem>>, vector<7x16x96xbf16>
    %50 = vector.shape_cast %49 : vector<7x16x96xbf16> to vector<112x96xbf16>
    %c336 = arith.constant 336 : index
    %c0_72 = arith.constant 0 : index
    %51 = vector.load %arg13[%c336, %c0_72] : memref<448x512xbf16, #tpu.memory_space<vmem>>, vector<112x96xbf16>
    tpu.vector_store %arg13[%c336, %c0_72], %50 {strides = array<i32>} : memref<448x512xbf16, #tpu.memory_space<vmem>>, vector<112x96xbf16>,
    %c1_73 = arith.constant 1 : index
    %c0_74 = arith.constant 0 : index
    %c0_75 = arith.constant 0 : index
    %52 = vector.load %arg1[%c1_73, %c0_74, %c0_75] : memref<8x16x512xbf16, #tpu.memory_space<vmem>>, vector<7x16x96xbf16>
    %53 = vector.shape_cast %52 : vector<7x16x96xbf16> to vector<112x96xbf16>
    %c336_76 = arith.constant 336 : index
    %c96_77 = arith.constant 96 : index
    %54 = vector.load %arg13[%c336_76, %c96_77] : memref<448x512xbf16, #tpu.memory_space<vmem>>, vector<112x96xbf16>
    tpu.vector_store %arg13[%c336_76, %c96_77], %53 {strides = array<i32>} : memref<448x512xbf16, #tpu.memory_space<vmem>>, vector<112x96xbf16>,
    %c1_78 = arith.constant 1 : index
    %c0_79 = arith.constant 0 : index
    %c128_80 = arith.constant 128 : index
    %55 = vector.load %arg1[%c1_78, %c0_79, %c128_80] : memref<8x16x512xbf16, #tpu.memory_space<vmem>>, vector<7x16x96xbf16>
    %56 = vector.shape_cast %55 : vector<7x16x96xbf16> to vector<112x96xbf16>
    %c336_81 = arith.constant 336 : index
    %c192_82 = arith.constant 192 : index
    %57 = vector.load %arg13[%c336_81, %c192_82] : memref<448x512xbf16, #tpu.memory_space<vmem>>, vector<112x96xbf16>
    tpu.vector_store %arg13[%c336_81, %c192_82], %56 {strides = array<i32>} : memref<448x512xbf16, #tpu.memory_space<vmem>>, vector<112x96xbf16>,
    %c1_83 = arith.constant 1 : index
    %c0_84 = arith.constant 0 : index
    %c256_85 = arith.constant 256 : index
    %58 = vector.load %arg1[%c1_83, %c0_84, %c256_85] : memref<8x16x512xbf16, #tpu.memory_space<vmem>>, vector<7x16x96xbf16>
    %59 = vector.shape_cast %58 : vector<7x16x96xbf16> to vector<112x96xbf16>
    %c336_86 = arith.constant 336 : index
    %c288_87 = arith.constant 288 : index
    %60 = vector.load %arg13[%c336_86, %c288_87] : memref<448x512xbf16, #tpu.memory_space<vmem>>, vector<112x96xbf16>
    tpu.vector_store %arg13[%c336_86, %c288_87], %59 {strides = array<i32>} : memref<448x512xbf16, #tpu.memory_space<vmem>>, vector<112x96xbf16>,
    %c1_88 = arith.constant 1 : index
    %c0_89 = arith.constant 0 : index
    %c384_90 = arith.constant 384 : index
    %61 = vector.load %arg1[%c1_88, %c0_89, %c384_90] : memref<8x16x512xbf16, #tpu.memory_space<vmem>>, vector<7x16x96xbf16>
    %62 = vector.shape_cast %61 : vector<7x16x96xbf16> to vector<112x96xbf16>
    %c336_91 = arith.constant 336 : index
    %c384_92 = arith.constant 384 : index
    %63 = vector.load %arg13[%c336_91, %c384_92] : memref<448x512xbf16, #tpu.memory_space<vmem>>, vector<112x96xbf16>
    tpu.vector_store %arg13[%c336_91, %c384_92], %62 {strides = array<i32>} : memref<448x512xbf16, #tpu.memory_space<vmem>>, vector<112x96xbf16>,
    %c0_93 = arith.constant 0 : index
    %c0_94 = arith.constant 0 : index
    %64 = vector.load %arg13[%c0_93, %c0_94] : memref<448x512xbf16, #tpu.memory_space<vmem>>, vector<112x512xbf16>
    %c0_95 = arith.constant 0 : index
    %c0_96 = arith.constant 0 : index
    %65 = vector.load %arg2[%c0_95, %c0_96] : memref<512x256xbf16, #tpu.memory_space<vmem>>, vector<512x256xbf16>
    %cst_97 = arith.constant dense<0.000000e+00> : vector<112x256xf32>
    %66 = tpu.matmul %64, %65, %cst_97 {dimension_numbers = #tpu.dot_dimension_numbers<[1], [0], [0], [1], [0, 0, 1, 1], [], []>} : vector<112x512xbf16>, vector<512x256xbf16>, vector<112x256xf32> -> vector<112x256xf32>
    %67 = vector.extract_strided_slice %66 {offsets = [0, 0], sizes = [112, 128], strides = [1, 1]} : vector<112x256xf32> to vector<112x128xf32>
    %68 = vector.extract_strided_slice %66 {offsets = [0, 128], sizes = [112, 128], strides = [1, 1]} : vector<112x256xf32> to vector<112x128xf32>
    %69 = arith.maximumf %67, %68 : vector<112x128xf32>
    %c112_98 = arith.constant 112 : index
    %c0_99 = arith.constant 0 : index
    %70 = vector.load %arg13[%c112_98, %c0_99] : memref<448x512xbf16, #tpu.memory_space<vmem>>, vector<112x512xbf16>
    %c0_100 = arith.constant 0 : index
    %c0_101 = arith.constant 0 : index
    %71 = vector.load %arg2[%c0_100, %c0_101] : memref<512x256xbf16, #tpu.memory_space<vmem>>, vector<512x256xbf16>
    %cst_102 = arith.constant dense<0.000000e+00> : vector<112x256xf32>
    %72 = tpu.matmul %70, %71, %cst_102 {dimension_numbers = #tpu.dot_dimension_numbers<[1], [0], [0], [1], [0, 0, 1, 1], [], []>} : vector<112x512xbf16>, vector<512x256xbf16>, vector<112x256xf32> -> vector<112x256xf32>
    %73 = vector.extract_strided_slice %72 {offsets = [0, 0], sizes = [112, 128], strides = [1, 1]} : vector<112x256xf32> to vector<112x128xf32>
    %74 = vector.extract_strided_slice %72 {offsets = [0, 128], sizes = [112, 128], strides = [1, 1]} : vector<112x256xf32> to vector<112x128xf32>
    %75 = arith.maximumf %73, %74 : vector<112x128xf32>
    %76 = arith.maximumf %69, %75 : vector<112x128xf32>
    %c0_103 = arith.constant 0 : index
    %c0_104 = arith.constant 0 : index
    %77 = vector.load %arg3[%c0_103, %c0_104] : memref<1x128xf32, #tpu.memory_space<vmem>>, vector<1x128xf32>
    %78 = vector.broadcast %77 : vector<1x128xf32> to vector<112x128xf32>
    %79 = arith.addf %76, %78 : vector<112x128xf32>
    %cst_105 = arith.constant 0.000000e+00 : f32
    %80 = vector.broadcast %cst_105 : f32 to vector<112x128xf32>
    %81 = arith.maximumf %79, %80 : vector<112x128xf32>
    %82 = arith.truncf %81 : vector<112x128xf32> to vector<112x128xbf16>
    %c0_106 = arith.constant 0 : index
    %c0_107 = arith.constant 0 : index
    %c0_108 = arith.constant 0 : index
    %83 = vector.load %arg15[%c0_106, %c0_107, %c0_108] : memref<2x112x128xbf16, #tpu.memory_space<vmem>>, vector<1x112x128xbf16>
    %84 = vector.shape_cast %83 : vector<1x112x128xbf16> to vector<112x128xbf16>
    %85 = vector.shape_cast %82 : vector<112x128xbf16> to vector<1x112x128xbf16>
    tpu.vector_store %arg15[%c0_106, %c0_107, %c0_108], %85 {strides = array<i32>} : memref<2x112x128xbf16, #tpu.memory_space<vmem>>, vector<1x112x128xbf16>,
    %c224_109 = arith.constant 224 : index
    %c0_110 = arith.constant 0 : index
    %86 = vector.load %arg13[%c224_109, %c0_110] : memref<448x512xbf16, #tpu.memory_space<vmem>>, vector<112x512xbf16>
    %c0_111 = arith.constant 0 : index
    %c0_112 = arith.constant 0 : index
    %87 = vector.load %arg2[%c0_111, %c0_112] : memref<512x256xbf16, #tpu.memory_space<vmem>>, vector<512x256xbf16>
    %cst_113 = arith.constant dense<0.000000e+00> : vector<112x256xf32>
    %88 = tpu.matmul %86, %87, %cst_113 {dimension_numbers = #tpu.dot_dimension_numbers<[1], [0], [0], [1], [0, 0, 1, 1], [], []>} : vector<112x512xbf16>, vector<512x256xbf16>, vector<112x256xf32> -> vector<112x256xf32>
    %89 = vector.extract_strided_slice %88 {offsets = [0, 0], sizes = [112, 128], strides = [1, 1]} : vector<112x256xf32> to vector<112x128xf32>
    %90 = vector.extract_strided_slice %88 {offsets = [0, 128], sizes = [112, 128], strides = [1, 1]} : vector<112x256xf32> to vector<112x128xf32>
    %91 = arith.maximumf %89, %90 : vector<112x128xf32>
    %c336_114 = arith.constant 336 : index
    %c0_115 = arith.constant 0 : index
    %92 = vector.load %arg13[%c336_114, %c0_115] : memref<448x512xbf16, #tpu.memory_space<vmem>>, vector<112x512xbf16>
    %c0_116 = arith.constant 0 : index
    %c0_117 = arith.constant 0 : index
    %93 = vector.load %arg2[%c0_116, %c0_117] : memref<512x256xbf16, #tpu.memory_space<vmem>>, vector<512x256xbf16>
    %cst_118 = arith.constant dense<0.000000e+00> : vector<112x256xf32>
    %94 = tpu.matmul %92, %93, %cst_118 {dimension_numbers = #tpu.dot_dimension_numbers<[1], [0], [0], [1], [0, 0, 1, 1], [], []>} : vector<112x512xbf16>, vector<512x256xbf16>, vector<112x256xf32> -> vector<112x256xf32>
    %95 = vector.extract_strided_slice %94 {offsets = [0, 0], sizes = [112, 128], strides = [1, 1]} : vector<112x256xf32> to vector<112x128xf32>
    %96 = vector.extract_strided_slice %94 {offsets = [0, 128], sizes = [112, 128], strides = [1, 1]} : vector<112x256xf32> to vector<112x128xf32>
    %97 = arith.maximumf %95, %96 : vector<112x128xf32>
    %98 = arith.maximumf %91, %97 : vector<112x128xf32>
    %c0_119 = arith.constant 0 : index
    %c0_120 = arith.constant 0 : index
    %99 = vector.load %arg3[%c0_119, %c0_120] : memref<1x128xf32, #tpu.memory_space<vmem>>, vector<1x128xf32>
    %100 = vector.broadcast %99 : vector<1x128xf32> to vector<112x128xf32>
    %101 = arith.addf %98, %100 : vector<112x128xf32>
    %cst_121 = arith.constant 0.000000e+00 : f32
    %102 = vector.broadcast %cst_121 : f32 to vector<112x128xf32>
    %103 = arith.maximumf %101, %102 : vector<112x128xf32>
    %104 = arith.truncf %103 : vector<112x128xf32> to vector<112x128xbf16>
    %c1_122 = arith.constant 1 : index
    %c0_123 = arith.constant 0 : index
    %c0_124 = arith.constant 0 : index
    %105 = vector.load %arg15[%c1_122, %c0_123, %c0_124] : memref<2x112x128xbf16, #tpu.memory_space<vmem>>, vector<1x112x128xbf16>
    %106 = vector.shape_cast %105 : vector<1x112x128xbf16> to vector<112x128xbf16>
    %107 = vector.shape_cast %104 : vector<112x128xbf16> to vector<1x112x128xbf16>
    tpu.vector_store %arg15[%c1_122, %c0_123, %c0_124], %107 {strides = array<i32>} : memref<2x112x128xbf16, #tpu.memory_space<vmem>>, vector<1x112x128xbf16>,
    %c0_125 = arith.constant 0 : index
    %c0_126 = arith.constant 0 : index
    %c0_127 = arith.constant 0 : index
    %108 = vector.load %arg15[%c0_125, %c0_126, %c0_127] : memref<2x112x128xbf16, #tpu.memory_space<vmem>>, vector<1x80x96xbf16>
    %109 = vector.shape_cast %108 : vector<1x80x96xbf16> to vector<80x96xbf16>
    %c0_128 = arith.constant 0 : index
    %c0_129 = arith.constant 0 : index
    %110 = vector.load %arg14[%c0_128, %c0_129] : memref<160x512xbf16, #tpu.memory_space<vmem>>, vector<80x96xbf16>
    tpu.vector_store %arg14[%c0_128, %c0_129], %109 {strides = array<i32>} : memref<160x512xbf16, #tpu.memory_space<vmem>>, vector<80x96xbf16>,
    %c1_130 = arith.constant 1 : index
    %c0_131 = arith.constant 0 : index
    %c0_132 = arith.constant 0 : index
    %111 = vector.load %arg15[%c1_130, %c0_131, %c0_132] : memref<2x112x128xbf16, #tpu.memory_space<vmem>>, vector<1x80x96xbf16>
    %112 = vector.shape_cast %111 : vector<1x80x96xbf16> to vector<80x96xbf16>
    %c0_133 = arith.constant 0 : index
    %c96_134 = arith.constant 96 : index
    %113 = vector.load %arg14[%c0_133, %c96_134] : memref<160x512xbf16, #tpu.memory_space<vmem>>, vector<80x96xbf16>
    tpu.vector_store %arg14[%c0_133, %c96_134], %112 {strides = array<i32>} : memref<160x512xbf16, #tpu.memory_space<vmem>>, vector<80x96xbf16>,
    %c0_135 = arith.constant 0 : index
    %c16 = arith.constant 16 : index
    %c0_136 = arith.constant 0 : index
    %114 = vector.load %arg15[%c0_135, %c16, %c0_136] : memref<2x112x128xbf16, #tpu.memory_space<vmem>>, vector<1x80x96xbf16>
    %115 = vector.shape_cast %114 : vector<1x80x96xbf16> to vector<80x96xbf16>
    %c0_137 = arith.constant 0 : index
    %c192_138 = arith.constant 192 : index
    %116 = vector.load %arg14[%c0_137, %c192_138] : memref<160x512xbf16, #tpu.memory_space<vmem>>, vector<80x96xbf16>
    tpu.vector_store %arg14[%c0_137, %c192_138], %115 {strides = array<i32>} : memref<160x512xbf16, #tpu.memory_space<vmem>>, vector<80x96xbf16>,
    %c1_139 = arith.constant 1 : index
    %c16_140 = arith.constant 16 : index
    %c0_141 = arith.constant 0 : index
    %117 = vector.load %arg15[%c1_139, %c16_140, %c0_141] : memref<2x112x128xbf16, #tpu.memory_space<vmem>>, vector<1x80x96xbf16>
    %118 = vector.shape_cast %117 : vector<1x80x96xbf16> to vector<80x96xbf16>
    %c0_142 = arith.constant 0 : index
    %c288_143 = arith.constant 288 : index
    %119 = vector.load %arg14[%c0_142, %c288_143] : memref<160x512xbf16, #tpu.memory_space<vmem>>, vector<80x96xbf16>
    tpu.vector_store %arg14[%c0_142, %c288_143], %118 {strides = array<i32>} : memref<160x512xbf16, #tpu.memory_space<vmem>>, vector<80x96xbf16>,
    %c0_144 = arith.constant 0 : index
    %c32 = arith.constant 32 : index
    %c0_145 = arith.constant 0 : index
    %120 = vector.load %arg15[%c0_144, %c32, %c0_145] : memref<2x112x128xbf16, #tpu.memory_space<vmem>>, vector<1x80x96xbf16>
    %121 = vector.shape_cast %120 : vector<1x80x96xbf16> to vector<80x96xbf16>
    %c0_146 = arith.constant 0 : index
    %c384_147 = arith.constant 384 : index
    %122 = vector.load %arg14[%c0_146, %c384_147] : memref<160x512xbf16, #tpu.memory_space<vmem>>, vector<80x96xbf16>
    tpu.vector_store %arg14[%c0_146, %c384_147], %121 {strides = array<i32>} : memref<160x512xbf16, #tpu.memory_space<vmem>>, vector<80x96xbf16>,
    %c1_148 = arith.constant 1 : index
    %c0_149 = arith.constant 0 : index
    %c0_150 = arith.constant 0 : index
    %123 = vector.load %arg15[%c1_148, %c0_149, %c0_150] : memref<2x112x128xbf16, #tpu.memory_space<vmem>>, vector<1x80x96xbf16>
    %124 = vector.shape_cast %123 : vector<1x80x96xbf16> to vector<80x96xbf16>
    %c80 = arith.constant 80 : index
    %c0_151 = arith.constant 0 : index
    %125 = vector.load %arg14[%c80, %c0_151] : memref<160x512xbf16, #tpu.memory_space<vmem>>, vector<80x96xbf16>
    tpu.vector_store %arg14[%c80, %c0_151], %124 {strides = array<i32>} : memref<160x512xbf16, #tpu.memory_space<vmem>>, vector<80x96xbf16>,
    %c0_152 = arith.constant 0 : index
    %c16_153 = arith.constant 16 : index
    %c0_154 = arith.constant 0 : index
    %126 = vector.load %arg15[%c0_152, %c16_153, %c0_154] : memref<2x112x128xbf16, #tpu.memory_space<vmem>>, vector<1x80x96xbf16>
    %127 = vector.shape_cast %126 : vector<1x80x96xbf16> to vector<80x96xbf16>
    %c80_155 = arith.constant 80 : index
    %c96_156 = arith.constant 96 : index
    %128 = vector.load %arg14[%c80_155, %c96_156] : memref<160x512xbf16, #tpu.memory_space<vmem>>, vector<80x96xbf16>
    tpu.vector_store %arg14[%c80_155, %c96_156], %127 {strides = array<i32>} : memref<160x512xbf16, #tpu.memory_space<vmem>>, vector<80x96xbf16>,
    %c1_157 = arith.constant 1 : index
    %c16_158 = arith.constant 16 : index
    %c0_159 = arith.constant 0 : index
    %129 = vector.load %arg15[%c1_157, %c16_158, %c0_159] : memref<2x112x128xbf16, #tpu.memory_space<vmem>>, vector<1x80x96xbf16>
    %130 = vector.shape_cast %129 : vector<1x80x96xbf16> to vector<80x96xbf16>
    %c80_160 = arith.constant 80 : index
    %c192_161 = arith.constant 192 : index
    %131 = vector.load %arg14[%c80_160, %c192_161] : memref<160x512xbf16, #tpu.memory_space<vmem>>, vector<80x96xbf16>
    tpu.vector_store %arg14[%c80_160, %c192_161], %130 {strides = array<i32>} : memref<160x512xbf16, #tpu.memory_space<vmem>>, vector<80x96xbf16>,
    %c0_162 = arith.constant 0 : index
    %c32_163 = arith.constant 32 : index
    %c0_164 = arith.constant 0 : index
    %132 = vector.load %arg15[%c0_162, %c32_163, %c0_164] : memref<2x112x128xbf16, #tpu.memory_space<vmem>>, vector<1x80x96xbf16>
    %133 = vector.shape_cast %132 : vector<1x80x96xbf16> to vector<80x96xbf16>
    %c80_165 = arith.constant 80 : index
    %c288_166 = arith.constant 288 : index
    %134 = vector.load %arg14[%c80_165, %c288_166] : memref<160x512xbf16, #tpu.memory_space<vmem>>, vector<80x96xbf16>
    tpu.vector_store %arg14[%c80_165, %c288_166], %133 {strides = array<i32>} : memref<160x512xbf16, #tpu.memory_space<vmem>>, vector<80x96xbf16>,
    %c1_167 = arith.constant 1 : index
    %c32_168 = arith.constant 32 : index
    %c0_169 = arith.constant 0 : index
    %135 = vector.load %arg15[%c1_167, %c32_168, %c0_169] : memref<2x112x128xbf16, #tpu.memory_space<vmem>>, vector<1x80x96xbf16>
    %136 = vector.shape_cast %135 : vector<1x80x96xbf16> to vector<80x96xbf16>
    %c80_170 = arith.constant 80 : index
    %c384_171 = arith.constant 384 : index
    %137 = vector.load %arg14[%c80_170, %c384_171] : memref<160x512xbf16, #tpu.memory_space<vmem>>, vector<80x96xbf16>
    tpu.vector_store %arg14[%c80_170, %c384_171], %136 {strides = array<i32>} : memref<160x512xbf16, #tpu.memory_space<vmem>>, vector<80x96xbf16>,
    %c0_172 = arith.constant 0 : index
    %c0_173 = arith.constant 0 : index
    %138 = vector.load %arg14[%c0_172, %c0_173] : memref<160x512xbf16, #tpu.memory_space<vmem>>, vector<80x512xbf16>
    %c0_174 = arith.constant 0 : index
    %c0_175 = arith.constant 0 : index
    %139 = vector.load %arg4[%c0_174, %c0_175] : memref<512x256xbf16, #tpu.memory_space<vmem>>, vector<512x256xbf16>
    %cst_176 = arith.constant dense<0.000000e+00> : vector<80x256xf32>
    %140 = tpu.matmul %138, %139, %cst_176 {dimension_numbers = #tpu.dot_dimension_numbers<[1], [0], [0], [1], [0, 0, 1, 1], [], []>} : vector<80x512xbf16>, vector<512x256xbf16>, vector<80x256xf32> -> vector<80x256xf32>
    %141 = vector.extract_strided_slice %140 {offsets = [0, 0], sizes = [80, 128], strides = [1, 1]} : vector<80x256xf32> to vector<80x128xf32>
    %142 = vector.extract_strided_slice %140 {offsets = [0, 128], sizes = [80, 128], strides = [1, 1]} : vector<80x256xf32> to vector<80x128xf32>
    %143 = arith.maximumf %141, %142 : vector<80x128xf32>
    %c80_177 = arith.constant 80 : index
    %c0_178 = arith.constant 0 : index
    %144 = vector.load %arg14[%c80_177, %c0_178] : memref<160x512xbf16, #tpu.memory_space<vmem>>, vector<80x512xbf16>
    %c0_179 = arith.constant 0 : index
    %c0_180 = arith.constant 0 : index
    %145 = vector.load %arg4[%c0_179, %c0_180] : memref<512x256xbf16, #tpu.memory_space<vmem>>, vector<512x256xbf16>
    %cst_181 = arith.constant dense<0.000000e+00> : vector<80x256xf32>
    %146 = tpu.matmul %144, %145, %cst_181 {dimension_numbers = #tpu.dot_dimension_numbers<[1], [0], [0], [1], [0, 0, 1, 1], [], []>} : vector<80x512xbf16>, vector<512x256xbf16>, vector<80x256xf32> -> vector<80x256xf32>
    %147 = vector.extract_strided_slice %146 {offsets = [0, 0], sizes = [80, 128], strides = [1, 1]} : vector<80x256xf32> to vector<80x128xf32>
    %148 = vector.extract_strided_slice %146 {offsets = [0, 128], sizes = [80, 128], strides = [1, 1]} : vector<80x256xf32> to vector<80x128xf32>
    %149 = arith.maximumf %147, %148 : vector<80x128xf32>
    %150 = arith.maximumf %143, %149 : vector<80x128xf32>
    %c0_182 = arith.constant 0 : index
    %c0_183 = arith.constant 0 : index
    %151 = vector.load %arg5[%c0_182, %c0_183] : memref<1x128xf32, #tpu.memory_space<vmem>>, vector<1x128xf32>
    %152 = vector.broadcast %151 : vector<1x128xf32> to vector<80x128xf32>
    %153 = arith.addf %150, %152 : vector<80x128xf32>
    %cst_184 = arith.constant 0.000000e+00 : f32
    %154 = vector.broadcast %cst_184 : f32 to vector<80x128xf32>
    %155 = arith.maximumf %153, %154 : vector<80x128xf32>
    %156 = arith.truncf %155 : vector<80x128xf32> to vector<80x128xbf16>
    %157 = vector.extract_strided_slice %156 {offsets = [0, 0], sizes = [16, 128], strides = [1, 1]} : vector<80x128xbf16> to vector<16x128xbf16>
    %c0_185 = arith.constant 0 : index
    %c0_186 = arith.constant 0 : index
    %c0_187 = arith.constant 0 : index
    %158 = vector.load %arg6[%c0_185, %c0_186, %c0_187] : memref<5x128x128xbf16, #tpu.memory_space<vmem>>, vector<1x128x128xbf16>
    %159 = vector.shape_cast %158 : vector<1x128x128xbf16> to vector<128x128xbf16>
    %cst_188 = arith.constant dense<0.000000e+00> : vector<16x128xf32>
    %160 = tpu.matmul %157, %159, %cst_188 {dimension_numbers = #tpu.dot_dimension_numbers<[1], [0], [0], [1], [0, 0, 1, 1], [], []>} : vector<16x128xbf16>, vector<128x128xbf16>, vector<16x128xf32> -> vector<16x128xf32>
    %161 = vector.extract_strided_slice %156 {offsets = [16, 0], sizes = [16, 128], strides = [1, 1]} : vector<80x128xbf16> to vector<16x128xbf16>
    %c1_189 = arith.constant 1 : index
    %c0_190 = arith.constant 0 : index
    %c0_191 = arith.constant 0 : index
    %162 = vector.load %arg6[%c1_189, %c0_190, %c0_191] : memref<5x128x128xbf16, #tpu.memory_space<vmem>>, vector<1x128x128xbf16>
    %163 = vector.shape_cast %162 : vector<1x128x128xbf16> to vector<128x128xbf16>
    %cst_192 = arith.constant dense<0.000000e+00> : vector<16x128xf32>
    %164 = tpu.matmul %161, %163, %cst_192 {dimension_numbers = #tpu.dot_dimension_numbers<[1], [0], [0], [1], [0, 0, 1, 1], [], []>} : vector<16x128xbf16>, vector<128x128xbf16>, vector<16x128xf32> -> vector<16x128xf32>
    %165 = arith.addf %160, %164 : vector<16x128xf32>
    %166 = vector.extract_strided_slice %156 {offsets = [32, 0], sizes = [16, 128], strides = [1, 1]} : vector<80x128xbf16> to vector<16x128xbf16>
    %c2 = arith.constant 2 : index
    %c0_193 = arith.constant 0 : index
    %c0_194 = arith.constant 0 : index
    %167 = vector.load %arg6[%c2, %c0_193, %c0_194] : memref<5x128x128xbf16, #tpu.memory_space<vmem>>, vector<1x128x128xbf16>
    %168 = vector.shape_cast %167 : vector<1x128x128xbf16> to vector<128x128xbf16>
    %cst_195 = arith.constant dense<0.000000e+00> : vector<16x128xf32>
    %169 = tpu.matmul %166, %168, %cst_195 {dimension_numbers = #tpu.dot_dimension_numbers<[1], [0], [0], [1], [0, 0, 1, 1], [], []>} : vector<16x128xbf16>, vector<128x128xbf16>, vector<16x128xf32> -> vector<16x128xf32>
    %170 = arith.addf %165, %169 : vector<16x128xf32>
    %171 = vector.extract_strided_slice %156 {offsets = [48, 0], sizes = [16, 128], strides = [1, 1]} : vector<80x128xbf16> to vector<16x128xbf16>
    %c3 = arith.constant 3 : index
    %c0_196 = arith.constant 0 : index
    %c0_197 = arith.constant 0 : index
    %172 = vector.load %arg6[%c3, %c0_196, %c0_197] : memref<5x128x128xbf16, #tpu.memory_space<vmem>>, vector<1x128x128xbf16>
    %173 = vector.shape_cast %172 : vector<1x128x128xbf16> to vector<128x128xbf16>
    %cst_198 = arith.constant dense<0.000000e+00> : vector<16x128xf32>
    %174 = tpu.matmul %171, %173, %cst_198 {dimension_numbers = #tpu.dot_dimension_numbers<[1], [0], [0], [1], [0, 0, 1, 1], [], []>} : vector<16x128xbf16>, vector<128x128xbf16>, vector<16x128xf32> -> vector<16x128xf32>
    %175 = arith.addf %170, %174 : vector<16x128xf32>
    %176 = vector.extract_strided_slice %156 {offsets = [64, 0], sizes = [16, 128], strides = [1, 1]} : vector<80x128xbf16> to vector<16x128xbf16>
    %c4 = arith.constant 4 : index
    %c0_199 = arith.constant 0 : index
    %c0_200 = arith.constant 0 : index
    %177 = vector.load %arg6[%c4, %c0_199, %c0_200] : memref<5x128x128xbf16, #tpu.memory_space<vmem>>, vector<1x128x128xbf16>
    %178 = vector.shape_cast %177 : vector<1x128x128xbf16> to vector<128x128xbf16>
    %cst_201 = arith.constant dense<0.000000e+00> : vector<16x128xf32>
    %179 = tpu.matmul %176, %178, %cst_201 {dimension_numbers = #tpu.dot_dimension_numbers<[1], [0], [0], [1], [0, 0, 1, 1], [], []>} : vector<16x128xbf16>, vector<128x128xbf16>, vector<16x128xf32> -> vector<16x128xf32>
    %180 = arith.addf %175, %179 : vector<16x128xf32>
    %c0_202 = arith.constant 0 : index
    %c0_203 = arith.constant 0 : index
    %181 = vector.load %arg7[%c0_202, %c0_203] : memref<1x128xf32, #tpu.memory_space<vmem>>, vector<1x128xf32>
    %182 = vector.broadcast %181 : vector<1x128xf32> to vector<16x128xf32>
    %183 = arith.addf %180, %182 : vector<16x128xf32>
    %cst_204 = arith.constant 0.000000e+00 : f32
    %184 = vector.broadcast %cst_204 : f32 to vector<16x128xf32>
    %185 = arith.maximumf %183, %184 : vector<16x128xf32>
    %186 = arith.truncf %185 : vector<16x128xf32> to vector<16x128xbf16>
    %c0_205 = arith.constant 0 : index
    %c0_206 = arith.constant 0 : index
    %187 = vector.load %arg8[%c0_205, %c0_206] : memref<128x128xbf16, #tpu.memory_space<vmem>>, vector<128x128xbf16>
    %cst_207 = arith.constant dense<0.000000e+00> : vector<16x128xf32>
    %188 = tpu.matmul %186, %187, %cst_207 {dimension_numbers = #tpu.dot_dimension_numbers<[1], [0], [0], [1], [0, 0, 1, 1], [], []>} : vector<16x128xbf16>, vector<128x128xbf16>, vector<16x128xf32> -> vector<16x128xf32>
    %c0_208 = arith.constant 0 : index
    %c0_209 = arith.constant 0 : index
    %189 = vector.load %arg9[%c0_208, %c0_209] : memref<1x128xf32, #tpu.memory_space<vmem>>, vector<1x128xf32>
    %190 = vector.broadcast %189 : vector<1x128xf32> to vector<16x128xf32>
    %191 = arith.addf %188, %190 : vector<16x128xf32>
    %cst_210 = arith.constant 0.000000e+00 : f32
    %192 = vector.broadcast %cst_210 : f32 to vector<16x128xf32>
    %193 = arith.maximumf %191, %192 : vector<16x128xf32>
    %194 = arith.truncf %193 : vector<16x128xf32> to vector<16x128xbf16>
    %c0_211 = arith.constant 0 : index
    %c0_212 = arith.constant 0 : index
    %195 = vector.load %arg10[%c0_211, %c0_212] : memref<128x128xbf16, #tpu.memory_space<vmem>>, vector<128x128xbf16>
    %cst_213 = arith.constant dense<0.000000e+00> : vector<16x128xf32>
    %196 = tpu.matmul %194, %195, %cst_213 {dimension_numbers = #tpu.dot_dimension_numbers<[1], [0], [0], [1], [0, 0, 1, 1], [], []>} : vector<16x128xbf16>, vector<128x128xbf16>, vector<16x128xf32> -> vector<16x128xf32>
    %c0_214 = arith.constant 0 : index
    %c0_215 = arith.constant 0 : index
    %197 = vector.load %arg11[%c0_214, %c0_215] : memref<1x128xf32, #tpu.memory_space<vmem>>, vector<1x128xf32>
    %198 = vector.broadcast %197 : vector<1x128xf32> to vector<16x128xf32>
    %199 = arith.addf %196, %198 : vector<16x128xf32>
    %200 = tpu.iota {dimensions = array<i32: 1>} : vector<16x128xi32>
    %c10_i32 = arith.constant 10 : i32
    %201 = vector.broadcast %c10_i32 : i32 to vector<16x128xi32>
    %202 = arith.cmpi slt, %200, %201 : vector<16x128xi32>
    %cst_216 = arith.constant -1.000000e+30 : f32
    %203 = vector.broadcast %cst_216 : f32 to vector<16x128xf32>
    %204 = arith.select %202, %199, %203 : vector<16x128xi1>, vector<16x128xf32>
    %cst_217 = arith.constant dense<0xFF800000> : vector<16xf32>
    %205 = vector.multi_reduction <maximumf>, %204, %cst_217 [1] : vector<16x128xf32> to vector<16xf32>
    %206 = vector.shape_cast %205 : vector<16xf32> to vector<16x1xf32>
    %207 = vector.broadcast %206 : vector<16x1xf32> to vector<16x128xf32>
    %208 = arith.subf %199, %207 : vector<16x128xf32>
    %cst_218 = arith.constant -1.000000e+30 : f32
    %209 = vector.broadcast %cst_218 : f32 to vector<16x128xf32>
    %210 = arith.select %202, %208, %209 : vector<16x128xi1>, vector<16x128xf32>
    %211 = math.exp %210 : vector<16x128xf32>
    %cst_219 = arith.constant dense<0.000000e+00> : vector<16xf32>
    %212 = vector.multi_reduction <add>, %211, %cst_219 [1] : vector<16x128xf32> to vector<16xf32>
    %213 = vector.shape_cast %212 : vector<16xf32> to vector<16x1xf32>
    %214 = math.log %213 : vector<16x1xf32>
    %215 = vector.broadcast %214 : vector<16x1xf32> to vector<16x128xf32>
    %216 = arith.subf %208, %215 : vector<16x128xf32>
    %c0_220 = arith.constant 0 : index
    %c0_221 = arith.constant 0 : index
    %217 = vector.load %arg12[%c0_220, %c0_221] : memref<16x128xf32, #tpu.memory_space<vmem>>, vector<16x128xf32>
    tpu.vector_store %arg12[%c0_220, %c0_221], %216 {strides = array<i32>} : memref<16x128xf32, #tpu.memory_space<vmem>>, vector<16x128xf32>,
    return
  }
  func.func @transform_0(%arg0: i32) -> (i32, i32, i32) {
    %c0_i32 = arith.constant 0 : i32
    %c0_i32_0 = arith.constant 0 : i32
    %c0_i32_1 = arith.constant 0 : i32
    return %c0_i32, %arg0, %c0_i32_0 : i32, i32, i32
  }
  func.func @transform_1(%arg0: i32) -> (i32, i32) {
    %c0_i32 = arith.constant 0 : i32
    %c0_i32_0 = arith.constant 0 : i32
    %c0_i32_1 = arith.constant 0 : i32
    return %c0_i32, %c0_i32_0 : i32, i32
  }
  func.func @transform_2(%arg0: i32) -> (i32, i32) {
    %c0_i32 = arith.constant 0 : i32
    %c0_i32_0 = arith.constant 0 : i32
    %c0_i32_1 = arith.constant 0 : i32
    return %c0_i32, %c0_i32_0 : i32, i32
  }
  func.func @transform_3(%arg0: i32) -> (i32, i32) {
    %c0_i32 = arith.constant 0 : i32
    %c0_i32_0 = arith.constant 0 : i32
    %c0_i32_1 = arith.constant 0 : i32
    return %c0_i32, %c0_i32_0 : i32, i32
  }
  func.func @transform_4(%arg0: i32) -> (i32, i32) {
    %c0_i32 = arith.constant 0 : i32
    %c0_i32_0 = arith.constant 0 : i32
    %c0_i32_1 = arith.constant 0 : i32
    return %c0_i32, %c0_i32_0 : i32, i32
  }
  func.func @transform_5(%arg0: i32) -> (i32, i32, i32) {
    %c0_i32 = arith.constant 0 : i32
    %c0_i32_0 = arith.constant 0 : i32
    %c0_i32_1 = arith.constant 0 : i32
    %c0_i32_2 = arith.constant 0 : i32
    return %c0_i32, %c0_i32_0, %c0_i32_1 : i32, i32, i32
  }
  func.func @transform_6(%arg0: i32) -> (i32, i32) {
    %c0_i32 = arith.constant 0 : i32
    %c0_i32_0 = arith.constant 0 : i32
    %c0_i32_1 = arith.constant 0 : i32
    return %c0_i32, %c0_i32_0 : i32, i32
  }
  func.func @transform_7(%arg0: i32) -> (i32, i32) {
    %c0_i32 = arith.constant 0 : i32
    %c0_i32_0 = arith.constant 0 : i32
    %c0_i32_1 = arith.constant 0 : i32
    return %c0_i32, %c0_i32_0 : i32, i32
  }
  func.func @transform_8(%arg0: i32) -> (i32, i32) {
    %c0_i32 = arith.constant 0 : i32
    %c0_i32_0 = arith.constant 0 : i32
    %c0_i32_1 = arith.constant 0 : i32
    return %c0_i32, %c0_i32_0 : i32, i32
  }
  func.func @transform_9(%arg0: i32) -> (i32, i32) {
    %c0_i32 = arith.constant 0 : i32
    %c0_i32_0 = arith.constant 0 : i32
    %c0_i32_1 = arith.constant 0 : i32
    return %c0_i32, %c0_i32_0 : i32, i32
  }
  func.func @transform_10(%arg0: i32) -> (i32, i32) {
    %c0_i32 = arith.constant 0 : i32
    %c0_i32_0 = arith.constant 0 : i32
    %c0_i32_1 = arith.constant 0 : i32
    return %c0_i32, %c0_i32_0 : i32, i32
  }
  func.func @transform_11(%arg0: i32) -> (i32, i32) {
    %c0_i32 = arith.constant 0 : i32
    %c0_i32_0 = arith.constant 0 : i32
    return %arg0, %c0_i32 : i32, i32
  }
}

</mosaic_0001>

<bundles_post_ra>
// kernel: cnn_cifar_forward.1
= control target key start
LH: loop header
LB: loop body
LE: loop exit
PB: predicated region body
PF: predicated region fallthrough
CT: control target
= control target key end

     0   :  { %s9950_s17 = smov 0   ;;  %s9952_s18 = smov 0   ;;  %s15303_s0 = inlined_call_operand.vmem [shape: bf16[8,32,512], index: 0, kind: input, shape index: {}]   ;;  %s15304_s1 = inlined_call_operand.vmem [shape: bf16[512,256], index: 1, kind: input, shape index: {}]   ;;  %s15305_s2 = inlined_call_operand.vmem [shape: f32[1,128], index: 2, kind: input, shape index: {}]   ;;  %s15306_s3 = inlined_call_operand.vmem [shape: bf16[512,256], index: 3, kind: input, shape index: {}]   ;;  %s15307_s4 = inlined_call_operand.vmem [shape: f32[1,128], index: 4, kind: input, shape index: {}]   ;;  %s15308_s5 = inlined_call_operand.vmem [shape: bf16[5,128,128], index: 5, kind: input, shape index: {}]   ;;  %s15309_s6 = inlined_call_operand.vmem [shape: f32[1,128], index: 6, kind: input, shape index: {}]   ;;  %s15310_s7 = inlined_call_operand.vmem [shape: bf16[128,128], index: 7, kind: input, shape index: {}]   ;;  %s15311_s8 = inlined_call_operand.vmem [shape: f32[1,128], index: 8, kind: input, shape index: {}]   ;;  %s15312_s9 = inlined_call_operand.vmem [shape: bf16[128,128], index: 9, kind: input, shape index: {}]   ;;  %s15313_s10 = inlined_call_operand.vmem [shape: f32[1,128], index: 10, kind: input, shape index: {}]   ;;  %s15314_s11 = inlined_call_operand.vmem [shape: f32[32,128], index: 11, kind: output, shape index: {}]  }
   0x1   :  { %s9954_s19 = smov 0  }
   0x2 LB: > { %s7518_s20 = sadd.s32 4294967295, %s9884_s19   ;;  %s9967_s21 = sadd.s32 1, %s9884_s19   ;;  %s9884_s19 = sphi %s9954_s19, %s15853_s19   ;;  %s9880_s18 = sphi %s9952_s18, %s15852_s18   ;;  %s9876_s17 = sphi %s9950_s17, %s15851_s17  }
   0x3   : > { %s25_s22 = ssub.s32 %s9884_s19, %s9967_s21  ;;  %s28_s23 = sadd.s32 1, %s9880_s18 }
   0x4   : > { %p26_p0 = scmp.eq.s32.totalorder %s25_s22, 0  ;;  %p35_p1 = scmp.ne.s32.totalorder %s9880_s18, %s9876_s17 }
   0x5   : > { %p36_p2 = scmp.eq.s32.totalorder %s9884_s19, 0  ;;  %p7521_p4 = scmp.ge.s32.totalorder %s9884_s19, 2 }
   0x6   : > { %s9976_s24 = scalar_select %p26_p0, %s9880_s18, %s28_s23  }
   0x7   : > { %p37_p3 = por %p36_p2, %p35_p1  ;;  %327 = sbr.rel (%p7521_p4) target bundleno = 48 (0x30), region = 56 }
   0xc   : > { %330 = sbr.rel (!%p37_p3) target bundleno = 48 (0x30), region = 60  ;;  %s332_s25 = sand.u32 (%p37_p3), 1, %s9880_s18  }
   0xd   : > { %s9337_s26 = sshll.u32 (%p37_p3), %s9884_s19, 5  ;;  %s7522_s27 = sshll.u32 (%p37_p3), %s332_s25, 8 }
   0xe   : > { %s9984_s30 = scalar_lea.vmem (%p37_p3), %s15303_s0, %s9337_s26  ;;  %s9989_s12 = scalar_lea.vmem (%p37_p3), [#allocation5], %s7522_s27 }
   0xf   : > { %v351_v0 = vld [vmem:[%s9984_s30] sm:$0xff] (%p37_p3)  ;;  %v353_v1 = vld [vmem:[%s9984_s30 + $0x8] sm:$0xff] (%p37_p3)  ;;  %v355_v2 = vld [vmem:[%s9984_s30 + $0x10] sm:$0xff] (%p37_p3) }
  0x10   : > { %352 = vst [vmem:[%s9989_s12] sm:$0xff] (%p37_p3), %v351_v0  ;;  %v357_v3 = vld [vmem:[%s9984_s30 + $0x18] sm:$0xff] (%p37_p3)  ;;  %v359_v4 = vld [vmem:[%s9984_s30 + $0x40] sm:$0xff] (%p37_p3)  ;;  %v361_v5 = vld [vmem:[%s9984_s30 + $0x48] sm:$0xff] (%p37_p3) }
  0x11   : > { %354 = vst [vmem:[%s9989_s12 + $0x8] sm:$0xff] %v353_v1  ;;  %v363_v6 = vld [vmem:[%s9984_s30 + $0x50] sm:$0xff]  ;;  %v365_v7 = vld [vmem:[%s9984_s30 + $0x58] sm:$0xff]  ;;  %v367_v8 = vld [vmem:[%s9984_s30 + $0x80] sm:$0xff] }
  0x12   : > { %356 = vst [vmem:[%s9989_s12 + $0x10] sm:$0xff] %v355_v2  ;;  %v369_v9 = vld [vmem:[%s9984_s30 + $0x88] sm:$0xff]  ;;  %v371_v10 = vld [vmem:[%s9984_s30 + $0x90] sm:$0xff]  ;;  %v373_v11 = vld [vmem:[%s9984_s30 + $0x98] sm:$0xff] }
  0x13   : > { %358 = vst [vmem:[%s9989_s12 + $0x18] sm:$0xff] %v357_v3  ;;  %v375_v12 = vld [vmem:[%s9984_s30 + $0xc0] sm:$0xff]  ;;  %v377_v13 = vld [vmem:[%s9984_s30 + $0xc8] sm:$0xff]  ;;  %v379_v14 = vld [vmem:[%s9984_s30 + $0xd0] sm:$0xff] }
  0x14   : > { %360 = vst [vmem:[%s9989_s12 + $0x20] sm:$0xff] %v359_v4  ;;  %v381_v15 = vld [vmem:[%s9984_s30 + $0xd8] sm:$0xff]  ;;  %v383_v16 = vld [vmem:[%s9984_s30 + $0x100] sm:$0xff]  ;;  %v385_v17 = vld [vmem:[%s9984_s30 + $0x108] sm:$0xff] }
  0x15   : > { %362 = vst [vmem:[%s9989_s12 + $0x28] sm:$0xff] %v361_v5  ;;  %v387_v18 = vld [vmem:[%s9984_s30 + $0x110] sm:$0xff]  ;;  %v389_v19 = vld [vmem:[%s9984_s30 + $0x118] sm:$0xff]  ;;  %v391_v20 = vld [vmem:[%s9984_s30 + $0x140] sm:$0xff] }
  0x16   : > { %364 = vst [vmem:[%s9989_s12 + $0x30] sm:$0xff] %v363_v6  ;;  %v393_v21 = vld [vmem:[%s9984_s30 + $0x148] sm:$0xff]  ;;  %v395_v22 = vld [vmem:[%s9984_s30 + $0x150] sm:$0xff]  ;;  %v397_v23 = vld [vmem:[%s9984_s30 + $0x158] sm:$0xff] }
  0x17   : > { %366 = vst [vmem:[%s9989_s12 + $0x38] sm:$0xff] %v365_v7  ;;  %v399_v24 = vld [vmem:[%s9984_s30 + $0x180] sm:$0xff]  ;;  %v401_v25 = vld [vmem:[%s9984_s30 + $0x188] sm:$0xff]  ;;  %v403_v26 = vld [vmem:[%s9984_s30 + $0x190] sm:$0xff] }
  0x18   : > { %368 = vst [vmem:[%s9989_s12 + $0x40] sm:$0xff] %v367_v8  ;;  %v405_v27 = vld [vmem:[%s9984_s30 + $0x198] sm:$0xff]  ;;  %v407_v28 = vld [vmem:[%s9984_s30 + $0x1c0] sm:$0xff]  ;;  %v409_v29 = vld [vmem:[%s9984_s30 + $0x1c8] sm:$0xff] }
  0x19   : > { %370 = vst [vmem:[%s9989_s12 + $0x48] sm:$0xff] %v369_v9  ;;  %v411_v30 = vld [vmem:[%s9984_s30 + $0x1d0] sm:$0xff]  ;;  %v413_v31 = vld [vmem:[%s9984_s30 + $0x1d8] sm:$0xff] }
  0x1a   : > { %372 = vst [vmem:[%s9989_s12 + $0x50] sm:$0xff] %v371_v10 }
  0x1b   : > { %374 = vst [vmem:[%s9989_s12 + $0x58] sm:$0xff] %v373_v11 }
  0x1c   : > { %376 = vst [vmem:[%s9989_s12 + $0x60] sm:$0xff] %v375_v12 }
  0x1d   : > { %378 = vst [vmem:[%s9989_s12 + $0x68] sm:$0xff] %v377_v13 }
  0x1e   : > { %380 = vst [vmem:[%s9989_s12 + $0x70] sm:$0xff] %v379_v14 }
  0x1f   : > { %382 = vst [vmem:[%s9989_s12 + $0x78] sm:$0xff] %v381_v15 }
  0x20   : > { %384 = vst [vmem:[%s9989_s12 + $0x80] sm:$0xff] %v383_v16 }
  0x21   : > { %386 = vst [vmem:[%s9989_s12 + $0x88] sm:$0xff] %v385_v17 }
  0x22   : > { %388 = vst [vmem:[%s9989_s12 + $0x90] sm:$0xff] %v387_v18 }
  0x23   : > { %390 = vst [vmem:[%s9989_s12 + $0x98] sm:$0xff] %v389_v19 }
  0x24   : > { %392 = vst [vmem:[%s9989_s12 + $0xa0] sm:$0xff] %v391_v20 }
  0x25   : > { %394 = vst [vmem:[%s9989_s12 + $0xa8] sm:$0xff] %v393_v21 }
  0x26   : > { %396 = vst [vmem:[%s9989_s12 + $0xb0] sm:$0xff] %v395_v22 }
  0x27   : > { %398 = vst [vmem:[%s9989_s12 + $0xb8] sm:$0xff] %v397_v23 }
  0x28   : > { %400 = vst [vmem:[%s9989_s12 + $0xc0] sm:$0xff] %v399_v24 }
  0x29   : > { %402 = vst [vmem:[%s9989_s12 + $0xc8] sm:$0xff] %v401_v25 }
  0x2a   : > { %404 = vst [vmem:[%s9989_s12 + $0xd0] sm:$0xff] %v403_v26 }
  0x2b   : > { %406 = vst [vmem:[%s9989_s12 + $0xd8] sm:$0xff] %v405_v27 }
  0x2c   : > { %408 = vst [vmem:[%s9989_s12 + $0xe0] sm:$0xff] %v407_v28 }
  0x2d   : > { %410 = vst [vmem:[%s9989_s12 + $0xe8] sm:$0xff] %v409_v29 }
  0x2e   : > { %412 = vst [vmem:[%s9989_s12 + $0xf0] sm:$0xff] %v411_v30 }
  0x2f   : > { %414 = vst [vmem:[%s9989_s12 + $0xf8] sm:$0xff] %v413_v31 }
  0x30 PF: > { %p7526_p5 = scmp.ge.s32.totalorder %s9884_s19, 1  ;;  %p419_p6 = scmp.lt.s32.totalorder %s9884_s19, 3 }
  0x32   : > { %p420_p7 = pnand %p7526_p5, %p419_p6 }
  0x34   : > { %423 = sbr.rel (%p420_p7) target bundleno = 2445 (0x98d), region = 83 }
  0x39   : > { %v8032_v32 = vld [vmem:[%s15304_s1 + $0x1f0] sm:$0xf]  ;;  %v9429_v33 = vld [vmem:[%s15304_s1 + $0x1f4] sm:$0xf0]  ;;  %s426_s22 = sand.u32 1, %s9876_s17   ;;  %s9886_s17 = smov 64  }
  0x3a   : > { %v10061_v34 = vor.u32 %v9429_v33, %v8032_v32  ;;  %s7527_s23 = sshll.u32 %s426_s22, 8  ;;  %v8024_v35 = vld [vmem:[%s15304_s1 + $0x1e0] sm:$0xf]  ;;  %v9427_v36 = vld [vmem:[%s15304_s1 + $0x1e4] sm:$0xf0]  ;;  %s9887_s30 = smov 96  }
  0x3b   : > { %s10070_s29 = scalar_lea.vmem [#allocation5], %s7527_s23  ;;  %v10074_v39 = vor.u32 %v9427_v36, %v8024_v35  ;;  %v8016_v40 = vld [vmem:[%s15304_s1 + $0x1d0] sm:$0xf]  ;;  %v9425_v41 = vld [vmem:[%s15304_s1 + $0x1d4] sm:$0xf0]  ;;  %vm473_vm0 = vcmask 1044224  }
  0x3c   : > { %2700 = vmatpush.bf16.msra.mxu3 %v10061_v34  ;;  %v694_v37 = vld [vmem:[%s10070_s29 + $0x8] sm:$0xf]  ;;  %v579_v38 = vld [vmem:[%s10070_s29 + $0x4] sm:$0xf]  ;;  %v10085_v42 = vor.u32 %v9425_v41, %v8016_v40  ;;  %v695_v43 = vld [vmem:[%s10070_s29 + $0x18] sm:$0xf] }
  0x3d   : > { %722 = vrot.lane.b32.xlu1 %v694_v37, %s9886_s17  ;;  %607 = vrot.lane.b32.xlu0 %v579_v38, %s9887_s30  ;;  %v8008_v44 = vld [vmem:[%s15304_s1 + $0x1c0] sm:$0xf]  ;;  %v9423_v45 = vld [vmem:[%s15304_s1 + $0x1c4] sm:$0xf0]  ;;  %v9888_v48 = vmov 0   ;;  %s9889_s26 = smov 32  }
  0x3e   : > { %v580_v46 = vld [vmem:[%s10070_s29 + $0x14] sm:$0xf]  ;;  %v810_v47 = vld [vmem:[%s10070_s29 + $0xc] sm:$0xf]  ;;  %474 = vst.msk [vmem:[#allocation2 + $0xc] sm:$0xf] %vm473_vm0, %v9888_v48  ;;  %v10103_v50 = vor.u32 %v9423_v45, %v8008_v44 }
  0x3f   : > { %838 = vrot.lane.b32.xlu2 %v810_v47, %s9889_s26  ;;  %475 = vst.msk [vmem:[#allocation2 + $0x1c] sm:$0xf] %vm473_vm0, %v9888_v48  ;;  %vm564_vm1 = vcmask 781312   ;;  %v7530_v49 = vld [vmem:[%s10070_s29 + $0x20] sm:$0xf]  ;;  %vm764_vm2 = vcmask 523264  }
  0x40   : > { %2701 = vmatpush.bf16.msra.mxu3 %v10074_v39  ;;  %v7531_v51 = vld [vmem:[%s10070_s29 + $0x30] sm:$0xf]  ;;  %910 = vst.msk [vmem:[#allocation2 + $0xc] sm:$0xf] %vm564_vm1, %v7530_v49  ;;  %v8000_v52 = vld [vmem:[%s15304_s1 + $0x1b0] sm:$0xf] }
  0x41   : > { %v9421_v53 = vld [vmem:[%s15304_s1 + $0x1b4] sm:$0xf0]  ;;  %911 = vst.msk [vmem:[#allocation2 + $0x1c] sm:$0xf] %vm564_vm1, %v7531_v51  ;;  %v7992_v54 = vld [vmem:[%s15304_s1 + $0x1a0] sm:$0xf] }
  0x42   : > { %476 = vst.msk [vmem:[#allocation2 + $0x2c] sm:$0xf] %vm473_vm0, %v9888_v48  ;;  %v9419_v55 = vld [vmem:[%s15304_s1 + $0x1a4] sm:$0xf0]  ;;  %v10127_v56 = vor.u32 %v9421_v53, %v8000_v52  ;;  %v582_v57 = vld [vmem:[%s10070_s29 + $0x34] sm:$0xf] }
  0x43   : > { %477 = vst.msk [vmem:[#allocation2 + $0x3c] sm:$0xf] %vm473_vm0, %v9888_v48  ;;  %v581_v58 = vld [vmem:[%s10070_s29 + $0x24] sm:$0xf]  ;;  %v811_v59 = vld [vmem:[%s10070_s29 + $0x1c] sm:$0xf]  ;;  %v10142_v60 = vor.u32 %v9419_v55, %v7992_v54 }
  0x44   : > { %2702 = vmatpush.bf16.msra.mxu3 %v10085_v42  ;;  %478 = vst.msk [vmem:[#allocation2 + $0x4c] sm:$0xf] %vm473_vm0, %v9888_v48  ;;  %v7984_v61 = vld [vmem:[%s15304_s1 + $0x190] sm:$0xf]  ;;  %v9417_v62 = vld [vmem:[%s15304_s1 + $0x194] sm:$0xf0] }
  0x45   : > { %724 = vrot.lane.b32.xlu1 %v695_v43, %s9886_s17  ;;  %609 = vrot.lane.b32.xlu0 %v580_v46, %s9887_s30  ;;  %479 = vst.msk [vmem:[#allocation2 + $0x5c] sm:$0xf] %vm473_vm0, %v9888_v48  ;;  %v10161_v63 = vor.u32 %v9417_v62, %v7984_v61  ;;  %v696_v0 = vld [vmem:[%s10070_s29 + $0x28] sm:$0xf]  ;;  %v7976_v1 = vld [vmem:[%s15304_s1 + $0x180] sm:$0xf] }
  0x46   : > { %480 = vst.msk [vmem:[#allocation2 + $0x6c] sm:$0xf] %vm473_vm0, %v9888_v48  ;;  %v9415_v2 = vld [vmem:[%s15304_s1 + $0x184] sm:$0xf0]  ;;  %v812_v3 = vld [vmem:[%s10070_s29 + $0x2c] sm:$0xf] }
  0x47   : > { %481 = vst.msk [vmem:[#allocation2 + $0x7c] sm:$0xf] %vm473_vm0, %v9888_v48  ;;  %840 = vrot.lane.b32.xlu2 %v811_v59, %s9889_s26  ;;  %v697_v4 = vld [vmem:[%s10070_s29 + $0x38] sm:$0xf]  ;;  %v10182_v5 = vor.u32 %v9415_v2, %v7976_v1  ;;  %v9339_v6 = vld [vmem:[#allocation2 + $0xc] sm:$0xf] }
  0x48   : > { %2703 = vmatpush.bf16.msra.mxu3 %v10103_v50  ;;  %482 = vst.msk [vmem:[#allocation2 + $0x8c] sm:$0xf] %vm473_vm0, %v9888_v48  ;;  %v7682_v7 = vld [vmem:[#allocation2 + $0x18] sm:$0xf0]  ;;  %v584_v9 = vld [vmem:[%s10070_s29 + $0x54] sm:$0xf] }
  0x49   : > { %483 = vst.msk [vmem:[#allocation2 + $0x9c] sm:$0xf] %vm473_vm0, %v9888_v48  ;;  %v10192_v8 = vor.u32 %v9339_v6, %v7682_v7  ;;  %v583_v10 = vld [vmem:[%s10070_s29 + $0x44] sm:$0xf]  ;;  %v814_v11 = vld [vmem:[%s10070_s29 + $0x4c] sm:$0xf] }
  0x4a   : > { %484 = vst.msk [vmem:[#allocation2 + $0xac] sm:$0xf] %vm473_vm0, %v9888_v48  ;;  %v699_v12 = vld [vmem:[%s10070_s29 + $0x58] sm:$0xf]  ;;  %v586_v13 = vld [vmem:[%s10070_s29 + $0x74] sm:$0xf] }
  0x4b   : > { %485 = vst.msk [vmem:[#allocation2 + $0xbc] sm:$0xf] %vm473_vm0, %v9888_v48  ;;  %v585_v14 = vld [vmem:[%s10070_s29 + $0x64] sm:$0xf]  ;;  %v813_v15 = vld [vmem:[%s10070_s29 + $0x3c] sm:$0xf] }
  0x4c   : > { %2704 = vmatpush.bf16.msra.mxu3 %v10127_v56  ;;  %486 = vst.msk [vmem:[#allocation2 + $0xcc] sm:$0xf] %vm473_vm0, %v9888_v48  ;;  %v816_v16 = vld [vmem:[%s10070_s29 + $0x6c] sm:$0xf]  ;;  %v701_v17 = vld [vmem:[%s10070_s29 + $0x78] sm:$0xf] }
  0x4d   : > { %613 = vrot.lane.b32.xlu1 %v582_v57, %s9887_s30  ;;  %611 = vrot.lane.b32.xlu0 %v581_v58, %s9887_s30  ;;  %487 = vst.msk [vmem:[#allocation2 + $0xdc] sm:$0xf] %vm473_vm0, %v9888_v48  ;;  %v698_v18 = vld [vmem:[%s10070_s29 + $0x48] sm:$0xf]  ;;  %v588_v19 = vld [vmem:[%s10070_s29 + $0x94] sm:$0xf] }
  0x4e   : > { %488 = vst.msk [vmem:[#allocation2 + $0xec] sm:$0xf] %vm473_vm0, %v9888_v48  ;;  %v587_v20 = vld [vmem:[%s10070_s29 + $0x84] sm:$0xf]  ;;  %v815_v21 = vld [vmem:[%s10070_s29 + $0x5c] sm:$0xf] }
  0x4f   : > { %489 = vst.msk [vmem:[#allocation2 + $0xfc] sm:$0xf] %vm473_vm0, %v9888_v48  ;;  %726 = vrot.lane.b32.xlu2 %v696_v0, %s9886_s17  ;;  %v7532_v22 = vld [vmem:[%s10070_s29 + $0x40] sm:$0xf]  ;;  %v7533_v23 = vld [vmem:[%s10070_s29 + $0x50] sm:$0xf] }
  0x50   : > { %2705 = vmatpush.bf16.msra.mxu3 %v10142_v60  ;;  %490 = vst.msk [vmem:[#allocation2 + $0x10c] sm:$0xf] %vm473_vm0, %v9888_v48  ;;  %v7534_v24 = vld [vmem:[%s10070_s29 + $0x60] sm:$0xf]  ;;  %v7535_v25 = vld [vmem:[%s10070_s29 + $0x70] sm:$0xf] }
  0x51   : > { %491 = vst.msk [vmem:[#allocation2 + $0x11c] sm:$0xf] %vm473_vm0, %v9888_v48  ;;  %v818_v26 = vld [vmem:[%s10070_s29 + $0x8c] sm:$0xf]  ;;  %v703_v27 = vld [vmem:[%s10070_s29 + $0x98] sm:$0xf] }
  0x52   : > { %492 = vst.msk [vmem:[#allocation2 + $0x12c] sm:$0xf] %vm473_vm0, %v9888_v48  ;;  %v7536_v28 = vld [vmem:[%s10070_s29 + $0x80] sm:$0xf]  ;;  %v700_v29 = vld [vmem:[%s10070_s29 + $0x68] sm:$0xf] }
  0x53   : > { %493 = vst.msk [vmem:[#allocation2 + $0x13c] sm:$0xf] %vm473_vm0, %v9888_v48  ;;  %v7537_v30 = vld [vmem:[%s10070_s29 + $0x90] sm:$0xf]  ;;  %v590_v35 = vld [vmem:[%s10070_s29 + $0xb4] sm:$0xf] }
  0x54   : > { %2706 = vmatpush.bf16.msra.mxu3 %v10161_v63  ;;  %494 = vst.msk [vmem:[#allocation2 + $0x14c] sm:$0xf] %vm473_vm0, %v9888_v48  ;;  %v589_v36 = vld [vmem:[%s10070_s29 + $0xa4] sm:$0xf]  ;;  %v817_v37 = vld [vmem:[%s10070_s29 + $0x7c] sm:$0xf] }
  0x55   : > { %842 = vrot.lane.b32.xlu1 %v812_v3, %s9889_s26  ;;  %728 = vrot.lane.b32.xlu0 %v697_v4, %s9886_s17  ;;  %495 = vst.msk [vmem:[#allocation2 + $0x15c] sm:$0xf] %vm473_vm0, %v9888_v48  ;;  %v7538_v38 = vld [vmem:[%s10070_s29 + $0xa0] sm:$0xf]  ;;  %v7539_v40 = vld [vmem:[%s10070_s29 + $0xb0] sm:$0xf] }
  0x56   : > { %496 = vst.msk [vmem:[#allocation2 + $0x16c] sm:$0xf] %vm473_vm0, %v9888_v48  ;;  %v820_v41 = vld [vmem:[%s10070_s29 + $0xac] sm:$0xf]  ;;  %v705_v43 = vld [vmem:[%s10070_s29 + $0xb8] sm:$0xf] }
  0x57   : > { %497 = vst.msk [vmem:[#allocation2 + $0x17c] sm:$0xf] %vm473_vm0, %v9888_v48  ;;  %844 = vrot.lane.b32.xlu2 %v813_v15, %s9889_s26  ;;  %v702_v44 = vld [vmem:[%s10070_s29 + $0x88] sm:$0xf]  ;;  %v591_v49 = vld [vmem:[%s10070_s29 + $0xc4] sm:$0xf] }
  0x58   : > { %2707 = vmatpush.bf16.msra.mxu3 %v10182_v5  ;;  %498 = vst.msk [vmem:[#allocation2 + $0x18c] sm:$0xf] %vm473_vm0, %v9888_v48  ;;  %v819_v51 = vld [vmem:[%s10070_s29 + $0x9c] sm:$0xf]  ;;  %v7840_v52 = vld [vmem:[%s15304_s1 + $0x70] sm:$0xf] }
  0x59   : > { %499 = vst.msk [vmem:[#allocation2 + $0x19c] sm:$0xf] %vm473_vm0, %v9888_v48  ;;  %v9381_v53 = vld [vmem:[%s15304_s1 + $0x74] sm:$0xf0]  ;;  %v7904_v54 = vld [vmem:[%s15304_s1 + $0xf0] sm:$0xf] }
  0x5a   : > { %500 = vst.msk [vmem:[#allocation2 + $0x1ac] sm:$0xf] %vm473_vm0, %v9888_v48  ;;  %v9397_v55 = vld [vmem:[%s15304_s1 + $0xf4] sm:$0xf0]  ;;  %v10394_v57 = vor.u32 %v9381_v53, %v7840_v52  ;;  %v7968_v59 = vld [vmem:[%s15304_s1 + $0x170] sm:$0xf] }
  0x5b   : > { %2708 = vmatmul.bf16.vlgmr.msra.gmra.mxu3 %v10192_v8  ;;  %501 = vst.msk [vmem:[#allocation2 + $0x1bc] sm:$0xf] %vm473_vm0, %v9888_v48  ;;  %v10396_v58 = vor.u32 %v9397_v55, %v7904_v54  ;;  %v9413_v61 = vld [vmem:[%s15304_s1 + $0x174] sm:$0xf0]  ;;  %v7832_v0 = vld [vmem:[%s15304_s1 + $0x60] sm:$0xf] }
  0x5c   : > { %502 = vst.msk [vmem:[#allocation2 + $0x1cc] sm:$0xf] %vm473_vm0, %v9888_v48  ;;  %v10404_v62 = vor.u32 %v9413_v61, %v7968_v59  ;;  %v9379_v1 = vld [vmem:[%s15304_s1 + $0x64] sm:$0xf0]  ;;  %2568 = vmatpush.bf16.msra.mxu0 %v10394_v57  ;;  %v7896_v3 = vld [vmem:[%s15304_s1 + $0xe0] sm:$0xf] }
  0x5d   : > { %617 = vrot.lane.b32.xlu1 %v584_v9, %s9887_s30  ;;  %615 = vrot.lane.b32.xlu0 %v583_v10, %s9887_s30  ;;  %503 = vst.msk [vmem:[#allocation2 + $0x1dc] sm:$0xf] %vm473_vm0, %v9888_v48  ;;  %v10414_v2 = vor.u32 %v9379_v1, %v7832_v0  ;;  %v9395_v4 = vld [vmem:[%s15304_s1 + $0xe4] sm:$0xf0]  ;;  %v7540_v6 = vld [vmem:[%s10070_s29 + $0xc0] sm:$0xf] }
  0x5e   : > { %504 = vst.msk [vmem:[#allocation2 + $0x1ec] sm:$0xf] %vm473_vm0, %v9888_v48  ;;  %2612 = vmatpush.bf16.msra.mxu1 %v10396_v58  ;;  %v707_v7 = vld [vmem:[%s10070_s29 + $0xd8] sm:$0xf]  ;;  %2656 = vmatpush.bf16.msra.mxu2 %v10404_v62  ;;  %v7541_v9 = vld [vmem:[%s10070_s29 + $0xd0] sm:$0xf] }
  0x5f   : > { %505 = vst.msk [vmem:[#allocation2 + $0x1fc] sm:$0xf] %vm473_vm0, %v9888_v48  ;;  %730 = vrot.lane.b32.xlu2 %v698_v18, %s9886_s17  ;;  %v704_v10 = vld [vmem:[%s10070_s29 + $0xa8] sm:$0xf]  ;;  %vm649_vm3 = vcmask 785408   ;;  %vm678_vm4 = vcmask 523268  }
  0x60   : > { %506 = vst.msk [vmem:[#allocation2 + $0x20c] sm:$0xf] %vm473_vm0, %v9888_v48  ;;  %2569 = vmatpush.bf16.msra.mxu0 %v10414_v2  ;;  %vm10480_vm5 = vmor %vm678_vm4, %vm473_vm0  ;;  %vm793_vm6 = vcmask 1043968   ;;  %vm794_vm7 = vcmask 261124   ;;  %vm880_vm8 = vcmask 1043712   ;;  %v15449_v53 = vmov 0 }
  0x61   : > { %507 = vst.msk [vmem:[#allocation2 + $0x21c] sm:$0xf] %vm473_vm0, %v9888_v48  ;;  %vm10514_vm9 = vmor %vm794_vm7, %vm793_vm6  ;;  %v7880_v54 = vld [vmem:[%s15304_s1 + $0xc0] sm:$0xf]  ;;  %v9391_v55 = vld [vmem:[%s15304_s1 + $0xc4] sm:$0xf0] }
  0x62   : > { %508 = vst.msk [vmem:[#allocation2 + $0x22c] sm:$0xf] %vm473_vm0, %v9888_v48  ;;  %v15450_v53 = vsel %vm10514_vm9, 4294967295, %v15449_v53  ;;  %v10527_v0 = vor.u32 %v9391_v55, %v7880_v54  ;;  %v7944_v1 = vld [vmem:[%s15304_s1 + $0x140] sm:$0xf]  ;;  %s7528_s25 = sshll.u32 %s7518_s20, 1 }
  0x63   : > { %509 = vst.msk [vmem:[#allocation2 + $0x23c] sm:$0xf] %vm473_vm0, %v9888_v48  ;;  %v7542_v55 = vld [vmem:[%s10070_s29 + $0xe0] sm:$0xf]  ;;  %p467_p8 = scmp.lt.s32.totalorder %s7528_s25, 3 }
  0x64   : > { %510 = vst.msk [vmem:[#allocation2 + $0x24c] sm:$0xf] %vm473_vm0, %v9888_v48 }
  0x65   : > { %846 = vrot.lane.b32.xlu1 %v814_v11, %s9889_s26  ;;  %732 = vrot.lane.b32.xlu0 %v699_v12, %s9886_s17  ;;  %511 = vst.msk [vmem:[#allocation2 + $0x25c] sm:$0xf] %vm473_vm0, %v9888_v48  ;;  %v822_v11 = vld [vmem:[%s10070_s29 + $0xcc] sm:$0xf]  ;;  %v10429_v12 = vor.u32 %v9395_v4, %v7896_v3  ;;  %v9407_v3 = vld [vmem:[%s15304_s1 + $0x144] sm:$0xf0] }
  0x66   : > { %512 = vst.msk [vmem:[#allocation2 + $0x26c] sm:$0xf] %vm473_vm0, %v9888_v48  ;;  %v10537_v4 = vor.u32 %v9407_v3, %v7944_v1  ;;  %v9403_v1 = vld [vmem:[%s15304_s1 + $0x124] sm:$0xf0]  ;;  %s15855_s25 = smov (!%p467_p8, %s7528_s25), 3 }
  0x67   : > { %513 = vst.msk [vmem:[#allocation2 + $0x27c] sm:$0xf] %vm473_vm0, %v9888_v48  ;;  %848 = vrot.lane.b32.xlu2 %v815_v21, %s9889_s26  ;;  %2613 = vmatpush.bf16.msra.mxu1 %v10429_v12  ;;  %s7529_s27 = sshll.u32 %s15855_s25, 3 }
  0x68   : > { %514 = vst.msk [vmem:[#allocation2 + $0x28c] sm:$0xf] %vm473_vm0, %v9888_v48 }
  0x69   : > { %515 = vst.msk [vmem:[#allocation2 + $0x29c] sm:$0xf] %vm473_vm0, %v9888_v48 }
  0x6a   : > { %516 = vst.msk [vmem:[#allocation2 + $0x2ac] sm:$0xf] %vm473_vm0, %v9888_v48 }
  0x6b   : > { %517 = vst.msk [vmem:[#allocation2 + $0x2bc] sm:$0xf] %vm473_vm0, %v9888_v48 }
  0x6c   : > { %518 = vst.msk [vmem:[#allocation2 + $0x2cc] sm:$0xf] %vm473_vm0, %v9888_v48 }
  0x6d   : > { %519 = vst.msk [vmem:[#allocation2 + $0x2dc] sm:$0xf] %vm473_vm0, %v9888_v48  ;;  %621 = vrot.lane.b32.xlu1 %v586_v13, %s9887_s30  ;;  %619 = vrot.lane.b32.xlu0 %v585_v14, %s9887_s30 }
  0x6e   : > { %520 = vst.msk [vmem:[#allocation2 + $0x2ec] sm:$0xf] %vm473_vm0, %v9888_v48 }
  0x6f   : > { %521 = vst.msk [vmem:[#allocation2 + $0x2fc] sm:$0xf] %vm473_vm0, %v9888_v48  ;;  %734 = vrot.lane.b32.xlu2 %v700_v29, %s9886_s17 }
  0x70   : > { %522 = vst.msk [vmem:[#allocation2 + $0x30c] sm:$0xf] %vm473_vm0, %v9888_v48 }
  0x71   : > { %523 = vst.msk [vmem:[#allocation2 + $0x31c] sm:$0xf] %vm473_vm0, %v9888_v48 }
  0x72   : > { %524 = vst.msk [vmem:[#allocation2 + $0x32c] sm:$0xf] %vm473_vm0, %v9888_v48 }
  0x73   : > { %525 = vst.msk [vmem:[#allocation2 + $0x33c] sm:$0xf] %vm473_vm0, %v9888_v48 }
  0x74   : > { %526 = vst.msk [vmem:[#allocation2 + $0x34c] sm:$0xf] %vm473_vm0, %v9888_v48 }
  0x75   : > { %527 = vst.msk [vmem:[#allocation2 + $0x35c] sm:$0xf] %vm473_vm0, %v9888_v48  ;;  %850 = vrot.lane.b32.xlu1 %v816_v16, %s9889_s26  ;;  %736 = vrot.lane.b32.xlu0 %v701_v17, %s9886_s17  ;;  %v7960_v16 = vld [vmem:[%s15304_s1 + $0x160] sm:$0xf]  ;;  %v9411_v17 = vld [vmem:[%s15304_s1 + $0x164] sm:$0xf0] }
  0x76   : > { %528 = vst.msk [vmem:[#allocation2 + $0x36c] sm:$0xf] %vm473_vm0, %v9888_v48  ;;  %v10445_v18 = vor.u32 %v9411_v17, %v7960_v16  ;;  %v7872_v16 = vld [vmem:[%s15304_s1 + $0xb0] sm:$0xf] }
  0x77   : > { %529 = vst.msk [vmem:[#allocation2 + $0x37c] sm:$0xf] %vm473_vm0, %v9888_v48  ;;  %852 = vrot.lane.b32.xlu2 %v817_v37, %s9889_s26  ;;  %v15446_v37 = vmov 0 }
  0x78   : > { %530 = vst.msk [vmem:[#allocation3 + $0xc] sm:$0xf] %vm473_vm0, %v9888_v48  ;;  %2657 = vmatpush.bf16.msra.mxu2 %v10445_v18  ;;  %v15447_v37 = vsel %vm10480_vm5, 4294967295, %v15446_v37 }
  0x79   : > { %531 = vst.msk [vmem:[#allocation3 + $0x1c] sm:$0xf] %vm473_vm0, %v9888_v48 }
  0x7a   : > { %532 = vst.msk [vmem:[#allocation3 + $0x2c] sm:$0xf] %vm473_vm0, %v9888_v48 }
  0x7b   : > { %533 = vst.msk [vmem:[#allocation3 + $0x3c] sm:$0xf] %vm473_vm0, %v9888_v48 }
  0x7c   : > { %534 = vst.msk [vmem:[#allocation3 + $0x4c] sm:$0xf] %vm473_vm0, %v9888_v48 }
  0x7d   : > { %535 = vst.msk [vmem:[#allocation3 + $0x5c] sm:$0xf] %vm473_vm0, %v9888_v48  ;;  %625 = vrot.lane.b32.xlu1 %v588_v19, %s9887_s30  ;;  %623 = vrot.lane.b32.xlu0 %v587_v20, %s9887_s30  ;;  %v9428_v19 = vld [vmem:[%s15304_s1 + $0x1f4] sm:$0xf]  ;;  %v8034_v20 = vld [vmem:[%s15304_s1 + $0x1f8] sm:$0xf0] }
  0x7e   : > { %536 = vst.msk [vmem:[#allocation3 + $0x6c] sm:$0xf] %vm473_vm0, %v9888_v48  ;;  %v10454_v21 = vor.u32 %v9428_v19, %v8034_v20  ;;  %v9389_v20 = vld [vmem:[%s15304_s1 + $0xb4] sm:$0xf0] }
  0x7f   : > { %537 = vst.msk [vmem:[#allocation3 + $0x7c] sm:$0xf] %vm473_vm0, %v9888_v48  ;;  %738 = vrot.lane.b32.xlu2 %v702_v44, %s9886_s17 }
  0x80   : > { %538 = vst.msk [vmem:[#allocation3 + $0x8c] sm:$0xf] %vm473_vm0, %v9888_v48  ;;  %2876 = vmatpush.bf16.msrb.mxu3 %v10454_v21 }
  0x81   : > { %539 = vst.msk [vmem:[#allocation3 + $0x9c] sm:$0xf] %vm473_vm0, %v9888_v48 }
  0x82   : > { %540 = vst.msk [vmem:[#allocation3 + $0xac] sm:$0xf] %vm473_vm0, %v9888_v48 }
  0x83   : > { %541 = vst.msk [vmem:[#allocation3 + $0xbc] sm:$0xf] %vm473_vm0, %v9888_v48 }
  0x84   : > { %542 = vst.msk [vmem:[#allocation3 + $0xcc] sm:$0xf] %vm473_vm0, %v9888_v48 }
  0x85   : > { %543 = vst.msk [vmem:[#allocation3 + $0xdc] sm:$0xf] %vm473_vm0, %v9888_v48  ;;  %854 = vrot.lane.b32.xlu1 %v818_v26, %s9889_s26  ;;  %740 = vrot.lane.b32.xlu0 %v703_v27, %s9886_s17 }
  0x86   : > { %544 = vst.msk [vmem:[#allocation3 + $0xec] sm:$0xf] %vm473_vm0, %v9888_v48 }
  0x87   : > { %545 = vst.msk [vmem:[#allocation3 + $0xfc] sm:$0xf] %vm473_vm0, %v9888_v48  ;;  %856 = vrot.lane.b32.xlu2 %v819_v51, %s9889_s26  ;;  %v9375_v51 = vld [vmem:[%s15304_s1 + $0x44] sm:$0xf0] }
  0x88   : > { %546 = vst.msk [vmem:[#allocation3 + $0x10c] sm:$0xf] %vm473_vm0, %v9888_v48 }
  0x89   : > { %547 = vst.msk [vmem:[#allocation3 + $0x11c] sm:$0xf] %vm473_vm0, %v9888_v48 }
  0x8a   : > { %548 = vst.msk [vmem:[#allocation3 + $0x12c] sm:$0xf] %vm473_vm0, %v9888_v48 }
  0x8b   : > { %549 = vst.msk [vmem:[#allocation3 + $0x13c] sm:$0xf] %vm473_vm0, %v9888_v48  ;;  %v592_v48 = vld [vmem:[%s10070_s29 + $0xd4] sm:$0xf] }
  0x8c   : > { %912 = vst.msk [vmem:[#allocation2 + $0x2c] sm:$0xf] %vm564_vm1, %v7532_v22  ;;  %v7824_v22 = vld [vmem:[%s15304_s1 + $0x50] sm:$0xf] }
  0x8d   : > { %913 = vst.msk [vmem:[#allocation2 + $0x3c] sm:$0xf] %vm564_vm1, %v7533_v23  ;;  %629 = vrot.lane.b32.xlu1 %v590_v35, %s9887_s30  ;;  %627 = vrot.lane.b32.xlu0 %v589_v36, %s9887_s30  ;;  %v9377_v23 = vld [vmem:[%s15304_s1 + $0x54] sm:$0xf0]  ;;  %v7952_v36 = vld [vmem:[%s15304_s1 + $0x150] sm:$0xf] }
  0x8e   : > { %914 = vst.msk [vmem:[#allocation2 + $0x4c] sm:$0xf] %vm564_vm1, %v7534_v24  ;;  %v7888_v24 = vld [vmem:[%s15304_s1 + $0xd0] sm:$0xf]  ;;  %v10466_v27 = vor.u32 %v9377_v23, %v7824_v22  ;;  %v551_v23 = vld [vmem:[%s10070_s29 + $0x10] sm:$0xf] }
  0x8f   : > { %915 = vst.msk [vmem:[#allocation2 + $0x5c] sm:$0xf] %vm564_vm1, %v7535_v25  ;;  %742 = vrot.lane.b32.xlu2 %v704_v10, %s9886_s17 }
  0x90   : > { %916 = vst.msk [vmem:[#allocation2 + $0x6c] sm:$0xf] %vm564_vm1, %v7536_v28  ;;  %v9393_v28 = vld [vmem:[%s15304_s1 + $0xd4] sm:$0xf0]  ;;  %2570 = vmatpush.bf16.msra.mxu0 %v10466_v27 }
  0x91   : > { %917 = vst.msk [vmem:[#allocation2 + $0x7c] sm:$0xf] %vm564_vm1, %v7537_v30 }
  0x92   : > { %918 = vst.msk [vmem:[#allocation2 + $0x8c] sm:$0xf] %vm564_vm1, %v7538_v38  ;;  %v9409_v38 = vld [vmem:[%s15304_s1 + $0x154] sm:$0xf0] }
  0x93   : > { %v9343_v31 = vld [vmem:[#allocation2 + $0x2c] sm:$0xf]  ;;  %919 = vst.msk [vmem:[#allocation2 + $0x9c] sm:$0xf] %vm564_vm1, %v7539_v40  ;;  %v9426_v40 = vld [vmem:[%s15304_s1 + $0x1e4] sm:$0xf]  ;;  %v10494_v44 = vor.u32 %v9409_v38, %v7952_v36 }
  0x94   : > { %v7698_v32 = vld [vmem:[#allocation2 + $0x38] sm:$0xf0]  ;;  %920 = vst.msk [vmem:[#allocation2 + $0xac] sm:$0xf] %vm564_vm1, %v7540_v6  ;;  %v9424_v6 = vld [vmem:[%s15304_s1 + $0x1d4] sm:$0xf] }
  0x95   : > { %v10354_v33 = vor.u32 %v9343_v31, %v7698_v32  ;;  %v9347_v45 = vld [vmem:[#allocation2 + $0x4c] sm:$0xf]  ;;  %858 = vrot.lane.b32.xlu1 %v820_v41, %s9889_s26  ;;  %744 = vrot.lane.b32.xlu0 %v705_v43, %s9886_s17  ;;  %921 = vst.msk [vmem:[#allocation2 + $0xbc] sm:$0xf] %vm564_vm1, %v7541_v9  ;;  %v10472_v31 = vor.u32 %v9393_v28, %v7888_v24  ;;  %v550_v32 = vld [vmem:[%s10070_s29] sm:$0xf] }
  0x96   : > { %v7714_v46 = vld [vmem:[#allocation2 + $0x58] sm:$0xf0]  ;;  %15448 = vst [vmem:[#allocation6_spill] sm:$0xff] %v15447_v37  ;;  %2658 = vmatpush.bf16.msra.mxu2 %v10494_v44  ;;  %v9405_v28 = vld [vmem:[%s15304_s1 + $0x134] sm:$0xf0] }
  0x97   : > { %2713 = vmatmul.bf16.gmra.mxu3 %v10354_v33  ;;  %v10373_v47 = vor.u32 %v9347_v45, %v7714_v46  ;;  %v9351_v13 = vld [vmem:[#allocation2 + $0x6c] sm:$0xf]  ;;  %565 = vst.msk [vmem:[#allocation2] sm:$0xf] %vm564_vm1, %v550_v32  ;;  %2614 = vmatpush.bf16.msra.mxu1 %v10472_v31  ;;  %v9422_v36 = vld [vmem:[%s15304_s1 + $0x1c4] sm:$0xf] }
  0x98   : > { %v7730_v14 = vld [vmem:[#allocation2 + $0x78] sm:$0xf0]  ;;  %v8026_v45 = vld [vmem:[%s15304_s1 + $0x1e8] sm:$0xf0]  ;;  %15451 = vst [vmem:[#allocation7_spill] sm:$0xff] %v15450_v53 }
  0x99   : > { %v10437_v15 = vor.u32 %v9351_v13, %v7730_v14  ;;  %v839_v30 = vpop.permute.xlu2 %838  ;;  %v821_v46 = vld [vmem:[%s10070_s29 + $0xbc] sm:$0xf]  ;;  %v7808_v13 = vld [vmem:[%s15304_s1 + $0x30] sm:$0xf]  ;;  %v9373_v14 = vld [vmem:[%s15304_s1 + $0x34] sm:$0xf0] }
  0x9a   : > { %860 = vrot.lane.b32.xlu2 %v821_v46, %s9889_s26  ;;  %v9355_v59 = vld [vmem:[#allocation2 + $0x8c] sm:$0xf]  ;;  %v7746_v61 = vld [vmem:[#allocation2 + $0x98] sm:$0xf0]  ;;  %2659 = vmatpush.bf16.msra.mxu2 %v10537_v4  ;;  %v10558_v19 = vor.u32 %v9373_v14, %v7808_v13  ;;  %566 = vst.msk [vmem:[#allocation2 + $0x10] sm:$0xf] %vm564_vm1, %v551_v23 }
  0x9b   : > { %2615 = vmatpush.bf16.msra.mxu1 %v10527_v0  ;;  %v8010_v38 = vld [vmem:[%s15304_s1 + $0x1c8] sm:$0xf0]  ;;  %922 = vst.msk [vmem:[#allocation2 + $0xcc] sm:$0xf] %vm564_vm1, %v7542_v55  ;;  %v7792_v14 = vld [vmem:[%s15304_s1 + $0x10] sm:$0xf] }
  0x9c   : > { %v9385_v23 = vld [vmem:[%s15304_s1 + $0x94] sm:$0xf0]  ;;  %v7784_v55 = vld [vmem:[%s15304_s1] sm:$0xf] }
  0x9d   : > { %633 = vrot.lane.b32.xlu1 %v592_v48, %s9887_s30  ;;  %631 = vrot.lane.b32.xlu0 %v591_v49, %s9887_s30  ;;  %v7816_v48 = vld [vmem:[%s15304_s1 + $0x40] sm:$0xf]  ;;  %v10505_v49 = vor.u32 %v9426_v40, %v8026_v45  ;;  %v706_v40 = vld [vmem:[%s10070_s29 + $0xc8] sm:$0xf] }
  0x9e   : > { %v10512_v52 = vor.u32 %v9375_v51, %v7816_v48  ;;  %v9371_v45 = vld [vmem:[%s15304_s1 + $0x24] sm:$0xf0]  ;;  %v7864_v48 = vld [vmem:[%s15304_s1 + $0xa0] sm:$0xf] }
  0x9f   : > { %2877 = vmatpush.bf16.msrb.mxu3 %v10505_v49  ;;  %v9387_v51 = vld [vmem:[%s15304_s1 + $0xa4] sm:$0xf0] }
  0xa0   : > { %2571 = vmatpush.bf16.msra.mxu0 %v10512_v52  ;;  %v10613_v54 = vor.u32 %v9387_v51, %v7864_v48  ;;  %v7994_v51 = vld [vmem:[%s15304_s1 + $0x1a8] sm:$0xf0] }
  0xa1   : > { %v841_v17 = vpop.permute.xlu2 %840 }
  0xa2   : > { %746 = vrot.lane.b32.xlu2 %v706_v40, %s9886_s17 }
  0xa4   : > { %2572 = vmatpush.bf16.msra.mxu0 %v10558_v19 }
  0xa5   : > { %748 = vrot.lane.b32.xlu0 %v707_v7, %s9886_s17  ;;  %862 = vrot.lane.b32.xlu1 %v822_v11, %s9889_s26  ;;  %v8018_v7 = vld [vmem:[%s15304_s1 + $0x1d8] sm:$0xf0] }
  0xa6   : > { %v10546_v11 = vor.u32 %v9424_v6, %v8018_v7 }
  0xa7   : > { %2718 = vmatmul.bf16.gmra.mxu3 %v10373_v47 }
  0xa8   : > { %2878 = vmatpush.bf16.msrb.mxu3 %v10546_v11 }
  0xaf   : > { %v723_v25 = vpop.permute.xlu1 %722  ;;  %v608_v26 = vpop.permute.xlu0 %607 }
  0xb0   : > { %v750_v29 = vrot.slane %v723_v25, 4  ;;  %v635_v35 = vrot.slane %v608_v26, 4 }
  0xb2   : > { %v765_v41 = vsel %vm764_vm2, %v750_v29, %v723_v25  ;;  %v650_v43 = vsel %vm649_vm3, %v635_v35, %v608_v26  ;;  %v10565_v25 = vor.u32 %v9389_v20, %v7872_v16  ;;  %v7936_v26 = vld [vmem:[%s15304_s1 + $0x130] sm:$0xf]  ;;  %v10574_v29 = vor.u32 %v9355_v59, %v7746_v61  ;;  %v7543_v59 = vld [vmem:[%s10070_s29 + $0xf0] sm:$0xf]  ;;  %v9369_v16 = vld [vmem:[%s15304_s1 + $0x14] sm:$0xf0]  ;;  %v727_v20 = vpop.permute.xlu2 %726 }
  0xb3   : > { %680 = vst.msk [vmem:[#allocation2] sm:$0xff] %vm10480_vm5, %v650_v43  ;;  %v10579_v35 = vor.u32 %v9405_v28, %v7936_v26  ;;  %v7800_v43 = vld [vmem:[%s15304_s1 + $0x20] sm:$0xf] }
  0xb4   : > { %796 = vst.msk [vmem:[#allocation2 + $0x4] sm:$0xff] %vm10514_vm9, %v765_v41  ;;  %2616 = vmatpush.bf16.msra.mxu1 %v10565_v25  ;;  %v10591_v41 = vor.u32 %v9422_v36, %v8010_v38  ;;  %v10603_v46 = vor.u32 %v9371_v45, %v7800_v43  ;;  %v7928_v61 = vld [vmem:[%s15304_s1 + $0x120] sm:$0xf]  ;;  %v7920_v36 = vld [vmem:[%s15304_s1 + $0x110] sm:$0xf] }
  0xb5   : > { %881 = vst.msk [vmem:[#allocation2 + $0x8] sm:$0xf] %vm880_vm8, %v839_v30  ;;  %2660 = vmatpush.bf16.msra.mxu2 %v10579_v35  ;;  %v10628_v7 = vor.u32 %v9403_v1, %v7928_v61  ;;  %v9401_v43 = vld [vmem:[%s15304_s1 + $0x114] sm:$0xf0]  ;;  %v9418_v45 = vld [vmem:[%s15304_s1 + $0x1a4] sm:$0xf] }
  0xb6   : > { %2879 = vmatpush.bf16.msrb.mxu3 %v10591_v41  ;;  %2573 = vmatpush.bf16.msra.mxu0 %v10603_v46  ;;  %923 = vst.msk [vmem:[#allocation2 + $0xdc] sm:$0xf] %vm564_vm1, %v7543_v59  ;;  %v10675_v48 = vor.u32 %v9401_v43, %v7920_v36  ;;  %v752_v59 = vrot.slane %v727_v20, 4  ;;  %v9359_v61 = vld [vmem:[#allocation2 + $0xac] sm:$0xf]  ;;  %v10685_v1 = vor.u32 %v9418_v45, %v7994_v51 }
  0xb7   : > { %2723 = vmatmul.bf16.gmra.mxu3 %v10437_v15  ;;  %v725_v9 = vpop.permute.xlu1 %724  ;;  %v610_v10 = vpop.permute.xlu0 %609  ;;  %v9416_v36 = vld [vmem:[%s15304_s1 + $0x194] sm:$0xf] }
  0xb8   : > { %v751_v22 = vrot.slane %v725_v9, 4  ;;  %v636_v24 = vrot.slane %v610_v10, 4  ;;  %2617 = vmatpush.bf16.msra.mxu1 %v10613_v54 }
  0xb9   : > { %2661 = vmatpush.bf16.msra.mxu2 %v10628_v7 }
  0xba   : > { %v766_v30 = vsel %vm764_vm2, %v751_v22, %v725_v9  ;;  %v651_v32 = vsel %vm649_vm3, %v636_v24, %v610_v10  ;;  %v9420_v9 = vld [vmem:[%s15304_s1 + $0x1b4] sm:$0xf]  ;;  %v8002_v10 = vld [vmem:[%s15304_s1 + $0x1b8] sm:$0xf0]  ;;  %v10648_v22 = vor.u32 %v9369_v16, %v7792_v14  ;;  %v553_v24 = vld [vmem:[%s10070_s29 + $0x30] sm:$0xf]  ;;  %v767_v14 = vsel %vm764_vm2, %v752_v59, %v727_v20 }
  0xbb   : > { %681 = vst.msk [vmem:[#allocation2 + $0x10] sm:$0xff] %vm10480_vm5, %v651_v32  ;;  %v10636_v13 = vor.u32 %v9420_v9, %v8002_v10  ;;  %v552_v32 = vld [vmem:[%s10070_s29 + $0x20] sm:$0xf]  ;;  %v823_v10 = vld [vmem:[%s10070_s29 + $0xdc] sm:$0xf] }
  0xbc   : > { %797 = vst.msk [vmem:[#allocation2 + $0x14] sm:$0xff] %vm10514_vm9, %v766_v30  ;;  %2574 = vmatpush.bf16.msra.mxu0 %v10648_v22  ;;  %v7848_v16 = vld [vmem:[%s15304_s1 + $0x80] sm:$0xf]  ;;  %864 = vrot.lane.b32.xlu2 %v823_v10, %s9889_s26 }
  0xbd   : > { %882 = vst.msk [vmem:[#allocation2 + $0x18] sm:$0xf] %vm880_vm8, %v841_v17  ;;  %v7856_v17 = vld [vmem:[%s15304_s1 + $0x90] sm:$0xf]  ;;  %2880 = vmatpush.bf16.msrb.mxu3 %v10636_v13  ;;  %2662 = vmatpush.bf16.msra.mxu2 %v10675_v48  ;;  %v7912_v20 = vld [vmem:[%s15304_s1 + $0x100] sm:$0xf] }
  0xbe   : > { %v10655_v30 = vor.u32 %v9385_v23, %v7856_v17  ;;  %568 = vst.msk [vmem:[#allocation2 + $0x30] sm:$0xf] %vm564_vm1, %v553_v24  ;;  %v9383_v24 = vld [vmem:[%s15304_s1 + $0x84] sm:$0xf0]  ;;  %v7672_v45 = vld [vmem:[#allocation2] sm:$0xf] }
  0xbf   : > { %v614_v3 = vpop.permute.xlu1 %613  ;;  %v612_v6 = vpop.permute.xlu0 %611  ;;  %567 = vst.msk [vmem:[#allocation2 + $0x20] sm:$0xf] %vm564_vm1, %v552_v32  ;;  %v9399_v32 = vld [vmem:[%s15304_s1 + $0x104] sm:$0xf0] }
  0xc0   : > { %v638_v26 = vrot.slane %v614_v3, 4  ;;  %v637_v28 = vrot.slane %v612_v6, 4  ;;  %2618 = vmatpush.bf16.msra.mxu1 %v10655_v30 }
  0xc1   : > { %2881 = vmatpush.bf16.msrb.mxu3 %v10685_v1 }
  0xc2   : > { %v653_v38 = vsel %vm649_vm3, %v638_v26, %v614_v3  ;;  %v652_v40 = vsel %vm649_vm3, %v637_v28, %v612_v6  ;;  %v9367_v3 = vld [vmem:[%s15304_s1 + $0x4] sm:$0xf0]  ;;  %v7762_v6 = vld [vmem:[#allocation2 + $0xb8] sm:$0xf0]  ;;  %v10709_v28 = vor.u32 %v9383_v24, %v7848_v16  ;;  %v9340_v51 = vld [vmem:[#allocation2 + $0xc] sm:$0xf0] }
  0xc3   : > { %683 = vst.msk [vmem:[#allocation2 + $0x30] sm:$0xff] %vm10480_vm5, %v653_v38  ;;  %v10691_v9 = vor.u32 %v9367_v3, %v7784_v55  ;;  %v7986_v38 = vld [vmem:[%s15304_s1 + $0x198] sm:$0xf0]  ;;  %v9338_v55 = vld [vmem:[#allocation2 + $0x4] sm:$0xf]  ;;  %v10725_v3 = vor.u32 %v9359_v61, %v7762_v6  ;;  %v10728_v10 = vor.u32 %v9340_v51, %v7672_v45 }
  0xc4   : > { %682 = vst.msk [vmem:[#allocation2 + $0x20] sm:$0xff] %vm10480_vm5, %v652_v40  ;;  %v10720_v40 = vor.u32 %v9399_v32, %v7912_v20  ;;  %v10722_v43 = vor.u32 %v9416_v36, %v7986_v38  ;;  %2619 = vmatpush.bf16.msra.mxu1 %v10709_v28  ;;  %v9412_v16 = vld [vmem:[%s15304_s1 + $0x174] sm:$0xf]  ;;  %v7970_v24 = vld [vmem:[%s15304_s1 + $0x178] sm:$0xf0]  ;;  %v845_v20 = vpop.permute.xlu2 %844 }
  0xc5   : > { %15452 = vst [vmem:[#allocation8_spill] sm:$0xff] %v10691_v9  ;;  %2575 = vmatpush.bf16.msra.mxu0 %v10691_v9  ;;  %v10740_v6 = vor.u32 %v9412_v16, %v7970_v24  ;;  %v9414_v36 = vld [vmem:[%s15304_s1 + $0x184] sm:$0xf]  ;;  %v7978_v38 = vld [vmem:[%s15304_s1 + $0x188] sm:$0xf0] }
  0xc6   : > { %798 = vst.msk [vmem:[#allocation2 + $0x24] sm:$0xff] %vm10514_vm9, %v767_v14  ;;  %v7674_v14 = vld [vmem:[#allocation2 + $0x10] sm:$0xf0]  ;;  %2663 = vmatpush.bf16.msra.mxu2 %v10720_v40  ;;  %2882 = vmatpush.bf16.msrb.mxu3 %v10722_v43  ;;  %v7842_v51 = vld [vmem:[%s15304_s1 + $0x78] sm:$0xf0] }
  0xc7   : > { %2728 = vmatmul.bf16.gmra.mxu3 %v10574_v29  ;;  %v843_v17 = vpop.permute.xlu1 %842  ;;  %v729_v23 = vpop.permute.xlu0 %728  ;;  %15453 = vst [vmem:[#allocation9_spill] sm:$0xff] %v10709_v28  ;;  %v10738_v61 = vor.u32 %v9338_v55, %v7674_v14  ;;  %v9380_v45 = vld [vmem:[%s15304_s1 + $0x74] sm:$0xf]  ;;  %v7906_v14 = vld [vmem:[%s15304_s1 + $0xf8] sm:$0xf0] }
  0xc8   : > { %v753_v26 = vrot.slane %v729_v23, 4  ;;  %15454 = vst [vmem:[#allocation10_spill] sm:$0xff] %v10740_v6  ;;  %2576 = vmatmul.bf16.vlgmr.msra.gmra.mxu0 %v10728_v10  ;;  %v10767_v55 = vor.u32 %v9380_v45, %v7842_v51  ;;  %v555_v24 = vld [vmem:[%s10070_s29 + $0x50] sm:$0xf] }
  0xc9   : > { %883 = vst.msk [vmem:[#allocation2 + $0x28] sm:$0xf] %vm880_vm8, %v843_v17  ;;  %2620 = vmatmul.bf16.vlgmr.msra.gmra.mxu1 %v10738_v61  ;;  %v10756_v17 = vor.u32 %v9414_v36, %v7978_v38  ;;  %v554_v36 = vld [vmem:[%s10070_s29 + $0x40] sm:$0xf] }
  0xca   : > { %v768_v59 = vsel %vm764_vm2, %v753_v26, %v729_v23  ;;  %v7680_v23 = vld [vmem:[#allocation2 + $0x8] sm:$0xf]  ;;  %v9341_v26 = vld [vmem:[#allocation2 + $0x14] sm:$0xf0]  ;;  %2832 = vmatpush.bf16.msrb.mxu2 %v10740_v6  ;;  %15455 = vst [vmem:[#allocation11_spill] sm:$0xff] %v10767_v55  ;;  %2744 = vmatpush.bf16.msrb.mxu0 %v10767_v55 }
  0xcb   : > { %799 = vst.msk [vmem:[#allocation2 + $0x34] sm:$0xff] %vm10514_vm9, %v768_v59  ;;  %v10746_v32 = vor.u32 %v9341_v26, %v7680_v23  ;;  %v9396_v59 = vld [vmem:[%s15304_s1 + $0xf4] sm:$0xf]  ;;  %2883 = vmatpush.bf16.msrb.mxu3 %v10756_v17  ;;  %v9344_v55 = vld [vmem:[#allocation2 + $0x2c] sm:$0xf0] }
  0xcc   : > { %884 = vst.msk [vmem:[#allocation2 + $0x38] sm:$0xf] %vm880_vm8, %v845_v20  ;;  %v10777_v23 = vor.u32 %v9396_v59, %v7906_v14  ;;  %v9410_v59 = vld [vmem:[%s15304_s1 + $0x164] sm:$0xf]  ;;  %v7962_v14 = vld [vmem:[%s15304_s1 + $0x168] sm:$0xf0] }
  0xcd   : > { %2664 = vmatmul.bf16.vlgmr.msra.gmra.mxu2 %v10746_v32  ;;  %570 = vst.msk [vmem:[#allocation2 + $0x50] sm:$0xf] %vm564_vm1, %v555_v24  ;;  %v731_v24 = vpop.permute.xlu2 %730 }
  0xce   : > { %15456 = vst [vmem:[#allocation12_spill] sm:$0xff] %v10777_v23  ;;  %2788 = vmatpush.bf16.msrb.mxu1 %v10777_v23  ;;  %v7688_v23 = vld [vmem:[#allocation2 + $0x20] sm:$0xf] }
  0xcf   : > { %v618_v16 = vpop.permute.xlu1 %617  ;;  %v616_v20 = vpop.permute.xlu0 %615  ;;  %569 = vst.msk [vmem:[#allocation2 + $0x40] sm:$0xf] %vm564_vm1, %v554_v36  ;;  %3234 = vmatpush.bf16.msra.mxu3 %v10061_v34  ;;  %v10795_v36 = vor.u32 %v9410_v59, %v7962_v14  ;;  %v9378_v34 = vld [vmem:[%s15304_s1 + $0x64] sm:$0xf]  ;;  %v7778_v59 = vld [vmem:[#allocation2 + $0xd8] sm:$0xf0] }
  0xd0   : > { %v640_v26 = vrot.slane %v618_v16, 4  ;;  %v639_v38 = vrot.slane %v616_v20, 4  ;;  %v7696_v28 = vld [vmem:[#allocation2 + $0x28] sm:$0xf] }
  0xd1   : > { %15457 = vst [vmem:[#allocation13_spill] sm:$0xff] %v10795_v36  ;;  %2833 = vmatpush.bf16.msrb.mxu2 %v10795_v36 }
  0xd2   : > { %v655_v45 = vsel %vm649_vm3, %v640_v26, %v618_v16  ;;  %v654_v51 = vsel %vm649_vm3, %v639_v38, %v616_v20  ;;  %v754_v16 = vrot.slane %v731_v24, 4  ;;  %v7834_v20 = vld [vmem:[%s15304_s1 + $0x68] sm:$0xf0]  ;;  %v9394_v38 = vld [vmem:[%s15304_s1 + $0xe4] sm:$0xf] }
  0xd3   : > { %685 = vst.msk [vmem:[#allocation2 + $0x50] sm:$0xff] %vm10480_vm5, %v655_v45  ;;  %v10806_v26 = vor.u32 %v9378_v34, %v7834_v20  ;;  %v7898_v45 = vld [vmem:[%s15304_s1 + $0xe8] sm:$0xf0]  ;;  %3235 = vmatpush.bf16.msra.mxu3 %v10074_v39  ;;  %v7690_v34 = vld [vmem:[#allocation2 + $0x30] sm:$0xf0] }
  0xd4   : > { %684 = vst.msk [vmem:[#allocation2 + $0x40] sm:$0xff] %vm10480_vm5, %v654_v51  ;;  %v9363_v51 = vld [vmem:[#allocation2 + $0xcc] sm:$0xf]  ;;  %v769_v14 = vsel %vm764_vm2, %v754_v16, %v731_v24  ;;  %v10816_v6 = vor.u32 %v9394_v38, %v7898_v45  ;;  %v9345_v9 = vld [vmem:[#allocation2 + $0x34] sm:$0xf0] }
  0xd5   : > { %15458 = vst [vmem:[#allocation14_spill] sm:$0xff] %v10806_v26  ;;  %2745 = vmatpush.bf16.msrb.mxu0 %v10806_v26  ;;  %v9342_v24 = vld [vmem:[#allocation2 + $0x24] sm:$0xf]  ;;  %v10827_v45 = vor.u32 %v9363_v51, %v7778_v59  ;;  %v849_v26 = vpop.permute.xlu2 %848 }
  0xd6   : > { %800 = vst.msk [vmem:[#allocation2 + $0x44] sm:$0xff] %vm10514_vm9, %v769_v14  ;;  %2789 = vmatpush.bf16.msrb.mxu1 %v10816_v6  ;;  %v10824_v16 = vor.u32 %v9342_v24, %v7690_v34  ;;  %v10829_v14 = vor.u32 %v9344_v55, %v7688_v23  ;;  %v556_v55 = vld [vmem:[%s10070_s29 + $0x60] sm:$0xf]  ;;  %v9376_v23 = vld [vmem:[%s15304_s1 + $0x54] sm:$0xf] }
  0xd7   : > { %2733 = vmatmul.bf16.gmra.mxu3 %v10725_v3  ;;  %v847_v20 = vpop.permute.xlu1 %846  ;;  %v733_v36 = vpop.permute.xlu0 %732  ;;  %571 = vst.msk [vmem:[#allocation2 + $0x60] sm:$0xf] %vm564_vm1, %v556_v55  ;;  %v9392_v34 = vld [vmem:[%s15304_s1 + $0xd4] sm:$0xf] }
  0xd8   : > { %885 = vst.msk [vmem:[#allocation2 + $0x48] sm:$0xf] %vm880_vm8, %v847_v20  ;;  %v755_v39 = vrot.slane %v733_v36, 4  ;;  %3236 = vmatpush.bf16.msra.mxu3 %v10085_v42  ;;  %v10833_v20 = vor.u32 %v9345_v9, %v7696_v28  ;;  %2581 = vmatmul.bf16.gmra.mxu0 %v10829_v14  ;;  %v557_v42 = vld [vmem:[%s10070_s29 + $0x70] sm:$0xf] }
  0xd9   : > { %2625 = vmatmul.bf16.gmra.mxu1 %v10824_v16  ;;  %v9408_v9 = vld [vmem:[%s15304_s1 + $0x154] sm:$0xf]  ;;  %572 = vst.msk [vmem:[#allocation2 + $0x70] sm:$0xf] %vm564_vm1, %v557_v42  ;;  %v7954_v28 = vld [vmem:[%s15304_s1 + $0x158] sm:$0xf0] }
  0xda   : > { %v770_v38 = vsel %vm764_vm2, %v755_v39, %v733_v36  ;;  %v7826_v36 = vld [vmem:[%s15304_s1 + $0x58] sm:$0xf0] }
  0xdb   : > { %801 = vst.msk [vmem:[#allocation2 + $0x54] sm:$0xff] %vm10514_vm9, %v770_v38  ;;  %v10860_v59 = vor.u32 %v9376_v23, %v7826_v36  ;;  %v7890_v39 = vld [vmem:[%s15304_s1 + $0xd8] sm:$0xf0]  ;;  %v7704_v36 = vld [vmem:[#allocation2 + $0x40] sm:$0xf] }
  0xdc   : > { %886 = vst.msk [vmem:[#allocation2 + $0x58] sm:$0xf] %vm880_vm8, %v849_v26  ;;  %3237 = vmatpush.bf16.msra.mxu3 %v10103_v50  ;;  %v10851_v50 = vor.u32 %v9408_v9, %v7954_v28  ;;  %v10869_v55 = vor.u32 %v9392_v34, %v7890_v39  ;;  %v9348_v34 = vld [vmem:[#allocation2 + $0x4c] sm:$0xf0] }
  0xdd   : > { %2669 = vmatmul.bf16.gmra.mxu2 %v10833_v20  ;;  %v735_v42 = vpop.permute.xlu2 %734  ;;  %2746 = vmatpush.bf16.msrb.mxu0 %v10860_v59 }
  0xde   : > { %2834 = vmatpush.bf16.msrb.mxu2 %v10851_v50  ;;  %15459 = vst [vmem:[#allocation15_spill] sm:$0xff] %v10869_v55  ;;  %2790 = vmatpush.bf16.msrb.mxu1 %v10869_v55 }
  0xdf   : > { %v622_v26 = vpop.permute.xlu1 %621  ;;  %v620_v51 = vpop.permute.xlu0 %619 }
  0xe0   : > { %3238 = vmatpush.bf16.msra.mxu3 %v10127_v56  ;;  %v642_v24 = vrot.slane %v622_v26, 4  ;;  %v641_v38 = vrot.slane %v620_v51, 4  ;;  %v756_v56 = vrot.slane %v735_v42, 4 }
  0xe2   : > { %v657_v9 = vsel %vm649_vm3, %v642_v24, %v622_v26  ;;  %v656_v28 = vsel %vm649_vm3, %v641_v38, %v620_v51  ;;  %v771_v23 = vsel %vm764_vm2, %v756_v56, %v735_v42  ;;  %v7706_v39 = vld [vmem:[#allocation2 + $0x50] sm:$0xf0]  ;;  %v7712_v26 = vld [vmem:[#allocation2 + $0x48] sm:$0xf]  ;;  %v9346_v24 = vld [vmem:[#allocation2 + $0x44] sm:$0xf]  ;;  %v10886_v42 = vor.u32 %v9348_v34, %v7704_v36 }
  0xe3   : > { %687 = vst.msk [vmem:[#allocation2 + $0x70] sm:$0xff] %vm10480_vm5, %v657_v9  ;;  %v9349_v51 = vld [vmem:[#allocation2 + $0x54] sm:$0xf0]  ;;  %v559_v36 = vld [vmem:[%s10070_s29 + $0x90] sm:$0xf] }
  0xe4   : > { %3239 = vmatpush.bf16.msra.mxu3 %v10142_v60  ;;  %686 = vst.msk [vmem:[#allocation2 + $0x60] sm:$0xff] %vm10480_vm5, %v656_v28  ;;  %v10884_v60 = vor.u32 %v9346_v24, %v7706_v39  ;;  %v10889_v28 = vor.u32 %v9349_v51, %v7712_v26  ;;  %v558_v39 = vld [vmem:[%s10070_s29 + $0x80] sm:$0xf] }
  0xe5   : > { %802 = vst.msk [vmem:[#allocation2 + $0x64] sm:$0xff] %vm10514_vm9, %v771_v23  ;;  %v853_v55 = vpop.permute.xlu2 %852 }
  0xe6   : > { %574 = vst.msk [vmem:[#allocation2 + $0x90] sm:$0xf] %vm564_vm1, %v559_v36  ;;  %v9390_v36 = vld [vmem:[%s15304_s1 + $0xc4] sm:$0xf] }
  0xe7   : > { %2738 = vmatmul.bf16.gmra.mxu3 %v10827_v45  ;;  %v851_v38 = vpop.permute.xlu1 %850  ;;  %v737_v9 = vpop.permute.xlu0 %736  ;;  %573 = vst.msk [vmem:[#allocation2 + $0x80] sm:$0xf] %vm564_vm1, %v558_v39  ;;  %v7882_v39 = vld [vmem:[%s15304_s1 + $0xc8] sm:$0xf0] }
  0xe8   : > { %3240 = vmatpush.bf16.msra.mxu3 %v10161_v63  ;;  %887 = vst.msk [vmem:[#allocation2 + $0x68] sm:$0xf] %vm880_vm8, %v851_v38  ;;  %v757_v56 = vrot.slane %v737_v9, 4  ;;  %2586 = vmatmul.bf16.gmra.mxu0 %v10886_v42  ;;  %v9374_v38 = vld [vmem:[%s15304_s1 + $0x44] sm:$0xf] }
  0xe9   : > { %2630 = vmatmul.bf16.gmra.mxu1 %v10884_v60 }
  0xea   : > { %v772_v23 = vsel %vm764_vm2, %v757_v56, %v737_v9 }
  0xeb   : > { %803 = vst.msk [vmem:[#allocation2 + $0x74] sm:$0xff] %vm10514_vm9, %v772_v23  ;;  %v7818_v23 = vld [vmem:[%s15304_s1 + $0x48] sm:$0xf0] }
  0xec   : > { %3241 = vmatpush.bf16.msra.mxu3 %v10182_v5  ;;  %888 = vst.msk [vmem:[#allocation2 + $0x78] sm:$0xf] %vm880_vm8, %v853_v55  ;;  %v9406_v5 = vld [vmem:[%s15304_s1 + $0x144] sm:$0xf] }
  0xed   : > { %2674 = vmatmul.bf16.gmra.mxu2 %v10889_v28  ;;  %v739_v24 = vpop.permute.xlu2 %738 }
  0xee   : > { %v758_v55 = vrot.slane %v739_v24, 4 }
  0xef   : > { %v626_v63 = vpop.permute.xlu1 %625  ;;  %v624_v34 = vpop.permute.xlu0 %623 }
  0xf0   : > { %v644_v26 = vrot.slane %v626_v63, 4  ;;  %v643_v51 = vrot.slane %v624_v34, 4 }
  0xf2   : > { %v659_v9 = vsel %vm649_vm3, %v644_v26, %v626_v63  ;;  %v658_v56 = vsel %vm649_vm3, %v643_v51, %v624_v34  ;;  %v7720_v63 = vld [vmem:[#allocation2 + $0x60] sm:$0xf]  ;;  %v10932_v34 = vor.u32 %v9374_v38, %v7818_v23  ;;  %v9352_v26 = vld [vmem:[#allocation2 + $0x6c] sm:$0xf0]  ;;  %v7722_v51 = vld [vmem:[#allocation2 + $0x70] sm:$0xf0] }
  0xf3   : > { %689 = vst.msk [vmem:[#allocation2 + $0x90] sm:$0xff] %vm10480_vm5, %v659_v9  ;;  %v9353_v9 = vld [vmem:[#allocation2 + $0x74] sm:$0xf0] }
  0xf4   : > { %688 = vst.msk [vmem:[#allocation2 + $0x80] sm:$0xff] %vm10480_vm5, %v658_v56  ;;  %2747 = vmatpush.bf16.msrb.mxu0 %v10932_v34 }
  0xf7   : > { %2884 = vmatmul.bf16.vlgmr.msrb.gmra.mxu3 %v10192_v8  ;;  %v7946_v8 = vld [vmem:[%s15304_s1 + $0x148] sm:$0xf0]  ;;  %v855_v38 = vpop.permute.xlu1 %854  ;;  %v741_v23 = vpop.permute.xlu0 %740 }
  0xf8   : > { %3410 = vmatpush.bf16.msrb.mxu3 %v10454_v21  ;;  %v10911_v21 = vor.u32 %v9406_v5, %v7946_v8  ;;  %v10934_v5 = vor.u32 %v9390_v36, %v7882_v39  ;;  %v7728_v8 = vld [vmem:[#allocation2 + $0x68] sm:$0xf]  ;;  %v10945_v36 = vor.u32 %v9352_v26, %v7720_v63  ;;  %v759_v56 = vrot.slane %v741_v23, 4  ;;  %v7938_v63 = vld [vmem:[%s15304_s1 + $0x138] sm:$0xf0] }
  0xf9   : > { %v10948_v39 = vor.u32 %v9353_v9, %v7728_v8  ;;  %v560_v9 = vld [vmem:[%s10070_s29 + $0xa0] sm:$0xf] }
  0xfa   : > { %2835 = vmatpush.bf16.msrb.mxu2 %v10911_v21  ;;  %15460 = vst [vmem:[#allocation16_spill] sm:$0xff] %v10934_v5  ;;  %2791 = vmatpush.bf16.msrb.mxu1 %v10934_v5  ;;  %v774_v5 = vsel %vm764_vm2, %v759_v56, %v741_v23  ;;  %v9372_v23 = vld [vmem:[%s15304_s1 + $0x34] sm:$0xf] }
  0xfb   : > { %15462 = vst [vmem:[#allocation18_spill] sm:$0xff] %v10948_v39  ;;  %2591 = vmatmul.bf16.gmra.mxu0 %v10945_v36 }
  0xfc   : > { %3411 = vmatpush.bf16.msrb.mxu3 %v10505_v49  ;;  %v773_v49 = vsel %vm764_vm2, %v758_v55, %v739_v24  ;;  %v9350_v24 = vld [vmem:[#allocation2 + $0x64] sm:$0xf]  ;;  %805 = vst.msk [vmem:[#allocation2 + $0x94] sm:$0xff] %vm10514_vm9, %v774_v5 }
  0xfd   : > { %804 = vst.msk [vmem:[#allocation2 + $0x84] sm:$0xff] %vm10514_vm9, %v773_v49  ;;  %v10943_v55 = vor.u32 %v9350_v24, %v7722_v51  ;;  %v857_v49 = vpop.permute.xlu2 %856  ;;  %2679 = vmatmul.bf16.gmra.mxu2 %v10948_v39  ;;  %v561_v51 = vld [vmem:[%s10070_s29 + $0xb0] sm:$0xf] }
  0xfe   : > { %889 = vst.msk [vmem:[#allocation2 + $0x88] sm:$0xf] %vm880_vm8, %v855_v38 }
  0xff   : > { %15461 = vst [vmem:[#allocation17_spill] sm:$0xff] %v10943_v55  ;;  %2635 = vmatmul.bf16.gmra.mxu1 %v10943_v55  ;;  %v630_v26 = vpop.permute.xlu1 %629  ;;  %v628_v8 = vpop.permute.xlu0 %627 }
 0x100   : > { %3412 = vmatpush.bf16.msrb.mxu3 %v10546_v11  ;;  %v10953_v11 = vpop.f32.mrf.mxu3  ;;  %890 = vst.msk [vmem:[#allocation2 + $0x98] sm:$0xf] %vm880_vm8, %v857_v49  ;;  %v645_v24 = vrot.slane %v628_v8, 4 }
 0x101   : > { %15463 = vst [vmem:[#allocation19_spill] sm:$0xff] %v10953_v11 }
 0x102   : > { %576 = vst.msk [vmem:[#allocation2 + $0xb0] sm:$0xf] %vm564_vm1, %v561_v51  ;;  %v660_v49 = vsel %vm649_vm3, %v645_v24, %v628_v8  ;;  %v7874_v51 = vld [vmem:[%s15304_s1 + $0xb8] sm:$0xf0]  ;;  %v9356_v24 = vld [vmem:[#allocation2 + $0x8c] sm:$0xf0] }
 0x103   : > { %575 = vst.msk [vmem:[#allocation2 + $0xa0] sm:$0xf] %vm564_vm1, %v560_v9  ;;  %v7736_v9 = vld [vmem:[#allocation2 + $0x80] sm:$0xf]  ;;  %v7738_v11 = vld [vmem:[#allocation2 + $0x90] sm:$0xf0] }
 0x104   : > { %3413 = vmatpush.bf16.msrb.mxu3 %v10591_v41  ;;  %v9404_v41 = vld [vmem:[%s15304_s1 + $0x134] sm:$0xf]  ;;  %690 = vst.msk [vmem:[#allocation2 + $0xa0] sm:$0xff] %vm10480_vm5, %v660_v49 }
 0x105   : > { %v10969_v5 = vor.u32 %v9404_v41, %v7938_v63  ;;  %v743_v38 = vpop.permute.xlu2 %742  ;;  %v7810_v41 = vld [vmem:[%s15304_s1 + $0x38] sm:$0xf0]  ;;  %v9388_v63 = vld [vmem:[%s15304_s1 + $0xb4] sm:$0xf] }
 0x106   : > { %v10993_v8 = vor.u32 %v9372_v23, %v7810_v41  ;;  %v11008_v41 = vor.u32 %v9356_v24, %v7736_v9 }
 0x107   : > { %2889 = vmatmul.bf16.gmra.mxu3 %v10354_v33  ;;  %v646_v33 = vrot.slane %v630_v26, 4  ;;  %2836 = vmatpush.bf16.msrb.mxu2 %v10969_v5  ;;  %v745_v49 = vpop.permute.xlu0 %744 }
 0x108   : > { %3414 = vmatpush.bf16.msrb.mxu3 %v10636_v13  ;;  %v760_v13 = vrot.slane %v743_v38, 4  ;;  %v10999_v39 = vpop.f32.mrf.mxu3  ;;  %2748 = vmatpush.bf16.msrb.mxu0 %v10993_v8  ;;  %15466 = vst [vmem:[#allocation22_spill] sm:$0xff] %v11008_v41 }
 0x109   : > { %v661_v56 = vsel %vm649_vm3, %v646_v33, %v630_v26  ;;  %v10995_v33 = vor.u32 %v9388_v63, %v7874_v51  ;;  %15464 = vst [vmem:[#allocation20_spill] sm:$0xff] %v10999_v39  ;;  %v761_v63 = vrot.slane %v745_v49, 4 }
 0x10a   : > { %691 = vst.msk [vmem:[#allocation2 + $0xb0] sm:$0xff] %vm10480_vm5, %v661_v56  ;;  %v775_v26 = vsel %vm764_vm2, %v760_v13, %v743_v38  ;;  %v9357_v38 = vld [vmem:[#allocation2 + $0x94] sm:$0xf0]  ;;  %v9354_v13 = vld [vmem:[#allocation2 + $0x84] sm:$0xf]  ;;  %v859_v56 = vpop.permute.xlu1 %858 }
 0x10b   : > { %806 = vst.msk [vmem:[#allocation2 + $0xa4] sm:$0xff] %vm10514_vm9, %v775_v26  ;;  %2792 = vmatpush.bf16.msrb.mxu1 %v10995_v33  ;;  %v11006_v23 = vor.u32 %v9354_v13, %v7738_v11  ;;  %2596 = vmatmul.bf16.gmra.mxu0 %v11008_v41  ;;  %v776_v26 = vsel %vm764_vm2, %v761_v63, %v745_v49  ;;  %v9402_v11 = vld [vmem:[%s15304_s1 + $0x124] sm:$0xf]  ;;  %v7802_v63 = vld [vmem:[%s15304_s1 + $0x28] sm:$0xf0] }
 0x10c   : > { %3415 = vmatpush.bf16.msrb.mxu3 %v10685_v1  ;;  %v7744_v1 = vld [vmem:[#allocation2 + $0x88] sm:$0xf]  ;;  %891 = vst.msk [vmem:[#allocation2 + $0xa8] sm:$0xf] %vm880_vm8, %v859_v56  ;;  %v9370_v13 = vld [vmem:[%s15304_s1 + $0x24] sm:$0xf] }
 0x10d   : > { %15465 = vst [vmem:[#allocation21_spill] sm:$0xff] %v11006_v23  ;;  %v11011_v51 = vor.u32 %v9357_v38, %v7744_v1  ;;  %v562_v38 = vld [vmem:[%s10070_s29 + $0xc0] sm:$0xf] }
 0x10e   : > { %807 = vst.msk [vmem:[#allocation2 + $0xb4] sm:$0xff] %vm10514_vm9, %v776_v26 }
 0x10f   : > { %15467 = vst [vmem:[#allocation23_spill] sm:$0xff] %v11011_v51  ;;  %2640 = vmatmul.bf16.gmra.mxu1 %v11006_v23  ;;  %2684 = vmatmul.bf16.gmra.mxu2 %v11011_v51  ;;  %v632_v49 = vpop.permute.xlu0 %631 }
 0x110   : > { %3416 = vmatpush.bf16.msrb.mxu3 %v10722_v43  ;;  %v861_v43 = vpop.permute.xlu2 %860  ;;  %577 = vst.msk [vmem:[#allocation2 + $0xc0] sm:$0xf] %vm564_vm1, %v562_v38  ;;  %v647_v26 = vrot.slane %v632_v49, 4 }
 0x111   : > { %892 = vst.msk [vmem:[#allocation2 + $0xb8] sm:$0xf] %vm880_vm8, %v861_v43  ;;  %v11043_v43 = vor.u32 %v9370_v13, %v7802_v63  ;;  %v9360_v39 = vld [vmem:[#allocation2 + $0xac] sm:$0xf0] }
 0x112   : > { %v634_v1 = vpop.permute.xlu1 %633 }
 0x113   : > { %v648_v56 = vrot.slane %v634_v1, 4  ;;  %2749 = vmatpush.bf16.msrb.mxu0 %v11043_v43  ;;  %v7760_v51 = vld [vmem:[#allocation2 + $0xa8] sm:$0xf] }
 0x114   : > { %3417 = vmatpush.bf16.msrb.mxu3 %v10756_v17  ;;  %v7930_v17 = vld [vmem:[%s15304_s1 + $0x128] sm:$0xf0] }
 0x115   : > { %v11028_v9 = vor.u32 %v9402_v11, %v7930_v17  ;;  %v9386_v11 = vld [vmem:[%s15304_s1 + $0xa4] sm:$0xf]  ;;  %v663_v17 = vsel %vm649_vm3, %v648_v56, %v634_v1  ;;  %v7752_v1 = vld [vmem:[#allocation2 + $0xa0] sm:$0xf]  ;;  %v7754_v56 = vld [vmem:[#allocation2 + $0xb0] sm:$0xf0] }
 0x116   : > { %v11072_v37 = vor.u32 %v9360_v39, %v7752_v1  ;;  %v953_v39 = vld [vmem:[%s10070_s29 + $0x18] sm:$0xf]  ;;  %v9368_v1 = vld [vmem:[%s15304_s1 + $0x14] sm:$0xf] }
 0x117   : > { %2894 = vmatmul.bf16.gmra.mxu3 %v10373_v47  ;;  %2837 = vmatpush.bf16.msrb.mxu2 %v11028_v9  ;;  %v563_v47 = vld [vmem:[%s10070_s29 + $0xd0] sm:$0xf]  ;;  %v749_v41 = vpop.permute.xlu0 %748 }
 0x118   : > { %578 = vst.msk [vmem:[#allocation2 + $0xd0] sm:$0xf] %vm564_vm1, %v563_v47  ;;  %v7866_v47 = vld [vmem:[%s15304_s1 + $0xa8] sm:$0xf0]  ;;  %v747_v13 = vpop.permute.xlu2 %746  ;;  %v9361_v23 = vld [vmem:[#allocation2 + $0xb4] sm:$0xf0]  ;;  %982 = vrot.lane.b32.xlu1 %v953_v39, %s9887_s30 }
 0x119   : > { %693 = vst.msk [vmem:[#allocation2 + $0xd0] sm:$0xff] %vm10480_vm5, %v663_v17  ;;  %v11056_v38 = vor.u32 %v9386_v11, %v7866_v47  ;;  %v762_v63 = vrot.slane %v747_v13, 4  ;;  %v952_v47 = vld [vmem:[%s10070_s29 + $0x8] sm:$0xf]  ;;  %v11074_v55 = vor.u32 %v9361_v23, %v7760_v51 }
 0x11a   : > { %v11030_v24 = vpop.f32.mrf.mxu3  ;;  %980 = vrot.lane.b32.xlu0 %v952_v47, %s9887_s30  ;;  %v863_v23 = vpop.permute.xlu1 %862 }
 0x11b   : > { %15468 = vst [vmem:[#allocation24_spill] sm:$0xff] %v11030_v24  ;;  %v662_v24 = vsel %vm649_vm3, %v647_v26, %v632_v49  ;;  %2793 = vmatpush.bf16.msrb.mxu1 %v11056_v38  ;;  %v777_v17 = vsel %vm764_vm2, %v762_v63, %v747_v13  ;;  %v9358_v49 = vld [vmem:[#allocation2 + $0xa4] sm:$0xf]  ;;  %v7922_v13 = vld [vmem:[%s15304_s1 + $0x118] sm:$0xf0]  ;;  %v763_v63 = vrot.slane %v749_v41, 4  ;;  %2601 = vmatmul.bf16.gmra.mxu0 %v11072_v37 }
 0x11c   : > { %692 = vst.msk [vmem:[#allocation2 + $0xc0] sm:$0xff] %vm10480_vm5, %v662_v24  ;;  %v11066_v11 = vor.u32 %v9358_v49, %v7754_v56  ;;  %v9400_v24 = vld [vmem:[%s15304_s1 + $0x114] sm:$0xf] }
 0x11d   : > { %808 = vst.msk [vmem:[#allocation2 + $0xc4] sm:$0xff] %vm10514_vm9, %v777_v17  ;;  %v11080_v56 = vor.u32 %v9400_v24, %v7922_v13  ;;  %v778_v17 = vsel %vm764_vm2, %v763_v63, %v749_v41  ;;  %v9384_v49 = vld [vmem:[%s15304_s1 + $0x94] sm:$0xf]  ;;  %v7858_v24 = vld [vmem:[%s15304_s1 + $0x98] sm:$0xf0] }
 0x11e   : > { %15470 = vst [vmem:[#allocation26_spill] sm:$0xff] %v11066_v11  ;;  %v1065_v13 = vld [vmem:[%s10070_s29 + $0x1c] sm:$0xf]  ;;  %v11111_v63 = vor.u32 %v9384_v49, %v7858_v24  ;;  %v954_v24 = vld [vmem:[%s10070_s29 + $0x28] sm:$0xf] }
 0x11f   : > { %15471 = vst [vmem:[#allocation27_spill] sm:$0xff] %v11074_v55  ;;  %2645 = vmatmul.bf16.gmra.mxu1 %v11066_v11  ;;  %2838 = vmatpush.bf16.msrb.mxu2 %v11080_v56 }
 0x120   : > { %809 = vst.msk [vmem:[#allocation2 + $0xd4] sm:$0xff] %vm10514_vm9, %v778_v17  ;;  %2689 = vmatmul.bf16.gmra.mxu2 %v11074_v55  ;;  %v865_v41 = vpop.permute.xlu2 %864  ;;  %v7544_v17 = vld [vmem:[%s10070_s29 + $0x20] sm:$0xf]  ;;  %2794 = vmatpush.bf16.msrb.mxu1 %v11111_v63 }
 0x121   : > { %893 = vst.msk [vmem:[#allocation2 + $0xc8] sm:$0xf] %vm880_vm8, %v863_v23  ;;  %1204 = vrot.lane.b32.xlu1 %v7544_v17, %s9889_s26  ;;  %v7914_v17 = vld [vmem:[%s15304_s1 + $0x108] sm:$0xf0] }
 0x122   : > { %v11062_v26 = vpop.f32.mrf.mxu3  ;;  %894 = vst.msk [vmem:[#allocation2 + $0xd8] sm:$0xf] %vm880_vm8, %v865_v41  ;;  %1094 = vrot.lane.b32.xlu0 %v1065_v13, %s9886_s17  ;;  %v9364_v41 = vld [vmem:[#allocation2 + $0xcc] sm:$0xf0]  ;;  %v9398_v13 = vld [vmem:[%s15304_s1 + $0x104] sm:$0xf] }
 0x123   : > { %15469 = vst [vmem:[#allocation25_spill] sm:$0xff] %v11062_v26  ;;  %v7768_v23 = vld [vmem:[#allocation2 + $0xc0] sm:$0xf]  ;;  %v11134_v11 = vor.u32 %v9398_v13, %v7914_v17  ;;  %v1067_v13 = vld [vmem:[%s10070_s29 + $0x3c] sm:$0xf] }
 0x124   : > { %v11126_v53 = vor.u32 %v9364_v41, %v7768_v23  ;;  %v9366_v23 = vld [vmem:[%s15304_s1 + $0x4] sm:$0xf]  ;;  %v7786_v41 = vld [vmem:[%s15304_s1 + $0x8] sm:$0xf0]  ;;  %v7558_v17 = vld [vmem:[%s10070_s29 + $0x24] sm:$0xf] }
 0x125   : > { %2839 = vmatpush.bf16.msrb.mxu2 %v11134_v11  ;;  %1274 = vst.msk [vmem:[#allocation2 + $0xec] sm:$0xf] %vm564_vm1, %v7558_v17  ;;  %v15479_v17 = vld [vmem:[#allocation14_spill] sm:$0xff] }
 0x127   : > { %2899 = vmatmul.bf16.gmra.mxu3 %v10437_v15  ;;  %v7794_v15 = vld [vmem:[%s15304_s1 + $0x18] sm:$0xf0]  ;;  %v7770_v39 = vld [vmem:[#allocation2 + $0xd0] sm:$0xf0] }
 0x128   : > { %v11105_v47 = vor.u32 %v9368_v1, %v7794_v15  ;;  %v7776_v1 = vld [vmem:[#allocation2 + $0xc8] sm:$0xf]  ;;  %v9362_v15 = vld [vmem:[#allocation2 + $0xc4] sm:$0xf] }
 0x129   : > { %v11120_v26 = vor.u32 %v9362_v15, %v7770_v39  ;;  %v9365_v49 = vld [vmem:[#allocation2 + $0xd4] sm:$0xf0]  ;;  %v955_v39 = vld [vmem:[%s10070_s29 + $0x38] sm:$0xf]  ;;  %v7850_v15 = vld [vmem:[%s15304_s1 + $0x88] sm:$0xf0]  ;;  %3190 = vmatpush.bf16.msra.mxu2 %v10404_v62 }
 0x12a   : > { %v11093_v51 = vpop.f32.mrf.mxu3  ;;  %2750 = vmatpush.bf16.msrb.mxu0 %v11105_v47  ;;  %v11128_v55 = vor.u32 %v9365_v49, %v7776_v1  ;;  %984 = vrot.lane.b32.xlu0 %v954_v24, %s9887_s30  ;;  %v11149_v1 = vor.u32 %v9366_v23, %v7786_v41  ;;  %v7546_v62 = vld [vmem:[%s10070_s29 + $0x40] sm:$0xf]  ;;  %v956_v23 = vld [vmem:[%s10070_s29 + $0x48] sm:$0xf]  ;;  %v7562_v41 = vld [vmem:[%s10070_s29 + $0x64] sm:$0xf] }
 0x12b   : > { %15472 = vst [vmem:[#allocation28_spill] sm:$0xff] %v11093_v51  ;;  %2606 = vmatmul.bf16.gmra.mxu0 %v11126_v53  ;;  %986 = vrot.lane.b32.xlu1 %v955_v39, %s9887_s30  ;;  %v7559_v39 = vld [vmem:[%s10070_s29 + $0x34] sm:$0xf] }
 0x12c   : > { %1275 = vst.msk [vmem:[#allocation2 + $0xfc] sm:$0xf] %vm564_vm1, %v7559_v39  ;;  %v9431_v39 = vld [vmem:[#allocation2 + $0xec] sm:$0xf] }
 0x12d   : > { %3191 = vmatpush.bf16.msra.mxu2 %v10445_v18  ;;  %v7545_v18 = vld [vmem:[%s10070_s29 + $0x30] sm:$0xf]  ;;  %1278 = vst.msk [vmem:[#allocation2 + $0x12c] sm:$0xf] %vm564_vm1, %v7562_v41  ;;  %v7566_v41 = vld [vmem:[%s10070_s29 + $0xa4] sm:$0xf] }
 0x12e   : > { %2751 = vmatpush.bf16.msrb.mxu0 %v11149_v1  ;;  %1282 = vst.msk [vmem:[#allocation2 + $0x16c] sm:$0xf] %vm564_vm1, %v7566_v41  ;;  %v15489_v41 = vld [vmem:[#allocation27_spill] sm:$0xff] }
 0x12f   : > { %2650 = vmatmul.bf16.gmra.mxu1 %v11120_v26 }
 0x130   : > { %2694 = vmatmul.bf16.gmra.mxu2 %v11128_v55 }
 0x131   : > { %3192 = vmatpush.bf16.msra.mxu2 %v10494_v44  ;;  %v7561_v44 = vld [vmem:[%s10070_s29 + $0x54] sm:$0xf] }
 0x132   : > { %v11118_v51 = vpop.f32.mrf.mxu3  ;;  %3102 = vmatpush.bf16.msra.mxu0 %v10394_v57  ;;  %1098 = vrot.lane.b32.xlu0 %v1067_v13, %s9886_s17  ;;  %1277 = vst.msk [vmem:[#allocation2 + $0x11c] sm:$0xf] %vm564_vm1, %v7561_v44  ;;  %v15478_v13 = vld [vmem:[#allocation13_spill] sm:$0xff] }
 0x133   : > { %1208 = vrot.lane.b32.xlu1 %v7546_v62, %s9889_s26  ;;  %v8050_v62 = vld [vmem:[#allocation2 + $0xf8] sm:$0xf0] }
 0x135   : > { %3193 = vmatpush.bf16.msra.mxu2 %v10537_v4  ;;  %v7548_v4 = vld [vmem:[%s10070_s29 + $0x60] sm:$0xf] }
 0x136   : > { %3103 = vmatpush.bf16.msra.mxu0 %v10414_v2  ;;  %v957_v2 = vld [vmem:[%s10070_s29 + $0x58] sm:$0xf] }
 0x137   : > { %2904 = vmatmul.bf16.gmra.mxu3 %v10574_v29  ;;  %v9382_v29 = vld [vmem:[%s15304_s1 + $0x84] sm:$0xf] }
 0x138   : > { %v11158_v49 = vor.u32 %v9382_v29, %v7850_v15  ;;  %v7563_v29 = vld [vmem:[%s10070_s29 + $0x74] sm:$0xf]  ;;  %v7550_v15 = vld [vmem:[%s10070_s29 + $0x80] sm:$0xf] }
 0x139   : > { %3194 = vmatpush.bf16.msra.mxu2 %v10579_v35  ;;  %v958_v35 = vld [vmem:[%s10070_s29 + $0x68] sm:$0xf]  ;;  %1279 = vst.msk [vmem:[#allocation2 + $0x13c] sm:$0xf] %vm564_vm1, %v7563_v29  ;;  %v7567_v29 = vld [vmem:[%s10070_s29 + $0xb4] sm:$0xf] }
 0x13a   : > { %v11160_v24 = vpop.f32.mrf.mxu3  ;;  %2795 = vmatpush.bf16.msrb.mxu1 %v11158_v49  ;;  %3104 = vmatpush.bf16.msra.mxu0 %v10466_v27  ;;  %v1069_v27 = vld [vmem:[%s10070_s29 + $0x5c] sm:$0xf]  ;;  %1283 = vst.msk [vmem:[#allocation2 + $0x17c] sm:$0xf] %vm564_vm1, %v7567_v29 }
 0x13b   : > { %988 = vrot.lane.b32.xlu0 %v956_v23, %s9887_s30  ;;  %2752 = vmatmul.bf16.vlgmr.msrb.gmra.mxu0 %v10728_v10  ;;  %v1071_v10 = vld [vmem:[%s10070_s29 + $0x7c] sm:$0xf] }
 0x13c   : > { %990 = vrot.lane.b32.xlu1 %v957_v2, %s9887_s30  ;;  %v1068_v2 = vld [vmem:[%s10070_s29 + $0x4c] sm:$0xf] }
 0x13d   : > { %3195 = vmatpush.bf16.msra.mxu2 %v10628_v7  ;;  %v15474_v7 = vld [vmem:[#allocation9_spill] sm:$0xff] }
 0x13e   : > { %3146 = vmatpush.bf16.msra.mxu1 %v10396_v58  ;;  %v1064_v58 = vld [vmem:[%s10070_s29 + $0xc] sm:$0xf]  ;;  %3105 = vmatpush.bf16.msra.mxu0 %v10512_v52 }
 0x13f   : > { %1092 = vrot.lane.b32.xlu2 %v1064_v58, %s9886_s17  ;;  %2796 = vmatmul.bf16.vlgmr.msrb.gmra.mxu1 %v10738_v61  ;;  %v15476_v61 = vld [vmem:[#allocation11_spill] sm:$0xff] }
 0x140   : > { %2840 = vmatmul.bf16.vlgmr.msrb.gmra.mxu2 %v10746_v32  ;;  %v15477_v32 = vld [vmem:[#allocation12_spill] sm:$0xff] }
 0x141   : > { %3196 = vmatpush.bf16.msra.mxu2 %v10675_v48 }
 0x142   : > { %3147 = vmatpush.bf16.msra.mxu1 %v10429_v12  ;;  %v11178_v57 = vpop.f32.mrf.mxu3  ;;  %3106 = vmatpush.bf16.msra.mxu0 %v10558_v19  ;;  %v1066_v19 = vld [vmem:[%s10070_s29 + $0x2c] sm:$0xf] }
 0x143   : > { %1102 = vrot.lane.b32.xlu0 %v1069_v27, %s9886_s17  ;;  %v15480_v27 = vld [vmem:[#allocation15_spill] sm:$0xff] }
 0x144   : > { %1212 = vrot.lane.b32.xlu1 %v7548_v4, %s9889_s26 }
 0x145   : > { %3197 = vmatpush.bf16.msra.mxu2 %v10720_v40  ;;  %v7547_v40 = vld [vmem:[%s10070_s29 + $0x50] sm:$0xf] }
 0x146   : > { %3148 = vmatpush.bf16.msra.mxu1 %v10472_v31  ;;  %v7560_v31 = vld [vmem:[%s10070_s29 + $0x44] sm:$0xf]  ;;  %3107 = vmatpush.bf16.msra.mxu0 %v10603_v46  ;;  %v959_v46 = vld [vmem:[%s10070_s29 + $0x78] sm:$0xf] }
 0x147   : > { %2909 = vmatmul.bf16.gmra.mxu3 %v10725_v3  ;;  %1206 = vrot.lane.b32.xlu2 %v7545_v18, %s9889_s26  ;;  %1276 = vst.msk [vmem:[#allocation2 + $0x10c] sm:$0xf] %vm564_vm1, %v7560_v31  ;;  %v2621_v3 = vpop.f32.mrf.mxu1  ;;  %v960_v18 = vld [vmem:[%s10070_s29 + $0x88] sm:$0xf]  ;;  %v11258_v31 = vor.u32 %v9431_v39, %v8050_v62  ;;  %v1072_v62 = vld [vmem:[%s10070_s29 + $0x8c] sm:$0xf] }
 0x14a   : > { %3149 = vmatpush.bf16.msra.mxu1 %v10527_v0  ;;  %v11196_v12 = vpop.f32.mrf.mxu3  ;;  %v2577_v0 = vpop.f32.mrf.mxu0  ;;  %3108 = vmatpush.bf16.msra.mxu0 %v10648_v22  ;;  %v15475_v22 = vld [vmem:[#allocation10_spill] sm:$0xff] }
 0x14b   : > { %992 = vrot.lane.b32.xlu0 %v958_v35, %s9887_s30  ;;  %2757 = vmatmul.bf16.gmra.mxu0 %v10829_v14 }
 0x14c   : > { %994 = vrot.lane.b32.xlu1 %v959_v46, %s9887_s30  ;;  %3366 = vmatpush.bf16.msrb.mxu2 %v15475_v22  ;;  %v7552_v46 = vld [vmem:[%s10070_s29 + $0xa0] sm:$0xf]  ;;  %v1070_v22 = vld [vmem:[%s10070_s29 + $0x6c] sm:$0xf] }
 0x14e   : > { %3150 = vmatpush.bf16.msra.mxu1 %v10565_v25  ;;  %v2622_v25 = vadd.f32 %v2621_v3, %v2577_v0  ;;  %v15481_v0 = vld [vmem:[#allocation16_spill] sm:$0xff] }
 0x14f   : > { %1096 = vrot.lane.b32.xlu2 %v1066_v19, %s9886_s17  ;;  %2801 = vmatmul.bf16.gmra.mxu1 %v10824_v16  ;;  %v1073_v19 = vld [vmem:[%s10070_s29 + $0x9c] sm:$0xf] }
 0x150   : > { %2845 = vmatmul.bf16.gmra.mxu2 %v10833_v20  ;;  %v2665_v16 = vpop.f32.mrf.mxu2 }
 0x151   : > { %v11239_v14 = vadd.f32 %v2665_v16, %v2622_v25  ;;  %3367 = vmatpush.bf16.msrb.mxu2 %v15478_v13  ;;  %v7564_v25 = vld [vmem:[%s10070_s29 + $0x84] sm:$0xf]  ;;  %v8082_v13 = vld [vmem:[#allocation2 + $0x138] sm:$0xf0] }
 0x152   : > { %3151 = vmatpush.bf16.msra.mxu1 %v10613_v54  ;;  %v11214_v52 = vpop.f32.mrf.mxu3  ;;  %v15473_v54 = vld [vmem:[#allocation8_spill] sm:$0xff]  ;;  %v2579_v48 = vpop.f32.mrf.mxu0  ;;  %1280 = vst.msk [vmem:[#allocation2 + $0x14c] sm:$0xf] %vm564_vm1, %v7564_v25 }
 0x153   : > { %3109 = vmatpush.bf16.msra.mxu0 %v15473_v54  ;;  %1106 = vrot.lane.b32.xlu0 %v1071_v10, %s9886_s17  ;;  %v8066_v54 = vld [vmem:[#allocation2 + $0x118] sm:$0xf0] }
 0x154   : > { %1216 = vrot.lane.b32.xlu1 %v7550_v15, %s9889_s26  ;;  %v7554_v15 = vld [vmem:[%s10070_s29 + $0xc0] sm:$0xf] }
 0x155   : > { %3368 = vmatpush.bf16.msrb.mxu2 %v10851_v50 }
 0x156   : > { %3152 = vmatpush.bf16.msra.mxu1 %v10655_v30 }
 0x157   : > { %2914 = vmatmul.bf16.gmra.mxu3 %v10827_v45  ;;  %3278 = vmatpush.bf16.msrb.mxu0 %v15476_v61  ;;  %v2623_v45 = vpop.f32.mrf.mxu1  ;;  %v963_v61 = vld [vmem:[%s10070_s29 + $0xb8] sm:$0xf] }
 0x158   : > { %1210 = vrot.lane.b32.xlu2 %v7547_v40, %s9889_s26  ;;  %v2624_v20 = vadd.f32 %v2623_v45, %v2579_v48  ;;  %v2667_v44 = vpop.f32.mrf.mxu2  ;;  %v962_v48 = vld [vmem:[%s10070_s29 + $0xa8] sm:$0xf] }
 0x159   : > { %3369 = vmatpush.bf16.msrb.mxu2 %v10911_v21 }
 0x15a   : > { %3153 = vmatpush.bf16.msra.mxu1 %v15474_v7  ;;  %v11232_v30 = vpop.f32.mrf.mxu3  ;;  %v2582_v23 = vpop.f32.mrf.mxu0  ;;  %v11261_v4 = vadd.f32 %v2667_v44, %v2624_v20 }
 0x15b   : > { %3279 = vmatpush.bf16.msrb.mxu0 %v15479_v17  ;;  %996 = vrot.lane.b32.xlu0 %v960_v18, %s9887_s30 }
 0x15c   : > { %2762 = vmatmul.bf16.gmra.mxu0 %v10886_v42 }
 0x15d   : > { %3370 = vmatpush.bf16.msrb.mxu2 %v10969_v5  ;;  %v7565_v5 = vld [vmem:[%s10070_s29 + $0x94] sm:$0xf] }
 0x15e   : > { %3322 = vmatpush.bf16.msrb.mxu1 %v15477_v32  ;;  %1281 = vst.msk [vmem:[#allocation2 + $0x15c] sm:$0xf] %vm564_vm1, %v7565_v5  ;;  %v1075_v32 = vld [vmem:[%s10070_s29 + $0xbc] sm:$0xf] }
 0x15f   : > { %3280 = vmatpush.bf16.msrb.mxu0 %v10860_v59  ;;  %2806 = vmatmul.bf16.gmra.mxu1 %v10884_v60  ;;  %v961_v59 = vld [vmem:[%s10070_s29 + $0x98] sm:$0xf]  ;;  %v7549_v60 = vld [vmem:[%s10070_s29 + $0x70] sm:$0xf] }
 0x160   : > { %1100 = vrot.lane.b32.xlu2 %v1068_v2, %s9886_s17  ;;  %2850 = vmatmul.bf16.gmra.mxu2 %v10889_v28 }
 0x161   : > { %998 = vrot.lane.b32.xlu1 %v961_v59, %s9887_s30  ;;  %3371 = vmatpush.bf16.msrb.mxu2 %v11028_v9  ;;  %v15486_v59 = vld [vmem:[#allocation21_spill] sm:$0xff] }
 0x162   : > { %3323 = vmatpush.bf16.msrb.mxu1 %v10816_v6  ;;  %v11252_v58 = vpop.f32.mrf.mxu3  ;;  %v2626_v6 = vpop.f32.mrf.mxu1 }
 0x163   : > { %v2627_v50 = vadd.f32 %v2626_v6, %v2582_v23  ;;  %3281 = vmatpush.bf16.msrb.mxu0 %v10932_v34  ;;  %v2584_v21 = vpop.f32.mrf.mxu0  ;;  %v2670_v34 = vpop.f32.mrf.mxu2  ;;  %1110 = vrot.lane.b32.xlu0 %v1073_v19, %s9886_s17  ;;  %v964_v23 = vld [vmem:[%s10070_s29 + $0xc8] sm:$0xf] }
 0x165   : > { %v11280_v28 = vadd.f32 %v2670_v34, %v2627_v50  ;;  %3372 = vmatpush.bf16.msrb.mxu2 %v11080_v56  ;;  %v15483_v56 = vld [vmem:[#allocation17_spill] sm:$0xff]  ;;  %v15485_v50 = vld [vmem:[#allocation22_spill] sm:$0xff]  ;;  %v7553_v34 = vld [vmem:[%s10070_s29 + $0xb0] sm:$0xf] }
 0x166   : > { %3324 = vmatpush.bf16.msrb.mxu1 %v15480_v27 }
 0x167   : > { %3242 = vmatmul.bf16.vlgmr.msra.gmra.mxu3 %v11258_v31  ;;  %3282 = vmatpush.bf16.msrb.mxu0 %v10993_v8  ;;  %v9435_v8 = vld [vmem:[#allocation2 + $0x10c] sm:$0xf] }
 0x168   : > { %1214 = vrot.lane.b32.xlu2 %v7549_v60, %s9889_s26  ;;  %v11299_v9 = vor.u32 %v9435_v8, %v8066_v54  ;;  %v7568_v8 = vld [vmem:[%s10070_s29 + $0xc4] sm:$0xf]  ;;  %v7569_v54 = vld [vmem:[%s10070_s29 + $0xd4] sm:$0xf] }
 0x169   : > { %1220 = vrot.lane.b32.xlu1 %v7552_v46, %s9889_s26  ;;  %3373 = vmatpush.bf16.msrb.mxu2 %v11134_v11  ;;  %v7551_v11 = vld [vmem:[%s10070_s29 + $0x90] sm:$0xf]  ;;  %1284 = vst.msk [vmem:[#allocation2 + $0x18c] sm:$0xf] %vm564_vm1, %v7568_v8 }
 0x16a   : > { %3325 = vmatpush.bf16.msrb.mxu1 %v15481_v0  ;;  %v11274_v42 = vpop.f32.mrf.mxu3  ;;  %v2628_v35 = vpop.f32.mrf.mxu1  ;;  %v15487_v0 = vld [vmem:[#allocation23_spill] sm:$0xff]  ;;  %1285 = vst.msk [vmem:[#allocation2 + $0x19c] sm:$0xf] %vm564_vm1, %v7569_v54 }
 0x16b   : > { %v2629_v3 = vadd.f32 %v2628_v35, %v2584_v21  ;;  %3283 = vmatpush.bf16.msrb.mxu0 %v11043_v43  ;;  %v2672_v40 = vpop.f32.mrf.mxu2  ;;  %1000 = vrot.lane.b32.xlu0 %v962_v48, %s9887_s30  ;;  %v965_v21 = vld [vmem:[%s10070_s29 + $0xd8] sm:$0xf]  ;;  %v1077_v35 = vld [vmem:[%s10070_s29 + $0xdc] sm:$0xf] }
 0x16c   : > { %2767 = vmatmul.bf16.gmra.mxu0 %v10945_v36 }
 0x16d   : > { %v11302_v10 = vadd.f32 %v2672_v40, %v2629_v3 }
 0x16e   : > { %3326 = vmatpush.bf16.msrb.mxu1 %v10995_v33  ;;  %v2587_v33 = vpop.f32.mrf.mxu0 }
 0x16f   : > { %3284 = vmatpush.bf16.msrb.mxu0 %v11105_v47  ;;  %2811 = vmatmul.bf16.gmra.mxu1 %v15483_v56  ;;  %v15484_v47 = vld [vmem:[#allocation18_spill] sm:$0xff] }
 0x170   : > { %1104 = vrot.lane.b32.xlu2 %v1070_v22, %s9886_s17  ;;  %2855 = vmatmul.bf16.gmra.mxu2 %v15484_v47  ;;  %v8098_v22 = vld [vmem:[#allocation2 + $0x158] sm:$0xf0]  ;;  %v924_v56 = vld [vmem:[%s10070_s29 + $0x4] sm:$0xf] }
 0x171   : > { %1002 = vrot.lane.b32.xlu1 %v963_v61, %s9887_s30  ;;  %938 = vst.msk [vmem:[#allocation2 + $0xe0] sm:$0xf] %vm564_vm1, %v924_v56 }
 0x172   : > { %3327 = vmatpush.bf16.msrb.mxu1 %v11056_v38  ;;  %v11294_v7 = vpop.f32.mrf.mxu3  ;;  %v2631_v43 = vpop.f32.mrf.mxu1 }
 0x173   : > { %15482 = vst [vmem:[#allocation8_spill] sm:$0xff] %v11294_v7  ;;  %v2632_v38 = vadd.f32 %v2631_v43, %v2587_v33  ;;  %3285 = vmatpush.bf16.msrb.mxu0 %v11149_v1  ;;  %v2675_v16 = vpop.f32.mrf.mxu2  ;;  %1114 = vrot.lane.b32.xlu0 %v1075_v32, %s9886_s17  ;;  %v9443_v33 = vld [vmem:[#allocation2 + $0x14c] sm:$0xf]  ;;  %v1074_v43 = vld [vmem:[%s10070_s29 + $0xac] sm:$0xf] }
 0x174   : > { %v11362_v47 = vor.u32 %v9443_v33, %v8098_v22 }
 0x175   : > { %v11320_v45 = vadd.f32 %v2675_v16, %v2632_v38  ;;  %v7556_v38 = vld [vmem:[%s10070_s29 + $0xe0] sm:$0xf] }
 0x176   : > { %3328 = vmatpush.bf16.msrb.mxu1 %v11111_v63  ;;  %v2589_v36 = vpop.f32.mrf.mxu0 }
 0x177   : > { %3247 = vmatmul.bf16.gmra.mxu3 %v11299_v9 }
 0x178   : > { %1218 = vrot.lane.b32.xlu2 %v7551_v11, %s9889_s26 }
 0x179   : > { %1224 = vrot.lane.b32.xlu1 %v7554_v15, %s9889_s26 }
 0x17a   : > { %3329 = vmatpush.bf16.msrb.mxu1 %v11158_v49  ;;  %v11315_v63 = vpop.f32.mrf.mxu3  ;;  %v2633_v1 = vpop.f32.mrf.mxu1  ;;  %v9439_v49 = vld [vmem:[#allocation2 + $0x12c] sm:$0xf] }
 0x17b   : > { %v2634_v20 = vadd.f32 %v2633_v1, %v2589_v36  ;;  %v11333_v2 = vor.u32 %v9439_v49, %v8082_v13  ;;  %v2677_v18 = vpop.f32.mrf.mxu2  ;;  %1004 = vrot.lane.b32.xlu0 %v964_v23, %s9887_s30  ;;  %v15488_v1 = vld [vmem:[#allocation26_spill] sm:$0xff] }
 0x17c   : > { %2772 = vmatmul.bf16.gmra.mxu0 %v15485_v50  ;;  %v7570_v50 = vld [vmem:[%s10070_s29 + $0xe4] sm:$0xf] }
 0x17d   : > { %v11336_v44 = vadd.f32 %v2677_v18, %v2634_v20  ;;  %1286 = vst.msk [vmem:[#allocation2 + $0x1ac] sm:$0xf] %vm564_vm1, %v7570_v50 }
 0x17e   : > { %v2592_v39 = vpop.f32.mrf.mxu0 }
 0x17f   : > { %2816 = vmatmul.bf16.gmra.mxu1 %v15486_v59  ;;  %v7571_v59 = vld [vmem:[%s10070_s29 + $0xf4] sm:$0xf] }
 0x180   : > { %1108 = vrot.lane.b32.xlu2 %v1072_v62, %s9886_s17  ;;  %2860 = vmatmul.bf16.gmra.mxu2 %v15487_v0  ;;  %1287 = vst.msk [vmem:[#allocation2 + $0x1bc] sm:$0xf] %vm564_vm1, %v7571_v59 }
 0x181   : > { %1006 = vrot.lane.b32.xlu1 %v965_v21, %s9887_s30 }
 0x182   : > { %v11329_v17 = vpop.f32.mrf.mxu3  ;;  %v2636_v27 = vpop.f32.mrf.mxu1 }
 0x183   : > { %v2637_v6 = vadd.f32 %v2636_v27, %v2592_v39  ;;  %v2680_v3 = vpop.f32.mrf.mxu2  ;;  %1118 = vrot.lane.b32.xlu0 %v1077_v35, %s9886_s17  ;;  %v925_v39 = vld [vmem:[%s10070_s29 + $0x14] sm:$0xf] }
 0x184   : > { %939 = vst.msk [vmem:[#allocation2 + $0xf0] sm:$0xf] %vm564_vm1, %v925_v39 }
 0x185   : > { %v11350_v5 = vadd.f32 %v2680_v3, %v2637_v6 }
 0x186   : > { %v2594_v19 = vpop.f32.mrf.mxu0 }
 0x187   : > { %3252 = vmatmul.bf16.gmra.mxu3 %v11333_v2 }
 0x188   : > { %1222 = vrot.lane.b32.xlu2 %v7553_v34, %s9889_s26 }
 0x189   : > { %1228 = vrot.lane.b32.xlu1 %v7556_v38, %s9889_s26  ;;  %v926_v38 = vld [vmem:[%s10070_s29 + $0x24] sm:$0xf] }
 0x18a   : > { %v11345_v60 = vpop.f32.mrf.mxu3  ;;  %v2638_v25 = vpop.f32.mrf.mxu1  ;;  %940 = vst.msk [vmem:[#allocation2 + $0x100] sm:$0xf] %vm564_vm1, %v926_v38 }
 0x18b   : > { %v2639_v46 = vadd.f32 %v2638_v25, %v2594_v19  ;;  %v2682_v61 = vpop.f32.mrf.mxu2  ;;  %v983_v6 = vpop.permute.xlu1 %982  ;;  %v9447_v25 = vld [vmem:[#allocation2 + $0x16c] sm:$0xf] }
 0x18c   : > { %2777 = vmatmul.bf16.gmra.mxu0 %v11072_v37  ;;  %v981_v16 = vpop.permute.xlu0 %980  ;;  %v7555_v37 = vld [vmem:[%s10070_s29 + $0xd0] sm:$0xf]  ;;  %v1009_v0 = vrot.slane %v983_v6, 4 }
 0x18d   : > { %v11367_v11 = vadd.f32 %v2682_v61, %v2639_v46  ;;  %v1008_v20 = vrot.slane %v981_v16, 4  ;;  %v8114_v46 = vld [vmem:[#allocation2 + $0x178] sm:$0xf0] }
 0x18e   : > { %v2597_v40 = vpop.f32.mrf.mxu0  ;;  %v1023_v35 = vsel %vm649_vm3, %v1009_v0, %v983_v6  ;;  %v11401_v56 = vor.u32 %v9447_v25, %v8114_v46  ;;  %v9451_v0 = vld [vmem:[#allocation2 + $0x18c] sm:$0xf] }
 0x18f   : > { %2821 = vmatmul.bf16.gmra.mxu1 %v15488_v1  ;;  %v1022_v29 = vsel %vm649_vm3, %v1008_v20, %v981_v16  ;;  %1051 = vst.msk [vmem:[#allocation2 + $0xf0] sm:$0xff] %vm10480_vm5, %v1023_v35 }
 0x190   : > { %1112 = vrot.lane.b32.xlu2 %v1074_v43, %s9886_s17  ;;  %2865 = vmatmul.bf16.gmra.mxu2 %v15489_v41  ;;  %1050 = vst.msk [vmem:[#allocation2 + $0xe0] sm:$0xff] %vm10480_vm5, %v1022_v29  ;;  %v1076_v43 = vld [vmem:[%s10070_s29 + $0xcc] sm:$0xf] }
 0x192   : > { %v11357_v48 = vpop.f32.mrf.mxu3  ;;  %v2641_v36 = vpop.f32.mrf.mxu1 }
 0x193   : > { %v2642_v32 = vadd.f32 %v2641_v36, %v2597_v40  ;;  %v2685_v62 = vpop.f32.mrf.mxu2  ;;  %v1205_v1 = vpop.permute.xlu1 %1204 }
 0x194   : > { %v1095_v34 = vpop.permute.xlu0 %1094 }
 0x195   : > { %v11382_v18 = vadd.f32 %v2685_v62, %v2642_v32  ;;  %v1121_v3 = vrot.slane %v1095_v34, 4  ;;  %v7557_v62 = vld [vmem:[%s10070_s29 + $0xf0] sm:$0xf] }
 0x196   : > { %v2599_v13 = vpop.f32.mrf.mxu0  ;;  %v9432_v46 = vld [vmem:[#allocation2 + $0xec] sm:$0xf0] }
 0x197   : > { %3257 = vmatmul.bf16.gmra.mxu3 %v11362_v47  ;;  %v1135_v33 = vsel %vm764_vm2, %v1121_v3, %v1095_v34  ;;  %v8040_v25 = vld [vmem:[#allocation2 + $0xe0] sm:$0xf] }
 0x198   : > { %1226 = vrot.lane.b32.xlu2 %v7555_v37, %s9889_s26  ;;  %1163 = vst.msk [vmem:[#allocation2 + $0xf4] sm:$0xff] %vm10514_vm9, %v1135_v33  ;;  %v927_v37 = vld [vmem:[%s10070_s29 + $0x34] sm:$0xf] }
 0x199   : > { %v1093_v21 = vpop.permute.xlu2 %1092  ;;  %941 = vst.msk [vmem:[#allocation2 + $0x110] sm:$0xf] %vm564_vm1, %v927_v37 }
 0x19a   : > { %v11376_v49 = vpop.f32.mrf.mxu3  ;;  %v2643_v23 = vpop.f32.mrf.mxu1  ;;  %v1120_v19 = vrot.slane %v1093_v21, 4 }
 0x19b   : > { %v2644_v27 = vadd.f32 %v2643_v23, %v2599_v13  ;;  %v2687_v61 = vpop.f32.mrf.mxu2 }
 0x19c   : > { %v1134_v8 = vsel %vm764_vm2, %v1120_v19, %v1093_v21  ;;  %2782 = vmatmul.bf16.gmra.mxu0 %v11126_v53  ;;  %v985_v41 = vpop.permute.xlu0 %984  ;;  %v8130_v21 = vld [vmem:[#allocation2 + $0x198] sm:$0xf0] }
 0x19d   : > { %1162 = vst.msk [vmem:[#allocation2 + $0xe4] sm:$0xff] %vm10514_vm9, %v1134_v8  ;;  %v11405_v32 = vadd.f32 %v2687_v61, %v2644_v27  ;;  %v1010_v29 = vrot.slane %v985_v41, 4  ;;  %v987_v6 = vpop.permute.xlu1 %986 }
 0x19e   : > { %v2602_v40 = vpop.f32.mrf.mxu0  ;;  %1246 = vst.msk [vmem:[#allocation2 + $0xe8] sm:$0xf] %vm880_vm8, %v1205_v1  ;;  %v1011_v50 = vrot.slane %v987_v6, 4  ;;  %v928_v1 = vld [vmem:[%s10070_s29 + $0x44] sm:$0xf] }
 0x19f   : > { %2826 = vmatmul.bf16.gmra.mxu1 %v11120_v26  ;;  %v1024_v13 = vsel %vm649_vm3, %v1010_v29, %v985_v41  ;;  %v8042_v61 = vld [vmem:[#allocation2 + $0xf0] sm:$0xf0]  ;;  %942 = vst.msk [vmem:[#allocation2 + $0x120] sm:$0xf] %vm564_vm1, %v928_v1 }
 0x1a0   : > { %1116 = vrot.lane.b32.xlu2 %v1076_v43, %s9886_s17  ;;  %2870 = vmatmul.bf16.gmra.mxu2 %v11128_v55  ;;  %1052 = vst.msk [vmem:[#allocation2 + $0x100] sm:$0xff] %vm10480_vm5, %v1024_v13  ;;  %v1025_v35 = vsel %vm649_vm3, %v1011_v50, %v987_v6  ;;  %v11438_v13 = vor.u32 %v9432_v46, %v8040_v25 }
 0x1a1   : > { %v1207_v20 = vpop.permute.xlu2 %1206  ;;  %1053 = vst.msk [vmem:[#allocation2 + $0x110] sm:$0xff] %vm10480_vm5, %v1025_v35 }
 0x1a2   : > { %v11395_v22 = vpop.f32.mrf.mxu3  ;;  %v2646_v36 = vpop.f32.mrf.mxu1  ;;  %1247 = vst.msk [vmem:[#allocation2 + $0xf8] sm:$0xf] %vm880_vm8, %v1207_v20  ;;  %v11436_v20 = vor.u32 %v9451_v0, %v8130_v21 }
 0x1a3   : > { %v2647_v16 = vadd.f32 %v2646_v36, %v2602_v40  ;;  %v2690_v23 = vpop.f32.mrf.mxu2 }
 0x1a4   : > { %v1099_v34 = vpop.permute.xlu0 %1098  ;;  %v9430_v38 = vld [vmem:[#allocation2 + $0xe4] sm:$0xf] }
 0x1a5   : > { %v11422_v27 = vadd.f32 %v2690_v23, %v2647_v16  ;;  %v1123_v3 = vrot.slane %v1099_v34, 4  ;;  %v8048_v33 = vld [vmem:[#allocation2 + $0xe8] sm:$0xf]  ;;  %v1209_v23 = vpop.permute.xlu1 %1208 }
 0x1a6   : > { %v2604_v53 = vpop.f32.mrf.mxu0 }
 0x1a7   : > { %3262 = vmatmul.bf16.gmra.mxu3 %v11401_v56  ;;  %v1137_v43 = vsel %vm764_vm2, %v1123_v3, %v1099_v34 }
 0x1a8   : > { %1230 = vrot.lane.b32.xlu2 %v7557_v62, %s9889_s26  ;;  %1165 = vst.msk [vmem:[#allocation2 + $0x114] sm:$0xff] %vm10514_vm9, %v1137_v43  ;;  %v8146_v43 = vld [vmem:[#allocation2 + $0x1b8] sm:$0xf0] }
 0x1a9   : > { %v1097_v59 = vpop.permute.xlu2 %1096  ;;  %v9433_v40 = vld [vmem:[#allocation2 + $0xf4] sm:$0xf0] }
 0x1aa   : > { %v11414_v39 = vpop.f32.mrf.mxu3  ;;  %v2648_v26 = vpop.f32.mrf.mxu1  ;;  %v1122_v19 = vrot.slane %v1097_v59, 4 }
 0x1ab   : > { %v2649_v55 = vadd.f32 %v2648_v26, %v2604_v53  ;;  %v2692_v41 = vpop.f32.mrf.mxu2  ;;  %v11440_v53 = vor.u32 %v9433_v40, %v8048_v33  ;;  %v11445_v26 = vor.u32 %v9430_v38, %v8042_v61  ;;  %v9455_v40 = vld [vmem:[#allocation2 + $0x1ac] sm:$0xf] }
 0x1ac   : > { %v1136_v8 = vsel %vm764_vm2, %v1122_v19, %v1097_v59  ;;  %3110 = vmatmul.bf16.vlgmr.msra.gmra.mxu0 %v11438_v13  ;;  %v929_v19 = vld [vmem:[%s10070_s29 + $0x54] sm:$0xf] }
 0x1ad   : > { %1164 = vst.msk [vmem:[#allocation2 + $0x104] sm:$0xff] %vm10514_vm9, %v1136_v8  ;;  %v11443_v37 = vadd.f32 %v2692_v41, %v2649_v55  ;;  %v989_v50 = vpop.permute.xlu0 %988  ;;  %v8056_v41 = vld [vmem:[#allocation2 + $0x100] sm:$0xf] }
 0x1ae   : > { %v2607_v16 = vpop.f32.mrf.mxu0  ;;  %1248 = vst.msk [vmem:[#allocation2 + $0x108] sm:$0xf] %vm880_vm8, %v1209_v23  ;;  %v1012_v55 = vrot.slane %v989_v50, 4  ;;  %v991_v46 = vpop.permute.xlu1 %990 }
 0x1af   : > { %3154 = vmatmul.bf16.vlgmr.msra.gmra.mxu1 %v11445_v26  ;;  %943 = vst.msk [vmem:[#allocation2 + $0x130] sm:$0xf] %vm564_vm1, %v929_v19  ;;  %v1013_v8 = vrot.slane %v991_v46, 4 }
 0x1b0   : > { %3198 = vmatmul.bf16.vlgmr.msra.gmra.mxu2 %v11440_v53  ;;  %v1026_v59 = vsel %vm649_vm3, %v1012_v55, %v989_v50 }
 0x1b1   : > { %1054 = vst.msk [vmem:[#allocation2 + $0x120] sm:$0xff] %vm10480_vm5, %v1026_v59  ;;  %v8058_v59 = vld [vmem:[#allocation2 + $0x110] sm:$0xf0] }
 0x1b2   : > { %v11431_v36 = vpop.f32.mrf.mxu3  ;;  %v2651_v29 = vpop.f32.mrf.mxu1 }
 0x1b3   : > { %v2652_v62 = vadd.f32 %v2651_v29, %v2607_v16  ;;  %v1211_v6 = vpop.permute.xlu2 %1210  ;;  %v2695_v34 = vpop.f32.mrf.mxu2  ;;  %v1027_v16 = vsel %vm649_vm3, %v1013_v8, %v991_v46  ;;  %v9436_v29 = vld [vmem:[#allocation2 + $0x10c] sm:$0xf0] }
 0x1b4   : > { %1249 = vst.msk [vmem:[#allocation2 + $0x118] sm:$0xf] %vm880_vm8, %v1211_v6  ;;  %v9434_v55 = vld [vmem:[#allocation2 + $0x104] sm:$0xf] }
 0x1b5   : > { %v11460_v3 = vadd.f32 %v2695_v34, %v2652_v62  ;;  %v1103_v61 = vpop.permute.xlu0 %1102  ;;  %1055 = vst.msk [vmem:[#allocation2 + $0x130] sm:$0xff] %vm10480_vm5, %v1027_v16  ;;  %v8064_v23 = vld [vmem:[#allocation2 + $0x108] sm:$0xf]  ;;  %v930_v34 = vld [vmem:[%s10070_s29 + $0x64] sm:$0xf] }
 0x1b6   : > { %v2609_v21 = vpop.f32.mrf.mxu0  ;;  %v1125_v1 = vrot.slane %v1103_v61, 4  ;;  %944 = vst.msk [vmem:[#allocation2 + $0x140] sm:$0xf] %vm564_vm1, %v930_v34 }
 0x1b7   : > { %3267 = vmatmul.bf16.gmra.mxu3 %v11436_v20 }
 0x1b8   : > { %v1139_v50 = vsel %vm764_vm2, %v1125_v1, %v1103_v61  ;;  %v1213_v1 = vpop.permute.xlu1 %1212 }
 0x1b9   : > { %1167 = vst.msk [vmem:[#allocation2 + $0x134] sm:$0xff] %vm10514_vm9, %v1139_v50 }
 0x1ba   : > { %v11454_v0 = vpop.f32.mrf.mxu3  ;;  %v2653_v35 = vpop.f32.mrf.mxu1 }
 0x1bb   : > { %v2654_v25 = vadd.f32 %v2653_v35, %v2609_v21  ;;  %v1101_v33 = vpop.permute.xlu2 %1100  ;;  %v9437_v6 = vld [vmem:[#allocation2 + $0x114] sm:$0xf0]  ;;  %v11474_v35 = vor.u32 %v9455_v40, %v8146_v43  ;;  %v2697_v46 = vpop.f32.mrf.mxu2 }
 0x1bc   : > { %v1124_v38 = vrot.slane %v1101_v33, 4 }
 0x1bd   : > { %15492 = vst [vmem:[#allocation9_spill] sm:$0xff] %v11474_v35  ;;  %v11481_v61 = vadd.f32 %v2697_v46, %v2654_v25  ;;  %v993_v43 = vpop.permute.xlu0 %992 }
 0x1be   : > { %v1138_v62 = vsel %vm764_vm2, %v1124_v38, %v1101_v33  ;;  %v2753_v19 = vpop.f32.mrf.mxu0  ;;  %v11476_v33 = vor.u32 %v9436_v29, %v8056_v41  ;;  %v11478_v38 = vor.u32 %v9437_v6, %v8064_v23  ;;  %v1014_v25 = vrot.slane %v993_v43, 4  ;;  %v931_v6 = vld [vmem:[%s10070_s29 + $0x74] sm:$0xf] }
 0x1bf   : > { %1166 = vst.msk [vmem:[#allocation2 + $0x124] sm:$0xff] %vm10514_vm9, %v1138_v62  ;;  %v11483_v62 = vor.u32 %v9434_v55, %v8058_v59 }
 0x1c0   : > { %15493 = vst [vmem:[#allocation10_spill] sm:$0xff] %v11478_v38  ;;  %3115 = vmatmul.bf16.gmra.mxu0 %v11476_v33  ;;  %3203 = vmatmul.bf16.gmra.mxu2 %v11478_v38  ;;  %v1028_v41 = vsel %vm649_vm3, %v1014_v25, %v993_v43  ;;  %v995_v34 = vpop.permute.xlu1 %994 }
 0x1c1   : > { %15494 = vst [vmem:[#allocation11_spill] sm:$0xff] %v11483_v62  ;;  %3159 = vmatmul.bf16.gmra.mxu1 %v11483_v62  ;;  %v1015_v46 = vrot.slane %v995_v34, 4  ;;  %v8072_v62 = vld [vmem:[#allocation2 + $0x120] sm:$0xf] }
 0x1c2   : > { %v11469_v21 = vpop.f32.mrf.mxu3  ;;  %v2797_v8 = vpop.f32.mrf.mxu1  ;;  %1250 = vst.msk [vmem:[#allocation2 + $0x128] sm:$0xf] %vm880_vm8, %v1213_v1  ;;  %v15495_v1 = vld [vmem:[#allocation19_spill] sm:$0xff] }
 0x1c3   : > { %v2798_v16 = vadd.f32 %v2797_v8, %v2753_v19  ;;  %v1215_v40 = vpop.permute.xlu2 %1214  ;;  %1056 = vst.msk [vmem:[#allocation2 + $0x140] sm:$0xff] %vm10480_vm5, %v1028_v41  ;;  %v2841_v50 = vpop.f32.mrf.mxu2  ;;  %v1029_v38 = vsel %vm649_vm3, %v1015_v46, %v995_v34 }
 0x1c4   : > { %1251 = vst.msk [vmem:[#allocation2 + $0x138] sm:$0xf] %vm880_vm8, %v1215_v40  ;;  %v11500_v40 = vadd.f32 %v15495_v1, %v11239_v14  ;;  %v932_v1 = vld [vmem:[%s10070_s29 + $0x84] sm:$0xf] }
 0x1c5   : > { %945 = vst.msk [vmem:[#allocation2 + $0x150] sm:$0xf] %vm564_vm1, %v931_v6  ;;  %v2842_v59 = vadd.f32 %v2841_v50, %v2798_v16  ;;  %v1107_v41 = vpop.permute.xlu0 %1106  ;;  %v9440_v6 = vld [vmem:[#allocation2 + $0x12c] sm:$0xf0] }
 0x1c6   : > { %v2755_v23 = vpop.f32.mrf.mxu0  ;;  %15496 = vst [vmem:[#allocation12_spill] sm:$0xff] %v11500_v40  ;;  %v15498_v40 = vld [vmem:[#allocation20_spill] sm:$0xff] }
 0x1c7   : > { %3272 = vmatmul.bf16.gmra.mxu3 %v11474_v35  ;;  %v11503_v43 = vadd.f32 %v11315_v63, %v2842_v59  ;;  %v1127_v35 = vrot.slane %v1107_v41, 4  ;;  %1057 = vst.msk [vmem:[#allocation2 + $0x150] sm:$0xff] %vm10480_vm5, %v1029_v38  ;;  %v8074_v59 = vld [vmem:[#allocation2 + $0x130] sm:$0xf0]  ;;  %v11530_v7 = vadd.f32 %v15498_v40, %v11261_v4  ;;  %v933_v40 = vld [vmem:[%s10070_s29 + $0x94] sm:$0xf] }
 0x1c8   : > { %946 = vst.msk [vmem:[#allocation2 + $0x160] sm:$0xf] %vm564_vm1, %v932_v1 }
 0x1c9   : > { %15497 = vst [vmem:[#allocation13_spill] sm:$0xff] %v11503_v43  ;;  %v1141_v63 = vsel %vm764_vm2, %v1127_v35, %v1107_v41  ;;  %v11519_v43 = vor.u32 %v9440_v6, %v8072_v62  ;;  %v1217_v35 = vpop.permute.xlu1 %1216 }
 0x1ca   : > { %v11492_v29 = vpop.f32.mrf.mxu3  ;;  %v2799_v55 = vpop.f32.mrf.mxu1  ;;  %1169 = vst.msk [vmem:[#allocation2 + $0x154] sm:$0xff] %vm10514_vm9, %v1141_v63 }
 0x1cb   : > { %v2800_v19 = vadd.f32 %v2799_v55, %v2755_v23  ;;  %v1105_v8 = vpop.permute.xlu2 %1104  ;;  %v8080_v23 = vld [vmem:[#allocation2 + $0x128] sm:$0xf]  ;;  %v9441_v50 = vld [vmem:[#allocation2 + $0x134] sm:$0xf0]  ;;  %v9438_v55 = vld [vmem:[#allocation2 + $0x124] sm:$0xf]  ;;  %v2843_v16 = vpop.f32.mrf.mxu2 }
 0x1cc   : > { %v1126_v25 = vrot.slane %v1105_v8, 4  ;;  %v11524_v41 = vor.u32 %v9438_v55, %v8074_v59  ;;  %15499 = vst [vmem:[#allocation14_spill] sm:$0xff] %v11530_v7 }
 0x1cd   : > { %947 = vst.msk [vmem:[#allocation2 + $0x170] sm:$0xf] %vm564_vm1, %v933_v40 }
 0x1ce   : > { %v1140_v14 = vsel %vm764_vm2, %v1126_v25, %v1105_v8  ;;  %v2758_v46 = vpop.f32.mrf.mxu0  ;;  %v11521_v8 = vor.u32 %v9441_v50, %v8080_v23  ;;  %v2844_v25 = vadd.f32 %v2843_v16, %v2800_v19  ;;  %v997_v19 = vpop.permute.xlu0 %996  ;;  %v9444_v40 = vld [vmem:[#allocation2 + $0x14c] sm:$0xf0] }
 0x1cf   : > { %1168 = vst.msk [vmem:[#allocation2 + $0x144] sm:$0xff] %vm10514_vm9, %v1140_v14  ;;  %v1016_v6 = vrot.slane %v997_v19, 4 }
 0x1d0   : > { %3120 = vmatmul.bf16.gmra.mxu0 %v11519_v43  ;;  %1252 = vst.msk [vmem:[#allocation2 + $0x148] sm:$0xf] %vm880_vm8, %v1217_v35  ;;  %v11533_v62 = vadd.f32 %v11329_v17, %v2844_v25  ;;  %3208 = vmatmul.bf16.gmra.mxu2 %v11521_v8  ;;  %v15501_v25 = vld [vmem:[#allocation24_spill] sm:$0xff] }
 0x1d1   : > { %3164 = vmatmul.bf16.gmra.mxu1 %v11524_v41  ;;  %v1030_v23 = vsel %vm649_vm3, %v1016_v6, %v997_v19  ;;  %v11550_v35 = vadd.f32 %v15501_v25, %v11280_v28  ;;  %v934_v25 = vld [vmem:[%s10070_s29 + $0xa4] sm:$0xf] }
 0x1d2   : > { %v11514_v34 = vpop.f32.mrf.mxu3  ;;  %v2802_v38 = vpop.f32.mrf.mxu1  ;;  %15500 = vst [vmem:[#allocation15_spill] sm:$0xff] %v11533_v62  ;;  %v8088_v62 = vld [vmem:[#allocation2 + $0x140] sm:$0xf] }
 0x1d3   : > { %v2803_v14 = vadd.f32 %v2802_v38, %v2758_v46  ;;  %v1219_v63 = vpop.permute.xlu2 %1218  ;;  %1058 = vst.msk [vmem:[#allocation2 + $0x160] sm:$0xff] %vm10480_vm5, %v1030_v23  ;;  %v2846_v50 = vpop.f32.mrf.mxu2 }
 0x1d4   : > { %1253 = vst.msk [vmem:[#allocation2 + $0x158] sm:$0xf] %vm880_vm8, %v1219_v63  ;;  %v999_v46 = vpop.permute.xlu1 %998 }
 0x1d5   : > { %v1017_v1 = vrot.slane %v999_v46, 4  ;;  %15502 = vst [vmem:[#allocation16_spill] sm:$0xff] %v11550_v35  ;;  %v15504_v35 = vld [vmem:[#allocation25_spill] sm:$0xff] }
 0x1d6   : > { %v2760_v17 = vpop.f32.mrf.mxu0  ;;  %v1111_v6 = vpop.permute.xlu0 %1110  ;;  %948 = vst.msk [vmem:[#allocation2 + $0x180] sm:$0xf] %vm564_vm1, %v934_v25  ;;  %v11580_v7 = vadd.f32 %v15504_v35, %v11302_v10  ;;  %v935_v35 = vld [vmem:[%s10070_s29 + $0xb4] sm:$0xf] }
 0x1d7   : > { %3418 = vmatmul.bf16.vlgmr.msrb.gmra.mxu3 %v11258_v31  ;;  %v2847_v31 = vadd.f32 %v2846_v50, %v2803_v14  ;;  %v1031_v23 = vsel %vm649_vm3, %v1017_v1, %v999_v46  ;;  %v1129_v16 = vrot.slane %v1111_v6, 4  ;;  %949 = vst.msk [vmem:[#allocation2 + $0x190] sm:$0xf] %vm564_vm1, %v935_v35 }
 0x1d8   : > { %1059 = vst.msk [vmem:[#allocation2 + $0x170] sm:$0xff] %vm10480_vm5, %v1031_v23 }
 0x1d9   : > { %v11553_v63 = vadd.f32 %v11345_v60, %v2847_v31  ;;  %v1143_v60 = vsel %vm764_vm2, %v1129_v16, %v1111_v6  ;;  %v8090_v31 = vld [vmem:[#allocation2 + $0x150] sm:$0xf0] }
 0x1da   : > { %v11542_v4 = vpop.f32.mrf.mxu3  ;;  %v2804_v55 = vpop.f32.mrf.mxu1  ;;  %1171 = vst.msk [vmem:[#allocation2 + $0x174] sm:$0xff] %vm10514_vm9, %v1143_v60  ;;  %v8104_v35 = vld [vmem:[#allocation2 + $0x160] sm:$0xf] }
 0x1db   : > { %v2805_v59 = vadd.f32 %v2804_v55, %v2760_v17  ;;  %v1109_v38 = vpop.permute.xlu2 %1108  ;;  %15503 = vst [vmem:[#allocation17_spill] sm:$0xff] %v11553_v63  ;;  %v8096_v17 = vld [vmem:[#allocation2 + $0x148] sm:$0xf]  ;;  %v9445_v50 = vld [vmem:[#allocation2 + $0x154] sm:$0xf0]  ;;  %v2848_v14 = vpop.f32.mrf.mxu2  ;;  %v11569_v63 = vor.u32 %v9444_v40, %v8088_v62 }
 0x1dc   : > { %v1128_v19 = vrot.slane %v1109_v38, 4  ;;  %v9442_v55 = vld [vmem:[#allocation2 + $0x144] sm:$0xf]  ;;  %v1221_v16 = vpop.permute.xlu1 %1220 }
 0x1dd   : > { %v11574_v6 = vor.u32 %v9442_v55, %v8090_v31 }
 0x1de   : > { %v1142_v28 = vsel %vm764_vm2, %v1128_v19, %v1109_v38  ;;  %v2763_v1 = vpop.f32.mrf.mxu0  ;;  %v11571_v38 = vor.u32 %v9445_v50, %v8096_v17  ;;  %v2849_v19 = vadd.f32 %v2848_v14, %v2805_v59  ;;  %v1001_v59 = vpop.permute.xlu0 %1000 }
 0x1df   : > { %1170 = vst.msk [vmem:[#allocation2 + $0x164] sm:$0xff] %vm10514_vm9, %v1142_v28  ;;  %v1018_v40 = vrot.slane %v1001_v59, 4 }
 0x1e0   : > { %3125 = vmatmul.bf16.gmra.mxu0 %v11569_v63  ;;  %1254 = vst.msk [vmem:[#allocation2 + $0x168] sm:$0xf] %vm880_vm8, %v1221_v16  ;;  %v11583_v62 = vadd.f32 %v11357_v48, %v2849_v19  ;;  %3213 = vmatmul.bf16.gmra.mxu2 %v11571_v38  ;;  %v15506_v19 = vld [vmem:[#allocation28_spill] sm:$0xff] }
 0x1e1   : > { %3169 = vmatmul.bf16.gmra.mxu1 %v11574_v6  ;;  %v1032_v17 = vsel %vm649_vm3, %v1018_v40, %v1001_v59  ;;  %v11600_v16 = vadd.f32 %v15506_v19, %v11320_v45 }
 0x1e2   : > { %v11564_v46 = vpop.f32.mrf.mxu3  ;;  %v2807_v23 = vpop.f32.mrf.mxu1  ;;  %15505 = vst [vmem:[#allocation18_spill] sm:$0xff] %v11583_v62 }
 0x1e3   : > { %v2808_v28 = vadd.f32 %v2807_v23, %v2763_v1  ;;  %v1223_v60 = vpop.permute.xlu2 %1222  ;;  %1060 = vst.msk [vmem:[#allocation2 + $0x180] sm:$0xff] %vm10480_vm5, %v1032_v17  ;;  %v2851_v50 = vpop.f32.mrf.mxu2 }
 0x1e4   : > { %1255 = vst.msk [vmem:[#allocation2 + $0x178] sm:$0xf] %vm880_vm8, %v1223_v60  ;;  %v1003_v1 = vpop.permute.xlu1 %1002 }
 0x1e5   : > { %v1019_v25 = vrot.slane %v1003_v1, 4  ;;  %15507 = vst [vmem:[#allocation22_spill] sm:$0xff] %v11600_v16 }
 0x1e6   : > { %v2765_v48 = vpop.f32.mrf.mxu0  ;;  %v1115_v40 = vpop.permute.xlu0 %1114 }
 0x1e7   : > { %3423 = vmatmul.bf16.gmra.mxu3 %v11299_v9  ;;  %v2852_v9 = vadd.f32 %v2851_v50, %v2808_v28  ;;  %v1033_v17 = vsel %vm649_vm3, %v1019_v25, %v1003_v1  ;;  %v1131_v14 = vrot.slane %v1115_v40, 4  ;;  %v9448_v28 = vld [vmem:[#allocation2 + $0x16c] sm:$0xf0]  ;;  %v8112_v50 = vld [vmem:[#allocation2 + $0x168] sm:$0xf] }
 0x1e8   : > { %1061 = vst.msk [vmem:[#allocation2 + $0x190] sm:$0xff] %vm10480_vm5, %v1033_v17  ;;  %v8106_v1 = vld [vmem:[#allocation2 + $0x170] sm:$0xf0] }
 0x1e9   : > { %v11603_v60 = vadd.f32 %v11376_v49, %v2852_v9  ;;  %v9446_v9 = vld [vmem:[#allocation2 + $0x164] sm:$0xf] }
 0x1ea   : > { %v11592_v10 = vpop.f32.mrf.mxu3  ;;  %v2809_v55 = vpop.f32.mrf.mxu1  ;;  %v11626_v62 = vor.u32 %v9446_v9, %v8106_v1 }
 0x1eb   : > { %v2810_v31 = vadd.f32 %v2809_v55, %v2765_v48  ;;  %v1113_v23 = vpop.permute.xlu2 %1112  ;;  %15508 = vst [vmem:[#allocation21_spill] sm:$0xff] %v11603_v60  ;;  %v9449_v49 = vld [vmem:[#allocation2 + $0x174] sm:$0xf0]  ;;  %v1145_v55 = vsel %vm764_vm2, %v1131_v14, %v1115_v40  ;;  %v7572_v48 = vld [vmem:[%s10070_s29 + $0x20] sm:$0xf]  ;;  %v2853_v17 = vpop.f32.mrf.mxu2 }
 0x1ec   : > { %v1130_v59 = vrot.slane %v1113_v23, 4  ;;  %1173 = vst.msk [vmem:[#allocation2 + $0x194] sm:$0xff] %vm10514_vm9, %v1145_v55  ;;  %v936_v60 = vld [vmem:[%s10070_s29 + $0xc4] sm:$0xf]  ;;  %1456 = vrot.lane.b32.xlu2 %v7572_v48, %s9886_s17 }
 0x1ed   : > { %950 = vst.msk [vmem:[#allocation2 + $0x1a0] sm:$0xf] %vm564_vm1, %v936_v60  ;;  %v2854_v14 = vadd.f32 %v2853_v17, %v2810_v31  ;;  %v7574_v60 = vld [vmem:[%s10070_s29 + $0x40] sm:$0xf] }
 0x1ee   : > { %v1144_v45 = vsel %vm764_vm2, %v1130_v59, %v1113_v23  ;;  %v2768_v19 = vpop.f32.mrf.mxu0  ;;  %v11620_v23 = vor.u32 %v9448_v28, %v8104_v35  ;;  %v11622_v59 = vor.u32 %v9449_v49, %v8112_v50  ;;  %v11632_v35 = vadd.f32 %v11118_v51, %v11336_v44  ;;  %v1005_v31 = vpop.permute.xlu0 %1004  ;;  %v7587_v50 = vld [vmem:[%s10070_s29 + $0x34] sm:$0xf] }
 0x1ef   : > { %1172 = vst.msk [vmem:[#allocation2 + $0x184] sm:$0xff] %vm10514_vm9, %v1144_v45  ;;  %v1225_v45 = vpop.permute.xlu1 %1224  ;;  %v11635_v28 = vadd.f32 %v11395_v22, %v2854_v14  ;;  %v937_v22 = vld [vmem:[%s10070_s29 + $0xd4] sm:$0xf] }
 0x1f0   : > { %3130 = vmatmul.bf16.gmra.mxu0 %v11620_v23  ;;  %1256 = vst.msk [vmem:[#allocation2 + $0x188] sm:$0xf] %vm880_vm8, %v1225_v45  ;;  %3218 = vmatmul.bf16.gmra.mxu2 %v11622_v59  ;;  %v11654_v45 = vadd.f32 %v11160_v24, %v11350_v5 }
 0x1f1   : > { %15509 = vst [vmem:[#allocation23_spill] sm:$0xff] %v11632_v35  ;;  %3174 = vmatmul.bf16.gmra.mxu1 %v11626_v62 }
 0x1f2   : > { %v11614_v25 = vpop.f32.mrf.mxu3  ;;  %v2812_v16 = vpop.f32.mrf.mxu1  ;;  %15510 = vst [vmem:[#allocation26_spill] sm:$0xff] %v11635_v28 }
 0x1f3   : > { %v2813_v40 = vadd.f32 %v2812_v16, %v2768_v19  ;;  %v1227_v55 = vpop.permute.xlu2 %1226  ;;  %v1020_v16 = vrot.slane %v1005_v31, 4  ;;  %v2856_v49 = vpop.f32.mrf.mxu2  ;;  %951 = vst.msk [vmem:[#allocation2 + $0x1b0] sm:$0xf] %vm564_vm1, %v937_v22 }
 0x1f4   : > { %1257 = vst.msk [vmem:[#allocation2 + $0x198] sm:$0xf] %vm880_vm8, %v1227_v55  ;;  %1570 = vrot.lane.b32.xlu2 %v7587_v50, %s9889_s26  ;;  %v8120_v50 = vld [vmem:[#allocation2 + $0x180] sm:$0xf] }
 0x1f5   : > { %v1034_v48 = vsel %vm649_vm3, %v1020_v16, %v1005_v31  ;;  %15511 = vst [vmem:[#allocation27_spill] sm:$0xff] %v11654_v45 }
 0x1f6   : > { %1062 = vst.msk [vmem:[#allocation2 + $0x1a0] sm:$0xff] %vm10480_vm5, %v1034_v48  ;;  %v2770_v44 = vpop.f32.mrf.mxu0  ;;  %v1119_v16 = vpop.permute.xlu0 %1118 }
 0x1f7   : > { %3428 = vmatmul.bf16.gmra.mxu3 %v11333_v2  ;;  %v2857_v2 = vadd.f32 %v2856_v49, %v2813_v40  ;;  %v1007_v19 = vpop.permute.xlu1 %1006  ;;  %v1133_v22 = vrot.slane %v1119_v16, 4  ;;  %v9452_v40 = vld [vmem:[#allocation2 + $0x18c] sm:$0xf0]  ;;  %v8128_v5 = vld [vmem:[#allocation2 + $0x188] sm:$0xf] }
 0x1f8   : > { %v1021_v17 = vrot.slane %v1007_v19, 4 }
 0x1f9   : > { %v11657_v55 = vadd.f32 %v11414_v39, %v2857_v2  ;;  %v1147_v49 = vsel %vm764_vm2, %v1133_v22, %v1119_v16  ;;  %v8122_v2 = vld [vmem:[#allocation2 + $0x190] sm:$0xf0] }
 0x1fa   : > { %v11644_v51 = vpop.f32.mrf.mxu3  ;;  %v2814_v9 = vpop.f32.mrf.mxu1  ;;  %v1035_v48 = vsel %vm649_vm3, %v1021_v17, %v1007_v19 }
 0x1fb   : > { %v2815_v1 = vadd.f32 %v2814_v9, %v2770_v44  ;;  %v1117_v14 = vpop.permute.xlu2 %1116  ;;  %15512 = vst [vmem:[#allocation19_spill] sm:$0xff] %v11657_v55  ;;  %v9453_v39 = vld [vmem:[#allocation2 + $0x194] sm:$0xf0]  ;;  %v9450_v9 = vld [vmem:[#allocation2 + $0x184] sm:$0xf] }
 0x1fc   : > { %v1132_v31 = vrot.slane %v1117_v14, 4  ;;  %1063 = vst.msk [vmem:[#allocation2 + $0x1b0] sm:$0xff] %vm10480_vm5, %v1035_v48  ;;  %v1316_v44 = vld [vmem:[%s10070_s29 + $0xc] sm:$0xf]  ;;  %v2858_v48 = vpop.f32.mrf.mxu2  ;;  %1460 = vrot.lane.b32.xlu2 %v7574_v60, %s9886_s17 }
 0x1fd   : > { %1175 = vst.msk [vmem:[#allocation2 + $0x1b4] sm:$0xff] %vm10514_vm9, %v1147_v49  ;;  %1344 = vrot.lane.b32.xlu0 %v1316_v44, %s9887_s30  ;;  %v2859_v16 = vadd.f32 %v2858_v48, %v2815_v1  ;;  %v8512_v49 = vld [vmem:[%s15304_s1 + $0x1f0] sm:$0xf]  ;;  %v1317_v44 = vld [vmem:[%s10070_s29 + $0x1c] sm:$0xf] }
 0x1fe   : > { %v1146_v24 = vsel %vm764_vm2, %v1132_v31, %v1117_v14  ;;  %v2773_v17 = vpop.f32.mrf.mxu0  ;;  %v11674_v14 = vor.u32 %v9452_v40, %v8120_v50  ;;  %v11676_v31 = vor.u32 %v9453_v39, %v8128_v5  ;;  %v9549_v50 = vld [vmem:[%s15304_s1 + $0x1f4] sm:$0xf0]  ;;  %v11691_v40 = vadd.f32 %v11178_v57, %v11367_v11  ;;  %1346 = vrot.lane.b32.xlu1 %v1317_v44, %s9887_s30  ;;  %v9547_v11 = vld [vmem:[%s15304_s1 + $0x1e4] sm:$0xf0]  ;;  %v8496_v48 = vld [vmem:[%s15304_s1 + $0x1d0] sm:$0xf] }
 0x1ff   : > { %1174 = vst.msk [vmem:[#allocation2 + $0x1a4] sm:$0xff] %vm10514_vm9, %v1146_v24  ;;  %v11680_v24 = vor.u32 %v9450_v9, %v8122_v2  ;;  %v11694_v60 = vadd.f32 %v11431_v36, %v2859_v16  ;;  %v11697_v1 = vor.u32 %v9549_v50, %v8512_v49  ;;  %v1229_v5 = vpop.permute.xlu1 %1228  ;;  %v7573_v2 = vld [vmem:[%s10070_s29 + $0x30] sm:$0xf]  ;;  %v9545_v50 = vld [vmem:[%s15304_s1 + $0x1d4] sm:$0xf0] }
 0x200   : > { %3135 = vmatmul.bf16.gmra.mxu0 %v11674_v14  ;;  %15513 = vst [vmem:[#allocation20_spill] sm:$0xff] %v11691_v40  ;;  %3223 = vmatmul.bf16.gmra.mxu2 %v11676_v31 }
 0x201   : > { %15514 = vst [vmem:[#allocation24_spill] sm:$0xff] %v11694_v60  ;;  %3179 = vmatmul.bf16.gmra.mxu1 %v11680_v24  ;;  %4226 = vmatpush.bf16.msra.mxu3 %v11697_v1 }
 0x202   : > { %v11668_v19 = vpop.f32.mrf.mxu3  ;;  %v2817_v55 = vpop.f32.mrf.mxu1  ;;  %1258 = vst.msk [vmem:[#allocation2 + $0x1a8] sm:$0xf] %vm880_vm8, %v1229_v5  ;;  %v11729_v5 = vor.u32 %v9545_v50, %v8496_v48 }
 0x203   : > { %v2818_v22 = vadd.f32 %v2817_v55, %v2773_v17  ;;  %v1231_v55 = vpop.permute.xlu2 %1230  ;;  %v7589_v17 = vld [vmem:[%s10070_s29 + $0x54] sm:$0xf]  ;;  %v9456_v57 = vld [vmem:[#allocation2 + $0x1ac] sm:$0xf0] }
 0x204   : > { %1259 = vst.msk [vmem:[#allocation2 + $0x1b8] sm:$0xf] %vm880_vm8, %v1231_v55  ;;  %v2861_v16 = vpop.f32.mrf.mxu2  ;;  %1574 = vrot.lane.b32.xlu2 %v7589_v17, %s9889_s26  ;;  %v8136_v17 = vld [vmem:[#allocation2 + $0x1a0] sm:$0xf] }
 0x205   : > { %1458 = vrot.lane.b32.xlu0 %v7573_v2, %s9886_s17  ;;  %v2862_v55 = vadd.f32 %v2861_v16, %v2818_v22  ;;  %v1318_v22 = vld [vmem:[%s10070_s29 + $0x2c] sm:$0xf]  ;;  %v11755_v60 = vor.u32 %v9456_v57, %v8136_v17  ;;  %v8480_v57 = vld [vmem:[%s15304_s1 + $0x1b0] sm:$0xf]  ;;  %v9541_v17 = vld [vmem:[%s15304_s1 + $0x1b4] sm:$0xf0] }
 0x206   : > { %v2775_v39 = vpop.f32.mrf.mxu0 }
 0x207   : > { %3433 = vmatmul.bf16.gmra.mxu3 %v11362_v47  ;;  %v8504_v47 = vld [vmem:[%s15304_s1 + $0x1e0] sm:$0xf]  ;;  %v11737_v2 = vadd.f32 %v11454_v0, %v2862_v55 }
 0x208   : > { %v11716_v9 = vor.u32 %v9547_v11, %v8504_v47  ;;  %v7586_v47 = vld [vmem:[%s10070_s29 + $0x24] sm:$0xf]  ;;  %v11734_v11 = vadd.f32 %v11196_v12, %v11382_v18  ;;  %v8488_v12 = vld [vmem:[%s15304_s1 + $0x1c0] sm:$0xf]  ;;  %v9543_v18 = vld [vmem:[%s15304_s1 + $0x1c4] sm:$0xf0] }
 0x209   : > { %15516 = vst [vmem:[#allocation28_spill] sm:$0xff] %v11737_v2  ;;  %1568 = vrot.lane.b32.xlu1 %v7586_v47, %s9889_s26  ;;  %v8144_v48 = vld [vmem:[#allocation2 + $0x1a8] sm:$0xf]  ;;  %v11751_v55 = vor.u32 %v9543_v18, %v8488_v12  ;;  %v7576_v2 = vld [vmem:[%s10070_s29 + $0x60] sm:$0xf] }
 0x20a   : > { %v11714_v36 = vpop.f32.mrf.mxu3  ;;  %v2819_v49 = vpop.f32.mrf.mxu1  ;;  %4227 = vmatpush.bf16.msra.mxu3 %v11716_v9  ;;  %15515 = vst [vmem:[#allocation25_spill] sm:$0xff] %v11734_v11 }
 0x20b   : > { %v2820_v44 = vadd.f32 %v2819_v49, %v2775_v39  ;;  %v9454_v39 = vld [vmem:[#allocation2 + $0x1a4] sm:$0xf]  ;;  %v9457_v16 = vld [vmem:[#allocation2 + $0x1b4] sm:$0xf0]  ;;  %v8138_v49 = vld [vmem:[#allocation2 + $0x1b0] sm:$0xf0] }
 0x20c   : > { %v2863_v47 = vpop.f32.mrf.mxu2  ;;  %v11757_v40 = vor.u32 %v9457_v16, %v8144_v48  ;;  %1464 = vrot.lane.b32.xlu2 %v7576_v2, %s9886_s17  ;;  %v11761_v35 = vor.u32 %v9454_v39, %v8138_v49  ;;  %v11773_v2 = vadd.f32 %v11214_v52, %v11405_v32  ;;  %v8472_v52 = vld [vmem:[%s15304_s1 + $0x1a0] sm:$0xf]  ;;  %v9539_v32 = vld [vmem:[%s15304_s1 + $0x1a4] sm:$0xf0]  ;;  %v7591_v16 = vld [vmem:[%s10070_s29 + $0x74] sm:$0xf] }
 0x20d   : > { %1348 = vrot.lane.b32.xlu0 %v1318_v22, %s9887_s30  ;;  %v2864_v45 = vadd.f32 %v2863_v47, %v2820_v44  ;;  %v1319_v22 = vld [vmem:[%s10070_s29 + $0x3c] sm:$0xf]  ;;  %v7575_v48 = vld [vmem:[%s10070_s29 + $0x50] sm:$0xf]  ;;  %v8464_v49 = vld [vmem:[%s15304_s1 + $0x190] sm:$0xf] }
 0x20e   : > { %4228 = vmatpush.bf16.msra.mxu3 %v11729_v5  ;;  %v2778_v50 = vpop.f32.mrf.mxu0  ;;  %15518 = vst [vmem:[#allocation30_spill] sm:$0xff] %v11773_v2  ;;  %v9501_v39 = vld [vmem:[%s15304_s1 + $0x74] sm:$0xf0]  ;;  %v7613_v2 = vld [vmem:[%s10070_s29 + $0xf8] sm:$0xf] }
 0x20f   : > { %v11776_v44 = vadd.f32 %v11469_v21, %v2864_v45  ;;  %v11796_v45 = vor.u32 %v9539_v32, %v8472_v52  ;;  %v7601_v52 = vld [vmem:[%s10070_s29 + $0x38] sm:$0xf]  ;;  %v7588_v32 = vld [vmem:[%s10070_s29 + $0x44] sm:$0xf]  ;;  %1651 = vst.msk [vmem:[#allocation2 + $0x29c] sm:$0xf] %vm564_vm1, %v7613_v2 }
 0x210   : > { %3140 = vmatmul.bf16.gmra.mxu0 %v11755_v60  ;;  %3228 = vmatmul.bf16.gmra.mxu2 %v11757_v40  ;;  %1639 = vst.msk [vmem:[#allocation2 + $0x1dc] sm:$0xf] %vm564_vm1, %v7601_v52  ;;  %v8490_v2 = vld [vmem:[%s15304_s1 + $0x1c8] sm:$0xf0] }
 0x211   : > { %15519 = vst [vmem:[#allocation31_spill] sm:$0xff] %v11776_v44  ;;  %3184 = vmatmul.bf16.gmra.mxu1 %v11761_v35  ;;  %1350 = vrot.lane.b32.xlu1 %v1319_v22, %s9887_s30  ;;  %v7600_v22 = vld [vmem:[%s10070_s29 + $0x28] sm:$0xf] }
 0x212   : > { %v11749_v0 = vpop.f32.mrf.mxu3  ;;  %v2822_v11 = vpop.f32.mrf.mxu1  ;;  %4229 = vmatpush.bf16.msra.mxu3 %v11751_v55  ;;  %1638 = vst.msk [vmem:[#allocation2 + $0x1cc] sm:$0xf] %vm564_vm1, %v7600_v22 }
 0x213   : > { %15517 = vst [vmem:[#allocation29_spill] sm:$0xff] %v11749_v0  ;;  %v2823_v28 = vadd.f32 %v2822_v11, %v2778_v50  ;;  %v11779_v11 = vor.u32 %v9541_v17, %v8480_v57  ;;  %v9537_v50 = vld [vmem:[%s15304_s1 + $0x194] sm:$0xf0] }
 0x214   : > { %v2866_v12 = vpop.f32.mrf.mxu2  ;;  %1578 = vrot.lane.b32.xlu2 %v7591_v16, %s9889_s26  ;;  %v11809_v17 = vor.u32 %v9537_v50, %v8464_v49  ;;  %v8448_v49 = vld [vmem:[%s15304_s1 + $0x170] sm:$0xf]  ;;  %v1320_v50 = vld [vmem:[%s10070_s29 + $0x4c] sm:$0xf] }
 0x215   : > { %1462 = vrot.lane.b32.xlu0 %v7575_v48, %s9886_s17  ;;  %v2867_v47 = vadd.f32 %v2866_v12, %v2823_v28  ;;  %v11817_v48 = vadd.f32 %v11232_v30, %v11422_v27  ;;  %v9535_v30 = vld [vmem:[%s15304_s1 + $0x184] sm:$0xf0]  ;;  %v9533_v12 = vld [vmem:[%s15304_s1 + $0x174] sm:$0xf0]  ;;  %v8320_v28 = vld [vmem:[%s15304_s1 + $0x70] sm:$0xf] }
 0x216   : > { %4230 = vmatpush.bf16.msra.mxu3 %v11779_v11  ;;  %v2780_v21 = vpop.f32.mrf.mxu0  ;;  %v11844_v52 = vor.u32 %v9533_v12, %v8448_v49  ;;  %v8384_v49 = vld [vmem:[%s15304_s1 + $0xf0] sm:$0xf]  ;;  %v9517_v12 = vld [vmem:[%s15304_s1 + $0xf4] sm:$0xf0] }
 0x217   : > { %3438 = vmatmul.bf16.gmra.mxu3 %v11401_v56  ;;  %15521 = vst [vmem:[#allocation33_spill] sm:$0xff] %v11817_v48  ;;  %v11820_v16 = vadd.f32 %v11492_v29, %v2867_v47 }
 0x218   : > { %15524 = vst [vmem:[#allocation36_spill] sm:$0xff] %v11844_v52  ;;  %4182 = vmatpush.bf16.msra.mxu2 %v11844_v52  ;;  %v9519_v52 = vld [vmem:[%s15304_s1 + $0x104] sm:$0xf0] }
 0x219   : > { %15522 = vst [vmem:[#allocation34_spill] sm:$0xff] %v11820_v16  ;;  %1572 = vrot.lane.b32.xlu1 %v7588_v32, %s9889_s26  ;;  %v7578_v32 = vld [vmem:[%s10070_s29 + $0x80] sm:$0xf] }
 0x21a   : > { %v11794_v56 = vpop.f32.mrf.mxu3  ;;  %v2824_v18 = vpop.f32.mrf.mxu1  ;;  %4231 = vmatpush.bf16.msra.mxu3 %v11796_v45 }
 0x21b   : > { %15520 = vst [vmem:[#allocation32_spill] sm:$0xff] %v11794_v56  ;;  %v2825_v57 = vadd.f32 %v2824_v18, %v2780_v21  ;;  %v8456_v21 = vld [vmem:[%s15304_s1 + $0x180] sm:$0xf] }
 0x21c   : > { %v11841_v18 = vor.u32 %v9535_v30, %v8456_v21  ;;  %v2868_v47 = vpop.f32.mrf.mxu2  ;;  %1468 = vrot.lane.b32.xlu2 %v7578_v32, %s9886_s17  ;;  %v11856_v30 = vor.u32 %v9501_v39, %v8320_v28  ;;  %v11870_v39 = vadd.f32 %v11252_v58, %v11443_v37 }
 0x21d   : > { %1352 = vrot.lane.b32.xlu0 %v1320_v50, %s9887_s30  ;;  %v2869_v16 = vadd.f32 %v2868_v47, %v2825_v57  ;;  %v11866_v57 = vor.u32 %v9517_v12, %v8384_v49  ;;  %v9531_v50 = vld [vmem:[%s15304_s1 + $0x164] sm:$0xf0]  ;;  %v7602_v49 = vld [vmem:[%s10070_s29 + $0x48] sm:$0xf] }
 0x21e   : > { %4232 = vmatpush.bf16.msra.mxu3 %v11809_v17  ;;  %v2783_v29 = vpop.f32.mrf.mxu0  ;;  %15525 = vst [vmem:[#allocation37_spill] sm:$0xff] %v11856_v30  ;;  %4094 = vmatpush.bf16.msra.mxu0 %v11856_v30  ;;  %v7603_v12 = vld [vmem:[%s10070_s29 + $0x58] sm:$0xf] }
 0x21f   : > { %15526 = vst [vmem:[#allocation38_spill] sm:$0xff] %v11866_v57  ;;  %v11873_v28 = vadd.f32 %v11514_v34, %v2869_v16  ;;  %4138 = vmatpush.bf16.msra.mxu1 %v11866_v57  ;;  %v7593_v34 = vld [vmem:[%s10070_s29 + $0x94] sm:$0xf]  ;;  %v9548_v57 = vld [vmem:[%s15304_s1 + $0x1f4] sm:$0xf] }
 0x220   : > { %3286 = vmatmul.bf16.vlgmr.msrb.gmra.mxu0 %v11438_v13  ;;  %15527 = vst [vmem:[#allocation39_spill] sm:$0xff] %v11870_v39  ;;  %3374 = vmatmul.bf16.vlgmr.msrb.gmra.mxu2 %v11440_v53  ;;  %v1321_v13 = vld [vmem:[%s10070_s29 + $0x5c] sm:$0xf]  ;;  %v8440_v53 = vld [vmem:[%s15304_s1 + $0x160] sm:$0xf] }
 0x221   : > { %15528 = vst [vmem:[#allocation40_spill] sm:$0xff] %v11873_v28  ;;  %3330 = vmatmul.bf16.vlgmr.msrb.gmra.mxu1 %v11445_v26  ;;  %1354 = vrot.lane.b32.xlu1 %v1321_v13, %s9887_s30  ;;  %v7577_v26 = vld [vmem:[%s10070_s29 + $0x70] sm:$0xf]  ;;  %v11896_v32 = vor.u32 %v9531_v50, %v8440_v53  ;;  %v7590_v13 = vld [vmem:[%s10070_s29 + $0x64] sm:$0xf]  ;;  %v15539_v28 = vld [vmem:[#allocation11_spill] sm:$0xff] }
 0x222   : > { %v11833_v27 = vpop.f32.mrf.mxu3  ;;  %v2827_v22 = vpop.f32.mrf.mxu1  ;;  %4233 = vmatpush.bf16.msra.mxu3 %v11841_v18  ;;  %1640 = vst.msk [vmem:[#allocation2 + $0x1ec] sm:$0xf] %vm564_vm1, %v7602_v49  ;;  %v9499_v53 = vld [vmem:[%s15304_s1 + $0x64] sm:$0xf0]  ;;  %v8376_v50 = vld [vmem:[%s15304_s1 + $0xe0] sm:$0xf] }
 0x223   : > { %15523 = vst [vmem:[#allocation35_spill] sm:$0xff] %v11833_v27  ;;  %v2828_v21 = vadd.f32 %v2827_v22, %v2783_v29  ;;  %4183 = vmatpush.bf16.msra.mxu2 %v11896_v32 }
 0x224   : > { %v2871_v16 = vpop.f32.mrf.mxu2  ;;  %1582 = vrot.lane.b32.xlu2 %v7593_v34, %s9889_s26  ;;  %15530 = vst [vmem:[#allocation42_spill] sm:$0xff] %v11896_v32 }
 0x225   : > { %1466 = vrot.lane.b32.xlu0 %v7577_v26, %s9886_s17  ;;  %v2872_v47 = vadd.f32 %v2871_v16, %v2828_v21  ;;  %v11904_v26 = vadd.f32 %v11274_v42, %v11460_v3  ;;  %1641 = vst.msk [vmem:[#allocation2 + $0x1fc] sm:$0xf] %vm564_vm1, %v7603_v12  ;;  %v1322_v16 = vld [vmem:[%s10070_s29 + $0x6c] sm:$0xf]  ;;  %v8312_v42 = vld [vmem:[%s15304_s1 + $0x60] sm:$0xf] }
 0x226   : > { %v2785_v37 = vpop.f32.mrf.mxu0  ;;  %v15536_v21 = vld [vmem:[#allocation8_spill] sm:$0xff] }
 0x227   : > { %3443 = vmatmul.bf16.gmra.mxu3 %v11436_v20  ;;  %15531 = vst [vmem:[#allocation43_spill] sm:$0xff] %v11904_v26  ;;  %v11907_v29 = vadd.f32 %v11542_v4, %v2872_v47  ;;  %v9515_v47 = vld [vmem:[%s15304_s1 + $0xe4] sm:$0xf0] }
 0x229   : > { %15532 = vst [vmem:[#allocation44_spill] sm:$0xff] %v11907_v29  ;;  %1576 = vrot.lane.b32.xlu1 %v7590_v13, %s9889_s26  ;;  %v11932_v13 = vor.u32 %v9499_v53, %v8312_v42  ;;  %v11939_v29 = vadd.f32 %v15536_v21, %v11481_v61  ;;  %v8432_v21 = vld [vmem:[%s15304_s1 + $0x150] sm:$0xf]  ;;  %v9529_v53 = vld [vmem:[%s15304_s1 + $0x154] sm:$0xf0] }
 0x22a   : > { %v11884_v58 = vpop.f32.mrf.mxu3  ;;  %v2829_v20 = vpop.f32.mrf.mxu1  ;;  %v8162_v42 = vld [vmem:[#allocation2 + $0x1d8] sm:$0xf0] }
 0x22b   : > { %15529 = vst [vmem:[#allocation41_spill] sm:$0xff] %v11884_v58  ;;  %v2830_v22 = vadd.f32 %v2829_v20, %v2785_v37  ;;  %v7580_v20 = vld [vmem:[%s10070_s29 + $0xa0] sm:$0xf]  ;;  %4095 = vmatpush.bf16.msra.mxu0 %v11932_v13 }
 0x22c   : > { %v2873_v3 = vpop.f32.mrf.mxu2  ;;  %1472 = vrot.lane.b32.xlu2 %v7580_v20, %s9886_s17  ;;  %15534 = vst [vmem:[#allocation46_spill] sm:$0xff] %v11932_v13  ;;  %v1323_v20 = vld [vmem:[%s10070_s29 + $0x7c] sm:$0xf]  ;;  %v7611_v13 = vld [vmem:[%s10070_s29 + $0xd8] sm:$0xf] }
 0x22d   : > { %1356 = vrot.lane.b32.xlu0 %v1322_v16, %s9887_s30  ;;  %v2874_v49 = vadd.f32 %v2873_v3, %v2830_v22  ;;  %v11934_v16 = vor.u32 %v9515_v47, %v8376_v50  ;;  %15537 = vst [vmem:[#allocation8_spill] sm:$0xff] %v11939_v29  ;;  %v15540_v22 = vld [vmem:[#allocation9_spill] sm:$0xff]  ;;  %v7582_v29 = vld [vmem:[%s10070_s29 + $0xc0] sm:$0xf] }
 0x22e   : > { %v3111_v34 = vpop.f32.mrf.mxu0  ;;  %1649 = vst.msk [vmem:[#allocation2 + $0x27c] sm:$0xf] %vm564_vm1, %v7611_v13 }
 0x22f   : > { %15535 = vst [vmem:[#allocation47_spill] sm:$0xff] %v11934_v16  ;;  %v11942_v26 = vadd.f32 %v11564_v46, %v2874_v49  ;;  %4139 = vmatpush.bf16.msra.mxu1 %v11934_v16  ;;  %v7579_v46 = vld [vmem:[%s10070_s29 + $0x90] sm:$0xf]  ;;  %v11967_v49 = vor.u32 %v9529_v53, %v8432_v21  ;;  %v9497_v21 = vld [vmem:[%s15304_s1 + $0x54] sm:$0xf0] }
 0x230   : > { %3291 = vmatmul.bf16.gmra.mxu0 %v11476_v33  ;;  %v7610_v16 = vld [vmem:[%s10070_s29 + $0xc8] sm:$0xf] }
 0x231   : > { %15538 = vst [vmem:[#allocation48_spill] sm:$0xff] %v11942_v26  ;;  %3335 = vmatmul.bf16.gmra.mxu1 %v15539_v28  ;;  %1358 = vrot.lane.b32.xlu1 %v1323_v20, %s9887_s30  ;;  %v7595_v28 = vld [vmem:[%s10070_s29 + $0xb4] sm:$0xf]  ;;  %v7592_v20 = vld [vmem:[%s10070_s29 + $0x84] sm:$0xf] }
 0x232   : > { %v11914_v37 = vpop.f32.mrf.mxu3  ;;  %v3155_v4 = vpop.f32.mrf.mxu1  ;;  %15543 = vst [vmem:[#allocation9_spill] sm:$0xff] %v11967_v49  ;;  %4184 = vmatpush.bf16.msra.mxu2 %v11967_v49  ;;  %v1324_v26 = vld [vmem:[%s10070_s29 + $0x8c] sm:$0xf] }
 0x233   : > { %15533 = vst [vmem:[#allocation45_spill] sm:$0xff] %v11914_v37  ;;  %v3156_v12 = vadd.f32 %v3155_v4, %v3111_v34  ;;  %v15541_v34 = vld [vmem:[#allocation10_spill] sm:$0xff]  ;;  %v1290_v37 = vld [vmem:[%s10070_s29 + $0x28] sm:$0xf] }
 0x234   : > { %3379 = vmatmul.bf16.gmra.mxu2 %v15541_v34  ;;  %v3199_v3 = vpop.f32.mrf.mxu2  ;;  %1586 = vrot.lane.b32.xlu2 %v7595_v28, %s9889_s26  ;;  %v7605_v34 = vld [vmem:[%s10070_s29 + $0x78] sm:$0xf]  ;;  %v8304_v28 = vld [vmem:[%s15304_s1 + $0x50] sm:$0xf]  ;;  %1648 = vst.msk [vmem:[#allocation2 + $0x26c] sm:$0xf] %vm564_vm1, %v7610_v16 }
 0x235   : > { %1470 = vrot.lane.b32.xlu0 %v7579_v46, %s9886_s17  ;;  %v11964_v50 = vadd.f32 %v3199_v3, %v3156_v12  ;;  %1643 = vst.msk [vmem:[#allocation2 + $0x21c] sm:$0xf] %vm564_vm1, %v7605_v34  ;;  %v9459_v46 = vld [vmem:[#allocation2 + $0x1cc] sm:$0xf]  ;;  %v8368_v3 = vld [vmem:[%s15304_s1 + $0xd0] sm:$0xf]  ;;  %v11989_v34 = vor.u32 %v9497_v21, %v8304_v28 }
 0x236   : > { %v3113_v61 = vpop.f32.mrf.mxu0  ;;  %v7594_v28 = vld [vmem:[%s10070_s29 + $0xa4] sm:$0xf]  ;;  %v8296_v21 = vld [vmem:[%s15304_s1 + $0x40] sm:$0xf]  ;;  %1304 = vst.msk [vmem:[#allocation2 + $0x1e0] sm:$0xf] %vm564_vm1, %v1290_v37 }
 0x237   : > { %3448 = vmatmul.bf16.gmra.mxu3 %v15540_v22  ;;  %v7604_v22 = vld [vmem:[%s10070_s29 + $0x68] sm:$0xf]  ;;  %15545 = vst [vmem:[#allocation49_spill] sm:$0xff] %v11989_v34  ;;  %4096 = vmatpush.bf16.msra.mxu0 %v11989_v34 }
 0x238   : > { %1642 = vst.msk [vmem:[#allocation2 + $0x20c] sm:$0xf] %vm564_vm1, %v7604_v22 }
 0x239   : > { %1580 = vrot.lane.b32.xlu1 %v7592_v20, %s9889_s26  ;;  %v9513_v20 = vld [vmem:[%s15304_s1 + $0xd4] sm:$0xf0] }
 0x23a   : > { %v11953_v33 = vpop.f32.mrf.mxu3  ;;  %v3157_v4 = vpop.f32.mrf.mxu1  ;;  %v11998_v48 = vor.u32 %v9513_v20, %v8368_v3  ;;  %v9495_v20 = vld [vmem:[%s15304_s1 + $0x44] sm:$0xf0] }
 0x23b   : > { %15542 = vst [vmem:[#allocation11_spill] sm:$0xff] %v11953_v33  ;;  %v3158_v47 = vadd.f32 %v3157_v4, %v3113_v61  ;;  %v11987_v4 = vor.u32 %v9459_v46, %v8162_v42  ;;  %v1325_v42 = vld [vmem:[%s10070_s29 + $0x9c] sm:$0xf]  ;;  %v7597_v46 = vld [vmem:[%s10070_s29 + $0xd4] sm:$0xf] }
 0x23c   : > { %v3201_v53 = vpop.f32.mrf.mxu2  ;;  %15546 = vst [vmem:[#allocation50_spill] sm:$0xff] %v11998_v48  ;;  %1476 = vrot.lane.b32.xlu2 %v7582_v29, %s9886_s17  ;;  %4140 = vmatpush.bf16.msra.mxu1 %v11998_v48  ;;  %v7581_v29 = vld [vmem:[%s10070_s29 + $0xb0] sm:$0xf] }
 0x23d   : > { %v11996_v39 = vadd.f32 %v3201_v53, %v3158_v47  ;;  %1360 = vrot.lane.b32.xlu0 %v1324_v26, %s9887_s30 }
 0x23e   : > { %v3116_v61 = vpop.f32.mrf.mxu0 }
 0x240   : > { %3296 = vmatmul.bf16.gmra.mxu0 %v11519_v43  ;;  %v8424_v43 = vld [vmem:[%s15304_s1 + $0x140] sm:$0xf] }
 0x241   : > { %3340 = vmatmul.bf16.gmra.mxu1 %v11524_v41  ;;  %1362 = vrot.lane.b32.xlu1 %v1325_v42, %s9887_s30  ;;  %v8360_v42 = vld [vmem:[%s15304_s1 + $0xc0] sm:$0xf] }
 0x242   : > { %v11976_v12 = vpop.f32.mrf.mxu3  ;;  %v3160_v22 = vpop.f32.mrf.mxu1 }
 0x243   : > { %15544 = vst [vmem:[#allocation10_spill] sm:$0xff] %v11976_v12  ;;  %v3161_v12 = vadd.f32 %v3160_v22, %v3116_v61 }
 0x244   : > { %3384 = vmatmul.bf16.gmra.mxu2 %v11521_v8  ;;  %v3204_v41 = vpop.f32.mrf.mxu2  ;;  %v9527_v8 = vld [vmem:[%s15304_s1 + $0x144] sm:$0xf0]  ;;  %1590 = vrot.lane.b32.xlu2 %v7597_v46, %s9889_s26 }
 0x245   : > { %v12024_v3 = vadd.f32 %v3204_v41, %v3161_v12  ;;  %1474 = vrot.lane.b32.xlu0 %v7581_v29, %s9886_s17  ;;  %v12028_v22 = vor.u32 %v9527_v8, %v8424_v43  ;;  %v9511_v12 = vld [vmem:[%s15304_s1 + $0xc4] sm:$0xf0]  ;;  %v9463_v43 = vld [vmem:[#allocation2 + $0x1ec] sm:$0xf]  ;;  %v8178_v41 = vld [vmem:[#allocation2 + $0x1f8] sm:$0xf0] }
 0x246   : > { %v3118_v26 = vpop.f32.mrf.mxu0  ;;  %v7607_v29 = vld [vmem:[%s10070_s29 + $0x98] sm:$0xf]  ;;  %v12044_v46 = vor.u32 %v9511_v12, %v8360_v42  ;;  %v7584_v42 = vld [vmem:[%s10070_s29 + $0xe0] sm:$0xf]  ;;  %v12057_v12 = vor.u32 %v9463_v43, %v8178_v41  ;;  %v7583_v41 = vld [vmem:[%s10070_s29 + $0xd0] sm:$0xf] }
 0x247   : > { %4234 = vmatmul.bf16.vlgmr.msra.gmra.mxu3 %v11987_v4  ;;  %15548 = vst [vmem:[#allocation52_spill] sm:$0xff] %v12028_v22  ;;  %4185 = vmatpush.bf16.msra.mxu2 %v12028_v22 }
 0x248   : > { %15550 = vst [vmem:[#allocation54_spill] sm:$0xff] %v12044_v46  ;;  %4141 = vmatpush.bf16.msra.mxu1 %v12044_v46 }
 0x249   : > { %1645 = vst.msk [vmem:[#allocation2 + $0x23c] sm:$0xf] %vm564_vm1, %v7607_v29  ;;  %1584 = vrot.lane.b32.xlu1 %v7594_v28, %s9889_s26  ;;  %v1327_v28 = vld [vmem:[%s10070_s29 + $0xbc] sm:$0xf] }
 0x24a   : > { %v12010_v47 = vpop.f32.mrf.mxu3  ;;  %v3162_v61 = vpop.f32.mrf.mxu1 }
 0x24b   : > { %15547 = vst [vmem:[#allocation51_spill] sm:$0xff] %v12010_v47  ;;  %v3163_v53 = vadd.f32 %v3162_v61, %v3118_v26  ;;  %v12036_v47 = vor.u32 %v9495_v20, %v8296_v21  ;;  %v7606_v26 = vld [vmem:[%s10070_s29 + $0x88] sm:$0xf]  ;;  %v12051_v61 = vpop.permute.xlu2 %1456  ;;  %v1326_v20 = vld [vmem:[%s10070_s29 + $0xac] sm:$0xf] }
 0x24c   : > { %1644 = vst.msk [vmem:[#allocation2 + $0x22c] sm:$0xf] %vm564_vm1, %v7606_v26  ;;  %v3206_v26 = vpop.f32.mrf.mxu2  ;;  %1480 = vrot.lane.b32.xlu2 %v7584_v42, %s9886_s17  ;;  %v8288_v42 = vld [vmem:[%s15304_s1 + $0x30] sm:$0xf] }
 0x24d   : > { %15549 = vst [vmem:[#allocation53_spill] sm:$0xff] %v12036_v47  ;;  %4097 = vmatpush.bf16.msra.mxu0 %v12036_v47  ;;  %v12059_v29 = vadd.f32 %v3206_v26, %v3163_v53  ;;  %1364 = vrot.lane.b32.xlu0 %v1326_v20, %s9887_s30  ;;  %v7599_v20 = vld [vmem:[%s10070_s29 + $0xf4] sm:$0xf]  ;;  %v9493_v26 = vld [vmem:[%s15304_s1 + $0x34] sm:$0xf0] }
 0x24e   : > { %v3121_v21 = vpop.f32.mrf.mxu0  ;;  %v12091_v46 = vor.u32 %v9493_v26, %v8288_v42 }
 0x250   : > { %3301 = vmatmul.bf16.gmra.mxu0 %v11569_v63  ;;  %v9525_v63 = vld [vmem:[%s15304_s1 + $0x134] sm:$0xf0]  ;;  %15553 = vst [vmem:[#allocation57_spill] sm:$0xff] %v12091_v46 }
 0x251   : > { %3345 = vmatmul.bf16.gmra.mxu1 %v11574_v6  ;;  %1366 = vrot.lane.b32.xlu1 %v1327_v28, %s9887_s30 }
 0x252   : > { %v12053_v8 = vpop.f32.mrf.mxu3  ;;  %v3165_v47 = vpop.f32.mrf.mxu1  ;;  %4098 = vmatpush.bf16.msra.mxu0 %v12091_v46 }
 0x253   : > { %15551 = vst [vmem:[#allocation55_spill] sm:$0xff] %v12053_v8  ;;  %v3166_v22 = vadd.f32 %v3165_v47, %v3121_v21  ;;  %v8416_v47 = vld [vmem:[%s15304_s1 + $0x130] sm:$0xf]  ;;  %v12099_v48 = vpop.permute.xlu2 %1570 }
 0x254   : > { %3389 = vmatmul.bf16.gmra.mxu2 %v11571_v38  ;;  %v3209_v6 = vpop.f32.mrf.mxu2  ;;  %v12078_v38 = vor.u32 %v9525_v63, %v8416_v47  ;;  %1594 = vrot.lane.b32.xlu2 %v7599_v20, %s9889_s26  ;;  %v8352_v47 = vld [vmem:[%s15304_s1 + $0xb0] sm:$0xf]  ;;  %v9509_v63 = vld [vmem:[%s15304_s1 + $0xb4] sm:$0xf0]  ;;  %v8194_v20 = vld [vmem:[#allocation2 + $0x218] sm:$0xf0] }
 0x255   : > { %v12087_v28 = vadd.f32 %v3209_v6, %v3166_v22  ;;  %1478 = vrot.lane.b32.xlu0 %v7583_v41, %s9886_s17  ;;  %v12102_v22 = vor.u32 %v9509_v63, %v8352_v47  ;;  %v7608_v41 = vld [vmem:[%s10070_s29 + $0xa8] sm:$0xf]  ;;  %v7609_v6 = vld [vmem:[%s10070_s29 + $0xb8] sm:$0xf]  ;;  %v1328_v47 = vld [vmem:[%s10070_s29 + $0xcc] sm:$0xf] }
 0x256   : > { %v3123_v53 = vpop.f32.mrf.mxu0  ;;  %15552 = vst [vmem:[#allocation56_spill] sm:$0xff] %v12078_v38  ;;  %4186 = vmatpush.bf16.msra.mxu2 %v12078_v38  ;;  %v7628_v63 = vld [vmem:[%s10070_s29 + $0x24] sm:$0xf] }
 0x257   : > { %4239 = vmatmul.bf16.gmra.mxu3 %v12057_v12  ;;  %15554 = vst [vmem:[#allocation58_spill] sm:$0xff] %v12102_v22  ;;  %4142 = vmatpush.bf16.msra.mxu1 %v12102_v22 }
 0x258   : > { %1646 = vst.msk [vmem:[#allocation2 + $0x24c] sm:$0xf] %vm564_vm1, %v7608_v41 }
 0x259   : > { %1647 = vst.msk [vmem:[#allocation2 + $0x25c] sm:$0xf] %vm564_vm1, %v7609_v6  ;;  %v1329_v6 = vld [vmem:[%s10070_s29 + $0xdc] sm:$0xf] }
 0x25a   : > { %v12069_v43 = vpop.f32.mrf.mxu3  ;;  %v3167_v21 = vpop.f32.mrf.mxu1 }
 0x25b   : > { %v3168_v8 = vadd.f32 %v3167_v21, %v3123_v53  ;;  %v7596_v53 = vld [vmem:[%s10070_s29 + $0xc4] sm:$0xf]  ;;  %v9467_v21 = vld [vmem:[#allocation2 + $0x20c] sm:$0xf] }
 0x25c   : > { %1588 = vrot.lane.b32.xlu1 %v7596_v53, %s9889_s26  ;;  %v12116_v38 = vor.u32 %v9467_v21, %v8194_v20  ;;  %v3211_v34 = vpop.f32.mrf.mxu2  ;;  %1820 = vrot.lane.b32.xlu2 %v7628_v63, %s9886_s17  ;;  %v12125_v53 = vpop.permute.xlu2 %1460  ;;  %v7643_v21 = vld [vmem:[%s10070_s29 + $0x38] sm:$0xf]  ;;  %v8280_v20 = vld [vmem:[%s15304_s1 + $0x20] sm:$0xf] }
 0x25d   : > { %v12118_v49 = vadd.f32 %v3211_v34, %v3168_v8  ;;  %1368 = vrot.lane.b32.xlu0 %v1328_v47, %s9887_s30  ;;  %v8408_v34 = vld [vmem:[%s15304_s1 + $0x120] sm:$0xf]  ;;  %v9491_v63 = vld [vmem:[%s15304_s1 + $0x24] sm:$0xf0] }
 0x25e   : > { %v3126_v26 = vpop.f32.mrf.mxu0  ;;  %15555 = vst [vmem:[#allocation59_spill] sm:$0xff] %v12116_v38  ;;  %v12159_v22 = vor.u32 %v9491_v63, %v8280_v20  ;;  %v1288_v63 = vld [vmem:[%s10070_s29 + $0x8] sm:$0xf] }
 0x25f   : > { %15556 = vst [vmem:[#allocation60_spill] sm:$0xff] %v12118_v49 }
 0x260   : > { %3306 = vmatmul.bf16.gmra.mxu0 %v11620_v23  ;;  %15559 = vst [vmem:[#allocation63_spill] sm:$0xff] %v12159_v22 }
 0x261   : > { %3350 = vmatmul.bf16.gmra.mxu1 %v11626_v62  ;;  %4099 = vmatpush.bf16.msra.mxu0 %v12159_v22  ;;  %1302 = vst.msk [vmem:[#allocation2 + $0x1c0] sm:$0xf] %vm564_vm1, %v1288_v63  ;;  %v8272_v63 = vld [vmem:[%s15304_s1 + $0x10] sm:$0xf] }
 0x262   : > { %v12112_v42 = vpop.f32.mrf.mxu3  ;;  %v3170_v46 = vpop.f32.mrf.mxu1 }
 0x263   : > { %v3171_v41 = vadd.f32 %v3170_v46, %v3126_v26  ;;  %v9523_v46 = vld [vmem:[%s15304_s1 + $0x124] sm:$0xf0] }
 0x264   : > { %3394 = vmatmul.bf16.gmra.mxu2 %v11622_v59  ;;  %1370 = vrot.lane.b32.xlu1 %v1329_v6, %s9887_s30  ;;  %v12136_v23 = vor.u32 %v9523_v46, %v8408_v34  ;;  %v7585_v59 = vld [vmem:[%s10070_s29 + $0xf0] sm:$0xf]  ;;  %v3214_v26 = vpop.f32.mrf.mxu2  ;;  %v9507_v34 = vld [vmem:[%s15304_s1 + $0xa4] sm:$0xf0] }
 0x265   : > { %v8344_v6 = vld [vmem:[%s15304_s1 + $0xa0] sm:$0xf]  ;;  %v12155_v46 = vadd.f32 %v3214_v26, %v3171_v41  ;;  %1482 = vrot.lane.b32.xlu0 %v7585_v59, %s9886_s17  ;;  %1934 = vrot.lane.b32.xlu2 %v7643_v21, %s9889_s26  ;;  %v9471_v41 = vld [vmem:[#allocation2 + $0x22c] sm:$0xf]  ;;  %v12169_v59 = vpop.permute.xlu2 %1574  ;;  %v7630_v26 = vld [vmem:[%s10070_s29 + $0x44] sm:$0xf] }
 0x266   : > { %15557 = vst [vmem:[#allocation61_spill] sm:$0xff] %v12136_v23  ;;  %v3128_v8 = vpop.f32.mrf.mxu0  ;;  %4187 = vmatpush.bf16.msra.mxu2 %v12136_v23  ;;  %v12163_v33 = vor.u32 %v9507_v34, %v8344_v6  ;;  %v1484_v6 = vrot.slane %v12051_v61, 4 }
 0x267   : > { %4244 = vmatmul.bf16.gmra.mxu3 %v12116_v38  ;;  %15558 = vst [vmem:[#allocation62_spill] sm:$0xff] %v12155_v46  ;;  %v1292_v38 = vld [vmem:[%s10070_s29 + $0x48] sm:$0xf] }
 0x268   : > { %15560 = vst [vmem:[#allocation64_spill] sm:$0xff] %v12163_v33  ;;  %4143 = vmatpush.bf16.msra.mxu1 %v12163_v33 }
 0x269   : > { %1306 = vst.msk [vmem:[#allocation2 + $0x200] sm:$0xf] %vm564_vm1, %v1292_v38  ;;  %v8322_v38 = vld [vmem:[%s15304_s1 + $0x78] sm:$0xf0] }
 0x26a   : > { %v12138_v62 = vpop.f32.mrf.mxu3  ;;  %v3172_v47 = vpop.f32.mrf.mxu1 }
 0x26b   : > { %v3173_v23 = vadd.f32 %v3172_v47, %v3128_v8  ;;  %v8210_v8 = vld [vmem:[#allocation2 + $0x238] sm:$0xf0]  ;;  %v7598_v47 = vld [vmem:[%s10070_s29 + $0xe4] sm:$0xf] }
 0x26c   : > { %v12177_v34 = vor.u32 %v9471_v41, %v8210_v8  ;;  %v3216_v16 = vpop.f32.mrf.mxu2  ;;  %1592 = vrot.lane.b32.xlu1 %v7598_v47, %s9889_s26  ;;  %v8514_v41 = vld [vmem:[%s15304_s1 + $0x1f8] sm:$0xf0] }
 0x26d   : > { %v12181_v13 = vadd.f32 %v3216_v16, %v3173_v23  ;;  %1824 = vrot.lane.b32.xlu2 %v7630_v26, %s9886_s17  ;;  %v12192_v47 = vor.u32 %v9548_v57, %v8514_v41  ;;  %v9521_v23 = vld [vmem:[%s15304_s1 + $0x114] sm:$0xf0]  ;;  %v1289_v26 = vld [vmem:[%s10070_s29 + $0x18] sm:$0xf]  ;;  %v12246_v30 = vpop.permute.xlu2 %1464 }
 0x26e   : > { %v3131_v20 = vpop.f32.mrf.mxu0  ;;  %15561 = vst [vmem:[#allocation65_spill] sm:$0xff] %v12177_v34 }
 0x26f   : > { %15562 = vst [vmem:[#allocation66_spill] sm:$0xff] %v12181_v13  ;;  %v1345_v32 = vpop.permute.xlu0 %1344  ;;  %4402 = vmatpush.bf16.msrb.mxu3 %v12192_v47 }
 0x270   : > { %3311 = vmatmul.bf16.gmra.mxu0 %v11674_v14  ;;  %v1372_v8 = vrot.slane %v1345_v32, 4  ;;  %v8400_v14 = vld [vmem:[%s15304_s1 + $0x110] sm:$0xf]  ;;  %1303 = vst.msk [vmem:[#allocation2 + $0x1d0] sm:$0xf] %vm564_vm1, %v1289_v26 }
 0x271   : > { %3355 = vmatmul.bf16.gmra.mxu1 %v11680_v24  ;;  %v12205_v57 = vor.u32 %v9521_v23, %v8400_v14  ;;  %v7645_v26 = vld [vmem:[%s10070_s29 + $0x58] sm:$0xf] }
 0x272   : > { %v12171_v21 = vpop.f32.mrf.mxu3  ;;  %v3175_v22 = vpop.f32.mrf.mxu1  ;;  %v1386_v24 = vsel %vm649_vm3, %v1372_v8, %v1345_v32  ;;  %v9489_v8 = vld [vmem:[%s15304_s1 + $0x14] sm:$0xf0] }
 0x273   : > { %v3176_v33 = vadd.f32 %v3175_v22, %v3131_v20  ;;  %v1498_v22 = vsel %vm764_vm2, %v1484_v6, %v12051_v61  ;;  %15563 = vst [vmem:[#allocation67_spill] sm:$0xff] %v12205_v57  ;;  %v8506_v61 = vld [vmem:[%s15304_s1 + $0x1e8] sm:$0xf0]  ;;  %4188 = vmatpush.bf16.msra.mxu2 %v12205_v57  ;;  %v9544_v57 = vld [vmem:[%s15304_s1 + $0x1d4] sm:$0xf] }
 0x274   : > { %3399 = vmatmul.bf16.gmra.mxu2 %v11676_v31  ;;  %1414 = vst.msk [vmem:[#allocation2 + $0x1c0] sm:$0xff] %vm10480_vm5, %v1386_v24  ;;  %v9546_v31 = vld [vmem:[%s15304_s1 + $0x1e4] sm:$0xf]  ;;  %v3219_v16 = vpop.f32.mrf.mxu2  ;;  %v1347_v24 = vpop.permute.xlu1 %1346 }
 0x275   : > { %1526 = vst.msk [vmem:[#allocation2 + $0x1c4] sm:$0xff] %vm10514_vm9, %v1498_v22  ;;  %v12225_v6 = vor.u32 %v9546_v31, %v8506_v61  ;;  %v8336_v22 = vld [vmem:[%s15304_s1 + $0x90] sm:$0xf]  ;;  %v12234_v14 = vadd.f32 %v3219_v16, %v3176_v33  ;;  %v12236_v31 = vor.u32 %v9489_v8, %v8272_v63  ;;  %v9505_v61 = vld [vmem:[%s15304_s1 + $0x94] sm:$0xf0]  ;;  %v1373_v33 = vrot.slane %v1347_v24, 4  ;;  %1938 = vrot.lane.b32.xlu2 %v7645_v26, %s9889_s26  ;;  %v12312_v37 = vpop.permute.xlu2 %1578 }
 0x276   : > { %v3133_v32 = vpop.f32.mrf.mxu0  ;;  %v12248_v16 = vor.u32 %v9505_v61, %v8336_v22  ;;  %v8498_v63 = vld [vmem:[%s15304_s1 + $0x1d8] sm:$0xf0]  ;;  %v9475_v61 = vld [vmem:[#allocation2 + $0x24c] sm:$0xf] }
 0x277   : > { %4249 = vmatmul.bf16.gmra.mxu3 %v12177_v34  ;;  %15564 = vst [vmem:[#allocation68_spill] sm:$0xff] %v12234_v14  ;;  %4100 = vmatpush.bf16.msra.mxu0 %v12236_v31  ;;  %v12256_v44 = vor.u32 %v9544_v57, %v8498_v63  ;;  %v1387_v22 = vsel %vm649_vm3, %v1373_v33, %v1347_v24  ;;  %v8226_v26 = vld [vmem:[#allocation2 + $0x258] sm:$0xf0]  ;;  %v9542_v57 = vld [vmem:[%s15304_s1 + $0x1c4] sm:$0xf] }
 0x278   : > { %15565 = vst [vmem:[#allocation69_spill] sm:$0xff] %v12236_v31  ;;  %4403 = vmatpush.bf16.msrb.mxu3 %v12225_v6  ;;  %4144 = vmatpush.bf16.msra.mxu1 %v12248_v16  ;;  %v7632_v63 = vld [vmem:[%s10070_s29 + $0x64] sm:$0xf] }
 0x279   : > { %15566 = vst [vmem:[#allocation70_spill] sm:$0xff] %v12248_v16 }
 0x27a   : > { %v12216_v20 = vpop.f32.mrf.mxu3  ;;  %v3177_v41 = vpop.f32.mrf.mxu1  ;;  %1415 = vst.msk [vmem:[#allocation2 + $0x1d0] sm:$0xff] %vm10480_vm5, %v1387_v22 }
 0x27b   : > { %v3178_v23 = vadd.f32 %v3177_v41, %v3133_v32  ;;  %v1459_v32 = vpop.permute.xlu0 %1458  ;;  %v7612_v41 = vld [vmem:[%s10070_s29 + $0xe8] sm:$0xf]  ;;  %v8152_v14 = vld [vmem:[#allocation2 + $0x1c0] sm:$0xf] }
 0x27c   : > { %v1485_v8 = vrot.slane %v1459_v32, 4  ;;  %1650 = vst.msk [vmem:[#allocation2 + $0x28c] sm:$0xf] %vm564_vm1, %v7612_v41  ;;  %4404 = vmatpush.bf16.msrb.mxu3 %v12256_v44  ;;  %v1486_v41 = vrot.slane %v12125_v53, 4  ;;  %v3221_v22 = vpop.f32.mrf.mxu2  ;;  %v9458_v13 = vld [vmem:[#allocation2 + $0x1c4] sm:$0xf] }
 0x27d   : > { %1828 = vrot.lane.b32.xlu2 %v7632_v63, %s9886_s17 }
 0x27e   : > { %v1499_v31 = vsel %vm764_vm2, %v1485_v8, %v1459_v32  ;;  %v3136_v33 = vpop.f32.mrf.mxu0  ;;  %v12279_v32 = vor.u32 %v9542_v57, %v8490_v2  ;;  %v12286_v8 = vor.u32 %v9475_v61, %v8226_v26  ;;  %v1569_v2 = vpop.permute.xlu1 %1568 }
 0x27f   : > { %1527 = vst.msk [vmem:[#allocation2 + $0x1d4] sm:$0xff] %vm10514_vm9, %v1499_v31  ;;  %v8392_v31 = vld [vmem:[%s15304_s1 + $0x100] sm:$0xf] }
 0x280   : > { %1611 = vst.msk [vmem:[#allocation2 + $0x1d8] sm:$0xf] %vm880_vm8, %v12099_v48  ;;  %v12292_v48 = vadd.f32 %v3221_v22, %v3178_v23  ;;  %4405 = vmatpush.bf16.msrb.mxu3 %v12279_v32  ;;  %v12295_v58 = vor.u32 %v9519_v52, %v8392_v31  ;;  %3316 = vmatmul.bf16.gmra.mxu0 %v11755_v60  ;;  %v9540_v23 = vld [vmem:[%s15304_s1 + $0x1b4] sm:$0xf]  ;;  %v8482_v52 = vld [vmem:[%s15304_s1 + $0x1b8] sm:$0xf0] }
 0x281   : > { %15568 = vst [vmem:[#allocation72_spill] sm:$0xff] %v12286_v8  ;;  %3360 = vmatmul.bf16.gmra.mxu1 %v11761_v35  ;;  %v1500_v60 = vsel %vm764_vm2, %v1486_v41, %v12125_v53  ;;  %v12315_v26 = vor.u32 %v9540_v23, %v8482_v52  ;;  %v8264_v35 = vld [vmem:[%s15304_s1] sm:$0xf]  ;;  %v9538_v22 = vld [vmem:[%s15304_s1 + $0x1a4] sm:$0xf] }
 0x282   : > { %v12275_v24 = vpop.f32.mrf.mxu3  ;;  %v3180_v16 = vpop.f32.mrf.mxu1  ;;  %15569 = vst [vmem:[#allocation73_spill] sm:$0xff] %v12292_v48  ;;  %4189 = vmatpush.bf16.msra.mxu2 %v12295_v58  ;;  %v8328_v53 = vld [vmem:[%s15304_s1 + $0x80] sm:$0xf]  ;;  %v9460_v27 = vld [vmem:[#allocation2 + $0x1cc] sm:$0xf0] }
 0x283   : > { %15567 = vst [vmem:[#allocation71_spill] sm:$0xff] %v12275_v24  ;;  %v3181_v57 = vadd.f32 %v3180_v16, %v3136_v33  ;;  %v1349_v61 = vpop.permute.xlu0 %1348  ;;  %v9487_v33 = vld [vmem:[%s15304_s1 + $0x4] sm:$0xf0] }
 0x284   : > { %15570 = vst [vmem:[#allocation74_spill] sm:$0xff] %v12295_v58  ;;  %v1374_v16 = vrot.slane %v1349_v61, 4  ;;  %3404 = vmatmul.bf16.gmra.mxu2 %v11757_v40  ;;  %v12327_v31 = vor.u32 %v9487_v33, %v8264_v35  ;;  %v9503_v40 = vld [vmem:[%s15304_s1 + $0x84] sm:$0xf0]  ;;  %4406 = vmatpush.bf16.msrb.mxu3 %v12315_v26  ;;  %v3224_v33 = vpop.f32.mrf.mxu2 }
 0x285   : > { %1610 = vst.msk [vmem:[#allocation2 + $0x1c8] sm:$0xf] %vm880_vm8, %v1569_v2  ;;  %v12335_v41 = vor.u32 %v9503_v40, %v8328_v53  ;;  %v8474_v2 = vld [vmem:[%s15304_s1 + $0x1a8] sm:$0xf0]  ;;  %v7647_v35 = vld [vmem:[%s10070_s29 + $0x78] sm:$0xf]  ;;  %v12360_v40 = vadd.f32 %v3224_v33, %v3181_v57 }
 0x286   : > { %v1388_v63 = vsel %vm649_vm3, %v1374_v16, %v1349_v61  ;;  %15571 = vst [vmem:[#allocation75_spill] sm:$0xff] %v12327_v31  ;;  %v3138_v23 = vpop.f32.mrf.mxu0  ;;  %4101 = vmatpush.bf16.msra.mxu0 %v12327_v31  ;;  %v1291_v16 = vld [vmem:[%s10070_s29 + $0x38] sm:$0xf]  ;;  %v12349_v52 = vor.u32 %v9538_v22, %v8474_v2  ;;  %v1351_v22 = vpop.permute.xlu1 %1350  ;;  %1942 = vrot.lane.b32.xlu2 %v7647_v35, %s9889_s26  ;;  %v8154_v57 = vld [vmem:[#allocation2 + $0x1d0] sm:$0xf0]  ;;  %v1488_v35 = vrot.slane %v12246_v30, 4 }
 0x287   : > { %4254 = vmatmul.bf16.gmra.mxu3 %v12286_v8  ;;  %1416 = vst.msk [vmem:[#allocation2 + $0x1e0] sm:$0xff] %vm10480_vm5, %v1388_v63  ;;  %4145 = vmatpush.bf16.msra.mxu1 %v12335_v41  ;;  %v9536_v63 = vld [vmem:[%s15304_s1 + $0x194] sm:$0xf]  ;;  %v1375_v2 = vrot.slane %v1351_v22, 4  ;;  %v8242_v8 = vld [vmem:[#allocation2 + $0x278] sm:$0xf0] }
 0x288   : > { %15572 = vst [vmem:[#allocation76_spill] sm:$0xff] %v12335_v41  ;;  %4407 = vmatpush.bf16.msrb.mxu3 %v12349_v52 }
 0x289   : > { %1528 = vst.msk [vmem:[#allocation2 + $0x1e4] sm:$0xff] %vm10514_vm9, %v1500_v60  ;;  %v8466_v60 = vld [vmem:[%s15304_s1 + $0x198] sm:$0xf0]  ;;  %v1389_v34 = vsel %vm649_vm3, %v1375_v2, %v1351_v22  ;;  %v9532_v22 = vld [vmem:[%s15304_s1 + $0x174] sm:$0xf] }
 0x28a   : > { %v12343_v61 = vpop.f32.mrf.mxu3  ;;  %v3182_v53 = vpop.f32.mrf.mxu1  ;;  %1305 = vst.msk [vmem:[#allocation2 + $0x1f0] sm:$0xf] %vm564_vm1, %v1291_v16  ;;  %v12364_v58 = vor.u32 %v9536_v63, %v8466_v60  ;;  %v9479_v16 = vld [vmem:[#allocation2 + $0x26c] sm:$0xf]  ;;  %v9534_v60 = vld [vmem:[%s15304_s1 + $0x184] sm:$0xf] }
 0x28b   : > { %15573 = vst [vmem:[#allocation77_spill] sm:$0xff] %v12343_v61  ;;  %v3183_v31 = vadd.f32 %v3182_v53, %v3138_v23  ;;  %v1463_v41 = vpop.permute.xlu0 %1462  ;;  %v9461_v53 = vld [vmem:[#allocation2 + $0x1d4] sm:$0xf0]  ;;  %v12371_v63 = vpop.permute.xlu2 %1468  ;;  %v8450_v2 = vld [vmem:[%s15304_s1 + $0x178] sm:$0xf0] }
 0x28c   : > { %15574 = vst [vmem:[#allocation78_spill] sm:$0xff] %v12360_v40  ;;  %v1487_v48 = vrot.slane %v1463_v41, 4  ;;  %v8160_v33 = vld [vmem:[#allocation2 + $0x1c8] sm:$0xf]  ;;  %4408 = vmatpush.bf16.msrb.mxu3 %v12364_v58  ;;  %v12394_v40 = vor.u32 %v9479_v16, %v8242_v8  ;;  %v3226_v61 = vpop.f32.mrf.mxu2 }
 0x28d   : > { %15575 = vst [vmem:[#allocation79_spill] sm:$0xff] %v12364_v58  ;;  %v12398_v46 = vor.u32 %v9461_v53, %v8160_v33  ;;  %v12403_v24 = vadd.f32 %v3226_v61, %v3183_v31  ;;  %v12405_v58 = vor.u32 %v9458_v13, %v8154_v57  ;;  %v9516_v13 = vld [vmem:[%s15304_s1 + $0xf4] sm:$0xf]  ;;  %v8386_v61 = vld [vmem:[%s15304_s1 + $0xf8] sm:$0xf0] }
 0x28e   : > { %1417 = vst.msk [vmem:[#allocation2 + $0x1f0] sm:$0xff] %vm10480_vm5, %v1389_v34  ;;  %v1501_v23 = vsel %vm764_vm2, %v1487_v48, %v1463_v41  ;;  %v8458_v34 = vld [vmem:[%s15304_s1 + $0x188] sm:$0xf0]  ;;  %v3141_v41 = vpop.f32.mrf.mxu0  ;;  %v1573_v49 = vpop.permute.xlu1 %1572  ;;  %v12437_v16 = vor.u32 %v9516_v13, %v8386_v61  ;;  %v1293_v53 = vld [vmem:[%s10070_s29 + $0x58] sm:$0xf] }
 0x28f   : > { %1529 = vst.msk [vmem:[#allocation2 + $0x1f4] sm:$0xff] %vm10514_vm9, %v1501_v23  ;;  %v12392_v23 = vor.u32 %v9534_v60, %v8458_v34  ;;  %v8442_v34 = vld [vmem:[%s15304_s1 + $0x168] sm:$0xf0] }
 0x290   : > { %1613 = vst.msk [vmem:[#allocation2 + $0x1f8] sm:$0xf] %vm880_vm8, %v12169_v59  ;;  %v12400_v59 = vor.u32 %v9532_v22, %v8450_v2  ;;  %4314 = vmatpush.bf16.msrb.mxu1 %v12437_v16 }
 0x291   : > { %1612 = vst.msk [vmem:[#allocation2 + $0x1e8] sm:$0xf] %vm880_vm8, %v1573_v49  ;;  %4146 = vmatmul.bf16.vlgmr.msra.gmra.mxu1 %v12405_v58  ;;  %4409 = vmatpush.bf16.msrb.mxu3 %v12392_v23  ;;  %v9500_v49 = vld [vmem:[%s15304_s1 + $0x74] sm:$0xf] }
 0x292   : > { %v12382_v48 = vpop.f32.mrf.mxu3  ;;  %v3185_v56 = vpop.f32.mrf.mxu1  ;;  %15577 = vst [vmem:[#allocation81_spill] sm:$0xff] %v12400_v59  ;;  %4358 = vmatpush.bf16.msrb.mxu2 %v12400_v59  ;;  %v12429_v31 = vor.u32 %v9500_v49, %v8322_v38  ;;  %v9483_v38 = vld [vmem:[#allocation2 + $0x28c] sm:$0xf] }
 0x293   : > { %15576 = vst [vmem:[#allocation80_spill] sm:$0xff] %v12382_v48  ;;  %v12396_v48 = vor.u32 %v9460_v27, %v8152_v14  ;;  %v3186_v0 = vadd.f32 %v3185_v56, %v3141_v41  ;;  %v7634_v27 = vld [vmem:[%s10070_s29 + $0x84] sm:$0xf]  ;;  %v1353_v14 = vpop.permute.xlu0 %1352  ;;  %v1502_v56 = vsel %vm764_vm2, %v1488_v35, %v12246_v30 }
 0x294   : > { %v1376_v8 = vrot.slane %v1353_v14, 4  ;;  %4190 = vmatmul.bf16.vlgmr.msra.gmra.mxu2 %v12398_v46  ;;  %1832 = vrot.lane.b32.xlu2 %v7634_v27, %s9886_s17  ;;  %15578 = vst [vmem:[#allocation82_spill] sm:$0xff] %v12429_v31  ;;  %v3229_v35 = vpop.f32.mrf.mxu2 }
 0x295   : > { %4102 = vmatmul.bf16.vlgmr.msra.gmra.mxu0 %v12396_v48  ;;  %4760 = vmatpush.bf16.msra.mxu3 %v11697_v1  ;;  %15579 = vst [vmem:[#allocation83_spill] sm:$0xff] %v12437_v16  ;;  %v9530_v1 = vld [vmem:[%s15304_s1 + $0x164] sm:$0xf]  ;;  %v12453_v41 = vadd.f32 %v3229_v35, %v3186_v0  ;;  %v8168_v0 = vld [vmem:[#allocation2 + $0x1e0] sm:$0xf] }
 0x296   : > { %v1390_v30 = vsel %vm649_vm3, %v1376_v8, %v1353_v14  ;;  %v3143_v33 = vpop.f32.mrf.mxu0  ;;  %4270 = vmatpush.bf16.msrb.mxu0 %v12429_v31  ;;  %1307 = vst.msk [vmem:[#allocation2 + $0x210] sm:$0xf] %vm564_vm1, %v1293_v53  ;;  %v1355_v2 = vpop.permute.xlu1 %1354  ;;  %v12455_v27 = vor.u32 %v9530_v1, %v8442_v34  ;;  %v9464_v53 = vld [vmem:[#allocation2 + $0x1ec] sm:$0xf0]  ;;  %v8170_v1 = vld [vmem:[#allocation2 + $0x1f0] sm:$0xf0] }
 0x297   : > { %4259 = vmatmul.bf16.gmra.mxu3 %v12394_v40  ;;  %1418 = vst.msk [vmem:[#allocation2 + $0x200] sm:$0xff] %vm10480_vm5, %v1390_v30  ;;  %v12458_v14 = vpop.permute.xlu2 %1582  ;;  %v1377_v8 = vrot.slane %v1355_v2, 4  ;;  %v8258_v30 = vld [vmem:[#allocation2 + $0x298] sm:$0xf0]  ;;  %v9465_v35 = vld [vmem:[#allocation2 + $0x1f4] sm:$0xf0] }
 0x298   : > { %1530 = vst.msk [vmem:[#allocation2 + $0x204] sm:$0xff] %vm10514_vm9, %v1502_v56  ;;  %v7649_v56 = vld [vmem:[%s10070_s29 + $0x98] sm:$0xf]  ;;  %4359 = vmatpush.bf16.msrb.mxu2 %v12455_v27  ;;  %v1490_v34 = vrot.slane %v12371_v63, 4 }
 0x299   : > { %15580 = vst [vmem:[#allocation84_spill] sm:$0xff] %v12455_v27  ;;  %4761 = vmatpush.bf16.msra.mxu3 %v11716_v9  ;;  %v1391_v61 = vsel %vm649_vm3, %v1377_v8, %v1355_v2  ;;  %v8314_v27 = vld [vmem:[%s15304_s1 + $0x68] sm:$0xf0] }
 0x29a   : > { %v12439_v57 = vpop.f32.mrf.mxu3  ;;  %v3187_v60 = vpop.f32.mrf.mxu1  ;;  %1419 = vst.msk [vmem:[#allocation2 + $0x210] sm:$0xff] %vm10480_vm5, %v1391_v61  ;;  %v12480_v61 = vor.u32 %v9464_v53, %v8168_v0 }
 0x29b   : > { %v3188_v22 = vadd.f32 %v3187_v60, %v3143_v33  ;;  %v1467_v49 = vpop.permute.xlu0 %1466  ;;  %v8176_v33 = vld [vmem:[#allocation2 + $0x1e8] sm:$0xf]  ;;  %v9462_v60 = vld [vmem:[#allocation2 + $0x1e4] sm:$0xf] }
 0x29c   : > { %v1489_v13 = vrot.slane %v1467_v49, 4  ;;  %1946 = vrot.lane.b32.xlu2 %v7649_v56, %s9889_s26  ;;  %v9498_v56 = vld [vmem:[%s15304_s1 + $0x64] sm:$0xf]  ;;  %v12495_v31 = vor.u32 %v9462_v60, %v8170_v1 }
 0x29d   : > { %4762 = vmatpush.bf16.msra.mxu3 %v11729_v5  ;;  %v3231_v5 = vpop.f32.mrf.mxu2  ;;  %v12497_v0 = vor.u32 %v9498_v56, %v8314_v27  ;;  %v1504_v27 = vsel %vm764_vm2, %v1490_v34, %v12371_v63  ;;  %v1295_v34 = vld [vmem:[%s10070_s29 + $0x78] sm:$0xf] }
 0x29e   : > { %v1503_v9 = vsel %vm764_vm2, %v1489_v13, %v1467_v49  ;;  %v3287_v8 = vpop.f32.mrf.mxu0  ;;  %v12478_v49 = vor.u32 %v9483_v38, %v8258_v30  ;;  %v8378_v38 = vld [vmem:[%s15304_s1 + $0xe8] sm:$0xf0]  ;;  %v12493_v30 = vadd.f32 %v3231_v5, %v3188_v22  ;;  %v1577_v16 = vpop.permute.xlu1 %1576  ;;  %1309 = vst.msk [vmem:[#allocation2 + $0x230] sm:$0xf] %vm564_vm1, %v1295_v34 }
 0x29f   : > { %1531 = vst.msk [vmem:[#allocation2 + $0x214] sm:$0xff] %vm10514_vm9, %v1503_v9  ;;  %v12482_v9 = vor.u32 %v9465_v35, %v8176_v33  ;;  %v1294_v33 = vld [vmem:[%s10070_s29 + $0x68] sm:$0xf]  ;;  %v7636_v35 = vld [vmem:[%s10070_s29 + $0xa4] sm:$0xf]  ;;  %4271 = vmatpush.bf16.msrb.mxu0 %v12497_v0 }
 0x2a0   : > { %1615 = vst.msk [vmem:[#allocation2 + $0x218] sm:$0xf] %vm880_vm8, %v12312_v37  ;;  %v9514_v37 = vld [vmem:[%s15304_s1 + $0xe4] sm:$0xf] }
 0x2a1   : > { %15581 = vst [vmem:[#allocation85_spill] sm:$0xff] %v12497_v0  ;;  %v12499_v53 = vor.u32 %v9514_v37, %v8378_v38  ;;  %4763 = vmatpush.bf16.msra.mxu3 %v11751_v55  ;;  %4151 = vmatmul.bf16.gmra.mxu1 %v12495_v31  ;;  %v12512_v55 = vpop.permute.xlu2 %1472 }
 0x2a2   : > { %v12471_v2 = vpop.f32.mrf.mxu3  ;;  %v3331_v13 = vpop.f32.mrf.mxu1  ;;  %1614 = vst.msk [vmem:[#allocation2 + $0x208] sm:$0xf] %vm880_vm8, %v1577_v16 }
 0x2a3   : > { %15582 = vst [vmem:[#allocation86_spill] sm:$0xff] %v12499_v53  ;;  %v1357_v59 = vpop.permute.xlu0 %1356  ;;  %4315 = vmatpush.bf16.msrb.mxu1 %v12499_v53  ;;  %v3332_v63 = vadd.f32 %v3331_v13, %v3287_v8  ;;  %v8184_v53 = vld [vmem:[#allocation2 + $0x200] sm:$0xf] }
 0x2a4   : > { %1308 = vst.msk [vmem:[#allocation2 + $0x220] sm:$0xf] %vm564_vm1, %v1294_v33  ;;  %v1378_v22 = vrot.slane %v1357_v59, 4  ;;  %4195 = vmatmul.bf16.gmra.mxu2 %v12482_v9  ;;  %1836 = vrot.lane.b32.xlu2 %v7636_v35, %s9886_s17  ;;  %v7651_v33 = vld [vmem:[%s10070_s29 + $0xb8] sm:$0xf] }
 0x2a5   : > { %4107 = vmatmul.bf16.gmra.mxu0 %v12480_v61  ;;  %4764 = vmatpush.bf16.msra.mxu3 %v11779_v11  ;;  %v3375_v56 = vpop.f32.mrf.mxu2  ;;  %v8434_v11 = vld [vmem:[%s15304_s1 + $0x158] sm:$0xf0] }
 0x2a6   : > { %v1392_v16 = vsel %vm649_vm3, %v1378_v22, %v1357_v59  ;;  %v3289_v1 = vpop.f32.mrf.mxu0  ;;  %v9528_v59 = vld [vmem:[%s15304_s1 + $0x154] sm:$0xf]  ;;  %v3376_v37 = vadd.f32 %v3375_v56, %v3332_v63  ;;  %v1359_v38 = vpop.permute.xlu1 %1358  ;;  %v3244_v22 = vadd.f32 %v11592_v10, %v11964_v50  ;;  %v9468_v63 = vld [vmem:[#allocation2 + $0x20c] sm:$0xf0]  ;;  %v9466_v50 = vld [vmem:[#allocation2 + $0x204] sm:$0xf] }
 0x2a7   : > { %4264 = vmatmul.bf16.gmra.mxu3 %v12478_v49  ;;  %1420 = vst.msk [vmem:[#allocation2 + $0x220] sm:$0xff] %vm10480_vm5, %v1392_v16  ;;  %v12533_v8 = vor.u32 %v9528_v59, %v8434_v11  ;;  %v1379_v13 = vrot.slane %v1359_v38, 4  ;;  %v9469_v11 = vld [vmem:[#allocation2 + $0x214] sm:$0xf0] }
 0x2a8   : > { %1532 = vst.msk [vmem:[#allocation2 + $0x224] sm:$0xff] %vm10514_vm9, %v1504_v27  ;;  %v3420_v27 = vadd.f32 %v12069_v43, %v3376_v37  ;;  %v8186_v43 = vld [vmem:[#allocation2 + $0x210] sm:$0xf0] }
 0x2a9   : > { %15583 = vst [vmem:[#allocation87_spill] sm:$0xff] %v12533_v8  ;;  %4765 = vmatpush.bf16.msra.mxu3 %v11796_v45  ;;  %4360 = vmatpush.bf16.msrb.mxu2 %v12533_v8  ;;  %v1393_v34 = vsel %vm649_vm3, %v1379_v13, %v1359_v38  ;;  %v8192_v59 = vld [vmem:[#allocation2 + $0x208] sm:$0xf]  ;;  %v12546_v10 = vpop.permute.xlu2 %1586  ;;  %v15584_v38 = vld [vmem:[#allocation12_spill] sm:$0xff]  ;;  %v12564_v8 = vor.u32 %v9468_v63, %v8184_v53  ;;  %v1296_v63 = vld [vmem:[%s10070_s29 + $0x88] sm:$0xf] }
 0x2aa   : > { %v12521_v60 = vpop.f32.mrf.mxu3  ;;  %v3333_v5 = vpop.f32.mrf.mxu1  ;;  %v3454_v56 = vmax.f32 %v3244_v22, %v3420_v27  ;;  %1421 = vst.msk [vmem:[#allocation2 + $0x230] sm:$0xff] %vm10480_vm5, %v1393_v34  ;;  %v15585_v13 = vld [vmem:[#allocation13_spill] sm:$0xff]  ;;  %v12577_v0 = vor.u32 %v9466_v50, %v8186_v43 }
 0x2ab   : > { %v1471_v35 = vpop.permute.xlu0 %1470  ;;  %v15586_v22 = vmax.f32 %v15584_v38, %v15585_v13  ;;  %v1492_v38 = vrot.slane %v12512_v55, 4  ;;  %1310 = vst.msk [vmem:[#allocation2 + $0x240] sm:$0xf] %vm564_vm1, %v1296_v63 }
 0x2ac   : > { %v1491_v16 = vrot.slane %v1471_v35, 4  ;;  %1950 = vrot.lane.b32.xlu2 %v7651_v33, %s9889_s26  ;;  %v3334_v33 = vadd.f32 %v3333_v5, %v3289_v1  ;;  %v8370_v5 = vld [vmem:[%s15304_s1 + $0xd8] sm:$0xf0] }
 0x2ad   : > { %4766 = vmatpush.bf16.msra.mxu3 %v11809_v17  ;;  %v3468_v27 = vmax.f32 %v15586_v22, %v3454_v56  ;;  %v8306_v17 = vld [vmem:[%s15304_s1 + $0x58] sm:$0xf0]  ;;  %v3377_v34 = vpop.f32.mrf.mxu2  ;;  %v12566_v56 = vor.u32 %v9469_v11, %v8192_v59  ;;  %v7638_v59 = vld [vmem:[%s10070_s29 + $0xc4] sm:$0xf]  ;;  %v3246_v11 = vadd.f32 %v11614_v25, %v11996_v39 }
 0x2ae   : > { %v1505_v45 = vsel %vm764_vm2, %v1491_v16, %v1471_v35  ;;  %v3292_v35 = vpop.f32.mrf.mxu0  ;;  %v9496_v16 = vld [vmem:[%s15304_s1 + $0x54] sm:$0xf]  ;;  %v3378_v13 = vadd.f32 %v3377_v34, %v3334_v33  ;;  %v1581_v22 = vpop.permute.xlu1 %1580  ;;  %v12591_v33 = vld [vmem:[%s15305_s2] ss:$0 sm:$0xff]  ;;  %v15589_v34 = vld [vmem:[#allocation15_spill] sm:$0xff] }
 0x2af   : > { %1533 = vst.msk [vmem:[#allocation2 + $0x234] sm:$0xff] %vm10514_vm9, %v1505_v45  ;;  %v12568_v1 = vor.u32 %v9496_v16, %v8306_v17  ;;  %v15588_v17 = vld [vmem:[#allocation14_spill] sm:$0xff] }
 0x2b0   : > { %1617 = vst.msk [vmem:[#allocation2 + $0x238] sm:$0xf] %vm880_vm8, %v12458_v14  ;;  %v9512_v14 = vld [vmem:[%s15304_s1 + $0xd4] sm:$0xf]  ;;  %v3422_v50 = vadd.f32 %v12112_v42, %v3378_v13 }
 0x2b1   : > { %v12579_v53 = vor.u32 %v9512_v14, %v8370_v5  ;;  %1616 = vst.msk [vmem:[#allocation2 + $0x228] sm:$0xf] %vm880_vm8, %v1581_v22  ;;  %4767 = vmatpush.bf16.msra.mxu3 %v11841_v18  ;;  %4156 = vmatmul.bf16.gmra.mxu1 %v12577_v0  ;;  %v1506_v18 = vsel %vm764_vm2, %v1492_v38, %v12512_v55  ;;  %v1297_v38 = vld [vmem:[%s10070_s29 + $0x98] sm:$0xf] }
 0x2b2   : > { %v12551_v37 = vpop.f32.mrf.mxu3  ;;  %v3336_v45 = vpop.f32.mrf.mxu1  ;;  %4272 = vmatpush.bf16.msrb.mxu0 %v12568_v1  ;;  %v3455_v39 = vmax.f32 %v3246_v11, %v3422_v50  ;;  %v15590_v14 = vmax.f32 %v15588_v17, %v15589_v34  ;;  %1311 = vst.msk [vmem:[#allocation2 + $0x250] sm:$0xf] %vm564_vm1, %v1297_v38  ;;  %v9510_v34 = vld [vmem:[%s15304_s1 + $0xc4] sm:$0xf] }
 0x2b3   : > { %15587 = vst [vmem:[#allocation12_spill] sm:$0xff] %v12579_v53  ;;  %v1361_v43 = vpop.permute.xlu0 %1360  ;;  %4316 = vmatpush.bf16.msrb.mxu1 %v12579_v53  ;;  %v3337_v13 = vadd.f32 %v3336_v45, %v3292_v35 }
 0x2b4   : > { %4200 = vmatmul.bf16.gmra.mxu2 %v12566_v56  ;;  %v1380_v25 = vrot.slane %v1361_v43, 4  ;;  %1840 = vrot.lane.b32.xlu2 %v7638_v59, %s9886_s17  ;;  %v3469_v5 = vmax.f32 %v15590_v14, %v3455_v39  ;;  %v8426_v59 = vld [vmem:[%s15304_s1 + $0x148] sm:$0xf0]  ;;  %v1477_v39 = vpop.permute.xlu2 %1476 }
 0x2b5   : > { %4112 = vmatmul.bf16.gmra.mxu0 %v12564_v8  ;;  %v8362_v14 = vld [vmem:[%s15304_s1 + $0xc8] sm:$0xf0] }
 0x2b6   : > { %v1394_v42 = vsel %vm649_vm3, %v1380_v25, %v1361_v43  ;;  %v3294_v55 = vpop.f32.mrf.mxu0  ;;  %v3487_v35 = vadd.f32 %v12591_v33, %v3469_v5  ;;  %v1363_v11 = vpop.permute.xlu1 %1362  ;;  %v9494_v43 = vld [vmem:[%s15304_s1 + $0x44] sm:$0xf]  ;;  %v8298_v25 = vld [vmem:[%s15304_s1 + $0x48] sm:$0xf0] }
 0x2b7   : > { %4410 = vmatmul.bf16.vlgmr.msrb.gmra.mxu3 %v11987_v4  ;;  %v3486_v4 = vadd.f32 %v12591_v33, %v3468_v27  ;;  %1422 = vst.msk [vmem:[#allocation2 + $0x240] sm:$0xff] %vm10480_vm5, %v1394_v42  ;;  %v3380_v22 = vpop.f32.mrf.mxu2  ;;  %v9526_v27 = vld [vmem:[%s15304_s1 + $0x144] sm:$0xf]  ;;  %v1381_v42 = vrot.slane %v1363_v11, 4  ;;  %v12635_v17 = vor.u32 %v9494_v43, %v8298_v25  ;;  %v9472_v43 = vld [vmem:[#allocation2 + $0x22c] sm:$0xf0] }
 0x2b8   : > { %4936 = vmatpush.bf16.msrb.mxu3 %v12192_v47  ;;  %1534 = vst.msk [vmem:[#allocation2 + $0x244] sm:$0xff] %vm10514_vm9, %v1506_v18  ;;  %v7653_v47 = vld [vmem:[%s10070_s29 + $0xd8] sm:$0xf]  ;;  %v3381_v45 = vadd.f32 %v3380_v22, %v3337_v13  ;;  %v12625_v50 = vor.u32 %v9526_v27, %v8426_v59  ;;  %v3249_v18 = vadd.f32 %v11644_v51, %v12024_v3  ;;  %v3501_v13 = vmax.f32 %v3487_v35, 0.0  ;;  %v8200_v59 = vld [vmem:[#allocation2 + $0x220] sm:$0xf] }
 0x2b9   : > { %v3500_v5 = vmax.f32 %v3486_v4, 0.0  ;;  %v12646_v3 = vor.u32 %v9510_v34, %v8362_v14  ;;  %v1395_v22 = vsel %vm649_vm3, %v1381_v42, %v1363_v11  ;;  %4273 = vmatpush.bf16.msrb.mxu0 %v12635_v17  ;;  %v9470_v35 = vld [vmem:[#allocation2 + $0x224] sm:$0xf]  ;;  %v15592_v42 = vld [vmem:[#allocation17_spill] sm:$0xff] }
 0x2ba   : > { %v12605_v16 = vpop.f32.mrf.mxu3  ;;  %v3338_v63 = vpop.f32.mrf.mxu1  ;;  %v3425_v38 = vadd.f32 %v12138_v62, %v3381_v45  ;;  %4361 = vmatpush.bf16.msrb.mxu2 %v12625_v50  ;;  %1423 = vst.msk [vmem:[#allocation2 + $0x250] sm:$0xff] %vm10480_vm5, %v1395_v22  ;;  %v8208_v62 = vld [vmem:[#allocation2 + $0x228] sm:$0xf]  ;;  %v8202_v45 = vld [vmem:[#allocation2 + $0x230] sm:$0xf0] }
 0x2bb   : > { %v1475_v51 = vpop.permute.xlu0 %1474  ;;  %v9741_v25 = vpack.c.bf16 %v3501_v13, %v3500_v5  ;;  %4317 = vmatpush.bf16.msrb.mxu1 %v12646_v3 }
 0x2bc   : > { %4937 = vmatpush.bf16.msrb.mxu3 %v12225_v6  ;;  %v1493_v27 = vrot.slane %v1475_v51, 4  ;;  %v3456_v53 = vmax.f32 %v3249_v18, %v3425_v38  ;;  %1954 = vrot.lane.b32.xlu2 %v7653_v47, %s9889_s26  ;;  %v9473_v6 = vld [vmem:[#allocation2 + $0x234] sm:$0xf0]  ;;  %v15591_v18 = vld [vmem:[#allocation16_spill] sm:$0xff]  ;;  %v3339_v47 = vadd.f32 %v3338_v63, %v3294_v55  ;;  %v7640_v55 = vld [vmem:[%s10070_s29 + $0xe4] sm:$0xf]  ;;  %v3251_v63 = vadd.f32 %v11668_v19, %v12059_v29 }
 0x2bd   : > { %9742 = vst [vmem:[#allocation4] sm:$0xff] %v9741_v25   ;;  %v15593_v34 = vmax.f32 %v15591_v18, %v15592_v42  ;;  %v12665_v22 = vor.u32 %v9473_v6, %v8208_v62 }
 0x2be   : > { %v1507_v4 = vsel %vm764_vm2, %v1493_v27, %v1475_v51  ;;  %v3297_v5 = vpop.f32.mrf.mxu0  ;;  %v12663_v51 = vor.u32 %v9472_v43, %v8200_v59  ;;  %v1494_v27 = vrot.slane %v1477_v39, 4  ;;  %v1585_v18 = vpop.permute.xlu1 %1584 }
 0x2bf   : > { %v3470_v14 = vmax.f32 %v15593_v34, %v3456_v53  ;;  %1535 = vst.msk [vmem:[#allocation2 + $0x254] sm:$0xff] %vm10514_vm9, %v1507_v4  ;;  %v3382_v13 = vpop.f32.mrf.mxu2  ;;  %v12670_v53 = vor.u32 %v9470_v35, %v8202_v45  ;;  %v12682_v43 = vpop.permute.xlu2 %1590  ;;  %v15595_v4 = vld [vmem:[#allocation18_spill] sm:$0xff]  ;;  %v1299_v34 = vld [vmem:[%s10070_s29 + $0xb8] sm:$0xf] }
 0x2c0   : > { %4938 = vmatpush.bf16.msrb.mxu3 %v12256_v44  ;;  %v1298_v44 = vld [vmem:[%s10070_s29 + $0xa8] sm:$0xf]  ;;  %1619 = vst.msk [vmem:[#allocation2 + $0x258] sm:$0xf] %vm880_vm8, %v12546_v10  ;;  %v3383_v25 = vadd.f32 %v3382_v13, %v3339_v47  ;;  %v15596_v35 = vmax.f32 %v11580_v7, %v15595_v4  ;;  %v9524_v47 = vld [vmem:[%s15304_s1 + $0x134] sm:$0xf] }
 0x2c1   : > { %1618 = vst.msk [vmem:[#allocation2 + $0x248] sm:$0xf] %vm880_vm8, %v1585_v18  ;;  %4161 = vmatmul.bf16.gmra.mxu1 %v12670_v53  ;;  %v8418_v7 = vld [vmem:[%s15304_s1 + $0x138] sm:$0xf0]  ;;  %v9492_v18 = vld [vmem:[%s15304_s1 + $0x34] sm:$0xf] }
 0x2c2   : > { %v12656_v11 = vpop.f32.mrf.mxu3  ;;  %v3341_v38 = vpop.f32.mrf.mxu1  ;;  %v3427_v59 = vadd.f32 %v12171_v21, %v3383_v25  ;;  %1312 = vst.msk [vmem:[#allocation2 + $0x260] sm:$0xf] %vm564_vm1, %v1298_v44  ;;  %v12709_v25 = vor.u32 %v9524_v47, %v8418_v7  ;;  %v9474_v7 = vld [vmem:[#allocation2 + $0x244] sm:$0xf] }
 0x2c3   : > { %v1365_v10 = vpop.permute.xlu0 %1364  ;;  %v3342_v42 = vadd.f32 %v3341_v38, %v3297_v5  ;;  %v7655_v5 = vld [vmem:[%s10070_s29 + $0xf8] sm:$0xf]  ;;  %1313 = vst.msk [vmem:[#allocation2 + $0x270] sm:$0xf] %vm564_vm1, %v1299_v34  ;;  %v9476_v34 = vld [vmem:[#allocation2 + $0x24c] sm:$0xf0] }
 0x2c4   : > { %4939 = vmatpush.bf16.msrb.mxu3 %v12279_v32  ;;  %4205 = vmatmul.bf16.gmra.mxu2 %v12665_v22  ;;  %v1382_v62 = vrot.slane %v1365_v10, 4  ;;  %v1508_v32 = vsel %vm764_vm2, %v1494_v27, %v1477_v39  ;;  %v3457_v6 = vmax.f32 %v3251_v63, %v3427_v59  ;;  %v5070_v29 = vld [vmem:[#allocation4 + $0x4] sm:$0xf]  ;;  %v3254_v63 = vadd.f32 %v11714_v36, %v12087_v28 }
 0x2c5   : > { %4117 = vmatmul.bf16.gmra.mxu0 %v12663_v51  ;;  %1844 = vrot.lane.b32.xlu2 %v7640_v55, %s9886_s17  ;;  %v8290_v55 = vld [vmem:[%s15304_s1 + $0x38] sm:$0xf0]  ;;  %5080 = vst.msk [vmem:[#allocation3 + $0x10] sm:$0xf] %vm564_vm1, %v5070_v29 }
 0x2c6   : > { %v1396_v19 = vsel %vm649_vm3, %v1382_v62, %v1365_v10  ;;  %v3471_v45 = vmax.f32 %v15596_v35, %v3457_v6  ;;  %v3299_v39 = vpop.f32.mrf.mxu0  ;;  %v1367_v27 = vpop.permute.xlu1 %1366  ;;  %v12719_v10 = vor.u32 %v9492_v18, %v8290_v55  ;;  %v9508_v62 = vld [vmem:[%s15304_s1 + $0xb4] sm:$0xf]  ;;  %4362 = vmatpush.bf16.msrb.mxu2 %v12709_v25  ;;  %v8216_v35 = vld [vmem:[#allocation2 + $0x240] sm:$0xf]  ;;  %v15600_v18 = vld [vmem:[#allocation21_spill] sm:$0xff] }
 0x2c7   : > { %4415 = vmatmul.bf16.gmra.mxu3 %v12057_v12  ;;  %v3488_v12 = vadd.f32 %v12591_v33, %v3470_v14  ;;  %1424 = vst.msk [vmem:[#allocation2 + $0x260] sm:$0xff] %vm10480_vm5, %v1396_v19  ;;  %v3385_v13 = vpop.f32.mrf.mxu2  ;;  %v1383_v59 = vrot.slane %v1367_v27, 4  ;;  %v9477_v47 = vld [vmem:[#allocation2 + $0x254] sm:$0xf0]  ;;  %v1481_v29 = vpop.permute.xlu2 %1480 }
 0x2c8   : > { %4940 = vmatpush.bf16.msrb.mxu3 %v12315_v26  ;;  %v5069_v26 = vld [vmem:[#allocation4] sm:$0xf]  ;;  %1536 = vst.msk [vmem:[#allocation2 + $0x264] sm:$0xff] %vm10514_vm9, %v1508_v32  ;;  %v3489_v38 = vadd.f32 %v12591_v33, %v3471_v45  ;;  %v3386_v44 = vadd.f32 %v3385_v13, %v3342_v42  ;;  %v8354_v32 = vld [vmem:[%s15304_s1 + $0xb8] sm:$0xf0]  ;;  %4274 = vmatpush.bf16.msrb.mxu0 %v12719_v10 }
 0x2c9   : > { %v3502_v6 = vmax.f32 %v3488_v12, 0.0  ;;  %v12730_v28 = vor.u32 %v9508_v62, %v8354_v32  ;;  %v1397_v45 = vsel %vm649_vm3, %v1383_v59, %v1367_v27  ;;  %5079 = vst.msk [vmem:[#allocation3] sm:$0xf] %vm564_vm1, %v5069_v26  ;;  %v15599_v27 = vld [vmem:[#allocation22_spill] sm:$0xff] }
 0x2ca   : > { %v12689_v21 = vpop.f32.mrf.mxu3  ;;  %v3343_v14 = vpop.f32.mrf.mxu1  ;;  %v3503_v19 = vmax.f32 %v3489_v38, 0.0  ;;  %v3430_v4 = vadd.f32 %v12216_v20, %v3386_v44  ;;  %1425 = vst.msk [vmem:[#allocation2 + $0x270] sm:$0xff] %vm10480_vm5, %v1397_v45  ;;  %v8224_v20 = vld [vmem:[#allocation2 + $0x248] sm:$0xf]  ;;  %v8218_v38 = vld [vmem:[#allocation2 + $0x250] sm:$0xf0]  ;;  %v15601_v55 = vmax.f32 %v15599_v27, %v15600_v18 }
 0x2cb   : > { %15594 = vst [vmem:[#allocation13_spill] sm:$0xff] %v12689_v21  ;;  %v1479_v36 = vpop.permute.xlu0 %1478  ;;  %4318 = vmatpush.bf16.msrb.mxu1 %v12730_v28  ;;  %v15597_v44 = vld [vmem:[#allocation79_spill] sm:$0xff] }
 0x2cc   : > { %4941 = vmatpush.bf16.msrb.mxu3 %v12349_v52  ;;  %v1495_v42 = vrot.slane %v1479_v36, 4  ;;  %v9746_v52 = vpack.c.bf16 %v3503_v19, %v3502_v6  ;;  %v3458_v12 = vmax.f32 %v3254_v63, %v3430_v4  ;;  %v12749_v6 = vor.u32 %v9476_v34, %v8216_v35  ;;  %v1300_v4 = vld [vmem:[%s10070_s29 + $0xc8] sm:$0xf] }
 0x2cd   : > { %1958 = vrot.lane.b32.xlu2 %v7655_v5, %s9889_s26  ;;  %v3344_v5 = vadd.f32 %v3343_v14, %v3299_v39  ;;  %v12751_v19 = vor.u32 %v9477_v47, %v8224_v20  ;;  %v15602_v39 = vld [vmem:[#allocation60_spill] sm:$0xff]  ;;  %v15603_v14 = vld [vmem:[#allocation29_spill] sm:$0xff]  ;;  %v15604_v34 = vld [vmem:[#allocation71_spill] sm:$0xff]  ;;  %1314 = vst.msk [vmem:[#allocation2 + $0x280] sm:$0xf] %vm564_vm1, %v1300_v4 }
 0x2ce   : > { %v1509_v13 = vsel %vm764_vm2, %v1495_v42, %v1479_v36  ;;  %9808 = vst [vmem:[#allocation4 + $0x8] sm:$0xff] %v9746_v52   ;;  %v3472_v63 = vmax.f32 %v15601_v55, %v3458_v12  ;;  %v3302_v59 = vpop.f32.mrf.mxu0  ;;  %v1496_v36 = vrot.slane %v1481_v29, 4  ;;  %v1589_v42 = vpop.permute.xlu1 %1588  ;;  %v12756_v52 = vor.u32 %v9474_v7, %v8218_v38  ;;  %v15605_v20 = vld [vmem:[#allocation59_spill] sm:$0xff]  ;;  %v15608_v4 = vld [vmem:[#allocation26_spill] sm:$0xff] }
 0x2cf   : > { %1537 = vst.msk [vmem:[#allocation2 + $0x274] sm:$0xff] %vm10514_vm9, %v1509_v13  ;;  %v3387_v62 = vpop.f32.mrf.mxu2  ;;  %v3256_v35 = vadd.f32 %v15603_v14, %v15602_v39  ;;  %v8410_v13 = vld [vmem:[%s15304_s1 + $0x128] sm:$0xf0]  ;;  %v9490_v14 = vld [vmem:[%s15304_s1 + $0x24] sm:$0xf] }
 0x2d0   : > { %4942 = vmatpush.bf16.msrb.mxu3 %v15597_v44  ;;  %1621 = vst.msk [vmem:[#allocation2 + $0x278] sm:$0xf] %vm880_vm8, %v12682_v43  ;;  %v3388_v45 = vadd.f32 %v3387_v62, %v3344_v5  ;;  %v1510_v7 = vsel %vm764_vm2, %v1496_v36, %v1481_v29  ;;  %v3490_v5 = vadd.f32 %v12591_v33, %v3472_v63  ;;  %v15607_v62 = vld [vmem:[#allocation23_spill] sm:$0xff]  ;;  %v1301_v36 = vld [vmem:[%s10070_s29 + $0xd8] sm:$0xf] }
 0x2d1   : > { %1620 = vst.msk [vmem:[#allocation2 + $0x268] sm:$0xf] %vm880_vm8, %v1589_v42  ;;  %4166 = vmatmul.bf16.gmra.mxu1 %v12756_v52 }
 0x2d2   : > { %v12742_v26 = vpop.f32.mrf.mxu3  ;;  %v3346_v32 = vpop.f32.mrf.mxu1  ;;  %v3432_v12 = vadd.f32 %v15604_v34, %v3388_v45  ;;  %v15609_v45 = vmax.f32 %v15607_v62, %v15608_v4  ;;  %1315 = vst.msk [vmem:[#allocation2 + $0x290] sm:$0xf] %vm564_vm1, %v1301_v36  ;;  %v15612_v4 = vld [vmem:[#allocation77_spill] sm:$0xff] }
 0x2d3   : > { %15598 = vst [vmem:[#allocation14_spill] sm:$0xff] %v12742_v26  ;;  %v1369_v43 = vpop.permute.xlu0 %1368  ;;  %v3347_v39 = vadd.f32 %v3346_v32, %v3302_v59  ;;  %v8282_v59 = vld [vmem:[%s15304_s1 + $0x28] sm:$0xf0]  ;;  %v9506_v32 = vld [vmem:[%s15304_s1 + $0xa4] sm:$0xf] }
 0x2d4   : > { %4943 = vmatpush.bf16.msrb.mxu3 %v12392_v23  ;;  %4210 = vmatmul.bf16.gmra.mxu2 %v12751_v19  ;;  %v1384_v47 = vrot.slane %v1369_v43, 4  ;;  %v9522_v23 = vld [vmem:[%s15304_s1 + $0x124] sm:$0xf]  ;;  %v3459_v38 = vmax.f32 %v3256_v35, %v3432_v12 }
 0x2d5   : > { %4122 = vmatmul.bf16.gmra.mxu0 %v12749_v6  ;;  %v12775_v44 = vor.u32 %v9522_v23, %v8410_v13  ;;  %v5169_v27 = vld [vmem:[#allocation4 + $0x8] sm:$0xf] }
 0x2d6   : > { %v1398_v18 = vsel %vm649_vm3, %v1384_v47, %v1369_v43  ;;  %v3473_v42 = vmax.f32 %v15609_v45, %v3459_v38  ;;  %5189 = vrot.lane.b32.xlu2 %v5169_v27, %s9886_s17  ;;  %v3304_v29 = vpop.f32.mrf.mxu0  ;;  %v1371_v43 = vpop.permute.xlu1 %1370  ;;  %v8346_v47 = vld [vmem:[%s15304_s1 + $0xa8] sm:$0xf0]  ;;  %v15611_v38 = vld [vmem:[#allocation32_spill] sm:$0xff]  ;;  %v5071_v36 = vld [vmem:[#allocation4 + $0x8] sm:$0xf] }
 0x2d7   : > { %4420 = vmatmul.bf16.gmra.mxu3 %v15605_v20  ;;  %1426 = vst.msk [vmem:[#allocation2 + $0x280] sm:$0xff] %vm10480_vm5, %v1398_v18  ;;  %4363 = vmatpush.bf16.msrb.mxu2 %v12775_v44  ;;  %v3390_v63 = vpop.f32.mrf.mxu2  ;;  %v12802_v20 = vor.u32 %v9490_v14, %v8282_v59  ;;  %v1385_v23 = vrot.slane %v1371_v43, 4  ;;  %v12807_v13 = vor.u32 %v9506_v32, %v8346_v47  ;;  %v3504_v18 = vmax.f32 %v3490_v5, 0.0  ;;  %v5072_v14 = vld [vmem:[#allocation4 + $0xc] sm:$0xf] }
 0x2d8   : > { %1538 = vst.msk [vmem:[#allocation2 + $0x284] sm:$0xff] %vm10514_vm9, %v1510_v7  ;;  %v3491_v34 = vadd.f32 %v12591_v33, %v3473_v42  ;;  %v3391_v12 = vadd.f32 %v3390_v63, %v3347_v39  ;;  %v15610_v7 = vld [vmem:[#allocation62_spill] sm:$0xff]  ;;  %v8232_v39 = vld [vmem:[#allocation2 + $0x260] sm:$0xf] }
 0x2d9   : > { %v3259_v27 = vadd.f32 %v15611_v38, %v15610_v7  ;;  %4275 = vmatpush.bf16.msrb.mxu0 %v12802_v20  ;;  %v1399_v63 = vsel %vm649_vm3, %v1385_v23, %v1371_v43  ;;  %4319 = vmatpush.bf16.msrb.mxu1 %v12807_v13  ;;  %v9480_v32 = vld [vmem:[#allocation2 + $0x26c] sm:$0xf0]  ;;  %5081 = vst.msk [vmem:[#allocation3 + $0x20] sm:$0xf] %vm564_vm1, %v5071_v36  ;;  %v1595_v7 = vpop.permute.xlu2 %1594  ;;  %v15614_v23 = vld [vmem:[#allocation27_spill] sm:$0xff] }
 0x2da   : > { %v12778_v55 = vpop.f32.mrf.mxu3  ;;  %v3348_v35 = vpop.f32.mrf.mxu1  ;;  %v3505_v62 = vmax.f32 %v3491_v34, 0.0  ;;  %v3435_v45 = vadd.f32 %v15612_v4, %v3391_v12  ;;  %1427 = vst.msk [vmem:[#allocation2 + $0x290] sm:$0xff] %vm10480_vm5, %v1399_v63  ;;  %v8240_v34 = vld [vmem:[#allocation2 + $0x268] sm:$0xf]  ;;  %v9481_v12 = vld [vmem:[#allocation2 + $0x274] sm:$0xf0] }
 0x2db   : > { %15606 = vst [vmem:[#allocation15_spill] sm:$0xff] %v12778_v55  ;;  %v1483_v42 = vpop.permute.xlu0 %1482  ;;  %v9478_v4 = vld [vmem:[#allocation2 + $0x264] sm:$0xf]  ;;  %v8234_v55 = vld [vmem:[#allocation2 + $0x270] sm:$0xf0]  ;;  %v15615_v36 = vld [vmem:[#allocation19_spill] sm:$0xff]  ;;  %v12830_v21 = vor.u32 %v9481_v12, %v8240_v34 }
 0x2dc   : > { %v1497_v59 = vrot.slane %v1483_v42, 4  ;;  %v9751_v47 = vpack.c.bf16 %v3505_v62, %v3504_v18  ;;  %v3460_v5 = vmax.f32 %v3259_v27, %v3435_v45  ;;  %5082 = vst.msk [vmem:[#allocation3 + $0x30] sm:$0xf] %vm564_vm1, %v5072_v14  ;;  %v15616_v26 = vmax.f32 %v15614_v23, %v15615_v36  ;;  %v7614_v45 = vld [vmem:[%s10070_s29 + $0x20] sm:$0xf] }
 0x2dd   : > { %v3349_v27 = vadd.f32 %v3348_v35, %v3304_v29  ;;  %15617 = vst [vmem:[#allocation17_spill] sm:$0xff] %v12830_v21  ;;  %1708 = vrot.lane.b32.xlu0 %v7614_v45, %s9887_s30  ;;  %v15619_v29 = vld [vmem:[#allocation35_spill] sm:$0xff]  ;;  %v7615_v34 = vld [vmem:[%s10070_s29 + $0x30] sm:$0xf] }
 0x2de   : > { %v1511_v38 = vsel %vm764_vm2, %v1497_v59, %v1483_v42  ;;  %9809 = vst [vmem:[#allocation4 + $0x10] sm:$0xff] %v9751_v47   ;;  %v3474_v18 = vmax.f32 %v15616_v26, %v3460_v5  ;;  %v3307_v62 = vpop.f32.mrf.mxu0  ;;  %v12828_v59 = vor.u32 %v9480_v32, %v8232_v39  ;;  %v12834_v47 = vor.u32 %v9478_v4, %v8234_v55  ;;  %v15618_v26 = vld [vmem:[#allocation66_spill] sm:$0xff]  ;;  %v15620_v5 = vld [vmem:[#allocation80_spill] sm:$0xff]  ;;  %v15621_v39 = vld [vmem:[#allocation65_spill] sm:$0xff]  ;;  %v1593_v12 = vpop.permute.xlu1 %1592 }
 0x2df   : > { %1539 = vst.msk [vmem:[#allocation2 + $0x294] sm:$0xff] %vm10514_vm9, %v1511_v38  ;;  %v3392_v63 = vpop.f32.mrf.mxu2  ;;  %v3261_v35 = vadd.f32 %v15619_v29, %v15618_v26  ;;  %v9520_v32 = vld [vmem:[%s15304_s1 + $0x114] sm:$0xf]  ;;  %v8402_v55 = vld [vmem:[%s15304_s1 + $0x118] sm:$0xf0]  ;;  %1710 = vrot.lane.b32.xlu1 %v7615_v34, %s9887_s30 }
 0x2e0   : > { %1623 = vst.msk [vmem:[#allocation2 + $0x298] sm:$0xf] %vm880_vm8, %v1595_v7  ;;  %v3393_v14 = vadd.f32 %v3392_v63, %v3349_v27  ;;  %v12850_v4 = vor.u32 %v9520_v32, %v8402_v55  ;;  %v3492_v45 = vadd.f32 %v12591_v33, %v3474_v18  ;;  %v15623_v63 = vld [vmem:[#allocation20_spill] sm:$0xff] }
 0x2e1   : > { %4171 = vmatmul.bf16.gmra.mxu1 %v12834_v47  ;;  %1622 = vst.msk [vmem:[#allocation2 + $0x288] sm:$0xf] %vm880_vm8, %v1593_v12 }
 0x2e2   : > { %v12820_v43 = vpop.f32.mrf.mxu3  ;;  %v3351_v42 = vpop.f32.mrf.mxu1  ;;  %v3437_v38 = vadd.f32 %v15620_v5, %v3393_v14  ;;  %v15624_v14 = vld [vmem:[#allocation24_spill] sm:$0xff]  ;;  %4364 = vmatpush.bf16.msrb.mxu2 %v12850_v4 }
 0x2e3   : > { %15613 = vst [vmem:[#allocation16_spill] sm:$0xff] %v12820_v43  ;;  %v15625_v26 = vmax.f32 %v15623_v63, %v15624_v14  ;;  %v15626_v63 = vld [vmem:[#allocation68_spill] sm:$0xff]  ;;  %v15627_v14 = vld [vmem:[#allocation41_spill] sm:$0xff] }
 0x2e4   : > { %4215 = vmatmul.bf16.gmra.mxu2 %v12830_v21  ;;  %v3461_v7 = vmax.f32 %v3261_v35, %v3437_v38  ;;  %v3352_v35 = vadd.f32 %v3351_v42, %v3307_v62  ;;  %v9488_v38 = vld [vmem:[%s15304_s1 + $0x14] sm:$0xf]  ;;  %v8338_v42 = vld [vmem:[%s15304_s1 + $0x98] sm:$0xf0]  ;;  %v8248_v43 = vld [vmem:[#allocation2 + $0x280] sm:$0xf] }
 0x2e5   : > { %4127 = vmatmul.bf16.gmra.mxu0 %v12828_v59  ;;  %v5309_v23 = vld [vmem:[#allocation4 + $0x10] sm:$0xf]  ;;  %v5310_v36 = vld [vmem:[#allocation4 + $0x14] sm:$0xf] }
 0x2e6   : > { %5319 = vst.msk [vmem:[#allocation3 + $0xc] sm:$0xf] %vm564_vm1, %v5309_v23  ;;  %v3475_v29 = vmax.f32 %v15625_v26, %v3461_v7  ;;  %v3309_v5 = vpop.f32.mrf.mxu0  ;;  %v9504_v62 = vld [vmem:[%s15304_s1 + $0x94] sm:$0xf]  ;;  %v7629_v23 = vld [vmem:[%s10070_s29 + $0x34] sm:$0xf]  ;;  %v3264_v26 = vadd.f32 %v15627_v14, %v15626_v63 }
 0x2e7   : > { %4425 = vmatmul.bf16.gmra.mxu3 %v15621_v39  ;;  %v8274_v39 = vld [vmem:[%s15304_s1 + $0x18] sm:$0xf0]  ;;  %5320 = vst.msk [vmem:[#allocation3 + $0x1c] sm:$0xf] %vm564_vm1, %v5310_v36  ;;  %v3395_v18 = vpop.f32.mrf.mxu2  ;;  %v12878_v7 = vor.u32 %v9504_v62, %v8338_v42  ;;  %1822 = vrot.lane.b32.xlu0 %v7629_v23, %s9886_s17  ;;  %v7642_v36 = vld [vmem:[%s10070_s29 + $0x28] sm:$0xf] }
 0x2e8   : > { %v12869_v55 = vor.u32 %v9488_v38, %v8274_v39  ;;  %v3493_v34 = vadd.f32 %v12591_v33, %v3475_v29  ;;  %v3396_v12 = vadd.f32 %v3395_v18, %v3352_v35  ;;  %v3506_v38 = vmax.f32 %v3492_v45, 0.0  ;;  %v9484_v29 = vld [vmem:[#allocation2 + $0x28c] sm:$0xf0]  ;;  %v5074_v18 = vld [vmem:[#allocation4 + $0x14] sm:$0xf]  ;;  %1932 = vrot.lane.b32.xlu1 %v7642_v36, %s9889_s26 }
 0x2e9   : > { %4320 = vmatpush.bf16.msrb.mxu1 %v12878_v7  ;;  %v5073_v35 = vld [vmem:[#allocation4 + $0x10] sm:$0xf]  ;;  %v8256_v23 = vld [vmem:[#allocation2 + $0x288] sm:$0xf]  ;;  %v9485_v54 = vld [vmem:[#allocation2 + $0x294] sm:$0xf0] }
 0x2ea   : > { %v12854_v27 = vpop.f32.mrf.mxu3  ;;  %v3353_v32 = vpop.f32.mrf.mxu1  ;;  %4276 = vmatpush.bf16.msrb.mxu0 %v12869_v55  ;;  %v3507_v39 = vmax.f32 %v3493_v34, 0.0  ;;  %5083 = vst.msk [vmem:[#allocation3 + $0x40] sm:$0xf] %vm564_vm1, %v5073_v35  ;;  %v9482_v63 = vld [vmem:[#allocation2 + $0x284] sm:$0xf]  ;;  %v15629_v34 = vld [vmem:[#allocation25_spill] sm:$0xff]  ;;  %v12902_v35 = vor.u32 %v9485_v54, %v8256_v23 }
 0x2eb   : > { %15622 = vst [vmem:[#allocation18_spill] sm:$0xff] %v12854_v27  ;;  %v3440_v27 = vadd.f32 %v12439_v57, %v3396_v12  ;;  %v8250_v45 = vld [vmem:[#allocation2 + $0x290] sm:$0xf0]  ;;  %v15630_v12 = vld [vmem:[#allocation28_spill] sm:$0xff]  ;;  %v3354_v21 = vadd.f32 %v3353_v32, %v3309_v5  ;;  %v15633_v32 = vld [vmem:[#allocation73_spill] sm:$0xff] }
 0x2ec   : > { %v9756_v62 = vpack.c.bf16 %v3507_v39, %v3506_v38  ;;  %5084 = vst.msk [vmem:[#allocation3 + $0x50] sm:$0xf] %vm564_vm1, %v5074_v18  ;;  %v15631_v14 = vmax.f32 %v15629_v34, %v15630_v12  ;;  %v9518_v36 = vld [vmem:[%s15304_s1 + $0x104] sm:$0xf]  ;;  %v12900_v39 = vor.u32 %v9484_v29, %v8248_v43  ;;  %v8394_v18 = vld [vmem:[%s15304_s1 + $0x108] sm:$0xf0] }
 0x2ed   : > { %v3462_v42 = vmax.f32 %v3264_v26, %v3440_v27  ;;  %v7616_v27 = vld [vmem:[%s10070_s29 + $0x40] sm:$0xf]  ;;  %15632 = vst [vmem:[#allocation22_spill] sm:$0xff] %v12902_v35  ;;  %v12909_v5 = vor.u32 %v9518_v36, %v8394_v18  ;;  %v15634_v12 = vld [vmem:[#allocation45_spill] sm:$0xff]  ;;  %v15635_v29 = vld [vmem:[#allocation72_spill] sm:$0xff] }
 0x2ee   : > { %9810 = vst [vmem:[#allocation4 + $0x18] sm:$0xff] %v9756_v62   ;;  %v3312_v38 = vpop.f32.mrf.mxu0  ;;  %v3266_v43 = vadd.f32 %v15634_v12, %v15633_v32  ;;  %v9486_v23 = vld [vmem:[%s15304_s1 + $0x4] sm:$0xf] }
 0x2ef   : > { %v3476_v15 = vmax.f32 %v15631_v14, %v3462_v42  ;;  %v3397_v26 = vpop.f32.mrf.mxu2  ;;  %v12907_v42 = vor.u32 %v9482_v63, %v8250_v45  ;;  %1712 = vrot.lane.b32.xlu0 %v7616_v27, %s9887_s30  ;;  %4365 = vmatpush.bf16.msrb.mxu2 %v12909_v5  ;;  %v8266_v63 = vld [vmem:[%s15304_s1 + $0x8] sm:$0xf0]  ;;  %v9502_v14 = vld [vmem:[%s15304_s1 + $0x84] sm:$0xf] }
 0x2f0   : > { %v3398_v62 = vadd.f32 %v3397_v26, %v3354_v21  ;;  %v7617_v21 = vld [vmem:[%s10070_s29 + $0x50] sm:$0xf]  ;;  %v8330_v27 = vld [vmem:[%s15304_s1 + $0x88] sm:$0xf0] }
 0x2f1   : > { %4176 = vmatmul.bf16.gmra.mxu1 %v12907_v42  ;;  %1714 = vrot.lane.b32.xlu1 %v7617_v21, %s9887_s30  ;;  %v15636_v36 = vld [vmem:[#allocation36_spill] sm:$0xff]  ;;  %v12937_v26 = vor.u32 %v9502_v14, %v8330_v27  ;;  %v3494_v12 = vadd.f32 %v12591_v33, %v3476_v15  ;;  %v15641_v27 = vld [vmem:[#allocation37_spill] sm:$0xff] }
 0x2f2   : > { %v12891_v57 = vpop.f32.mrf.mxu3  ;;  %v3356_v34 = vpop.f32.mrf.mxu1  ;;  %v3442_v54 = vadd.f32 %v12471_v2, %v3398_v62  ;;  %v12928_v2 = vor.u32 %v9486_v23, %v8266_v63 }
 0x2f3   : > { %15628 = vst [vmem:[#allocation79_spill] sm:$0xff] %v12891_v57  ;;  %4716 = vmatpush.bf16.msra.mxu2 %v15636_v36  ;;  %v3357_v23 = vadd.f32 %v3356_v34, %v3312_v38  ;;  %v7631_v36 = vld [vmem:[%s10070_s29 + $0x54] sm:$0xf]  ;;  %4321 = vmatpush.bf16.msrb.mxu1 %v12937_v26  ;;  %v7657_v38 = vld [vmem:[%s10070_s29 + $0x3c] sm:$0xf]  ;;  %v15642_v34 = vld [vmem:[#allocation38_spill] sm:$0xff] }
 0x2f4   : > { %4220 = vmatmul.bf16.gmra.mxu2 %v12902_v35  ;;  %v3463_v45 = vmax.f32 %v3266_v43, %v3442_v54  ;;  %v15638_v43 = vld [vmem:[#allocation30_spill] sm:$0xff]  ;;  %v15639_v54 = vld [vmem:[#allocation31_spill] sm:$0xff]  ;;  %4277 = vmatpush.bf16.msrb.mxu0 %v12928_v2  ;;  %v3508_v35 = vmax.f32 %v3494_v12, 0.0  ;;  %2003 = vst.msk [vmem:[#allocation2 + $0x2bc] sm:$0xf] %vm564_vm1, %v7657_v38 }
 0x2f5   : > { %4132 = vmatmul.bf16.gmra.mxu0 %v12900_v39  ;;  %v5311_v18 = vld [vmem:[#allocation4 + $0x18] sm:$0xf]  ;;  %v5312_v62 = vld [vmem:[#allocation4 + $0x1c] sm:$0xf]  ;;  %v15650_v12 = vld [vmem:[#allocation34_spill] sm:$0xff] }
 0x2f6   : > { %v3314_v63 = vpop.f32.mrf.mxu0  ;;  %5321 = vst.msk [vmem:[#allocation3 + $0x2c] sm:$0xf] %vm564_vm1, %v5311_v18  ;;  %v7644_v18 = vld [vmem:[%s10070_s29 + $0x48] sm:$0xf] }
 0x2f7   : > { %4430 = vmatmul.bf16.gmra.mxu3 %v15635_v29  ;;  %v15640_v29 = vmax.f32 %v15638_v43, %v15639_v54  ;;  %v3400_v14 = vpop.f32.mrf.mxu2  ;;  %5322 = vst.msk [vmem:[#allocation3 + $0x3c] sm:$0xf] %vm564_vm1, %v5312_v62  ;;  %4672 = vmatpush.bf16.msra.mxu1 %v15642_v34  ;;  %v15643_v54 = vld [vmem:[#allocation42_spill] sm:$0xff]  ;;  %v15645_v57 = vld [vmem:[#allocation11_spill] sm:$0xff] }
 0x2f8   : > { %4628 = vmatpush.bf16.msra.mxu0 %v15641_v27  ;;  %4717 = vmatpush.bf16.msra.mxu2 %v15643_v54  ;;  %v5076_v34 = vld [vmem:[#allocation4 + $0x1c] sm:$0xf] }
 0x2f9   : > { %v3477_v21 = vmax.f32 %v15640_v29, %v3463_v45  ;;  %v7656_v45 = vld [vmem:[%s10070_s29 + $0x2c] sm:$0xf]  ;;  %1826 = vrot.lane.b32.xlu0 %v7631_v36, %s9886_s17  ;;  %v15644_v29 = vld [vmem:[#allocation78_spill] sm:$0xff]  ;;  %1936 = vrot.lane.b32.xlu1 %v7644_v18, %s9889_s26  ;;  %5086 = vst.msk [vmem:[#allocation3 + $0x70] sm:$0xf] %vm564_vm1, %v5076_v34 }
 0x2fa   : > { %v12939_v32 = vpop.f32.mrf.mxu3  ;;  %v3358_v43 = vpop.f32.mrf.mxu1  ;;  %2002 = vst.msk [vmem:[#allocation2 + $0x2ac] sm:$0xf] %vm564_vm1, %v7656_v45  ;;  %v3269_v27 = vadd.f32 %v15645_v57, %v15644_v29  ;;  %v15647_v45 = vld [vmem:[#allocation47_spill] sm:$0xff]  ;;  %v15648_v57 = vld [vmem:[#allocation9_spill] sm:$0xff]  ;;  %v15654_v34 = vld [vmem:[#allocation10_spill] sm:$0xff] }
 0x2fb   : > { %15637 = vst [vmem:[#allocation21_spill] sm:$0xff] %v12939_v32  ;;  %v3495_v15 = vadd.f32 %v12591_v33, %v3477_v21  ;;  %v3401_v32 = vadd.f32 %v3400_v14, %v3357_v23  ;;  %v5075_v23 = vld [vmem:[#allocation4 + $0x18] sm:$0xf]  ;;  %v15646_v14 = vld [vmem:[#allocation46_spill] sm:$0xff]  ;;  %4673 = vmatpush.bf16.msra.mxu1 %v15647_v45  ;;  %v3359_v29 = vadd.f32 %v3358_v43, %v3314_v63  ;;  %v15655_v63 = vld [vmem:[#allocation52_spill] sm:$0xff] }
 0x2fc   : > { %4629 = vmatpush.bf16.msra.mxu0 %v15646_v14  ;;  %5085 = vst.msk [vmem:[#allocation3 + $0x60] sm:$0xf] %vm564_vm1, %v5075_v23  ;;  %4718 = vmatpush.bf16.msra.mxu2 %v15648_v57  ;;  %v15653_v14 = vld [vmem:[#allocation50_spill] sm:$0xff]  ;;  %v7619_v43 = vld [vmem:[%s10070_s29 + $0x70] sm:$0xf] }
 0x2fd   : > { %v3509_v62 = vmax.f32 %v3495_v15, 0.0  ;;  %v3445_v21 = vadd.f32 %v12521_v60, %v3401_v32  ;;  %v15649_v32 = vld [vmem:[#allocation33_spill] sm:$0xff]  ;;  %v15657_v57 = vld [vmem:[#allocation54_spill] sm:$0xff] }
 0x2fe   : > { %v15651_v15 = vmax.f32 %v15649_v32, %v15650_v12  ;;  %v3317_v23 = vpop.f32.mrf.mxu0  ;;  %v15658_v12 = vld [vmem:[#allocation39_spill] sm:$0xff] }
 0x2ff   : > { %v9761_v36 = vpack.c.bf16 %v3509_v62, %v3508_v35  ;;  %v3464_v54 = vmax.f32 %v3269_v27, %v3445_v21  ;;  %v7618_v35 = vld [vmem:[%s10070_s29 + $0x60] sm:$0xf]  ;;  %v3402_v27 = vpop.f32.mrf.mxu2  ;;  %v15652_v62 = vld [vmem:[#allocation49_spill] sm:$0xff]  ;;  %4674 = vmatpush.bf16.msra.mxu1 %v15653_v14 }
 0x300   : > { %4630 = vmatpush.bf16.msra.mxu0 %v15652_v62  ;;  %v3403_v18 = vadd.f32 %v3402_v27, %v3359_v29  ;;  %4719 = vmatpush.bf16.msra.mxu2 %v15655_v63  ;;  %v7633_v27 = vld [vmem:[%s10070_s29 + $0x74] sm:$0xf]  ;;  %v15662_v63 = vld [vmem:[#allocation57_spill] sm:$0xff] }
 0x301   : > { %9811 = vst [vmem:[#allocation4 + $0x20] sm:$0xff] %v9761_v36   ;;  %v3478_v38 = vmax.f32 %v15651_v15, %v3464_v54  ;;  %1716 = vrot.lane.b32.xlu0 %v7618_v35, %s9887_s30  ;;  %v3271_v36 = vadd.f32 %v15654_v34, %v12403_v24  ;;  %4322 = vmatmul.bf16.vlgmr.msrb.gmra.mxu1 %v12405_v58  ;;  %v15661_v62 = vld [vmem:[#allocation56_spill] sm:$0xff] }
 0x302   : > { %v12969_v60 = vpop.f32.mrf.mxu3  ;;  %v3361_v21 = vpop.f32.mrf.mxu1  ;;  %v3447_v54 = vadd.f32 %v12551_v37, %v3403_v18  ;;  %1718 = vrot.lane.b32.xlu1 %v7619_v43, %s9887_s30  ;;  %v15664_v43 = vld [vmem:[#allocation51_spill] sm:$0xff] }
 0x303   : > { %4675 = vmatpush.bf16.msra.mxu1 %v15657_v57  ;;  %v3496_v32 = vadd.f32 %v12591_v33, %v3478_v38  ;;  %v3362_v29 = vadd.f32 %v3361_v21, %v3317_v23  ;;  %v7658_v38 = vld [vmem:[%s10070_s29 + $0x4c] sm:$0xf]  ;;  %v7646_v23 = vld [vmem:[%s10070_s29 + $0x68] sm:$0xf]  ;;  %v15663_v21 = vld [vmem:[#allocation58_spill] sm:$0xff] }
 0x304   : > { %4366 = vmatmul.bf16.vlgmr.msrb.gmra.mxu2 %v12398_v46  ;;  %v3465_v45 = vmax.f32 %v3271_v36, %v3447_v54  ;;  %v7659_v54 = vld [vmem:[%s10070_s29 + $0x5c] sm:$0xf]  ;;  %2004 = vst.msk [vmem:[#allocation2 + $0x2cc] sm:$0xf] %vm564_vm1, %v7658_v38  ;;  %v7620_v38 = vld [vmem:[%s10070_s29 + $0x80] sm:$0xf] }
 0x305   : > { %4278 = vmatmul.bf16.vlgmr.msrb.gmra.mxu0 %v12396_v48  ;;  %v15656_v48 = vld [vmem:[#allocation53_spill] sm:$0xff]  ;;  %4720 = vmatpush.bf16.msra.mxu2 %v15661_v62  ;;  %2005 = vst.msk [vmem:[#allocation2 + $0x2dc] sm:$0xf] %vm564_vm1, %v7659_v54  ;;  %v15671_v54 = vld [vmem:[#allocation67_spill] sm:$0xff] }
 0x306   : > { %4631 = vmatpush.bf16.msra.mxu0 %v15656_v48  ;;  %v3319_v35 = vpop.f32.mrf.mxu0  ;;  %v3510_v48 = vmax.f32 %v3496_v32, 0.0  ;;  %v15668_v32 = vld [vmem:[#allocation43_spill] sm:$0xff] }
 0x307   : > { %4435 = vmatmul.bf16.gmra.mxu3 %v12394_v40  ;;  %v15659_v40 = vld [vmem:[#allocation40_spill] sm:$0xff]  ;;  %v3405_v18 = vpop.f32.mrf.mxu2  ;;  %4676 = vmatpush.bf16.msra.mxu1 %v15663_v21 }
 0x308   : > { %v5313_v24 = vld [vmem:[#allocation4 + $0x20] sm:$0xf]  ;;  %v5314_v37 = vld [vmem:[#allocation4 + $0x24] sm:$0xf]  ;;  %v15660_v15 = vmax.f32 %v15658_v12, %v15659_v40  ;;  %v3406_v34 = vadd.f32 %v3405_v18, %v3362_v29  ;;  %v15666_v29 = vld [vmem:[#allocation63_spill] sm:$0xff] }
 0x309   : > { %5323 = vst.msk [vmem:[#allocation3 + $0x4c] sm:$0xf] %vm564_vm1, %v5313_v24  ;;  %1830 = vrot.lane.b32.xlu0 %v7633_v27, %s9886_s17  ;;  %v5077_v12 = vld [vmem:[#allocation4 + $0x20] sm:$0xf]  ;;  %v5078_v40 = vld [vmem:[#allocation4 + $0x24] sm:$0xf] }
 0x30a   : > { %v12990_v58 = vpop.f32.mrf.mxu3  ;;  %v3479_v46 = vmax.f32 %v15660_v15, %v3465_v45  ;;  %5324 = vst.msk [vmem:[#allocation3 + $0x5c] sm:$0xf] %vm564_vm1, %v5314_v37  ;;  %v3363_v36 = vpop.f32.mrf.mxu1  ;;  %4632 = vmatpush.bf16.msra.mxu0 %v15662_v63  ;;  %v3274_v45 = vadd.f32 %v15664_v43, %v12453_v41  ;;  %v3450_v24 = vadd.f32 %v12605_v16, %v3406_v34  ;;  %v15665_v37 = vld [vmem:[#allocation61_spill] sm:$0xff]  ;;  %v15667_v41 = vld [vmem:[#allocation64_spill] sm:$0xff] }
 0x30b   : > { %4721 = vmatpush.bf16.msra.mxu2 %v15665_v37  ;;  %5087 = vst.msk [vmem:[#allocation3 + $0x80] sm:$0xf] %vm564_vm1, %v5077_v12  ;;  %1940 = vrot.lane.b32.xlu1 %v7646_v23, %s9889_s26  ;;  %v15669_v27 = vld [vmem:[#allocation44_spill] sm:$0xff]  ;;  %v15672_v43 = vld [vmem:[#allocation69_spill] sm:$0xff]  ;;  %v15676_v12 = vld [vmem:[#allocation75_spill] sm:$0xff] }
 0x30c   : > { %v3497_v14 = vadd.f32 %v12591_v33, %v3479_v46  ;;  %v3466_v46 = vmax.f32 %v3274_v45, %v3450_v24  ;;  %5088 = vst.msk [vmem:[#allocation3 + $0x90] sm:$0xf] %vm564_vm1, %v5078_v40  ;;  %4677 = vmatpush.bf16.msra.mxu1 %v15667_v41  ;;  %v15670_v62 = vmax.f32 %v15668_v32, %v15669_v27  ;;  %v7621_v24 = vld [vmem:[%s10070_s29 + $0x90] sm:$0xf]  ;;  %v7635_v32 = vld [vmem:[%s10070_s29 + $0x94] sm:$0xf] }
 0x30d   : > { %v15681_v27 = vld [vmem:[#allocation82_spill] sm:$0xff] }
 0x30e   : > { %v3511_v57 = vmax.f32 %v3497_v14, 0.0  ;;  %4633 = vmatpush.bf16.msra.mxu0 %v15666_v29  ;;  %v3480_v18 = vmax.f32 %v15670_v62, %v3466_v46  ;;  %v3364_v14 = vadd.f32 %v3363_v36, %v3319_v35  ;;  %v15674_v36 = vld [vmem:[#allocation74_spill] sm:$0xff] }
 0x30f   : > { %4722 = vmatpush.bf16.msra.mxu2 %v15671_v54  ;;  %v3407_v63 = vpop.f32.mrf.mxu2  ;;  %v7661_v54 = vld [vmem:[%s10070_s29 + $0x7c] sm:$0xf] }
 0x310   : > { %v9766_v15 = vpack.c.bf16 %v3511_v57, %v3510_v48  ;;  %v3408_v23 = vadd.f32 %v3407_v63, %v3364_v14  ;;  %v15673_v48 = vld [vmem:[#allocation55_spill] sm:$0xff]  ;;  %v15682_v63 = vld [vmem:[#allocation76_spill] sm:$0xff]  ;;  %2007 = vst.msk [vmem:[#allocation2 + $0x2fc] sm:$0xf] %vm564_vm1, %v7661_v54 }
 0x311   : > { %1720 = vrot.lane.b32.xlu0 %v7620_v38, %s9887_s30  ;;  %v3276_v57 = vadd.f32 %v15673_v48, %v12493_v30  ;;  %4327 = vmatmul.bf16.gmra.mxu1 %v12495_v31  ;;  %v15677_v30 = vld [vmem:[#allocation81_spill] sm:$0xff]  ;;  %v8546_v54 = vld [vmem:[#allocation2 + $0x2d8] sm:$0xf0] }
 0x312   : > { %v13018_v16 = vpop.f32.mrf.mxu3  ;;  %9812 = vst [vmem:[#allocation4 + $0x28] sm:$0xff] %v9766_v15   ;;  %v4103_v34 = vpop.f32.mrf.mxu0  ;;  %4634 = vmatpush.bf16.msra.mxu0 %v15672_v43  ;;  %v3452_v35 = vadd.f32 %v12656_v11, %v3408_v23  ;;  %v15678_v15 = vld [vmem:[#allocation8_spill] sm:$0xff]  ;;  %v15683_v43 = vld [vmem:[#allocation83_spill] sm:$0xff] }
 0x313   : > { %v4147_v21 = vpop.f32.mrf.mxu1  ;;  %4723 = vmatpush.bf16.msra.mxu2 %v15674_v36  ;;  %1722 = vrot.lane.b32.xlu1 %v7621_v24, %s9887_s30  ;;  %v8530_v36 = vld [vmem:[#allocation2 + $0x2b8] sm:$0xf0] }
 0x314   : > { %v4148_v45 = vadd.f32 %v4147_v21, %v4103_v34  ;;  %4371 = vmatmul.bf16.gmra.mxu2 %v12482_v9  ;;  %v3467_v37 = vmax.f32 %v3276_v57, %v3452_v35  ;;  %v15679_v9 = vld [vmem:[#allocation48_spill] sm:$0xff]  ;;  %v7648_v21 = vld [vmem:[%s10070_s29 + $0x88] sm:$0xf]  ;;  %v9551_v35 = vld [vmem:[#allocation2 + $0x2ac] sm:$0xf] }
 0x315   : > { %4283 = vmatmul.bf16.gmra.mxu0 %v12480_v61  ;;  %v15675_v61 = vld [vmem:[#allocation70_spill] sm:$0xff]  ;;  %v15680_v46 = vmax.f32 %v15678_v15, %v15679_v9 }
 0x316   : > { %4678 = vmatpush.bf16.msra.mxu1 %v15675_v61  ;;  %4635 = vmatpush.bf16.msra.mxu0 %v15676_v12 }
 0x317   : > { %4440 = vmatmul.bf16.gmra.mxu3 %v12478_v49  ;;  %4892 = vmatpush.bf16.msrb.mxu2 %v15677_v30  ;;  %v3498_v49 = vadd.f32 %v12591_v33, %v3480_v18  ;;  %v3481_v29 = vmax.f32 %v15680_v46, %v3467_v37  ;;  %v4191_v62 = vpop.f32.mrf.mxu2  ;;  %v7660_v18 = vld [vmem:[%s10070_s29 + $0x6c] sm:$0xf]  ;;  %v15686_v37 = vld [vmem:[#allocation86_spill] sm:$0xff] }
 0x318   : > { %v13051_v34 = vadd.f32 %v4191_v62, %v4148_v45  ;;  %2006 = vst.msk [vmem:[#allocation2 + $0x2ec] sm:$0xf] %vm564_vm1, %v7660_v18  ;;  %v15685_v45 = vld [vmem:[#allocation85_spill] sm:$0xff]  ;;  %v7622_v30 = vld [vmem:[%s10070_s29 + $0xa0] sm:$0xf] }
 0x319   : > { %v5315_v31 = vld [vmem:[#allocation4 + $0x28] sm:$0xf]  ;;  %v5316_v11 = vld [vmem:[#allocation4 + $0x2c] sm:$0xf]  ;;  %v3499_v14 = vadd.f32 %v12591_v33, %v3481_v29  ;;  %1834 = vrot.lane.b32.xlu0 %v7635_v32, %s9886_s17  ;;  %v3512_v48 = vmax.f32 %v3498_v49, 0.0  ;;  %v15684_v33 = vld [vmem:[#allocation84_spill] sm:$0xff] }
 0x31a   : > { %v13040_v40 = vpop.f32.mrf.mxu3  ;;  %v4105_v41 = vpop.f32.mrf.mxu0  ;;  %4804 = vmatpush.bf16.msrb.mxu0 %v15681_v27  ;;  %5325 = vst.msk [vmem:[#allocation3 + $0x6c] sm:$0xf] %vm564_vm1, %v5315_v31  ;;  %4679 = vmatpush.bf16.msra.mxu1 %v15682_v63  ;;  %v15687_v31 = vld [vmem:[#allocation87_spill] sm:$0xff]  ;;  %v15688_v29 = vld [vmem:[#allocation12_spill] sm:$0xff] }
 0x31b   : > { %5326 = vst.msk [vmem:[#allocation3 + $0x7c] sm:$0xf] %vm564_vm1, %v5316_v11  ;;  %v4149_v38 = vpop.f32.mrf.mxu1  ;;  %v3513_v57 = vmax.f32 %v3499_v14, 0.0  ;;  %4893 = vmatpush.bf16.msrb.mxu2 %v15684_v33  ;;  %1944 = vrot.lane.b32.xlu1 %v7648_v21, %s9889_s26  ;;  %v13070_v11 = vor.u32 %v9551_v35, %v8530_v36  ;;  %v7662_v14 = vld [vmem:[%s10070_s29 + $0x8c] sm:$0xf] }
 0x31c   : > { %v4150_v23 = vadd.f32 %v4149_v38, %v4105_v41  ;;  %v7663_v38 = vld [vmem:[%s10070_s29 + $0x9c] sm:$0xf]  ;;  %v7650_v18 = vld [vmem:[%s10070_s29 + $0xa8] sm:$0xf]  ;;  %2008 = vst.msk [vmem:[#allocation2 + $0x30c] sm:$0xf] %vm564_vm1, %v7662_v14 }
 0x31d   : > { %v9771_v24 = vpack.c.bf16 %v3513_v57, %v3512_v48  ;;  %2009 = vst.msk [vmem:[#allocation2 + $0x31c] sm:$0xf] %vm564_vm1, %v7663_v38  ;;  %v7665_v33 = vld [vmem:[%s10070_s29 + $0xbc] sm:$0xf]  ;;  %v8562_v35 = vld [vmem:[#allocation2 + $0x2f8] sm:$0xf0] }
 0x31e   : > { %4848 = vmatpush.bf16.msrb.mxu1 %v15683_v43  ;;  %4805 = vmatpush.bf16.msrb.mxu0 %v15685_v45  ;;  %2011 = vst.msk [vmem:[#allocation2 + $0x33c] sm:$0xf] %vm564_vm1, %v7665_v33 }
 0x31f   : > { %9813 = vst [vmem:[#allocation4 + $0x30] sm:$0xff] %v9771_v24   ;;  %4894 = vmatpush.bf16.msrb.mxu2 %v15687_v31  ;;  %v4193_v49 = vpop.f32.mrf.mxu2 }
 0x320   : > { %v13072_v15 = vadd.f32 %v4193_v49, %v4150_v23  ;;  %v7624_v23 = vld [vmem:[%s10070_s29 + $0xc0] sm:$0xf] }
 0x321   : > { %1724 = vrot.lane.b32.xlu0 %v7622_v30, %s9887_s30  ;;  %4332 = vmatmul.bf16.gmra.mxu1 %v12577_v0 }
 0x322   : > { %4849 = vmatpush.bf16.msrb.mxu1 %v15686_v37  ;;  %v13065_v61 = vpop.f32.mrf.mxu3  ;;  %v4108_v12 = vpop.f32.mrf.mxu0  ;;  %4806 = vmatpush.bf16.msrb.mxu0 %v12568_v1  ;;  %v7623_v1 = vld [vmem:[%s10070_s29 + $0xb0] sm:$0xf] }
 0x323   : > { %v4152_v9 = vpop.f32.mrf.mxu1  ;;  %4895 = vmatpush.bf16.msrb.mxu2 %v12625_v50  ;;  %1726 = vrot.lane.b32.xlu1 %v7623_v1, %s9887_s30  ;;  %v7637_v50 = vld [vmem:[%s10070_s29 + $0xb4] sm:$0xf] }
 0x324   : > { %v4153_v46 = vadd.f32 %v4152_v9, %v4108_v12  ;;  %4376 = vmatmul.bf16.gmra.mxu2 %v12566_v56  ;;  %v7627_v9 = vld [vmem:[%s10070_s29 + $0xf0] sm:$0xf] }
 0x325   : > { %4288 = vmatmul.bf16.gmra.mxu0 %v12564_v8 }
 0x326   : > { %4850 = vmatpush.bf16.msrb.mxu1 %v15688_v29  ;;  %4807 = vmatpush.bf16.msrb.mxu0 %v12635_v17  ;;  %v5317_v8 = vld [vmem:[#allocation4 + $0x30] sm:$0xf]  ;;  %v5318_v41 = vld [vmem:[#allocation4 + $0x34] sm:$0xf]  ;;  %v7641_v29 = vld [vmem:[%s10070_s29 + $0xf4] sm:$0xf] }
 0x327   : > { %4768 = vmatmul.bf16.vlgmr.msra.gmra.mxu3 %v13070_v11  ;;  %4896 = vmatpush.bf16.msrb.mxu2 %v12709_v25  ;;  %5327 = vst.msk [vmem:[#allocation3 + $0x8c] sm:$0xf] %vm564_vm1, %v5317_v8  ;;  %v4196_v56 = vpop.f32.mrf.mxu2  ;;  %v9555_v25 = vld [vmem:[#allocation2 + $0x2cc] sm:$0xf] }
 0x328   : > { %5328 = vst.msk [vmem:[#allocation3 + $0x9c] sm:$0xf] %vm564_vm1, %v5318_v41  ;;  %v13090_v27 = vadd.f32 %v4196_v56, %v4153_v46 }
 0x329   : > { %1838 = vrot.lane.b32.xlu0 %v7637_v50, %s9886_s17  ;;  %v7667_v50 = vld [vmem:[%s10070_s29 + $0xdc] sm:$0xf] }
 0x32a   : > { %v13084_v32 = vpop.f32.mrf.mxu3  ;;  %v4110_v0 = vpop.f32.mrf.mxu0  ;;  %4851 = vmatpush.bf16.msrb.mxu1 %v12646_v3  ;;  %4808 = vmatpush.bf16.msrb.mxu0 %v12719_v10  ;;  %v13108_v10 = vor.u32 %v9555_v25, %v8546_v54  ;;  %2013 = vst.msk [vmem:[#allocation2 + $0x35c] sm:$0xf] %vm564_vm1, %v7667_v50 }
 0x32b   : > { %v4154_v62 = vpop.f32.mrf.mxu1  ;;  %4897 = vmatpush.bf16.msrb.mxu2 %v12775_v44  ;;  %1948 = vrot.lane.b32.xlu1 %v7650_v18, %s9889_s26  ;;  %v1652_v18 = vld [vmem:[%s10070_s29 + $0xc] sm:$0xf] }
 0x32c   : > { %v4155_v17 = vadd.f32 %v4154_v62, %v4110_v0  ;;  %v8578_v62 = vld [vmem:[#allocation2 + $0x318] sm:$0xf0]  ;;  %1666 = vst.msk [vmem:[#allocation2 + $0x2a0] sm:$0xf] %vm564_vm1, %v1652_v18 }
 0x32e   : > { %4852 = vmatpush.bf16.msrb.mxu1 %v12730_v28  ;;  %4809 = vmatpush.bf16.msrb.mxu0 %v12802_v20  ;;  %v13117_v28 = vpop.permute.xlu2 %1820  ;;  %v7625_v20 = vld [vmem:[%s10070_s29 + $0xd0] sm:$0xf] }
 0x32f   : > { %4898 = vmatpush.bf16.msrb.mxu2 %v12850_v4  ;;  %v4198_v21 = vpop.f32.mrf.mxu2  ;;  %v1848_v25 = vrot.slane %v13117_v28, 4 }
 0x330   : > { %v13110_v43 = vadd.f32 %v4198_v21, %v4155_v17  ;;  %v7654_v17 = vld [vmem:[%s10070_s29 + $0xe8] sm:$0xf] }
 0x331   : > { %1728 = vrot.lane.b32.xlu0 %v7624_v23, %s9887_s30  ;;  %4337 = vmatmul.bf16.gmra.mxu1 %v12670_v53 }
 0x332   : > { %v13104_v3 = vpop.f32.mrf.mxu3  ;;  %v4113_v63 = vpop.f32.mrf.mxu0  ;;  %4853 = vmatpush.bf16.msrb.mxu1 %v12807_v13  ;;  %4810 = vmatpush.bf16.msrb.mxu0 %v12869_v55  ;;  %v7639_v13 = vld [vmem:[%s10070_s29 + $0xd4] sm:$0xf] }
 0x333   : > { %15689 = vst [vmem:[#allocation60_spill] sm:$0xff] %v13104_v3  ;;  %v4157_v44 = vpop.f32.mrf.mxu1  ;;  %1730 = vrot.lane.b32.xlu1 %v7625_v20, %s9887_s30  ;;  %4899 = vmatpush.bf16.msrb.mxu2 %v12909_v5  ;;  %v9559_v5 = vld [vmem:[#allocation2 + $0x2ec] sm:$0xf] }
 0x334   : > { %v4158_v48 = vadd.f32 %v4157_v44, %v4113_v63  ;;  %4381 = vmatmul.bf16.gmra.mxu2 %v12665_v22  ;;  %v7664_v22 = vld [vmem:[%s10070_s29 + $0xac] sm:$0xf]  ;;  %v13144_v37 = vor.u32 %v9559_v5, %v8562_v35 }
 0x335   : > { %4293 = vmatmul.bf16.gmra.mxu0 %v12663_v51  ;;  %2010 = vst.msk [vmem:[#allocation2 + $0x32c] sm:$0xf] %vm564_vm1, %v7664_v22 }
 0x336   : > { %4854 = vmatpush.bf16.msrb.mxu1 %v12878_v7  ;;  %4811 = vmatpush.bf16.msrb.mxu0 %v12928_v2  ;;  %v7652_v7 = vld [vmem:[%s10070_s29 + $0xc8] sm:$0xf]  ;;  %v13139_v2 = vpop.permute.xlu2 %1934 }
 0x337   : > { %4773 = vmatmul.bf16.gmra.mxu3 %v13108_v10  ;;  %v4201_v4 = vpop.f32.mrf.mxu2 }
 0x338   : > { %v13129_v55 = vadd.f32 %v4201_v4, %v4158_v48  ;;  %v15690_v4 = vld [vmem:[#allocation17_spill] sm:$0xff] }
 0x339   : > { %1842 = vrot.lane.b32.xlu0 %v7639_v13, %s9886_s17  ;;  %v1862_v13 = vsel %vm764_vm2, %v1848_v25, %v13117_v28 }
 0x33a   : > { %v13125_v51 = vpop.f32.mrf.mxu3  ;;  %v4115_v53 = vpop.f32.mrf.mxu0  ;;  %4855 = vmatpush.bf16.msrb.mxu1 %v12937_v26  ;;  %v7626_v26 = vld [vmem:[%s10070_s29 + $0xe0] sm:$0xf] }
 0x33b   : > { %v4159_v57 = vpop.f32.mrf.mxu1  ;;  %1952 = vrot.lane.b32.xlu1 %v7652_v7, %s9889_s26 }
 0x33c   : > { %v4160_v45 = vadd.f32 %v4159_v57, %v4115_v53 }
 0x33e   : > { %v13158_v8 = vpop.permute.xlu2 %1824 }
 0x33f   : > { %v4203_v12 = vpop.f32.mrf.mxu2 }
 0x340   : > { %v13146_v30 = vadd.f32 %v4203_v12, %v4160_v45  ;;  %v1653_v45 = vld [vmem:[%s10070_s29 + $0x1c] sm:$0xf] }
 0x341   : > { %1732 = vrot.lane.b32.xlu0 %v7626_v26, %s9887_s30  ;;  %4342 = vmatmul.bf16.gmra.mxu1 %v12756_v52  ;;  %v7666_v52 = vld [vmem:[%s10070_s29 + $0xcc] sm:$0xf]  ;;  %1667 = vst.msk [vmem:[#allocation2 + $0x2b0] sm:$0xf] %vm564_vm1, %v1653_v45  ;;  %v7669_v12 = vld [vmem:[%s10070_s29 + $0xfc] sm:$0xf] }
 0x342   : > { %v13141_v36 = vpop.f32.mrf.mxu3  ;;  %v4118_v24 = vpop.f32.mrf.mxu0  ;;  %2012 = vst.msk [vmem:[#allocation2 + $0x34c] sm:$0xf] %vm564_vm1, %v7666_v52  ;;  %v7668_v26 = vld [vmem:[%s10070_s29 + $0xec] sm:$0xf] }
 0x343   : > { %v4162_v31 = vpop.f32.mrf.mxu1  ;;  %1734 = vrot.lane.b32.xlu1 %v7627_v9, %s9887_s30  ;;  %2014 = vst.msk [vmem:[#allocation2 + $0x36c] sm:$0xf] %vm564_vm1, %v7668_v26  ;;  %v8610_v26 = vld [vmem:[#allocation2 + $0x358] sm:$0xf0] }
 0x344   : > { %v4163_v49 = vadd.f32 %v4162_v31, %v4118_v24  ;;  %4386 = vmatmul.bf16.gmra.mxu2 %v12751_v19  ;;  %v9563_v19 = vld [vmem:[#allocation2 + $0x30c] sm:$0xf]  ;;  %2015 = vst.msk [vmem:[#allocation2 + $0x37c] sm:$0xf] %vm564_vm1, %v7669_v12 }
 0x345   : > { %4298 = vmatmul.bf16.gmra.mxu0 %v12749_v6  ;;  %v13172_v54 = vor.u32 %v9563_v19, %v8578_v62 }
 0x346   : > { %v13178_v44 = vpop.permute.xlu2 %1938 }
 0x347   : > { %4778 = vmatmul.bf16.gmra.mxu3 %v13144_v37  ;;  %v4206_v6 = vpop.f32.mrf.mxu2 }
 0x348   : > { %v13160_v41 = vadd.f32 %v4206_v6, %v4163_v49  ;;  %v8594_v6 = vld [vmem:[#allocation2 + $0x338] sm:$0xf0] }
 0x349   : > { %1846 = vrot.lane.b32.xlu0 %v7641_v29, %s9886_s17  ;;  %v9567_v29 = vld [vmem:[#allocation2 + $0x32c] sm:$0xf] }
 0x34a   : > { %v13155_v46 = vpop.f32.mrf.mxu3  ;;  %v4120_v1 = vpop.f32.mrf.mxu0  ;;  %v13209_v19 = vor.u32 %v9567_v29, %v8594_v6 }
 0x34b   : > { %v4164_v0 = vpop.f32.mrf.mxu1  ;;  %1956 = vrot.lane.b32.xlu1 %v7654_v17, %s9889_s26  ;;  %v1654_v17 = vld [vmem:[%s10070_s29 + $0x2c] sm:$0xf] }
 0x34c   : > { %v4165_v56 = vadd.f32 %v4164_v0, %v4120_v1  ;;  %1668 = vst.msk [vmem:[#allocation2 + $0x2c0] sm:$0xf] %vm564_vm1, %v1654_v17 }
 0x34e   : > { %v13202_v9 = vpop.permute.xlu2 %1828 }
 0x34f   : > { %v4208_v63 = vpop.f32.mrf.mxu2  ;;  %v1709_v20 = vpop.permute.xlu0 %1708 }
 0x350   : > { %v13176_v23 = vadd.f32 %v4208_v63, %v4165_v56  ;;  %v1736_v53 = vrot.slane %v1709_v20, 4  ;;  %v1850_v63 = vrot.slane %v13158_v8, 4 }
 0x351   : > { %4347 = vmatmul.bf16.gmra.mxu1 %v12834_v47  ;;  %v1711_v28 = vpop.permute.xlu1 %1710 }
 0x352   : > { %v13167_v14 = vpop.f32.mrf.mxu3  ;;  %v4123_v38 = vpop.f32.mrf.mxu0  ;;  %v1750_v57 = vsel %vm649_vm3, %v1736_v53, %v1709_v20  ;;  %v1737_v24 = vrot.slane %v1711_v28, 4  ;;  %v1864_v53 = vsel %vm764_vm2, %v1850_v63, %v13158_v8 }
 0x353   : > { %v4167_v21 = vpop.f32.mrf.mxu1  ;;  %1778 = vst.msk [vmem:[#allocation2 + $0x2a0] sm:$0xff] %vm10480_vm5, %v1750_v57 }
 0x354   : > { %v4168_v48 = vadd.f32 %v4167_v21, %v4123_v38  ;;  %4391 = vmatmul.bf16.gmra.mxu2 %v15690_v4  ;;  %1890 = vst.msk [vmem:[#allocation2 + $0x2a4] sm:$0xff] %vm10514_vm9, %v1862_v13  ;;  %v1751_v49 = vsel %vm649_vm3, %v1737_v24, %v1711_v28  ;;  %v9571_v24 = vld [vmem:[#allocation2 + $0x34c] sm:$0xf] }
 0x355   : > { %4303 = vmatmul.bf16.gmra.mxu0 %v12828_v59  ;;  %1779 = vst.msk [vmem:[#allocation2 + $0x2b0] sm:$0xff] %vm10480_vm5, %v1751_v49 }
 0x356   : > { %v13227_v13 = vpop.permute.xlu2 %1942 }
 0x357   : > { %4783 = vmatmul.bf16.gmra.mxu3 %v13172_v54  ;;  %v4211_v7 = vpop.f32.mrf.mxu2 }
 0x358   : > { %v13195_v5 = vadd.f32 %v4211_v7, %v4168_v48  ;;  %v15693_v48 = vld [vmem:[#allocation22_spill] sm:$0xff] }
 0x359   : > { %v1823_v1 = vpop.permute.xlu0 %1822 }
 0x35a   : > { %v13189_v33 = vpop.f32.mrf.mxu3  ;;  %v4125_v47 = vpop.f32.mrf.mxu0  ;;  %v1849_v0 = vrot.slane %v1823_v1, 4  ;;  %v8520_v49 = vld [vmem:[#allocation2 + $0x2a0] sm:$0xf] }
 0x35b   : > { %v4169_v35 = vpop.f32.mrf.mxu1  ;;  %v1933_v38 = vpop.permute.xlu1 %1932 }
 0x35c   : > { %v4170_v31 = vadd.f32 %v4169_v35, %v4125_v47  ;;  %v1863_v50 = vsel %vm764_vm2, %v1849_v0, %v1823_v1  ;;  %1974 = vst.msk [vmem:[#allocation2 + $0x2a8] sm:$0xf] %vm880_vm8, %v1933_v38  ;;  %v1655_v47 = vld [vmem:[%s10070_s29 + $0x3c] sm:$0xf]  ;;  %v9552_v1 = vld [vmem:[#allocation2 + $0x2ac] sm:$0xf0] }
 0x35d   : > { %1891 = vst.msk [vmem:[#allocation2 + $0x2b4] sm:$0xff] %vm10514_vm9, %v1863_v50  ;;  %v9550_v50 = vld [vmem:[#allocation2 + $0x2a4] sm:$0xf] }
 0x35e   : > { %1975 = vst.msk [vmem:[#allocation2 + $0x2b8] sm:$0xf] %vm880_vm8, %v13139_v2 }
 0x35f   : > { %v4213_v62 = vpop.f32.mrf.mxu2  ;;  %1669 = vst.msk [vmem:[#allocation2 + $0x2d0] sm:$0xf] %vm564_vm1, %v1655_v47  ;;  %v1852_v47 = vrot.slane %v13202_v9, 4 }
 0x360   : > { %v13216_v18 = vadd.f32 %v4213_v62, %v4170_v31 }
 0x361   : > { %4352 = vmatmul.bf16.gmra.mxu1 %v12907_v42  ;;  %v1713_v2 = vpop.permute.xlu0 %1712 }
 0x362   : > { %v13206_v52 = vpop.f32.mrf.mxu3  ;;  %v4128_v56 = vpop.f32.mrf.mxu0  ;;  %v1738_v20 = vrot.slane %v1713_v2, 4 }
 0x363   : > { %v4172_v25 = vpop.f32.mrf.mxu1  ;;  %v1715_v45 = vpop.permute.xlu1 %1714  ;;  %v8528_v6 = vld [vmem:[#allocation2 + $0x2a8] sm:$0xf] }
 0x364   : > { %v4173_v21 = vadd.f32 %v4172_v25, %v4128_v56  ;;  %4396 = vmatmul.bf16.gmra.mxu2 %v15693_v48  ;;  %v1739_v8 = vrot.slane %v1715_v45, 4  ;;  %v8522_v56 = vld [vmem:[#allocation2 + $0x2b0] sm:$0xf0]  ;;  %v13246_v25 = vor.u32 %v9571_v24, %v8610_v26 }
 0x365   : > { %4308 = vmatmul.bf16.gmra.mxu0 %v12900_v39  ;;  %v1752_v39 = vsel %vm649_vm3, %v1738_v20, %v1713_v2  ;;  %v9553_v0 = vld [vmem:[#allocation2 + $0x2b4] sm:$0xf0]  ;;  %v1656_v20 = vld [vmem:[%s10070_s29 + $0x4c] sm:$0xf] }
 0x366   : > { %1780 = vst.msk [vmem:[#allocation2 + $0x2c0] sm:$0xff] %vm10480_vm5, %v1752_v39  ;;  %v1753_v12 = vsel %vm649_vm3, %v1739_v8, %v1715_v45  ;;  %v13252_v2 = vor.u32 %v9553_v0, %v8528_v6  ;;  %v1866_v8 = vsel %vm764_vm2, %v1852_v47, %v13202_v9  ;;  %v9575_v9 = vld [vmem:[#allocation2 + $0x36c] sm:$0xf] }
 0x367   : > { %4788 = vmatmul.bf16.gmra.mxu3 %v13209_v19  ;;  %v4216_v42 = vpop.f32.mrf.mxu2  ;;  %1892 = vst.msk [vmem:[#allocation2 + $0x2c4] sm:$0xff] %vm10514_vm9, %v1864_v53 }
 0x368   : > { %v13237_v7 = vadd.f32 %v4216_v42, %v4173_v21  ;;  %1781 = vst.msk [vmem:[#allocation2 + $0x2d0] sm:$0xff] %vm10480_vm5, %v1753_v12  ;;  %v13250_v21 = vor.u32 %v9552_v1, %v8520_v49  ;;  %v1833_v42 = vpop.permute.xlu2 %1832  ;;  %v1657_v12 = vld [vmem:[%s10070_s29 + $0x5c] sm:$0xf] }
 0x369   : > { %1670 = vst.msk [vmem:[#allocation2 + $0x2e0] sm:$0xf] %vm564_vm1, %v1656_v20 }
 0x36a   : > { %v13229_v4 = vpop.f32.mrf.mxu3  ;;  %v4130_v57 = vpop.f32.mrf.mxu0  ;;  %1671 = vst.msk [vmem:[#allocation2 + $0x2f0] sm:$0xf] %vm564_vm1, %v1657_v12 }
 0x36b   : > { %v4174_v28 = vpop.f32.mrf.mxu1  ;;  %v1827_v31 = vpop.permute.xlu0 %1826 }
 0x36c   : > { %v4175_v35 = vadd.f32 %v4174_v28, %v4130_v57  ;;  %v1851_v29 = vrot.slane %v1827_v31, 4  ;;  %v1937_v48 = vpop.permute.xlu1 %1936  ;;  %v13259_v57 = vor.u32 %v9550_v50, %v8522_v56  ;;  %v8626_v50 = vld [vmem:[#allocation2 + $0x378] sm:$0xf0] }
 0x36d   : > { %1976 = vst.msk [vmem:[#allocation2 + $0x2c8] sm:$0xf] %vm880_vm8, %v1937_v48 }
 0x36e   : > { %v1865_v38 = vsel %vm764_vm2, %v1851_v29, %v1827_v31 }
 0x36f   : > { %1893 = vst.msk [vmem:[#allocation2 + $0x2d4] sm:$0xff] %vm10514_vm9, %v1865_v38  ;;  %v4218_v63 = vpop.f32.mrf.mxu2  ;;  %v9556_v48 = vld [vmem:[#allocation2 + $0x2cc] sm:$0xf0] }
 0x370   : > { %1977 = vst.msk [vmem:[#allocation2 + $0x2d8] sm:$0xf] %vm880_vm8, %v13178_v44  ;;  %v13257_v53 = vadd.f32 %v4218_v63, %v4175_v35  ;;  %v13282_v38 = vpop.permute.xlu2 %1946  ;;  %v8536_v63 = vld [vmem:[#allocation2 + $0x2c0] sm:$0xf] }
 0x371   : > { %4680 = vmatmul.bf16.vlgmr.msra.gmra.mxu1 %v13259_v57 }
 0x372   : > { %v13243_v62 = vpop.f32.mrf.mxu3  ;;  %v4133_v17 = vpop.f32.mrf.mxu0 }
 0x373   : > { %v4177_v39 = vpop.f32.mrf.mxu1  ;;  %v1717_v44 = vpop.permute.xlu0 %1716 }
 0x374   : > { %v4178_v45 = vadd.f32 %v4177_v39, %v4133_v17  ;;  %4724 = vmatmul.bf16.vlgmr.msra.gmra.mxu2 %v13252_v2  ;;  %v1740_v28 = vrot.slane %v1717_v44, 4  ;;  %v1719_v49 = vpop.permute.xlu1 %1718  ;;  %v8544_v39 = vld [vmem:[#allocation2 + $0x2c8] sm:$0xf] }
 0x375   : > { %4636 = vmatmul.bf16.vlgmr.msra.gmra.mxu0 %v13250_v21  ;;  %v1741_v6 = vrot.slane %v1719_v49, 4 }
 0x376   : > { %v1754_v24 = vsel %vm649_vm3, %v1740_v28, %v1717_v44  ;;  %v8538_v44 = vld [vmem:[#allocation2 + $0x2d0] sm:$0xf0] }
 0x377   : > { %4793 = vmatmul.bf16.gmra.mxu3 %v13246_v25  ;;  %1782 = vst.msk [vmem:[#allocation2 + $0x2e0] sm:$0xff] %vm10480_vm5, %v1754_v24  ;;  %v4221_v31 = vpop.f32.mrf.mxu2  ;;  %v1755_v56 = vsel %vm649_vm3, %v1741_v6, %v1719_v49  ;;  %v9557_v47 = vld [vmem:[#allocation2 + $0x2d4] sm:$0xf0]  ;;  %v1658_v6 = vld [vmem:[%s10070_s29 + $0x6c] sm:$0xf] }
 0x378   : > { %1894 = vst.msk [vmem:[#allocation2 + $0x2e4] sm:$0xff] %vm10514_vm9, %v1866_v8  ;;  %v13278_v1 = vadd.f32 %v4221_v31, %v4178_v45  ;;  %v9554_v45 = vld [vmem:[#allocation2 + $0x2c4] sm:$0xf]  ;;  %v13293_v31 = vor.u32 %v9556_v48, %v8536_v63  ;;  %v1837_v48 = vpop.permute.xlu2 %1836 }
 0x379   : > { %1783 = vst.msk [vmem:[#allocation2 + $0x2f0] sm:$0xff] %vm10480_vm5, %v1755_v56 }
 0x37a   : > { %v13270_v35 = vpop.f32.mrf.mxu3  ;;  %v4135_v26 = vpop.f32.mrf.mxu0  ;;  %1672 = vst.msk [vmem:[#allocation2 + $0x300] sm:$0xf] %vm564_vm1, %v1658_v6 }
 0x37b   : > { %v4179_v29 = vpop.f32.mrf.mxu1  ;;  %v1831_v17 = vpop.permute.xlu0 %1830 }
 0x37c   : > { %v4180_v0 = vadd.f32 %v4179_v29, %v4135_v26  ;;  %v1853_v20 = vrot.slane %v1831_v17, 4  ;;  %v13289_v26 = vor.u32 %v9575_v9, %v8626_v50  ;;  %v13295_v29 = vor.u32 %v9557_v47, %v8544_v39  ;;  %v1659_v47 = vld [vmem:[%s10070_s29 + $0x7c] sm:$0xf] }
 0x37d   : > { %v1941_v49 = vpop.permute.xlu1 %1940  ;;  %v1854_v9 = vrot.slane %v1833_v42, 4  ;;  %1673 = vst.msk [vmem:[#allocation2 + $0x310] sm:$0xf] %vm564_vm1, %v1659_v47 }
 0x37e   : > { %v1867_v8 = vsel %vm764_vm2, %v1853_v20, %v1831_v17  ;;  %15694 = vst [vmem:[#allocation29_spill] sm:$0xff] %v13289_v26  ;;  %v13302_v17 = vor.u32 %v9554_v45, %v8538_v44 }
 0x37f   : > { %1895 = vst.msk [vmem:[#allocation2 + $0x2f4] sm:$0xff] %vm10514_vm9, %v1867_v8  ;;  %v4223_v12 = vpop.f32.mrf.mxu2  ;;  %v1868_v63 = vsel %vm764_vm2, %v1854_v9, %v1833_v42  ;;  %v15697_v42 = vld [vmem:[#allocation13_spill] sm:$0xff] }
 0x380   : > { %15695 = vst [vmem:[#allocation71_spill] sm:$0xff] %v13295_v29  ;;  %v13300_v56 = vadd.f32 %v4223_v12, %v4180_v0  ;;  %v13322_v6 = vadd.f32 %v15697_v42, %v13051_v34  ;;  %v9558_v34 = vld [vmem:[#allocation2 + $0x2e4] sm:$0xf] }
 0x381   : > { %1979 = vst.msk [vmem:[#allocation2 + $0x2f8] sm:$0xf] %vm880_vm8, %v13227_v13  ;;  %4685 = vmatmul.bf16.gmra.mxu1 %v13302_v17 }
 0x382   : > { %v13286_v28 = vpop.f32.mrf.mxu3  ;;  %v4279_v24 = vpop.f32.mrf.mxu0  ;;  %15696 = vst [vmem:[#allocation59_spill] sm:$0xff] %v13302_v17  ;;  %v1856_v17 = vrot.slane %v1837_v48, 4 }
 0x383   : > { %v4323_v3 = vpop.f32.mrf.mxu1  ;;  %1978 = vst.msk [vmem:[#allocation2 + $0x2e8] sm:$0xf] %vm880_vm8, %v1941_v49  ;;  %v1721_v13 = vpop.permute.xlu0 %1720 }
 0x384   : > { %v4324_v50 = vadd.f32 %v4323_v3, %v4279_v24  ;;  %4729 = vmatmul.bf16.gmra.mxu2 %v13295_v29  ;;  %v1742_v0 = vrot.slane %v1721_v13, 4  ;;  %15698 = vst [vmem:[#allocation23_spill] sm:$0xff] %v13322_v6 }
 0x385   : > { %4641 = vmatmul.bf16.gmra.mxu0 %v13293_v31  ;;  %v1723_v44 = vpop.permute.xlu1 %1722 }
 0x386   : > { %v1756_v3 = vsel %vm649_vm3, %v1742_v0, %v1721_v13  ;;  %v1743_v12 = vrot.slane %v1723_v44, 4 }
 0x387   : > { %4798 = vmatmul.bf16.gmra.mxu3 %v13289_v26  ;;  %1784 = vst.msk [vmem:[#allocation2 + $0x300] sm:$0xff] %vm10480_vm5, %v1756_v3  ;;  %v4367_v45 = vpop.f32.mrf.mxu2  ;;  %v1660_v3 = vld [vmem:[%s10070_s29 + $0x8c] sm:$0xf] }
 0x388   : > { %1896 = vst.msk [vmem:[#allocation2 + $0x304] sm:$0xff] %vm10514_vm9, %v1868_v63  ;;  %v4368_v8 = vadd.f32 %v4367_v45, %v4324_v50  ;;  %v1757_v13 = vsel %vm649_vm3, %v1743_v12, %v1723_v44  ;;  %v8552_v63 = vld [vmem:[#allocation2 + $0x2e0] sm:$0xf]  ;;  %v9560_v50 = vld [vmem:[#allocation2 + $0x2ec] sm:$0xf0] }
 0x389   : > { %1785 = vst.msk [vmem:[#allocation2 + $0x310] sm:$0xff] %vm10480_vm5, %v1757_v13  ;;  %v9561_v45 = vld [vmem:[#allocation2 + $0x2f4] sm:$0xf0]  ;;  %v13337_v12 = vor.u32 %v9560_v50, %v8552_v63  ;;  %v15701_v63 = vld [vmem:[#allocation14_spill] sm:$0xff] }
 0x38a   : > { %v13311_v20 = vpop.f32.mrf.mxu3  ;;  %v4281_v39 = vpop.f32.mrf.mxu0  ;;  %v13325_v9 = vadd.f32 %v13125_v51, %v4368_v8  ;;  %v8560_v47 = vld [vmem:[#allocation2 + $0x2e8] sm:$0xf]  ;;  %v13350_v50 = vadd.f32 %v15701_v63, %v13072_v15  ;;  %1674 = vst.msk [vmem:[#allocation2 + $0x320] sm:$0xf] %vm564_vm1, %v1660_v3 }
 0x38b   : > { %v4325_v24 = vpop.f32.mrf.mxu1  ;;  %v1835_v0 = vpop.permute.xlu0 %1834  ;;  %v13339_v29 = vor.u32 %v9561_v45, %v8560_v47  ;;  %v1870_v45 = vsel %vm764_vm2, %v1856_v17, %v1837_v48  ;;  %v15704_v17 = vld [vmem:[#allocation15_spill] sm:$0xff] }
 0x38c   : > { %v4326_v49 = vadd.f32 %v4325_v24, %v4281_v39  ;;  %15699 = vst [vmem:[#allocation26_spill] sm:$0xff] %v13325_v9  ;;  %v1855_v39 = vrot.slane %v1835_v0, 4  ;;  %v8554_v24 = vld [vmem:[#allocation2 + $0x2f0] sm:$0xf0]  ;;  %v13373_v48 = vadd.f32 %v15704_v17, %v13090_v27 }
 0x38d   : > { %v1945_v13 = vpop.permute.xlu1 %1944  ;;  %15700 = vst [vmem:[#allocation62_spill] sm:$0xff] %v13339_v29  ;;  %v13344_v26 = vor.u32 %v9558_v34, %v8554_v24  ;;  %v1661_v34 = vld [vmem:[%s10070_s29 + $0x9c] sm:$0xf] }
 0x38e   : > { %v1869_v51 = vsel %vm764_vm2, %v1855_v39, %v1835_v0  ;;  %v1951_v0 = vpop.permute.xlu2 %1950  ;;  %1980 = vst.msk [vmem:[#allocation2 + $0x308] sm:$0xf] %vm880_vm8, %v1945_v13 }
 0x38f   : > { %1897 = vst.msk [vmem:[#allocation2 + $0x314] sm:$0xff] %vm10514_vm9, %v1869_v51  ;;  %v4369_v8 = vpop.f32.mrf.mxu2 }
 0x390   : > { %1981 = vst.msk [vmem:[#allocation2 + $0x318] sm:$0xf] %vm880_vm8, %v13282_v38  ;;  %v4370_v9 = vadd.f32 %v4369_v8, %v4326_v49 }
 0x391   : > { %15702 = vst [vmem:[#allocation32_spill] sm:$0xff] %v13350_v50  ;;  %4690 = vmatmul.bf16.gmra.mxu1 %v13344_v26 }
 0x392   : > { %v13332_v42 = vpop.f32.mrf.mxu3  ;;  %v4284_v44 = vpop.f32.mrf.mxu0  ;;  %v13353_v47 = vadd.f32 %v13141_v36, %v4370_v9  ;;  %1675 = vst.msk [vmem:[#allocation2 + $0x330] sm:$0xf] %vm564_vm1, %v1661_v34 }
 0x393   : > { %v4328_v6 = vpop.f32.mrf.mxu1  ;;  %v1725_v38 = vpop.permute.xlu0 %1724  ;;  %15705 = vst [vmem:[#allocation27_spill] sm:$0xff] %v13373_v48 }
 0x394   : > { %v4329_v39 = vadd.f32 %v4328_v6, %v4284_v44  ;;  %15703 = vst [vmem:[#allocation77_spill] sm:$0xff] %v13353_v47  ;;  %4734 = vmatmul.bf16.gmra.mxu2 %v13339_v29  ;;  %v1744_v6 = vrot.slane %v1725_v38, 4 }
 0x395   : > { %4646 = vmatmul.bf16.gmra.mxu0 %v13337_v12  ;;  %v8576_v34 = vld [vmem:[#allocation2 + $0x308] sm:$0xf] }
 0x396   : > { %v1758_v36 = vsel %vm649_vm3, %v1744_v6, %v1725_v38  ;;  %v1841_v38 = vpop.permute.xlu2 %1840 }
 0x397   : > { %4944 = vmatmul.bf16.vlgmr.msrb.gmra.mxu3 %v13070_v11  ;;  %1786 = vst.msk [vmem:[#allocation2 + $0x320] sm:$0xff] %vm10480_vm5, %v1758_v36  ;;  %v4372_v3 = vpop.f32.mrf.mxu2  ;;  %v1727_v11 = vpop.permute.xlu1 %1726  ;;  %v9565_v27 = vld [vmem:[#allocation2 + $0x314] sm:$0xf0]  ;;  %v1662_v36 = vld [vmem:[%s10070_s29 + $0xac] sm:$0xf]  ;;  %v1858_v50 = vrot.slane %v1841_v38, 4 }
 0x398   : > { %1898 = vst.msk [vmem:[#allocation2 + $0x324] sm:$0xff] %vm10514_vm9, %v1870_v45  ;;  %v4373_v24 = vadd.f32 %v4372_v3, %v4329_v39  ;;  %v1745_v44 = vrot.slane %v1727_v11, 4  ;;  %v8568_v39 = vld [vmem:[#allocation2 + $0x300] sm:$0xf]  ;;  %v9564_v45 = vld [vmem:[#allocation2 + $0x30c] sm:$0xf0]  ;;  %v13390_v49 = vor.u32 %v9565_v27, %v8576_v34 }
 0x399   : > { %v9562_v3 = vld [vmem:[#allocation2 + $0x304] sm:$0xf]  ;;  %v13388_v17 = vor.u32 %v9564_v45, %v8568_v39  ;;  %1676 = vst.msk [vmem:[#allocation2 + $0x340] sm:$0xf] %vm564_vm1, %v1662_v36  ;;  %v1663_v27 = vld [vmem:[%s10070_s29 + $0xbc] sm:$0xf] }
 0x39a   : > { %v13362_v15 = vpop.f32.mrf.mxu3  ;;  %v4286_v9 = vpop.f32.mrf.mxu0  ;;  %v13376_v13 = vadd.f32 %v13155_v46, %v4373_v24  ;;  %v1759_v63 = vsel %vm649_vm3, %v1745_v44, %v1727_v11  ;;  %1677 = vst.msk [vmem:[#allocation2 + $0x350] sm:$0xf] %vm564_vm1, %v1663_v27 }
 0x39b   : > { %v4330_v51 = vpop.f32.mrf.mxu1  ;;  %1787 = vst.msk [vmem:[#allocation2 + $0x330] sm:$0xff] %vm10480_vm5, %v1759_v63  ;;  %v1839_v6 = vpop.permute.xlu0 %1838 }
 0x39c   : > { %v4331_v8 = vadd.f32 %v4330_v51, %v4286_v9  ;;  %15706 = vst [vmem:[#allocation19_spill] sm:$0xff] %v13376_v13  ;;  %v1857_v9 = vrot.slane %v1839_v6, 4  ;;  %v8570_v51 = vld [vmem:[#allocation2 + $0x310] sm:$0xf0] }
 0x39d   : > { %v13394_v47 = vor.u32 %v9562_v3, %v8570_v51 }
 0x39e   : > { %v1871_v11 = vsel %vm764_vm2, %v1857_v9, %v1839_v6  ;;  %v15707_v6 = vld [vmem:[#allocation16_spill] sm:$0xff]  ;;  %v1872_v9 = vsel %vm764_vm2, %v1858_v50, %v1841_v38  ;;  %v15709_v50 = vld [vmem:[#allocation18_spill] sm:$0xff] }
 0x39f   : > { %1899 = vst.msk [vmem:[#allocation2 + $0x334] sm:$0xff] %vm10514_vm9, %v1871_v11  ;;  %v4374_v44 = vpop.f32.mrf.mxu2  ;;  %v1949_v63 = vpop.permute.xlu1 %1948  ;;  %v13400_v39 = vadd.f32 %v15707_v6, %v13110_v43  ;;  %v13423_v38 = vadd.f32 %v15709_v50, %v13129_v55  ;;  %v9566_v55 = vld [vmem:[#allocation2 + $0x324] sm:$0xf] }
 0x3a0   : > { %1983 = vst.msk [vmem:[#allocation2 + $0x338] sm:$0xf] %vm880_vm8, %v1951_v0  ;;  %v4375_v13 = vadd.f32 %v4374_v44, %v4331_v8  ;;  %v1955_v43 = vpop.permute.xlu2 %1954 }
 0x3a1   : > { %1982 = vst.msk [vmem:[#allocation2 + $0x328] sm:$0xf] %vm880_vm8, %v1949_v63  ;;  %4695 = vmatmul.bf16.gmra.mxu1 %v13394_v47 }
 0x3a2   : > { %v13383_v46 = vpop.f32.mrf.mxu3  ;;  %v4289_v24 = vpop.f32.mrf.mxu0  ;;  %v13403_v45 = vadd.f32 %v13167_v14, %v4375_v13  ;;  %15710 = vst [vmem:[#allocation35_spill] sm:$0xff] %v13423_v38 }
 0x3a3   : > { %v4333_v48 = vpop.f32.mrf.mxu1  ;;  %v1729_v0 = vpop.permute.xlu0 %1728 }
 0x3a4   : > { %v4334_v29 = vadd.f32 %v4333_v48, %v4289_v24  ;;  %15708 = vst [vmem:[#allocation66_spill] sm:$0xff] %v13403_v45  ;;  %4739 = vmatmul.bf16.gmra.mxu2 %v13390_v49  ;;  %v1746_v48 = vrot.slane %v1729_v0, 4 }
 0x3a5   : > { %4651 = vmatmul.bf16.gmra.mxu0 %v13388_v17 }
 0x3a6   : > { %v1760_v14 = vsel %vm649_vm3, %v1746_v48, %v1729_v0  ;;  %v8584_v0 = vld [vmem:[#allocation2 + $0x320] sm:$0xf]  ;;  %v8586_v27 = vld [vmem:[#allocation2 + $0x330] sm:$0xf0] }
 0x3a7   : > { %4949 = vmatmul.bf16.gmra.mxu3 %v13108_v10  ;;  %1788 = vst.msk [vmem:[#allocation2 + $0x340] sm:$0xff] %vm10480_vm5, %v1760_v14  ;;  %v4377_v10 = vpop.f32.mrf.mxu2  ;;  %v1731_v36 = vpop.permute.xlu1 %1730  ;;  %v13444_v38 = vor.u32 %v9566_v55, %v8586_v27 }
 0x3a8   : > { %1900 = vst.msk [vmem:[#allocation2 + $0x344] sm:$0xff] %vm10514_vm9, %v1872_v9  ;;  %v4378_v3 = vadd.f32 %v4377_v10, %v4334_v29  ;;  %v1747_v11 = vrot.slane %v1731_v36, 4  ;;  %v9568_v29 = vld [vmem:[#allocation2 + $0x32c] sm:$0xf0]  ;;  %v8592_v14 = vld [vmem:[#allocation2 + $0x328] sm:$0xf]  ;;  %v1845_v48 = vpop.permute.xlu2 %1844 }
 0x3a9   : > { %v1860_v45 = vrot.slane %v1845_v48, 4 }
 0x3aa   : > { %v13412_v34 = vpop.f32.mrf.mxu3  ;;  %v4291_v13 = vpop.f32.mrf.mxu0  ;;  %v13426_v44 = vadd.f32 %v13189_v33, %v4378_v3  ;;  %v1761_v63 = vsel %vm649_vm3, %v1747_v11, %v1731_v36 }
 0x3ab   : > { %v4335_v51 = vpop.f32.mrf.mxu1  ;;  %1789 = vst.msk [vmem:[#allocation2 + $0x350] sm:$0xff] %vm10480_vm5, %v1761_v63  ;;  %v1843_v6 = vpop.permute.xlu0 %1842  ;;  %v1664_v63 = vld [vmem:[%s10070_s29 + $0xcc] sm:$0xf] }
 0x3ac   : > { %v4336_v24 = vadd.f32 %v4335_v51, %v4291_v13  ;;  %15711 = vst [vmem:[#allocation80_spill] sm:$0xff] %v13426_v44  ;;  %v1859_v9 = vrot.slane %v1843_v6, 4  ;;  %v9569_v13 = vld [vmem:[#allocation2 + $0x334] sm:$0xf0]  ;;  %v13438_v51 = vor.u32 %v9568_v29, %v8584_v0 }
 0x3ad   : > { %v13440_v50 = vor.u32 %v9569_v13, %v8592_v14  ;;  %v15712_v0 = vld [vmem:[#allocation79_spill] sm:$0xff]  ;;  %1678 = vst.msk [vmem:[#allocation2 + $0x360] sm:$0xf] %vm564_vm1, %v1664_v63  ;;  %v1874_v14 = vsel %vm764_vm2, %v1860_v45, %v1845_v48  ;;  %v1665_v13 = vld [vmem:[%s10070_s29 + $0xdc] sm:$0xf] }
 0x3ae   : > { %v1873_v33 = vsel %vm764_vm2, %v1859_v9, %v1843_v6  ;;  %v13450_v29 = vadd.f32 %v15712_v0, %v13146_v30  ;;  %1679 = vst.msk [vmem:[#allocation2 + $0x370] sm:$0xf] %vm564_vm1, %v1665_v13  ;;  %v15713_v45 = vld [vmem:[#allocation21_spill] sm:$0xff] }
 0x3af   : > { %1901 = vst.msk [vmem:[#allocation2 + $0x354] sm:$0xff] %vm10514_vm9, %v1873_v33  ;;  %v4379_v3 = vpop.f32.mrf.mxu2  ;;  %v1953_v11 = vpop.permute.xlu1 %1952  ;;  %v13473_v48 = vadd.f32 %v15713_v45, %v13160_v41  ;;  %v9570_v13 = vld [vmem:[#allocation2 + $0x344] sm:$0xf] }
 0x3b0   : > { %1985 = vst.msk [vmem:[#allocation2 + $0x358] sm:$0xf] %vm880_vm8, %v1955_v43  ;;  %v4380_v8 = vadd.f32 %v4379_v3, %v4336_v24 }
 0x3b1   : > { %1984 = vst.msk [vmem:[#allocation2 + $0x348] sm:$0xf] %vm880_vm8, %v1953_v11  ;;  %4700 = vmatmul.bf16.gmra.mxu1 %v13444_v38 }
 0x3b2   : > { %v13433_v10 = vpop.f32.mrf.mxu3  ;;  %v4294_v36 = vpop.f32.mrf.mxu0  ;;  %v13453_v9 = vadd.f32 %v13206_v52, %v4380_v8 }
 0x3b3   : > { %v4338_v44 = vpop.f32.mrf.mxu1  ;;  %v1733_v43 = vpop.permute.xlu0 %1732 }
 0x3b4   : > { %v4339_v6 = vadd.f32 %v4338_v44, %v4294_v36  ;;  %4744 = vmatmul.bf16.gmra.mxu2 %v13440_v50  ;;  %v1748_v44 = vrot.slane %v1733_v43, 4 }
 0x3b5   : > { %4656 = vmatmul.bf16.gmra.mxu0 %v13438_v51 }
 0x3b6   : > { %v1762_v52 = vsel %vm649_vm3, %v1748_v44, %v1733_v43  ;;  %v8600_v43 = vld [vmem:[#allocation2 + $0x340] sm:$0xf]  ;;  %v8602_v41 = vld [vmem:[#allocation2 + $0x350] sm:$0xf0] }
 0x3b7   : > { %4954 = vmatmul.bf16.gmra.mxu3 %v13144_v37  ;;  %1790 = vst.msk [vmem:[#allocation2 + $0x360] sm:$0xff] %vm10480_vm5, %v1762_v52  ;;  %v4382_v55 = vpop.f32.mrf.mxu2  ;;  %v1735_v37 = vpop.permute.xlu1 %1734  ;;  %v13493_v24 = vor.u32 %v9570_v13, %v8602_v41  ;;  %v8944_v13 = vld [vmem:[%s15306_s3 + $0x1d0] sm:$0xf]  ;;  %v9657_v41 = vld [vmem:[%s15306_s3 + $0x1d4] sm:$0xf0] }
 0x3b8   : > { %1902 = vst.msk [vmem:[#allocation2 + $0x364] sm:$0xff] %vm10514_vm9, %v1874_v14  ;;  %v4383_v27 = vadd.f32 %v4382_v55, %v4339_v6  ;;  %v1749_v36 = vrot.slane %v1735_v37, 4  ;;  %v9572_v6 = vld [vmem:[#allocation2 + $0x34c] sm:$0xf0]  ;;  %v8608_v52 = vld [vmem:[#allocation2 + $0x348] sm:$0xf] }
 0x3ba   : > { %v13462_v30 = vpop.f32.mrf.mxu3  ;;  %v4296_v8 = vpop.f32.mrf.mxu0  ;;  %v13476_v11 = vadd.f32 %v13229_v4, %v4383_v27  ;;  %v1763_v63 = vsel %vm649_vm3, %v1749_v36, %v1735_v37  ;;  %v13488_v36 = vor.u32 %v9572_v6, %v8600_v43  ;;  %v9661_v43 = vld [vmem:[%s15306_s3 + $0x1f4] sm:$0xf0]  ;;  %v13504_v6 = vadd.f32 %v12969_v60, %v13176_v23  ;;  %v8952_v60 = vld [vmem:[%s15306_s3 + $0x1e0] sm:$0xf]  ;;  %v9659_v23 = vld [vmem:[%s15306_s3 + $0x1e4] sm:$0xf0] }
 0x3bb   : > { %v4340_v33 = vpop.f32.mrf.mxu1  ;;  %1791 = vst.msk [vmem:[#allocation2 + $0x370] sm:$0xff] %vm10480_vm5, %v1763_v63  ;;  %v1847_v0 = vpop.permute.xlu0 %1846 }
 0x3bc   : > { %v4341_v3 = vadd.f32 %v4340_v33, %v4296_v8  ;;  %v1861_v14 = vrot.slane %v1847_v0, 4  ;;  %v9573_v8 = vld [vmem:[#allocation2 + $0x354] sm:$0xf0]  ;;  %v1959_v37 = vpop.permute.xlu2 %1958  ;;  %15714 = vst [vmem:[#allocation65_spill] sm:$0xff] %v13504_v6  ;;  %v8928_v6 = vld [vmem:[%s15306_s3 + $0x1b0] sm:$0xf] }
 0x3bd   : > { %v13490_v45 = vor.u32 %v9573_v8, %v8608_v52  ;;  %v13526_v8 = vor.u32 %v9659_v23, %v8952_v60 }
 0x3be   : > { %v1875_v4 = vsel %vm764_vm2, %v1861_v14, %v1847_v0  ;;  %v8960_v0 = vld [vmem:[%s15306_s3 + $0x1f0] sm:$0xf] }
 0x3bf   : > { %1903 = vst.msk [vmem:[#allocation2 + $0x374] sm:$0xff] %vm10514_vm9, %v1875_v4  ;;  %v4384_v33 = vpop.f32.mrf.mxu2  ;;  %v1957_v14 = vpop.permute.xlu1 %1956 }
 0x3c0   : > { %1987 = vst.msk [vmem:[#allocation2 + $0x378] sm:$0xf] %vm880_vm8, %v1959_v37  ;;  %v4385_v63 = vadd.f32 %v4384_v33, %v4341_v3  ;;  %v13535_v33 = vor.u32 %v9657_v41, %v8944_v13 }
 0x3c1   : > { %4705 = vmatmul.bf16.gmra.mxu1 %v13493_v24  ;;  %1986 = vst.msk [vmem:[#allocation2 + $0x368] sm:$0xf] %vm880_vm8, %v1957_v14  ;;  %v8616_v14 = vld [vmem:[#allocation2 + $0x360] sm:$0xf] }
 0x3c2   : > { %v13483_v55 = vpop.f32.mrf.mxu3  ;;  %v4299_v27 = vpop.f32.mrf.mxu0  ;;  %v13507_v3 = vadd.f32 %v13243_v62, %v4385_v63  ;;  %v9576_v60 = vld [vmem:[#allocation2 + $0x36c] sm:$0xf0] }
 0x3c3   : > { %v4343_v44 = vpop.f32.mrf.mxu1 }
 0x3c4   : > { %v4344_v22 = vadd.f32 %v4343_v44, %v4299_v27  ;;  %15715 = vst [vmem:[#allocation20_spill] sm:$0xff] %v13507_v3  ;;  %v13510_v44 = vor.u32 %v9661_v43, %v8960_v0  ;;  %4749 = vmatmul.bf16.gmra.mxu2 %v13490_v45  ;;  %v13539_v0 = vadd.f32 %v12990_v58, %v13195_v5  ;;  %v9655_v58 = vld [vmem:[%s15306_s3 + $0x1c4] sm:$0xf0] }
 0x3c5   : > { %4661 = vmatmul.bf16.gmra.mxu0 %v13488_v36 }
 0x3c6   : > { %6195 = vmatpush.bf16.msra.mxu3 %v13510_v44  ;;  %15716 = vst [vmem:[#allocation24_spill] sm:$0xff] %v13539_v0  ;;  %v8618_v13 = vld [vmem:[#allocation2 + $0x370] sm:$0xf0] }
 0x3c7   : > { %4959 = vmatmul.bf16.gmra.mxu3 %v13172_v54  ;;  %v4387_v4 = vpop.f32.mrf.mxu2  ;;  %v9577_v52 = vld [vmem:[#allocation2 + $0x374] sm:$0xf0] }
 0x3c8   : > { %v4388_v27 = vadd.f32 %v4387_v4, %v4344_v22  ;;  %v9574_v22 = vld [vmem:[#allocation2 + $0x364] sm:$0xf]  ;;  %v8624_v4 = vld [vmem:[#allocation2 + $0x368] sm:$0xf] }
 0x3c9   : > { %v13559_v23 = vor.u32 %v9577_v52, %v8624_v4  ;;  %v13561_v0 = vor.u32 %v9574_v22, %v8618_v13  ;;  %v13573_v52 = vadd.f32 %v13018_v16, %v13216_v18  ;;  %v8920_v16 = vld [vmem:[%s15306_s3 + $0x1a0] sm:$0xf]  ;;  %v9649_v22 = vld [vmem:[%s15306_s3 + $0x194] sm:$0xf0] }
 0x3ca   : > { %v13524_v62 = vpop.f32.mrf.mxu3  ;;  %v4301_v54 = vpop.f32.mrf.mxu0  ;;  %6196 = vmatpush.bf16.msra.mxu3 %v13526_v8  ;;  %v13542_v43 = vadd.f32 %v13270_v35, %v4388_v27 }
 0x3cb   : > { %v4345_v37 = vpop.f32.mrf.mxu1  ;;  %15718 = vst [vmem:[#allocation41_spill] sm:$0xff] %v13573_v52 }
 0x3cc   : > { %v4346_v63 = vadd.f32 %v4345_v37, %v4301_v54  ;;  %15717 = vst [vmem:[#allocation68_spill] sm:$0xff] %v13542_v43  ;;  %v8936_v54 = vld [vmem:[%s15306_s3 + $0x1c0] sm:$0xf]  ;;  %v13557_v37 = vor.u32 %v9576_v60, %v8616_v14  ;;  %v9653_v14 = vld [vmem:[%s15306_s3 + $0x1b4] sm:$0xf0] }
 0x3cd   : > { %v13555_v41 = vor.u32 %v9655_v58, %v8936_v54 }
 0x3ce   : > { %6197 = vmatpush.bf16.msra.mxu3 %v13535_v33 }
 0x3cf   : > { %v4389_v27 = vpop.f32.mrf.mxu2 }
 0x3d0   : > { %v4390_v59 = vadd.f32 %v4389_v27, %v4346_v63  ;;  %v13607_v27 = vadd.f32 %v13040_v40, %v13237_v7 }
 0x3d1   : > { %4710 = vmatmul.bf16.gmra.mxu1 %v13561_v0 }
 0x3d2   : > { %v13553_v5 = vpop.f32.mrf.mxu3  ;;  %v4304_v35 = vpop.f32.mrf.mxu0  ;;  %6198 = vmatpush.bf16.msra.mxu3 %v13555_v41  ;;  %v13576_v63 = vadd.f32 %v13286_v28, %v4390_v59  ;;  %v9651_v59 = vld [vmem:[%s15306_s3 + $0x1a4] sm:$0xf0]  ;;  %15720 = vst [vmem:[#allocation28_spill] sm:$0xff] %v13607_v27 }
 0x3d3   : > { %v4348_v43 = vpop.f32.mrf.mxu1 }
 0x3d4   : > { %v4349_v3 = vadd.f32 %v4348_v43, %v4304_v35  ;;  %15719 = vst [vmem:[#allocation25_spill] sm:$0xff] %v13576_v63  ;;  %v13579_v43 = vor.u32 %v9653_v14, %v8928_v6  ;;  %4754 = vmatmul.bf16.gmra.mxu2 %v13559_v23  ;;  %v13594_v6 = vor.u32 %v9651_v59, %v8920_v16  ;;  %v9647_v59 = vld [vmem:[%s15306_s3 + $0x184] sm:$0xf0] }
 0x3d5   : > { %4666 = vmatmul.bf16.gmra.mxu0 %v13557_v37 }
 0x3d6   : > { %6199 = vmatpush.bf16.msra.mxu3 %v13579_v43 }
 0x3d7   : > { %4964 = vmatmul.bf16.gmra.mxu3 %v13209_v19  ;;  %v8912_v19 = vld [vmem:[%s15306_s3 + $0x190] sm:$0xf]  ;;  %v4392_v4 = vpop.f32.mrf.mxu2 }
 0x3d8   : > { %v4393_v13 = vadd.f32 %v4392_v4, %v4349_v3  ;;  %v13603_v58 = vor.u32 %v9649_v22, %v8912_v19  ;;  %v8904_v3 = vld [vmem:[%s15306_s3 + $0x180] sm:$0xf] }
 0x3d9   : > { %v13623_v7 = vor.u32 %v9647_v59, %v8904_v3 }
 0x3da   : > { %v13592_v18 = vpop.f32.mrf.mxu3  ;;  %v4306_v28 = vpop.f32.mrf.mxu0  ;;  %6200 = vmatpush.bf16.msra.mxu3 %v13594_v6  ;;  %v13610_v14 = vadd.f32 %v13311_v20, %v4393_v13  ;;  %v13629_v13 = vadd.f32 %v13065_v61, %v13257_v53  ;;  %v13643_v53 = vadd.f32 %v13084_v32, %v13278_v1  ;;  %v15729_v1 = vld [vmem:[#allocation59_spill] sm:$0xff] }
 0x3db   : > { %v4350_v54 = vpop.f32.mrf.mxu1 }
 0x3dc   : > { %v4351_v35 = vadd.f32 %v4350_v54, %v4306_v28  ;;  %15721 = vst [vmem:[#allocation73_spill] sm:$0xff] %v13610_v14 }
 0x3dd   : > { %15722 = vst [vmem:[#allocation45_spill] sm:$0xff] %v13629_v13 }
 0x3de   : > { %6201 = vmatpush.bf16.msra.mxu3 %v13603_v58  ;;  %15724 = vst [vmem:[#allocation36_spill] sm:$0xff] %v13643_v53 }
 0x3df   : > { %v4394_v20 = vpop.f32.mrf.mxu2 }
 0x3e0   : > { %v4395_v19 = vadd.f32 %v4394_v20, %v4351_v35 }
 0x3e1   : > { %4856 = vmatmul.bf16.vlgmr.msrb.gmra.mxu1 %v13259_v57 }
 0x3e2   : > { %v13621_v28 = vpop.f32.mrf.mxu3  ;;  %v4309_v40 = vpop.f32.mrf.mxu0  ;;  %6202 = vmatpush.bf16.msra.mxu3 %v13623_v7  ;;  %v13632_v54 = vadd.f32 %v13332_v42, %v4395_v19 }
 0x3e3   : > { %v4353_v22 = vpop.f32.mrf.mxu1 }
 0x3e4   : > { %v4354_v4 = vadd.f32 %v4353_v22, %v4309_v40  ;;  %15723 = vst [vmem:[#allocation72_spill] sm:$0xff] %v13632_v54  ;;  %4900 = vmatmul.bf16.vlgmr.msrb.gmra.mxu2 %v13252_v2 }
 0x3e5   : > { %4812 = vmatmul.bf16.vlgmr.msrb.gmra.mxu0 %v13250_v21 }
 0x3e7   : > { %4969 = vmatmul.bf16.gmra.mxu3 %v13246_v25  ;;  %v4397_v21 = vpop.f32.mrf.mxu2 }
 0x3e8   : > { %v4398_v40 = vadd.f32 %v4397_v21, %v4354_v4  ;;  %v15726_v4 = vld [vmem:[#allocation60_spill] sm:$0xff]  ;;  %v15731_v21 = vld [vmem:[#allocation71_spill] sm:$0xff] }
 0x3ea   : > { %v13639_v3 = vpop.f32.mrf.mxu3  ;;  %v4311_v59 = vpop.f32.mrf.mxu0  ;;  %v13646_v57 = vadd.f32 %v13362_v15, %v4398_v40  ;;  %v15730_v15 = vld [vmem:[#allocation29_spill] sm:$0xff] }
 0x3eb   : > { %v4355_v20 = vpop.f32.mrf.mxu1 }
 0x3ec   : > { %v4356_v61 = vadd.f32 %v4355_v20, %v4311_v59  ;;  %15725 = vst [vmem:[#allocation30_spill] sm:$0xff] %v13646_v57  ;;  %v13655_v59 = vadd.f32 %v15726_v4, %v13300_v56 }
 0x3ee   : > { %15727 = vst [vmem:[#allocation31_spill] sm:$0xff] %v13655_v59 }
 0x3ef   : > { %v4399_v19 = vpop.f32.mrf.mxu2 }
 0x3f0   : > { %v4400_v22 = vadd.f32 %v4399_v19, %v4356_v61  ;;  %v9579_v19 = vld [vmem:[#allocation3 + $0xc] sm:$0xf] }
 0x3f1   : > { %4861 = vmatmul.bf16.gmra.mxu1 %v15729_v1 }
 0x3f2   : > { %v13650_v2 = vpop.f32.mrf.mxu3  ;;  %v4637_v42 = vpop.f32.mrf.mxu0  ;;  %v13658_v32 = vadd.f32 %v13383_v46, %v4400_v22  ;;  %v8642_v46 = vld [vmem:[#allocation3 + $0x18] sm:$0xf0] }
 0x3f3   : > { %v4681_v35 = vpop.f32.mrf.mxu1 }
 0x3f4   : > { %v4682_v16 = vadd.f32 %v4681_v35, %v4637_v42  ;;  %15728 = vst [vmem:[#allocation37_spill] sm:$0xff] %v13658_v32  ;;  %4905 = vmatmul.bf16.gmra.mxu2 %v15731_v21  ;;  %v13673_v21 = vor.u32 %v9579_v19, %v8642_v46  ;;  %v9583_v32 = vld [vmem:[#allocation3 + $0x2c] sm:$0xf]  ;;  %v8658_v19 = vld [vmem:[#allocation3 + $0x38] sm:$0xf0] }
 0x3f5   : > { %4817 = vmatmul.bf16.gmra.mxu0 %v13293_v31 }
 0x3f7   : > { %4974 = vmatmul.bf16.gmra.mxu3 %v15730_v15  ;;  %v4725_v31 = vpop.f32.mrf.mxu2 }
 0x3f8   : > { %v13667_v61 = vadd.f32 %v4725_v31, %v4682_v16  ;;  %v15734_v16 = vld [vmem:[#allocation62_spill] sm:$0xff] }
 0x3fa   : > { %v4639_v20 = vpop.f32.mrf.mxu0  ;;  %v13665_v35 = vpop.f32.mrf.mxu3 }
 0x3fb   : > { %15732 = vst [vmem:[#allocation38_spill] sm:$0xff] %v13665_v35  ;;  %v4683_v56 = vpop.f32.mrf.mxu1 }
 0x3fc   : > { %v4684_v42 = vadd.f32 %v4683_v56, %v4639_v20 }
 0x3ff   : > { %v4727_v4 = vpop.f32.mrf.mxu2 }
 0x400   : > { %v13669_v1 = vadd.f32 %v4727_v4, %v4684_v42 }
 0x401   : > { %4866 = vmatmul.bf16.gmra.mxu1 %v13344_v26  ;;  %v13685_v26 = vor.u32 %v9583_v32, %v8658_v19 }
 0x402   : > { %v4642_v22 = vpop.f32.mrf.mxu0  ;;  %v13671_v25 = vpop.f32.mrf.mxu3 }
 0x403   : > { %v4686_v15 = vpop.f32.mrf.mxu1  ;;  %15733 = vst [vmem:[#allocation42_spill] sm:$0xff] %v13671_v25 }
 0x404   : > { %v4687_v40 = vadd.f32 %v4686_v15, %v4642_v22  ;;  %4910 = vmatmul.bf16.gmra.mxu2 %v15734_v16  ;;  %v8962_v16 = vld [vmem:[%s15306_s3 + $0x1f8] sm:$0xf0] }
 0x405   : > { %4822 = vmatmul.bf16.gmra.mxu0 %v13337_v12 }
 0x407   : > { %6203 = vmatmul.bf16.vlgmr.msra.gmra.mxu3 %v13673_v21  ;;  %v4730_v31 = vpop.f32.mrf.mxu2 }
 0x408   : > { %v13679_v56 = vadd.f32 %v4730_v31, %v4687_v40  ;;  %v9660_v40 = vld [vmem:[%s15306_s3 + $0x1f4] sm:$0xf]  ;;  %v8954_v31 = vld [vmem:[%s15306_s3 + $0x1e8] sm:$0xf0] }
 0x40a   : > { %v4644_v20 = vpop.f32.mrf.mxu0  ;;  %v13681_v60 = vpop.f32.mrf.mxu3 }
 0x40b   : > { %v4688_v42 = vpop.f32.mrf.mxu1  ;;  %15735 = vst [vmem:[#allocation78_spill] sm:$0xff] %v13681_v60  ;;  %v9652_v60 = vld [vmem:[%s15306_s3 + $0x1b4] sm:$0xf] }
 0x40c   : > { %v4689_v4 = vadd.f32 %v4688_v42, %v4644_v20  ;;  %v13695_v20 = vor.u32 %v9660_v40, %v8962_v16  ;;  %v9654_v40 = vld [vmem:[%s15306_s3 + $0x1c4] sm:$0xf]  ;;  %v8938_v16 = vld [vmem:[%s15306_s3 + $0x1c8] sm:$0xf0] }
 0x40e   : > { %6331 = vmatpush.bf16.msrb.mxu3 %v13695_v20 }
 0x40f   : > { %v4732_v22 = vpop.f32.mrf.mxu2 }
 0x410   : > { %v13683_v15 = vadd.f32 %v4732_v22, %v4689_v4  ;;  %v8946_v4 = vld [vmem:[%s15306_s3 + $0x1d8] sm:$0xf0] }
 0x411   : > { %4871 = vmatmul.bf16.gmra.mxu1 %v13394_v47 }
 0x412   : > { %v4647_v46 = vpop.f32.mrf.mxu0  ;;  %v13700_v32 = vpop.f32.mrf.mxu3 }
 0x413   : > { %v4691_v12 = vpop.f32.mrf.mxu1  ;;  %15736 = vst [vmem:[#allocation11_spill] sm:$0xff] %v13700_v32 }
 0x414   : > { %v4692_v59 = vadd.f32 %v4691_v12, %v4647_v46  ;;  %4915 = vmatmul.bf16.gmra.mxu2 %v13390_v49  ;;  %v9656_v49 = vld [vmem:[%s15306_s3 + $0x1d4] sm:$0xf] }
 0x415   : > { %4827 = vmatmul.bf16.gmra.mxu0 %v13388_v17  ;;  %v9658_v17 = vld [vmem:[%s15306_s3 + $0x1e4] sm:$0xf]  ;;  %v13723_v12 = vor.u32 %v9656_v49, %v8946_v4 }
 0x416   : > { %v13710_v47 = vor.u32 %v9658_v17, %v8954_v31  ;;  %v9587_v17 = vld [vmem:[#allocation3 + $0x4c] sm:$0xf]  ;;  %v8674_v31 = vld [vmem:[#allocation3 + $0x58] sm:$0xf0] }
 0x417   : > { %6208 = vmatmul.bf16.gmra.mxu3 %v13685_v26  ;;  %v4735_v19 = vpop.f32.mrf.mxu2  ;;  %v13739_v4 = vor.u32 %v9587_v17, %v8674_v31  ;;  %v8922_v17 = vld [vmem:[%s15306_s3 + $0x1a8] sm:$0xf0] }
 0x418   : > { %v13718_v46 = vadd.f32 %v4735_v19, %v4692_v59  ;;  %6332 = vmatpush.bf16.msrb.mxu3 %v13710_v47  ;;  %v13732_v19 = vor.u32 %v9654_v40, %v8938_v16  ;;  %v8930_v40 = vld [vmem:[%s15306_s3 + $0x1b8] sm:$0xf0] }
 0x419   : > { %v13749_v16 = vor.u32 %v9652_v60, %v8930_v40 }
 0x41a   : > { %v13708_v42 = vpop.f32.mrf.mxu0  ;;  %v13734_v32 = vpop.f32.mrf.mxu3 }
 0x41b   : > { %v13720_v22 = vpop.f32.mrf.mxu1 }
 0x41c   : > { %6333 = vmatpush.bf16.msrb.mxu3 %v13723_v12 }
 0x41f   : > { %v13736_v57 = vpop.f32.mrf.mxu2 }
 0x420   : > { %6334 = vmatpush.bf16.msrb.mxu3 %v13732_v19 }
 0x421   : > { %4876 = vmatmul.bf16.gmra.mxu1 %v13444_v38  ;;  %v9648_v38 = vld [vmem:[%s15306_s3 + $0x194] sm:$0xf] }
 0x422   : > { %v4652_v59 = vpop.f32.mrf.mxu0  ;;  %v13777_v13 = vpop.f32.mrf.mxu3 }
 0x423   : > { %v4696_v49 = vpop.f32.mrf.mxu1 }
 0x424   : > { %v4697_v53 = vadd.f32 %v4696_v49, %v4652_v59  ;;  %4920 = vmatmul.bf16.gmra.mxu2 %v13440_v50  ;;  %6335 = vmatpush.bf16.msrb.mxu3 %v13749_v16  ;;  %v8914_v50 = vld [vmem:[%s15306_s3 + $0x198] sm:$0xf0] }
 0x425   : > { %4832 = vmatmul.bf16.gmra.mxu0 %v13438_v51  ;;  %v9650_v51 = vld [vmem:[%s15306_s3 + $0x1a4] sm:$0xf]  ;;  %v13775_v54 = vor.u32 %v9648_v38, %v8914_v50 }
 0x426   : > { %v13762_v59 = vor.u32 %v9650_v51, %v8922_v17  ;;  %v9646_v51 = vld [vmem:[%s15306_s3 + $0x184] sm:$0xf]  ;;  %v8906_v17 = vld [vmem:[%s15306_s3 + $0x188] sm:$0xf0] }
 0x427   : > { %6213 = vmatmul.bf16.gmra.mxu3 %v13739_v4  ;;  %v4740_v60 = vpop.f32.mrf.mxu2  ;;  %v13786_v14 = vor.u32 %v9646_v51, %v8906_v17 }
 0x428   : > { %v13770_v49 = vadd.f32 %v4740_v60, %v4697_v53  ;;  %6336 = vmatpush.bf16.msrb.mxu3 %v13762_v59  ;;  %v9591_v53 = vld [vmem:[#allocation3 + $0x6c] sm:$0xf]  ;;  %v8690_v60 = vld [vmem:[#allocation3 + $0x78] sm:$0xf0] }
 0x429   : > { %v13791_v50 = vor.u32 %v9591_v53, %v8690_v60 }
 0x42a   : > { %v13760_v31 = vpop.f32.mrf.mxu0  ;;  %v13796_v63 = vpop.f32.mrf.mxu3 }
 0x42b   : > { %v13772_v40 = vpop.f32.mrf.mxu1 }
 0x42c   : > { %6337 = vmatpush.bf16.msrb.mxu3 %v13775_v54 }
 0x42f   : > { %v13788_v27 = vpop.f32.mrf.mxu2 }
 0x430   : > { %6338 = vmatpush.bf16.msrb.mxu3 %v13786_v14 }
 0x431   : > { %4881 = vmatmul.bf16.gmra.mxu1 %v13493_v24  ;;  %v9595_v24 = vld [vmem:[#allocation3 + $0x8c] sm:$0xf] }
 0x432   : > { %v4657_v25 = vpop.f32.mrf.mxu0 }
 0x433   : > { %v4701_v38 = vpop.f32.mrf.mxu1 }
 0x434   : > { %v4702_v35 = vadd.f32 %v4701_v38, %v4657_v25  ;;  %6597 = vmatpush.bf16.msra.mxu3 %v13510_v44  ;;  %4925 = vmatmul.bf16.gmra.mxu2 %v13490_v45  ;;  %v8706_v44 = vld [vmem:[#allocation3 + $0x98] sm:$0xf0] }
 0x435   : > { %4837 = vmatmul.bf16.gmra.mxu0 %v13488_v36  ;;  %v13808_v36 = vpop.f32.mrf.mxu3 }
 0x437   : > { %6218 = vmatmul.bf16.gmra.mxu3 %v13791_v50  ;;  %v4745_v17 = vpop.f32.mrf.mxu2 }
 0x438   : > { %6598 = vmatpush.bf16.msra.mxu3 %v13526_v8  ;;  %v13803_v53 = vadd.f32 %v4745_v17, %v4702_v35  ;;  %v13813_v8 = vor.u32 %v9595_v24, %v8706_v44 }
 0x43a   : > { %v13801_v51 = vpop.f32.mrf.mxu0 }
 0x43b   : > { %v13805_v25 = vpop.f32.mrf.mxu1 }
 0x43c   : > { %6599 = vmatpush.bf16.msra.mxu3 %v13535_v33 }
 0x43f   : > { %v13811_v38 = vpop.f32.mrf.mxu2 }
 0x440   : > { %6600 = vmatpush.bf16.msra.mxu3 %v13555_v41  ;;  %v13823_v41 = vpop.f32.mrf.mxu3 }
 0x441   : > { %4886 = vmatmul.bf16.gmra.mxu1 %v13561_v0 }
 0x442   : > { %v4662_v60 = vpop.f32.mrf.mxu0 }
 0x443   : > { %v4706_v45 = vpop.f32.mrf.mxu1 }
 0x444   : > { %v4707_v52 = vadd.f32 %v4706_v45, %v4662_v60  ;;  %6601 = vmatpush.bf16.msra.mxu3 %v13579_v43  ;;  %4930 = vmatmul.bf16.gmra.mxu2 %v13559_v23 }
 0x445   : > { %4842 = vmatmul.bf16.gmra.mxu0 %v13557_v37 }
 0x447   : > { %6223 = vmatmul.bf16.gmra.mxu3 %v13813_v8  ;;  %v4750_v35 = vpop.f32.mrf.mxu2 }
 0x448   : > { %6602 = vmatpush.bf16.msra.mxu3 %v13594_v6  ;;  %v13825_v17 = vadd.f32 %v4750_v35, %v4707_v52  ;;  %v13833_v23 = vpop.f32.mrf.mxu3 }
 0x44a   : > { %v13821_v33 = vpop.f32.mrf.mxu0 }
 0x44b   : > { %v13827_v24 = vpop.f32.mrf.mxu1 }
 0x44c   : > { %6603 = vmatpush.bf16.msra.mxu3 %v13603_v58 }
 0x44f   : > { %v13831_v37 = vpop.f32.mrf.mxu2 }
 0x450   : > { %6604 = vmatpush.bf16.msra.mxu3 %v13623_v7  ;;  %15737 = vst [vmem:[#allocation46_spill] sm:$0xff] %v13831_v37  ;;  %v13844_v58 = vpop.f32.mrf.mxu3 }
 0x452   : > { %v4667_v0 = vpop.f32.mrf.mxu0 }
 0x453   : > { %v4711_v43 = vpop.f32.mrf.mxu1 }
 0x454   : > { %v4712_v6 = vadd.f32 %v4711_v43, %v4667_v0 }
 0x457   : > { %6339 = vmatmul.bf16.vlgmr.msrb.gmra.mxu3 %v13673_v21  ;;  %v4755_v52 = vpop.f32.mrf.mxu2 }
 0x458   : > { %6733 = vmatpush.bf16.msrb.mxu3 %v13695_v20  ;;  %v13839_v60 = vadd.f32 %v4755_v52, %v4712_v6  ;;  %v13852_v21 = vpop.f32.mrf.mxu3 }
 0x45a   : > { %v13837_v44 = vpop.f32.mrf.mxu0  ;;  %15739 = vst [vmem:[#allocation9_spill] sm:$0xff] %v13839_v60 }
 0x45b   : > { %15738 = vst [vmem:[#allocation47_spill] sm:$0xff] %v13837_v44  ;;  %v13841_v45 = vpop.f32.mrf.mxu1 }
 0x45c   : > { %15740 = vst [vmem:[#allocation33_spill] sm:$0xff] %v13841_v45  ;;  %6734 = vmatpush.bf16.msrb.mxu3 %v13710_v47 }
 0x45f   : > { %v13847_v35 = vpop.f32.mrf.mxu2 }
 0x460   : > { %6735 = vmatpush.bf16.msrb.mxu3 %v13723_v12  ;;  %15741 = vst [vmem:[#allocation34_spill] sm:$0xff] %v13847_v35  ;;  %v4770_v12 = vadd.f32 %v13412_v34, %v13667_v61  ;;  %v4772_v34 = vadd.f32 %v13433_v10, %v13669_v1 }
 0x462   : > { %v4813_v7 = vpop.f32.mrf.mxu0 }
 0x463   : > { %v4857_v0 = vpop.f32.mrf.mxu1 }
 0x464   : > { %6736 = vmatpush.bf16.msrb.mxu3 %v13732_v19  ;;  %v4858_v20 = vadd.f32 %v4857_v0, %v4813_v7  ;;  %v15743_v19 = vld [vmem:[#allocation26_spill] sm:$0xff]  ;;  %v13862_v0 = vpop.f32.mrf.mxu3 }
 0x467   : > { %6344 = vmatmul.bf16.gmra.mxu3 %v13685_v26  ;;  %v4901_v6 = vpop.f32.mrf.mxu2  ;;  %v15742_v26 = vld [vmem:[#allocation23_spill] sm:$0xff] }
 0x468   : > { %6737 = vmatpush.bf16.msrb.mxu3 %v13749_v16  ;;  %v4902_v47 = vadd.f32 %v4901_v6, %v4858_v20  ;;  %v15744_v16 = vmax.f32 %v15742_v26, %v15743_v19 }
 0x46a   : > { %v4815_v43 = vpop.f32.mrf.mxu0  ;;  %v4946_v35 = vadd.f32 %v13734_v32, %v4902_v47 }
 0x46b   : > { %v4859_v52 = vpop.f32.mrf.mxu1 }
 0x46c   : > { %6738 = vmatpush.bf16.msrb.mxu3 %v13762_v59  ;;  %v4980_v45 = vmax.f32 %v4770_v12, %v4946_v35  ;;  %v4860_v60 = vadd.f32 %v4859_v52, %v4815_v43  ;;  %v13879_v26 = vpop.f32.mrf.mxu3 }
 0x46e   : > { %v4994_v44 = vmax.f32 %v15744_v16, %v4980_v45  ;;  %v15745_v45 = vld [vmem:[#allocation32_spill] sm:$0xff] }
 0x46f   : > { %v4903_v20 = vpop.f32.mrf.mxu2 }
 0x470   : > { %6739 = vmatpush.bf16.msrb.mxu3 %v13775_v54  ;;  %v4904_v6 = vadd.f32 %v4903_v20, %v4860_v60  ;;  %v13870_v54 = vld [vmem:[%s15305_s2] ss:$0 sm:$0xff]  ;;  %v15746_v60 = vld [vmem:[#allocation77_spill] sm:$0xff] }
 0x471   : > { %v5012_v59 = vadd.f32 %v13870_v54, %v4994_v44  ;;  %v15747_v35 = vmax.f32 %v15745_v45, %v15746_v60 }
 0x472   : > { %v4818_v7 = vpop.f32.mrf.mxu0  ;;  %v4948_v61 = vadd.f32 %v13777_v13, %v4904_v6  ;;  %v4775_v13 = vadd.f32 %v13462_v30, %v13679_v56  ;;  %v15748_v6 = vld [vmem:[#allocation27_spill] sm:$0xff] }
 0x473   : > { %v4862_v37 = vpop.f32.mrf.mxu1 }
 0x474   : > { %6740 = vmatpush.bf16.msrb.mxu3 %v13786_v14  ;;  %v4981_v32 = vmax.f32 %v4772_v34, %v4948_v61  ;;  %v4863_v14 = vadd.f32 %v4862_v37, %v4818_v7  ;;  %v15749_v37 = vld [vmem:[#allocation19_spill] sm:$0xff]  ;;  %v13890_v56 = vpop.f32.mrf.mxu3 }
 0x475   : > { %v15750_v7 = vmax.f32 %v15748_v6, %v15749_v37  ;;  %v4694_v6 = vadd.f32 %v13720_v22, %v13708_v42 }
 0x476   : > { %v4995_v43 = vmax.f32 %v15747_v35, %v4981_v32 }
 0x477   : > { %6349 = vmatmul.bf16.gmra.mxu3 %v13739_v4  ;;  %v4906_v52 = vpop.f32.mrf.mxu2  ;;  %v5026_v4 = vmax.f32 %v5012_v59, 0.0 }
 0x478   : > { %v5013_v10 = vadd.f32 %v13870_v54, %v4995_v43  ;;  %v4907_v1 = vadd.f32 %v4906_v52, %v4863_v14  ;;  %v4777_v43 = vadd.f32 %v13483_v55, %v13683_v15 }
 0x47a   : > { %v4820_v47 = vpop.f32.mrf.mxu0  ;;  %v5027_v19 = vmax.f32 %v5013_v10, 0.0  ;;  %v4951_v44 = vadd.f32 %v13796_v63, %v4907_v1 }
 0x47b   : > { %v4864_v12 = vpop.f32.mrf.mxu1 }
 0x47c   : > { %v9776_v16 = vpack.c.bf16 %v5027_v19, %v5026_v4  ;;  %v4982_v20 = vmax.f32 %v4775_v13, %v4951_v44  ;;  %v4865_v61 = vadd.f32 %v4864_v12, %v4820_v47  ;;  %v15751_v47 = vld [vmem:[#allocation66_spill] sm:$0xff] }
 0x47d   : > { %v15752_v1 = vmax.f32 %v13400_v39, %v15751_v47  ;;  %v4780_v39 = vadd.f32 %v13524_v62, %v13718_v46  ;;  %v15756_v47 = vmax.f32 %v13450_v29, %v13453_v9 }
 0x47e   : > { %9777 = vst [vmem:[#allocation4 + $0x38] sm:$0xff] %v9776_v16   ;;  %v4996_v34 = vmax.f32 %v15750_v7, %v4982_v20 }
 0x47f   : > { %v4908_v45 = vpop.f32.mrf.mxu2 }
 0x480   : > { %v4909_v60 = vadd.f32 %v4908_v45, %v4865_v61  ;;  %v5014_v10 = vadd.f32 %v13870_v54, %v4996_v34  ;;  %v13907_v34 = vpop.f32.mrf.mxu3  ;;  %v5170_v61 = vld [vmem:[#allocation4 + $0xc] sm:$0xf]  ;;  %v15753_v45 = vld [vmem:[#allocation35_spill] sm:$0xff] }
 0x482   : > { %v4823_v32 = vpop.f32.mrf.mxu0  ;;  %v4953_v30 = vadd.f32 %v13808_v36, %v4909_v60  ;;  %v5028_v44 = vmax.f32 %v5014_v10, 0.0  ;;  %v15754_v60 = vld [vmem:[#allocation80_spill] sm:$0xff] }
 0x483   : > { %v4867_v35 = vpop.f32.mrf.mxu1 }
 0x484   : > { %v4983_v63 = vmax.f32 %v4777_v43, %v4953_v30  ;;  %v4868_v13 = vadd.f32 %v4867_v35, %v4823_v32  ;;  %v4738_v32 = vadd.f32 %v13736_v57, %v4694_v6  ;;  %v15755_v35 = vmax.f32 %v15753_v45, %v15754_v60 }
 0x485   : > { %v5090_v59 = vld [vmem:[#allocation4 + $0x3c] sm:$0xf]  ;;  %v5089_v14 = vld [vmem:[#allocation4 + $0x38] sm:$0xf]  ;;  %v15757_v60 = vmax.f32 %v13473_v48, %v13476_v11  ;;  %v8832_v48 = vld [vmem:[%s15306_s3 + $0xf0] sm:$0xf] }
 0x486   : > { %v5329_v52 = vld [vmem:[#allocation4 + $0x38] sm:$0xf]  ;;  %v4997_v12 = vmax.f32 %v15752_v1, %v4983_v63  ;;  %5111 = vrot.lane.b32.xlu1 %v5090_v59, %s9887_s30  ;;  %5109 = vrot.lane.b32.xlu0 %v5089_v14, %s9887_s30  ;;  %v5330_v15 = vld [vmem:[#allocation4 + $0x3c] sm:$0xf]  ;;  %v4782_v42 = vadd.f32 %v13553_v5, %v4738_v32  ;;  %v5171_v32 = vld [vmem:[#allocation4 + $0x10] sm:$0xf] }
 0x487   : > { %6354 = vmatmul.bf16.gmra.mxu3 %v13791_v50  ;;  %5339 = vst.msk [vmem:[#allocation3 + $0xa0] sm:$0xf] %vm564_vm1, %v5329_v52  ;;  %v4911_v50 = vpop.f32.mrf.mxu2  ;;  %v9629_v11 = vld [vmem:[%s15306_s3 + $0xf4] sm:$0xf0] }
 0x488   : > { %5340 = vst.msk [vmem:[#allocation3 + $0xb0] sm:$0xf] %vm564_vm1, %v5330_v15  ;;  %v5015_v36 = vadd.f32 %v13870_v54, %v4997_v12  ;;  %v4912_v4 = vadd.f32 %v4911_v50, %v4868_v13  ;;  %v13929_v13 = vpop.f32.mrf.mxu3 }
 0x48a   : > { %v4825_v55 = vpop.f32.mrf.mxu0  ;;  %v5029_v16 = vmax.f32 %v5015_v36, 0.0  ;;  %v4956_v20 = vadd.f32 %v13823_v41, %v4912_v4 }
 0x48b   : > { %v4869_v19 = vpop.f32.mrf.mxu1 }
 0x48c   : > { %v9781_v37 = vpack.c.bf16 %v5029_v16, %v5028_v44  ;;  %v4984_v7 = vmax.f32 %v4780_v39, %v4956_v20  ;;  %v4870_v62 = vadd.f32 %v4869_v19, %v4825_v55  ;;  %v4785_v19 = vadd.f32 %v13592_v18, %v13770_v49 }
 0x48d   : > { %v4699_v20 = vadd.f32 %v13772_v40, %v13760_v31  ;;  %v8768_v31 = vld [vmem:[%s15306_s3 + $0x70] sm:$0xf]  ;;  %v9613_v40 = vld [vmem:[%s15306_s3 + $0x74] sm:$0xf0] }
 0x48e   : > { %9814 = vst [vmem:[#allocation4 + $0x40] sm:$0xff] %v9781_v37   ;;  %v4998_v43 = vmax.f32 %v15755_v35, %v4984_v7  ;;  %5191 = vrot.lane.b32.xlu0 %v5170_v61, %s9886_s17  ;;  %v5172_v61 = vld [vmem:[#allocation4 + $0x14] sm:$0xf] }
 0x48f   : > { %v4913_v41 = vpop.f32.mrf.mxu2  ;;  %v4743_v45 = vadd.f32 %v13788_v27, %v4699_v20 }
 0x490   : > { %v4914_v30 = vadd.f32 %v4913_v41, %v4870_v62  ;;  %v5016_v10 = vadd.f32 %v13870_v54, %v4998_v43  ;;  %v13966_v41 = vpop.f32.mrf.mxu3 }
 0x492   : > { %v4828_v46 = vpop.f32.mrf.mxu0  ;;  %v4958_v22 = vadd.f32 %v13833_v23, %v4914_v30  ;;  %v9645_v23 = vld [vmem:[%s15306_s3 + $0x174] sm:$0xf0]  ;;  %v5030_v39 = vmax.f32 %v5016_v10, 0.0  ;;  %v4787_v30 = vadd.f32 %v13621_v28, %v4743_v45  ;;  %v15759_v10 = vld [vmem:[#allocation20_spill] sm:$0xff] }
 0x493   : > { %v4872_v63 = vpop.f32.mrf.mxu1 }
 0x494   : > { %v4985_v59 = vmax.f32 %v4782_v42, %v4958_v22  ;;  %v4873_v12 = vadd.f32 %v4872_v63, %v4828_v46  ;;  %v13964_v46 = vor.u32 %v9629_v11, %v8832_v48  ;;  %v9611_v48 = vld [vmem:[%s15306_s3 + $0x64] sm:$0xf0]  ;;  %v8824_v11 = vld [vmem:[%s15306_s3 + $0xe0] sm:$0xf] }
 0x495   : > { %v5249_v57 = vld [vmem:[#allocation4 + $0x40] sm:$0xf]  ;;  %v5250_v52 = vld [vmem:[#allocation4 + $0x44] sm:$0xf] }
 0x496   : > { %v5091_v14 = vld [vmem:[#allocation4 + $0x40] sm:$0xf]  ;;  %v4999_v1 = vmax.f32 %v15756_v47, %v4985_v59  ;;  %5269 = vrot.lane.b32.xlu1 %v5249_v57, %s9889_s26  ;;  %5271 = vrot.lane.b32.xlu2 %v5250_v52, %s9889_s26  ;;  %v5332_v4 = vld [vmem:[#allocation4 + $0x44] sm:$0xf]  ;;  %v15758_v52 = vld [vmem:[#allocation65_spill] sm:$0xff] }
 0x497   : > { %6359 = vmatmul.bf16.gmra.mxu3 %v13813_v8  ;;  %5113 = vrot.lane.b32.xlu0 %v5091_v14, %s9887_s30  ;;  %v8896_v8 = vld [vmem:[%s15306_s3 + $0x170] sm:$0xf]  ;;  %v4916_v29 = vpop.f32.mrf.mxu2  ;;  %v5331_v55 = vld [vmem:[#allocation4 + $0x40] sm:$0xf]  ;;  %5342 = vst.msk [vmem:[#allocation3 + $0xd0] sm:$0xf] %vm564_vm1, %v5332_v4  ;;  %v15760_v47 = vmax.f32 %v15758_v52, %v15759_v10 }
 0x498   : > { %v13932_v9 = vor.u32 %v9645_v23, %v8896_v8  ;;  %v5017_v15 = vadd.f32 %v13870_v54, %v4999_v1  ;;  %v4917_v50 = vadd.f32 %v4916_v29, %v4873_v12  ;;  %5341 = vst.msk [vmem:[#allocation3 + $0xc0] sm:$0xf] %vm564_vm1, %v5331_v55  ;;  %v5092_v7 = vld [vmem:[#allocation4 + $0x44] sm:$0xf]  ;;  %6127 = vmatpush.bf16.msra.mxu1 %v13964_v46  ;;  %v8888_v23 = vld [vmem:[%s15306_s3 + $0x160] sm:$0xf] }
 0x49a   : > { %v4830_v5 = vpop.f32.mrf.mxu0  ;;  %6161 = vmatpush.bf16.msra.mxu2 %v13932_v9  ;;  %v5031_v44 = vmax.f32 %v5017_v15, 0.0  ;;  %v4961_v16 = vadd.f32 %v13844_v58, %v4917_v50  ;;  %v13956_v58 = vor.u32 %v9613_v40, %v8768_v31  ;;  %v9643_v50 = vld [vmem:[%s15306_s3 + $0x164] sm:$0xf0] }
 0x49b   : > { %v4874_v36 = vpop.f32.mrf.mxu1 }
 0x49c   : > { %v9786_v6 = vpack.c.bf16 %v5031_v44, %v5030_v39  ;;  %v4986_v37 = vmax.f32 %v4785_v19, %v4961_v16  ;;  %v4875_v18 = vadd.f32 %v4874_v36, %v4830_v5  ;;  %6093 = vmatpush.bf16.msra.mxu0 %v13956_v58  ;;  %v13988_v36 = vor.u32 %v9643_v50, %v8888_v23 }
 0x49d   : > { %v4790_v39 = vadd.f32 %v13639_v3, %v13803_v53  ;;  %v5173_v3 = vld [vmem:[#allocation4 + $0x18] sm:$0xf] }
 0x49e   : > { %9815 = vst [vmem:[#allocation4 + $0x48] sm:$0xff] %v9786_v6   ;;  %v5000_v35 = vmax.f32 %v15757_v60, %v4986_v37  ;;  %5115 = vrot.lane.b32.xlu1 %v5092_v7, %s9887_s30  ;;  %5193 = vrot.lane.b32.xlu2 %v5171_v32, %s9886_s17  ;;  %v13994_v6 = vpop.f32.mrf.mxu3  ;;  %v4704_v37 = vadd.f32 %v13805_v25, %v13801_v51  ;;  %v5174_v32 = vld [vmem:[#allocation4 + $0x1c] sm:$0xf]  ;;  %v8760_v51 = vld [vmem:[%s15306_s3 + $0x60] sm:$0xf] }
 0x49f   : > { %5195 = vrot.lane.b32.xlu0 %v5172_v61, %s9886_s17  ;;  %v4918_v27 = vpop.f32.mrf.mxu2  ;;  %15761 = vst [vmem:[#allocation49_spill] sm:$0xff] %v13994_v6  ;;  %6162 = vmatpush.bf16.msra.mxu2 %v13988_v36 }
 0x4a0   : > { %v4919_v43 = vadd.f32 %v4918_v27, %v4875_v18  ;;  %v5018_v14 = vadd.f32 %v13870_v54, %v5000_v35  ;;  %v4748_v60 = vadd.f32 %v13811_v38, %v4704_v37  ;;  %v15763_v35 = vld [vmem:[#allocation68_spill] sm:$0xff]  ;;  %v15769_v37 = vld [vmem:[#allocation38_spill] sm:$0xff] }
 0x4a2   : > { %v4833_v49 = vpop.f32.mrf.mxu0  ;;  %v4963_v63 = vadd.f32 %v13852_v21, %v4919_v43  ;;  %v5032_v44 = vmax.f32 %v5018_v14, 0.0 }
 0x4a3   : > { %v4877_v62 = vpop.f32.mrf.mxu1 }
 0x4a4   : > { %v4987_v42 = vmax.f32 %v4787_v30, %v4963_v63  ;;  %v4878_v12 = vadd.f32 %v4877_v62, %v4833_v49  ;;  %v14018_v30 = vor.u32 %v9611_v48, %v8760_v51  ;;  %v9627_v63 = vld [vmem:[%s15306_s3 + $0xe4] sm:$0xf0] }
 0x4a5   : > { %v5569_v22 = vld [vmem:[#allocation4 + $0x48] sm:$0xf]  ;;  %v5570_v59 = vld [vmem:[#allocation4 + $0x4c] sm:$0xf] }
 0x4a6   : > { %v5251_v57 = vld [vmem:[#allocation4 + $0x48] sm:$0xf]  ;;  %5579 = vst.msk [vmem:[#allocation3 + $0xac] sm:$0xf] %vm564_vm1, %v5569_v22  ;;  %v5001_v1 = vmax.f32 %v15760_v47, %v4987_v42  ;;  %v5252_v5 = vld [vmem:[#allocation4 + $0x4c] sm:$0xf]  ;;  %v14024_v42 = vor.u32 %v9627_v63, %v8824_v11  ;;  %v4792_v22 = vadd.f32 %v13650_v2, %v4748_v60  ;;  %6094 = vmatpush.bf16.msra.mxu0 %v14018_v30  ;;  %v14030_v14 = vpop.f32.mrf.mxu3 }
 0x4a7   : > { %5273 = vrot.lane.b32.xlu1 %v5251_v57, %s9889_s26  ;;  %v5093_v28 = vld [vmem:[#allocation4 + $0x48] sm:$0xf]  ;;  %5580 = vst.msk [vmem:[#allocation3 + $0xbc] sm:$0xf] %vm564_vm1, %v5570_v59  ;;  %5275 = vrot.lane.b32.xlu2 %v5252_v5, %s9889_s26  ;;  %v4921_v8 = vpop.f32.mrf.mxu2  ;;  %v5334_v19 = vld [vmem:[#allocation4 + $0x4c] sm:$0xf] }
 0x4a8   : > { %5117 = vrot.lane.b32.xlu0 %v5093_v28, %s9887_s30  ;;  %v5019_v29 = vadd.f32 %v13870_v54, %v5001_v1  ;;  %v4922_v55 = vadd.f32 %v4921_v8, %v4878_v12  ;;  %v5333_v4 = vld [vmem:[#allocation4 + $0x48] sm:$0xf]  ;;  %5344 = vst.msk [vmem:[#allocation3 + $0xf0] sm:$0xf] %vm564_vm1, %v5334_v19  ;;  %v5094_v45 = vld [vmem:[#allocation4 + $0x4c] sm:$0xf]  ;;  %6128 = vmatpush.bf16.msra.mxu1 %v14024_v42 }
 0x4a9   : > { %5343 = vst.msk [vmem:[#allocation3 + $0xe0] sm:$0xf] %vm564_vm1, %v5333_v4  ;;  %v15766_v12 = vld [vmem:[#allocation41_spill] sm:$0xff]  ;;  %v8880_v2 = vld [vmem:[%s15306_s3 + $0x150] sm:$0xf] }
 0x4aa   : > { %v4835_v21 = vpop.f32.mrf.mxu0  ;;  %v5033_v16 = vmax.f32 %v5019_v29, 0.0  ;;  %v4966_v20 = vadd.f32 %v13862_v0, %v4922_v55  ;;  %v15762_v0 = vld [vmem:[#allocation24_spill] sm:$0xff]  ;;  %15765 = vst [vmem:[#allocation50_spill] sm:$0xff] %v14030_v14  ;;  %v15767_v28 = vld [vmem:[#allocation25_spill] sm:$0xff]  ;;  %v8752_v4 = vld [vmem:[%s15306_s3 + $0x50] sm:$0xf] }
 0x4ab   : > { %v4879_v15 = vpop.f32.mrf.mxu1  ;;  %v15764_v18 = vmax.f32 %v15762_v0, %v15763_v35  ;;  %v15768_v5 = vmax.f32 %v15766_v12, %v15767_v28  ;;  %v4709_v35 = vadd.f32 %v13827_v24, %v13821_v33  ;;  %v15772_v51 = vld [vmem:[#allocation73_spill] sm:$0xff] }
 0x4ac   : > { %v9791_v7 = vpack.c.bf16 %v5033_v16, %v5032_v44  ;;  %v4988_v61 = vmax.f32 %v4790_v39, %v4966_v20  ;;  %v4880_v31 = vadd.f32 %v4879_v15, %v4835_v21  ;;  %v9609_v16 = vld [vmem:[%s15306_s3 + $0x54] sm:$0xf0]  ;;  %v8816_v20 = vld [vmem:[%s15306_s3 + $0xd0] sm:$0xf] }
 0x4ad   : > { %v9663_v53 = vld [vmem:[#allocation3 + $0xac] sm:$0xf] }
 0x4ae   : > { %9816 = vst [vmem:[#allocation4 + $0x50] sm:$0xff] %v9791_v7   ;;  %v5002_v49 = vmax.f32 %v15764_v18, %v4988_v61  ;;  %v8978_v27 = vld [vmem:[#allocation3 + $0xb8] sm:$0xf0]  ;;  %v4795_v7 = vadd.f32 %v15769_v37, %v13825_v17  ;;  %v14062_v61 = vor.u32 %v9609_v16, %v8752_v4  ;;  %v14081_v33 = vpop.f32.mrf.mxu3  ;;  %v8872_v4 = vld [vmem:[%s15306_s3 + $0x140] sm:$0xf] }
 0x4af   : > { %5119 = vrot.lane.b32.xlu1 %v5094_v45, %s9887_s30  ;;  %5197 = vrot.lane.b32.xlu2 %v5173_v3, %s9886_s17  ;;  %v4923_v25 = vpop.f32.mrf.mxu2  ;;  %v14010_v38 = vor.u32 %v9663_v53, %v8978_v27  ;;  %v15771_v27 = vld [vmem:[#allocation28_spill] sm:$0xff]  ;;  %15774 = vst [vmem:[#allocation10_spill] sm:$0xff] %v14081_v33 }
 0x4b0   : > { %5199 = vrot.lane.b32.xlu0 %v5174_v32, %s9886_s17  ;;  %v4924_v43 = vadd.f32 %v4923_v25, %v4880_v31  ;;  %v5020_v1 = vadd.f32 %v13870_v54, %v5002_v49  ;;  %v9625_v32 = vld [vmem:[%s15306_s3 + $0xd4] sm:$0xf0]  ;;  %6095 = vmatpush.bf16.msra.mxu0 %v14062_v61  ;;  %v15773_v25 = vmax.f32 %v15771_v27, %v15772_v51 }
 0x4b1   : > { %6605 = vmatmul.bf16.vlgmr.msra.gmra.mxu3 %v14010_v38  ;;  %v14068_v60 = vor.u32 %v9625_v32, %v8816_v20  ;;  %v8744_v20 = vld [vmem:[%s15306_s3 + $0x40] sm:$0xf]  ;;  %v9607_v32 = vld [vmem:[%s15306_s3 + $0x44] sm:$0xf0] }
 0x4b2   : > { %v4838_v40 = vpop.f32.mrf.mxu0  ;;  %v4968_v59 = vadd.f32 %v13879_v26, %v4924_v43  ;;  %v9641_v26 = vld [vmem:[%s15306_s3 + $0x154] sm:$0xf0]  ;;  %v5034_v45 = vmax.f32 %v5020_v1, 0.0  ;;  %v5176_v43 = vld [vmem:[#allocation4 + $0x24] sm:$0xf] }
 0x4b3   : > { %v4882_v62 = vpop.f32.mrf.mxu1  ;;  %v14045_v55 = vor.u32 %v9641_v26, %v8880_v2  ;;  %6129 = vmatpush.bf16.msra.mxu1 %v14068_v60  ;;  %v15776_v26 = vld [vmem:[#allocation45_spill] sm:$0xff] }
 0x4b4   : > { %v4989_v57 = vmax.f32 %v4792_v22, %v4968_v59  ;;  %v4883_v8 = vadd.f32 %v4882_v62, %v4838_v40  ;;  %v15770_v40 = vld [vmem:[#allocation46_spill] sm:$0xff]  ;;  %v5175_v62 = vld [vmem:[#allocation4 + $0x20] sm:$0xf] }
 0x4b5   : > { %v5253_v52 = vld [vmem:[#allocation4 + $0x50] sm:$0xf]  ;;  %v5254_v47 = vld [vmem:[#allocation4 + $0x54] sm:$0xf]  ;;  %6163 = vmatpush.bf16.msra.mxu2 %v14045_v55 }
 0x4b6   : > { %v5095_v10 = vld [vmem:[#allocation4 + $0x50] sm:$0xf]  ;;  %v5003_v21 = vmax.f32 %v15768_v5, %v4989_v57  ;;  %v5572_v50 = vld [vmem:[#allocation4 + $0x54] sm:$0xf] }
 0x4b7   : > { %5277 = vrot.lane.b32.xlu1 %v5253_v52, %s9889_s26  ;;  %5279 = vrot.lane.b32.xlu2 %v5254_v47, %s9889_s26  ;;  %v4926_v29 = vpop.f32.mrf.mxu2  ;;  %v5571_v15 = vld [vmem:[#allocation4 + $0x50] sm:$0xf]  ;;  %5582 = vst.msk [vmem:[#allocation3 + $0xdc] sm:$0xf] %vm564_vm1, %v5572_v50  ;;  %v5336_v17 = vld [vmem:[#allocation4 + $0x54] sm:$0xf] }
 0x4b8   : > { %5121 = vrot.lane.b32.xlu0 %v5095_v10, %s9887_s30  ;;  %v5021_v19 = vadd.f32 %v13870_v54, %v5003_v21  ;;  %v4927_v39 = vadd.f32 %v4926_v29, %v4883_v8  ;;  %5581 = vst.msk [vmem:[#allocation3 + $0xcc] sm:$0xf] %vm564_vm1, %v5571_v15  ;;  %v5335_v0 = vld [vmem:[#allocation4 + $0x50] sm:$0xf]  ;;  %v5096_v31 = vld [vmem:[#allocation4 + $0x54] sm:$0xf] }
 0x4b9   : > { %5345 = vst.msk [vmem:[#allocation3 + $0x100] sm:$0xf] %vm564_vm1, %v5335_v0  ;;  %v15775_v47 = vld [vmem:[#allocation42_spill] sm:$0xff] }
 0x4ba   : > { %v4840_v23 = vpop.f32.mrf.mxu0  ;;  %v5035_v3 = vmax.f32 %v5021_v19, 0.0  ;;  %v4971_v53 = vadd.f32 %v13890_v56, %v4927_v39  ;;  %5346 = vst.msk [vmem:[#allocation3 + $0x110] sm:$0xf] %vm564_vm1, %v5336_v17  ;;  %v4753_v56 = vadd.f32 %v15770_v40, %v4709_v35  ;;  %v14118_v17 = vpop.f32.mrf.mxu3  ;;  %v14122_v35 = vor.u32 %v9607_v32, %v8744_v20  ;;  %v5349_v20 = vld [vmem:[#allocation4 + $0x8] sm:$0xf] }
 0x4bb   : > { %v4884_v44 = vpop.f32.mrf.mxu1  ;;  %15781 = vst [vmem:[#allocation52_spill] sm:$0xff] %v14118_v17 }
 0x4bc   : > { %v9796_v18 = vpack.c.bf16 %v5035_v3, %v5034_v45  ;;  %v4990_v49 = vmax.f32 %v4795_v7, %v4971_v53  ;;  %v4885_v11 = vadd.f32 %v4884_v44, %v4840_v23  ;;  %v4797_v1 = vadd.f32 %v15775_v47, %v4753_v56  ;;  %v15777_v23 = vld [vmem:[#allocation72_spill] sm:$0xff]  ;;  %v15779_v3 = vld [vmem:[#allocation9_spill] sm:$0xff]  ;;  %v15780_v53 = vld [vmem:[#allocation78_spill] sm:$0xff]  ;;  %6096 = vmatpush.bf16.msra.mxu0 %v14122_v35 }
 0x4bd   : > { %v15778_v29 = vmax.f32 %v15776_v26, %v15777_v23  ;;  %v8808_v45 = vld [vmem:[%s15306_s3 + $0xc0] sm:$0xf]  ;;  %v4800_v0 = vadd.f32 %v15780_v53, %v15779_v3  ;;  %v15790_v3 = vld [vmem:[#allocation31_spill] sm:$0xff]  ;;  %v15791_v53 = vld [vmem:[#allocation37_spill] sm:$0xff] }
 0x4be   : > { %9817 = vst [vmem:[#allocation4 + $0x58] sm:$0xff] %v9796_v18   ;;  %v5004_v48 = vmax.f32 %v15773_v25, %v4990_v49  ;;  %v8994_v59 = vld [vmem:[#allocation3 + $0xd8] sm:$0xf0]  ;;  %v9623_v18 = vld [vmem:[%s15306_s3 + $0xc4] sm:$0xf0]  ;;  %v15785_v47 = vld [vmem:[#allocation36_spill] sm:$0xff] }
 0x4bf   : > { %5123 = vrot.lane.b32.xlu1 %v5096_v31, %s9887_s30  ;;  %5201 = vrot.lane.b32.xlu2 %v5175_v62, %s9886_s17  ;;  %v4928_v24 = vpop.f32.mrf.mxu2  ;;  %v9667_v63 = vld [vmem:[#allocation3 + $0xcc] sm:$0xf]  ;;  %v14128_v56 = vor.u32 %v9623_v18, %v8808_v45 }
 0x4c0   : > { %5203 = vrot.lane.b32.xlu0 %v5176_v43, %s9886_s17  ;;  %v4929_v22 = vadd.f32 %v4928_v24, %v4885_v11  ;;  %v14085_v10 = vor.u32 %v9667_v63, %v8994_v59  ;;  %v5022_v2 = vadd.f32 %v13870_v54, %v5004_v48  ;;  %v15782_v11 = vld [vmem:[#allocation47_spill] sm:$0xff]  ;;  %v15783_v43 = vld [vmem:[#allocation33_spill] sm:$0xff] }
 0x4c1   : > { %v4714_v62 = vadd.f32 %v15783_v43, %v15782_v11  ;;  %6130 = vmatpush.bf16.msra.mxu1 %v14128_v56  ;;  %v5177_v59 = vld [vmem:[#allocation4 + $0x28] sm:$0xf] }
 0x4c2   : > { %v4843_v57 = vpop.f32.mrf.mxu0  ;;  %v4973_v12 = vadd.f32 %v13907_v34, %v4929_v22  ;;  %6610 = vmatmul.bf16.gmra.mxu3 %v14085_v10  ;;  %v9639_v34 = vld [vmem:[%s15306_s3 + $0x144] sm:$0xf0]  ;;  %v5036_v49 = vmax.f32 %v5022_v2, 0.0  ;;  %v5178_v22 = vld [vmem:[#allocation4 + $0x2c] sm:$0xf] }
 0x4c3   : > { %v4887_v52 = vpop.f32.mrf.mxu1  ;;  %v14103_v39 = vor.u32 %v9639_v34, %v8872_v4  ;;  %v15788_v4 = vld [vmem:[#allocation11_spill] sm:$0xff] }
 0x4c4   : > { %v4991_v28 = vmax.f32 %v4797_v1, %v4973_v12  ;;  %v4888_v50 = vadd.f32 %v4887_v52, %v4843_v57  ;;  %v15784_v57 = vld [vmem:[#allocation34_spill] sm:$0xff] }
 0x4c5   : > { %v5255_v5 = vld [vmem:[#allocation4 + $0x58] sm:$0xf]  ;;  %v5256_v8 = vld [vmem:[#allocation4 + $0x5c] sm:$0xf]  ;;  %6164 = vmatpush.bf16.msra.mxu2 %v14103_v39  ;;  %v4758_v52 = vadd.f32 %v15784_v57, %v4714_v62  ;;  %v15786_v1 = vld [vmem:[#allocation30_spill] sm:$0xff] }
 0x4c6   : > { %v5097_v21 = vld [vmem:[#allocation4 + $0x58] sm:$0xf]  ;;  %v5005_v15 = vmax.f32 %v15778_v29, %v4991_v28  ;;  %v5574_v16 = vld [vmem:[#allocation4 + $0x5c] sm:$0xf]  ;;  %v15787_v12 = vmax.f32 %v15785_v47, %v15786_v1 }
 0x4c7   : > { %5281 = vrot.lane.b32.xlu1 %v5255_v5, %s9889_s26  ;;  %5283 = vrot.lane.b32.xlu2 %v5256_v8, %s9889_s26  ;;  %v4931_v19 = vpop.f32.mrf.mxu2  ;;  %v5573_v44 = vld [vmem:[#allocation4 + $0x58] sm:$0xf]  ;;  %5584 = vst.msk [vmem:[#allocation3 + $0xfc] sm:$0xf] %vm564_vm1, %v5574_v16  ;;  %v5338_v48 = vld [vmem:[#allocation4 + $0x5c] sm:$0xf]  ;;  %v4802_v34 = vadd.f32 %v15788_v4, %v4758_v52 }
 0x4c8   : > { %5125 = vrot.lane.b32.xlu0 %v5097_v21, %s9887_s30  ;;  %v5023_v37 = vadd.f32 %v13870_v54, %v5005_v15  ;;  %v4932_v7 = vadd.f32 %v4931_v19, %v4888_v50  ;;  %5583 = vst.msk [vmem:[#allocation3 + $0xec] sm:$0xf] %vm564_vm1, %v5573_v44  ;;  %v5337_v27 = vld [vmem:[#allocation4 + $0x58] sm:$0xf]  ;;  %v8864_v21 = vld [vmem:[%s15306_s3 + $0x130] sm:$0xf]  ;;  %v14156_v44 = vpop.f32.mrf.mxu3 }
 0x4c9   : > { %5347 = vst.msk [vmem:[#allocation3 + $0x120] sm:$0xf] %vm564_vm1, %v5337_v27  ;;  %v9637_v8 = vld [vmem:[%s15306_s3 + $0x134] sm:$0xf0]  ;;  %v9635_v52 = vld [vmem:[%s15306_s3 + $0x124] sm:$0xf0] }
 0x4ca   : > { %v5037_v31 = vmax.f32 %v5023_v37, 0.0  ;;  %v4976_v40 = vadd.f32 %v13929_v13, %v4932_v7  ;;  %v4845_v51 = vpop.f32.mrf.mxu0  ;;  %5348 = vst.msk [vmem:[#allocation3 + $0x130] sm:$0xf] %vm564_vm1, %v5338_v48  ;;  %v5098_v13 = vld [vmem:[#allocation4 + $0x5c] sm:$0xf]  ;;  %v14149_v23 = vor.u32 %v9637_v8, %v8864_v21 }
 0x4cb   : > { %v4889_v25 = vpop.f32.mrf.mxu1  ;;  %15789 = vst [vmem:[#allocation53_spill] sm:$0xff] %v14156_v44  ;;  %v9621_v27 = vld [vmem:[%s15306_s3 + $0xb4] sm:$0xf0] }
 0x4cc   : > { %v9801_v24 = vpack.c.bf16 %v5037_v31, %v5036_v49  ;;  %v4992_v63 = vmax.f32 %v4800_v0, %v4976_v40  ;;  %v4890_v5 = vadd.f32 %v4889_v25, %v4845_v51  ;;  %6165 = vmatpush.bf16.msra.mxu2 %v14149_v23  ;;  %v15792_v0 = vmax.f32 %v15790_v3, %v15791_v53  ;;  %v9605_v49 = vld [vmem:[%s15306_s3 + $0x34] sm:$0xf0]  ;;  %v8800_v31 = vld [vmem:[%s15306_s3 + $0xb0] sm:$0xf] }
 0x4cd   : > { %v14182_v48 = vor.u32 %v9621_v27, %v8800_v31  ;;  %v9633_v3 = vld [vmem:[%s15306_s3 + $0x114] sm:$0xf0]  ;;  %v8784_v27 = vld [vmem:[%s15306_s3 + $0x90] sm:$0xf] }
 0x4ce   : > { %9818 = vst [vmem:[#allocation4 + $0x60] sm:$0xff] %v9801_v24   ;;  %v5006_v28 = vmax.f32 %v15787_v12, %v4992_v63  ;;  %v9010_v15 = vld [vmem:[#allocation3 + $0xf8] sm:$0xf0]  ;;  %v5350_v63 = vld [vmem:[#allocation4 + $0xc] sm:$0xf] }
 0x4cf   : > { %5127 = vrot.lane.b32.xlu1 %v5098_v13, %s9887_s30  ;;  %5205 = vrot.lane.b32.xlu2 %v5177_v59, %s9886_s17  ;;  %v4933_v2 = vpop.f32.mrf.mxu2  ;;  %v9671_v26 = vld [vmem:[#allocation3 + $0xec] sm:$0xf]  ;;  %v5430_v13 = vld [vmem:[#allocation4 + $0x44] sm:$0xf]  ;;  %v8856_v59 = vld [vmem:[%s15306_s3 + $0x120] sm:$0xf] }
 0x4d0   : > { %5207 = vrot.lane.b32.xlu0 %v5178_v22, %s9886_s17  ;;  %v4934_v29 = vadd.f32 %v4933_v2, %v4890_v5  ;;  %v14151_v50 = vor.u32 %v9671_v26, %v9010_v15  ;;  %v5024_v45 = vadd.f32 %v13870_v54, %v5006_v28  ;;  %6131 = vmatpush.bf16.msra.mxu1 %v14182_v48  ;;  %v14187_v24 = vpop.f32.mrf.mxu3  ;;  %v5429_v22 = vld [vmem:[#allocation4 + $0x40] sm:$0xf]  ;;  %v5509_v12 = vld [vmem:[#allocation4 + $0x10] sm:$0xf]  ;;  %v5510_v5 = vld [vmem:[#allocation4 + $0x14] sm:$0xf] }
 0x4d1   : > { %15793 = vst [vmem:[#allocation54_spill] sm:$0xff] %v14187_v24  ;;  %v14200_v1 = vor.u32 %v9635_v52, %v8856_v59  ;;  %v5351_v28 = vld [vmem:[#allocation4 + $0x10] sm:$0xf]  ;;  %v8728_v2 = vld [vmem:[%s15306_s3 + $0x20] sm:$0xf] }
 0x4d2   : > { %v4978_v19 = vadd.f32 %v13966_v41, %v4934_v29  ;;  %6615 = vmatmul.bf16.gmra.mxu3 %v14151_v50  ;;  %v8736_v41 = vld [vmem:[%s15306_s3 + $0x30] sm:$0xf]  ;;  %v5038_v11 = vmax.f32 %v5024_v45, 0.0  ;;  %v9603_v26 = vld [vmem:[%s15306_s3 + $0x24] sm:$0xf0] }
 0x4d3   : > { %v14175_v40 = vor.u32 %v9605_v49, %v8736_v41  ;;  %6166 = vmatpush.bf16.msra.mxu2 %v14200_v1  ;;  %v8792_v29 = vld [vmem:[%s15306_s3 + $0xa0] sm:$0xf]  ;;  %v14218_v4 = vor.u32 %v9603_v26, %v8728_v2  ;;  %v8848_v45 = vld [vmem:[%s15306_s3 + $0x110] sm:$0xf]  ;;  %v9601_v41 = vld [vmem:[%s15306_s3 + $0x14] sm:$0xf0] }
 0x4d4   : > { %v4993_v16 = vmax.f32 %v4802_v34, %v4978_v19  ;;  %v9619_v34 = vld [vmem:[%s15306_s3 + $0xa4] sm:$0xf0]  ;;  %v5358_v24 = vld [vmem:[#allocation4 + $0x2c] sm:$0xf] }
 0x4d5   : > { %v5257_v37 = vld [vmem:[#allocation4 + $0x60] sm:$0xf]  ;;  %v5258_v7 = vld [vmem:[#allocation4 + $0x64] sm:$0xf]  ;;  %6097 = vmatpush.bf16.msra.mxu0 %v14175_v40  ;;  %v14224_v19 = vor.u32 %v9619_v34, %v8792_v29  ;;  %v5354_v34 = vld [vmem:[#allocation4 + $0x1c] sm:$0xf] }
 0x4d6   : > { %v5575_v32 = vld [vmem:[#allocation4 + $0x60] sm:$0xf]  ;;  %v5007_v18 = vmax.f32 %v15792_v0, %v4993_v16  ;;  %v5576_v51 = vld [vmem:[#allocation4 + $0x64] sm:$0xf]  ;;  %v5190_v16 = vpop.permute.xlu2 %5189  ;;  %v14238_v0 = vor.u32 %v9633_v3, %v8848_v45  ;;  %v9631_v3 = vld [vmem:[%s15306_s3 + $0x104] sm:$0xf0] }
 0x4d7   : > { %5285 = vrot.lane.b32.xlu1 %v5257_v37, %s9889_s26  ;;  %5287 = vrot.lane.b32.xlu2 %v5258_v7, %s9889_s26  ;;  %5585 = vst.msk [vmem:[#allocation3 + $0x10c] sm:$0xf] %vm564_vm1, %v5575_v32  ;;  %v5432_v37 = vld [vmem:[#allocation4 + $0x4c] sm:$0xf]  ;;  %v5431_v7 = vld [vmem:[#allocation4 + $0x48] sm:$0xf] }
 0x4d8   : > { %5369 = vrot.lane.b32.xlu0 %v5349_v20, %s9887_s30  ;;  %v5025_v25 = vadd.f32 %v13870_v54, %v5007_v18  ;;  %5586 = vst.msk [vmem:[#allocation3 + $0x11c] sm:$0xf] %vm564_vm1, %v5576_v51  ;;  %v14214_v15 = vpop.f32.mrf.mxu3  ;;  %6132 = vmatpush.bf16.msra.mxu1 %v14224_v19  ;;  %v5352_v20 = vld [vmem:[#allocation4 + $0x14] sm:$0xf]  ;;  %v8720_v18 = vld [vmem:[%s15306_s3 + $0x10] sm:$0xf] }
 0x4d9   : > { %15794 = vst [vmem:[#allocation39_spill] sm:$0xff] %v14214_v15  ;;  %6098 = vmatpush.bf16.msra.mxu0 %v14218_v4  ;;  %v14248_v31 = vor.u32 %v9601_v41, %v8720_v18  ;;  %v9617_v51 = vld [vmem:[%s15306_s3 + $0x94] sm:$0xf0]  ;;  %6167 = vmatpush.bf16.msra.mxu2 %v14238_v0  ;;  %v8840_v45 = vld [vmem:[%s15306_s3 + $0x100] sm:$0xf] }
 0x4da   : > { %v5039_v43 = vmax.f32 %v5025_v25, 0.0  ;;  %v9615_v18 = vld [vmem:[%s15306_s3 + $0x84] sm:$0xf0]  ;;  %v5437_v33 = vld [vmem:[#allocation4 + $0x60] sm:$0xf] }
 0x4dc   : > { %v9806_v62 = vpack.c.bf16 %v5039_v43, %v5038_v11  ;;  %v14261_v43 = vor.u32 %v9617_v51, %v8784_v27  ;;  %v9644_v51 = vld [vmem:[%s15306_s3 + $0x174] sm:$0xf] }
 0x4dd   : > { %6099 = vmatpush.bf16.msra.mxu0 %v14248_v31 }
 0x4de   : > { %9819 = vst [vmem:[#allocation4 + $0x68] sm:$0xff] %v9806_v62   ;;  %v9675_v54 = vld [vmem:[#allocation3 + $0x10c] sm:$0xf]  ;;  %6133 = vmatpush.bf16.msra.mxu1 %v14261_v43  ;;  %v5511_v62 = vld [vmem:[#allocation4 + $0x18] sm:$0xf] }
 0x4df   : > { %5371 = vrot.lane.b32.xlu1 %v5350_v63, %s9887_s30  ;;  %5449 = vrot.lane.b32.xlu2 %v5429_v22, %s9886_s17  ;;  %v9026_v57 = vld [vmem:[#allocation3 + $0x118] sm:$0xf0]  ;;  %v5353_v63 = vld [vmem:[#allocation4 + $0x18] sm:$0xf]  ;;  %v8712_v22 = vld [vmem:[%s15306_s3] sm:$0xf] }
 0x4e0   : > { %5451 = vrot.lane.b32.xlu0 %v5430_v13, %s9886_s17  ;;  %v14198_v47 = vor.u32 %v9675_v54, %v9026_v57  ;;  %v14256_v25 = vpop.f32.mrf.mxu3  ;;  %v5512_v13 = vld [vmem:[#allocation4 + $0x1c] sm:$0xf]  ;;  %v9599_v54 = vld [vmem:[%s15306_s3 + $0x4] sm:$0xf0] }
 0x4e1   : > { %15795 = vst [vmem:[#allocation40_spill] sm:$0xff] %v14256_v25  ;;  %v14275_v59 = vor.u32 %v9599_v54, %v8712_v22 }
 0x4e2   : > { %6620 = vmatmul.bf16.gmra.mxu3 %v14198_v47 }
 0x4e3   : > { %6100 = vmatpush.bf16.msra.mxu0 %v14275_v59 }
 0x4e5   : > { %v5577_v21 = vld [vmem:[#allocation4 + $0x68] sm:$0xf]  ;;  %v5578_v8 = vld [vmem:[#allocation4 + $0x6c] sm:$0xf] }
 0x4e6   : > { %5587 = vst.msk [vmem:[#allocation3 + $0x12c] sm:$0xf] %vm564_vm1, %v5577_v21 }
 0x4e7   : > { %5529 = vrot.lane.b32.xlu1 %v5509_v12, %s9889_s26  ;;  %5531 = vrot.lane.b32.xlu2 %v5510_v5, %s9889_s26  ;;  %5588 = vst.msk [vmem:[#allocation3 + $0x13c] sm:$0xf] %vm564_vm1, %v5578_v8  ;;  %v5209_v12 = vrot.slane %v5190_v16, 4 }
 0x4e8   : > { %5373 = vrot.lane.b32.xlu0 %v5351_v28, %s9887_s30  ;;  %v14280_v8 = vpop.f32.mrf.mxu3 }
 0x4e9   : > { %15796 = vst [vmem:[#allocation56_spill] sm:$0xff] %v14280_v8 }
 0x4ed   : > { %v9679_v32 = vld [vmem:[#allocation3 + $0x12c] sm:$0xf] }
 0x4ee   : > { %v9042_v53 = vld [vmem:[#allocation3 + $0x138] sm:$0xf0] }
 0x4ef   : > { %5375 = vrot.lane.b32.xlu1 %v5352_v20, %s9887_s30  ;;  %5453 = vrot.lane.b32.xlu2 %v5431_v7, %s9886_s17  ;;  %v14246_v49 = vor.u32 %v9679_v32, %v9042_v53  ;;  %v5219_v20 = vsel %vm764_vm2, %v5209_v12, %v5190_v16  ;;  %v5433_v7 = vld [vmem:[#allocation4 + $0x50] sm:$0xf]  ;;  %v14300_v16 = vor.u32 %v9631_v3, %v8840_v45  ;;  %v8776_v53 = vld [vmem:[%s15306_s3 + $0x80] sm:$0xf] }
 0x4f0   : > { %5455 = vrot.lane.b32.xlu0 %v5432_v37, %s9886_s17  ;;  %v14258_v11 = vpop.permute.xlu2 %5271  ;;  %v5434_v37 = vld [vmem:[#allocation4 + $0x54] sm:$0xf]  ;;  %v14308_v27 = vor.u32 %v9615_v18, %v8776_v53  ;;  %v14352_v3 = vpop.f32.mrf.mxu3  ;;  %v5514_v53 = vld [vmem:[#allocation4 + $0x24] sm:$0xf] }
 0x4f1   : > { %6168 = vmatpush.bf16.msra.mxu2 %v14300_v16  ;;  %15799 = vst [vmem:[#allocation57_spill] sm:$0xff] %v14352_v3 }
 0x4f2   : > { %6625 = vmatmul.bf16.gmra.mxu3 %v14246_v49  ;;  %6134 = vmatpush.bf16.msra.mxu1 %v14308_v27 }
 0x4f7   : > { %5533 = vrot.lane.b32.xlu1 %v5511_v62, %s9889_s26  ;;  %5535 = vrot.lane.b32.xlu2 %v5512_v13, %s9889_s26  ;;  %v8898_v62 = vld [vmem:[%s15306_s3 + $0x178] sm:$0xf0] }
 0x4f8   : > { %5377 = vrot.lane.b32.xlu0 %v5353_v63, %s9887_s30  ;;  %v5112_v57 = vpop.permute.xlu1 %5111  ;;  %v5110_v52 = vpop.permute.xlu0 %5109  ;;  %v9612_v63 = vld [vmem:[%s15306_s3 + $0x74] sm:$0xf]  ;;  %v14322_v54 = vor.u32 %v9644_v51, %v8898_v62  ;;  %v8762_v51 = vld [vmem:[%s15306_s3 + $0x68] sm:$0xf0] }
 0x4f9   : > { %v5130_v28 = vrot.slane %v5112_v57, 4  ;;  %v5129_v5 = vrot.slane %v5110_v52, 4  ;;  %v14277_v21 = vpop.permute.xlu2 %5193 }
 0x4fa   : > { %6297 = vmatpush.bf16.msrb.mxu2 %v14322_v54 }
 0x4fb   : > { %v5140_v2 = vsel %vm649_vm3, %v5130_v28, %v5112_v57  ;;  %v5139_v26 = vsel %vm649_vm3, %v5129_v5, %v5110_v52  ;;  %v8770_v57 = vld [vmem:[%s15306_s3 + $0x78] sm:$0xf0]  ;;  %v9628_v52 = vld [vmem:[%s15306_s3 + $0xf4] sm:$0xf]  ;;  %v9642_v5 = vld [vmem:[%s15306_s3 + $0x164] sm:$0xf] }
 0x4fc   : > { %5160 = vst.msk [vmem:[#allocation3 + $0x10] sm:$0xff] %vm10480_vm5, %v5140_v2  ;;  %v14331_v12 = vor.u32 %v9612_v63, %v8770_v57  ;;  %v8834_v28 = vld [vmem:[%s15306_s3 + $0xf8] sm:$0xf0]  ;;  %v8890_v2 = vld [vmem:[%s15306_s3 + $0x168] sm:$0xf0]  ;;  %v5211_v57 = vrot.slane %v14277_v21, 4 }
 0x4fd   : > { %5159 = vst.msk [vmem:[#allocation3] sm:$0xff] %vm10480_vm5, %v5139_v26  ;;  %v14350_v45 = vor.u32 %v9642_v5, %v8890_v2  ;;  %v8826_v63 = vld [vmem:[%s15306_s3 + $0xe8] sm:$0xf0]  ;;  %v8882_v2 = vld [vmem:[%s15306_s3 + $0x158] sm:$0xf0] }
 0x4fe   : > { %5239 = vst.msk [vmem:[#allocation3 + $0x4] sm:$0xff] %vm10514_vm9, %v5219_v20  ;;  %v14345_v20 = vor.u32 %v9628_v52, %v8834_v28  ;;  %6229 = vmatpush.bf16.msrb.mxu0 %v14331_v12 }
 0x4ff   : > { %5379 = vrot.lane.b32.xlu1 %v5354_v34, %s9887_s30  ;;  %5457 = vrot.lane.b32.xlu2 %v5433_v7, %s9886_s17 }
 0x500   : > { %5459 = vrot.lane.b32.xlu0 %v5434_v37, %s9886_s17  ;;  %v5192_v41 = vpop.permute.xlu0 %5191  ;;  %v5513_v37 = vld [vmem:[#allocation4 + $0x20] sm:$0xf]  ;;  %6263 = vmatpush.bf16.msrb.mxu1 %v14345_v20 }
 0x501   : > { %v5210_v13 = vrot.slane %v5192_v41, 4  ;;  %v14319_v22 = vpop.permute.xlu2 %5275  ;;  %6298 = vmatpush.bf16.msrb.mxu2 %v14350_v45 }
 0x502   : > { %6741 = vmatmul.bf16.vlgmr.msrb.gmra.mxu3 %v14010_v38  ;;  %v5355_v38 = vld [vmem:[#allocation4 + $0x20] sm:$0xf] }
 0x503   : > { %v5220_v26 = vsel %vm764_vm2, %v5210_v13, %v5192_v41  ;;  %v9580_v34 = vld [vmem:[#allocation3 + $0xc] sm:$0xf0]  ;;  %v9610_v41 = vld [vmem:[%s15306_s3 + $0x64] sm:$0xf]  ;;  %v9640_v13 = vld [vmem:[%s15306_s3 + $0x154] sm:$0xf] }
 0x504   : > { %5240 = vst.msk [vmem:[#allocation3 + $0x14] sm:$0xff] %vm10514_vm9, %v5220_v26  ;;  %v8632_v7 = vld [vmem:[#allocation3] sm:$0xf]  ;;  %v14371_v62 = vor.u32 %v9610_v41, %v8762_v51  ;;  %v5221_v41 = vsel %vm764_vm2, %v5211_v57, %v14277_v21  ;;  %v5356_v51 = vld [vmem:[#allocation4 + $0x24] sm:$0xf] }
 0x505   : > { %5300 = vst.msk [vmem:[#allocation3 + $0x18] sm:$0xf] %vm880_vm8, %v14258_v11  ;;  %v14356_v18 = vor.u32 %v9580_v34, %v8632_v7  ;;  %v9626_v11 = vld [vmem:[%s15306_s3 + $0xe4] sm:$0xf]  ;;  %v9608_v21 = vld [vmem:[%s15306_s3 + $0x54] sm:$0xf] }
 0x506   : > { %v14382_v5 = vor.u32 %v9626_v11, %v8826_v63  ;;  %6230 = vmatpush.bf16.msrb.mxu0 %v14371_v62  ;;  %v5436_v63 = vld [vmem:[#allocation4 + $0x5c] sm:$0xf] }
 0x507   : > { %5537 = vrot.lane.b32.xlu1 %v5513_v37, %s9889_s26  ;;  %5539 = vrot.lane.b32.xlu2 %v5514_v53, %s9889_s26  ;;  %v14391_v37 = vor.u32 %v9640_v13, %v8882_v2  ;;  %v5435_v13 = vld [vmem:[#allocation4 + $0x58] sm:$0xf]  ;;  %v8754_v57 = vld [vmem:[%s15306_s3 + $0x58] sm:$0xf0] }
 0x508   : > { %5381 = vrot.lane.b32.xlu0 %v5355_v38, %s9887_s30  ;;  %6101 = vmatmul.bf16.vlgmr.msra.gmra.mxu0 %v14356_v18  ;;  %v5270_v52 = vpop.permute.xlu1 %5269  ;;  %v9578_v38 = vld [vmem:[#allocation3 + $0x4] sm:$0xf]  ;;  %v14419_v2 = vor.u32 %v9608_v21, %v8754_v57  ;;  %v5515_v21 = vld [vmem:[#allocation4 + $0x28] sm:$0xf] }
 0x509   : > { %v5114_v28 = vpop.permute.xlu0 %5113  ;;  %5299 = vst.msk [vmem:[#allocation3 + $0x8] sm:$0xf] %vm880_vm8, %v5270_v52  ;;  %v14388_v34 = vpop.permute.xlu2 %5197  ;;  %6264 = vmatpush.bf16.msrb.mxu1 %v14382_v5  ;;  %6299 = vmatpush.bf16.msrb.mxu2 %v14391_v37  ;;  %v9624_v52 = vld [vmem:[%s15306_s3 + $0xd4] sm:$0xf]  ;;  %v5357_v57 = vld [vmem:[#allocation4 + $0x28] sm:$0xf] }
 0x50a   : > { %v5131_v26 = vrot.slane %v5114_v28, 4  ;;  %6231 = vmatpush.bf16.msrb.mxu0 %v14419_v2 }
 0x50b   : > { %v8634_v53 = vld [vmem:[#allocation3 + $0x10] sm:$0xf0] }
 0x50c   : > { %v5141_v7 = vsel %vm649_vm3, %v5131_v26, %v5114_v28  ;;  %v14399_v11 = vor.u32 %v9578_v38, %v8634_v53  ;;  %v14415_v28 = vpop.f32.mrf.mxu3  ;;  %v8818_v26 = vld [vmem:[%s15306_s3 + $0xd8] sm:$0xf0] }
 0x50d   : > { %5161 = vst.msk [vmem:[#allocation3 + $0x20] sm:$0xff] %vm10480_vm5, %v5141_v7 }
 0x50e   : > { %5241 = vst.msk [vmem:[#allocation3 + $0x24] sm:$0xff] %vm10514_vm9, %v5221_v41  ;;  %6135 = vmatmul.bf16.vlgmr.msra.gmra.mxu1 %v14399_v11  ;;  %v9581_v41 = vld [vmem:[#allocation3 + $0x14] sm:$0xf0] }
 0x50f   : > { %5383 = vrot.lane.b32.xlu1 %v5356_v51, %s9887_s30  ;;  %15800 = vst [vmem:[#allocation58_spill] sm:$0xff] %v14415_v28  ;;  %5461 = vrot.lane.b32.xlu2 %v5435_v13, %s9886_s17  ;;  %v14424_v51 = vor.u32 %v9624_v52, %v8818_v26  ;;  %v5516_v52 = vld [vmem:[#allocation4 + $0x2c] sm:$0xf] }
 0x510   : > { %5463 = vrot.lane.b32.xlu0 %v5436_v63, %s9886_s17  ;;  %v5116_v7 = vpop.permute.xlu1 %5115  ;;  %v8640_v53 = vld [vmem:[#allocation3 + $0x8] sm:$0xf]  ;;  %v8746_v26 = vld [vmem:[%s15306_s3 + $0x48] sm:$0xf0] }
 0x511   : > { %v5196_v38 = vpop.permute.xlu0 %5195  ;;  %v5132_v3 = vrot.slane %v5116_v7, 4  ;;  %v14426_v8 = vpop.permute.xlu2 %5279  ;;  %v14428_v15 = vor.u32 %v9581_v41, %v8640_v53  ;;  %6265 = vmatpush.bf16.msrb.mxu1 %v14424_v51  ;;  %v9622_v53 = vld [vmem:[%s15306_s3 + $0xc4] sm:$0xf]  ;;  %v8810_v41 = vld [vmem:[%s15306_s3 + $0xc8] sm:$0xf0] }
 0x512   : > { %v5212_v25 = vrot.slane %v5196_v38, 4  ;;  %6746 = vmatmul.bf16.gmra.mxu3 %v14085_v10  ;;  %v9638_v10 = vld [vmem:[%s15306_s3 + $0x144] sm:$0xf] }
 0x513   : > { %v5142_v63 = vsel %vm649_vm3, %v5132_v3, %v5116_v7  ;;  %6169 = vmatmul.bf16.vlgmr.msra.gmra.mxu2 %v14428_v15 }
 0x514   : > { %v5222_v13 = vsel %vm764_vm2, %v5212_v25, %v5196_v38  ;;  %5162 = vst.msk [vmem:[#allocation3 + $0x30] sm:$0xff] %vm10480_vm5, %v5142_v63  ;;  %v8874_v25 = vld [vmem:[%s15306_s3 + $0x148] sm:$0xf0]  ;;  %v5213_v63 = vrot.slane %v14388_v34, 4 }
 0x515   : > { %5242 = vst.msk [vmem:[#allocation3 + $0x34] sm:$0xff] %vm10514_vm9, %v5222_v13  ;;  %v14451_v3 = vor.u32 %v9638_v10, %v8874_v25  ;;  %v8648_v25 = vld [vmem:[#allocation3 + $0x20] sm:$0xf]  ;;  %v9582_v44 = vld [vmem:[#allocation3 + $0x24] sm:$0xf] }
 0x516   : > { %5302 = vst.msk [vmem:[#allocation3 + $0x38] sm:$0xf] %vm880_vm8, %v14319_v22  ;;  %v9606_v22 = vld [vmem:[%s15306_s3 + $0x44] sm:$0xf] }
 0x517   : > { %5541 = vrot.lane.b32.xlu1 %v5515_v21, %s9889_s26  ;;  %5543 = vrot.lane.b32.xlu2 %v5516_v52, %s9889_s26  ;;  %v14459_v38 = vor.u32 %v9606_v22, %v8746_v26  ;;  %v14474_v52 = vpop.f32.mrf.mxu3 }
 0x518   : > { %5385 = vrot.lane.b32.xlu0 %v5357_v57, %s9887_s30  ;;  %6300 = vmatpush.bf16.msrb.mxu2 %v14451_v3  ;;  %v14472_v57 = vor.u32 %v9622_v53, %v8810_v41  ;;  %15801 = vst [vmem:[#allocation51_spill] sm:$0xff] %v14474_v52  ;;  %v5223_v53 = vsel %vm764_vm2, %v5213_v63, %v14388_v34  ;;  %v5438_v41 = vld [vmem:[#allocation4 + $0x64] sm:$0xf]  ;;  %v8866_v34 = vld [vmem:[%s15306_s3 + $0x138] sm:$0xf0] }
 0x519   : > { %v5274_v7 = vpop.permute.xlu1 %5273  ;;  %v14469_v21 = vpop.permute.xlu2 %5201  ;;  %6232 = vmatpush.bf16.msrb.mxu0 %v14459_v38 }
 0x51a   : > { %5301 = vst.msk [vmem:[#allocation3 + $0x28] sm:$0xf] %vm880_vm8, %v5274_v7  ;;  %v5118_v13 = vpop.permute.xlu0 %5117  ;;  %6266 = vmatpush.bf16.msrb.mxu1 %v14472_v57 }
 0x51b   : > { %v5133_v10 = vrot.slane %v5118_v13, 4  ;;  %v9584_v22 = vld [vmem:[#allocation3 + $0x2c] sm:$0xf0] }
 0x51c   : > { %v14479_v7 = vor.u32 %v9584_v22, %v8648_v25  ;;  %v8650_v17 = vld [vmem:[#allocation3 + $0x30] sm:$0xf0]  ;;  %v8738_v25 = vld [vmem:[%s15306_s3 + $0x38] sm:$0xf0] }
 0x51d   : > { %v5143_v26 = vsel %vm649_vm3, %v5133_v10, %v5118_v13  ;;  %v14485_v52 = vor.u32 %v9582_v44, %v8650_v17  ;;  %v9636_v13 = vld [vmem:[%s15306_s3 + $0x134] sm:$0xf]  ;;  %v9585_v17 = vld [vmem:[#allocation3 + $0x34] sm:$0xf0] }
 0x51e   : > { %5163 = vst.msk [vmem:[#allocation3 + $0x40] sm:$0xff] %vm10480_vm5, %v5143_v26  ;;  %6106 = vmatmul.bf16.gmra.mxu0 %v14479_v7  ;;  %v14499_v44 = vor.u32 %v9636_v13, %v8866_v34  ;;  %v9604_v10 = vld [vmem:[%s15306_s3 + $0x34] sm:$0xf]  ;;  %v8802_v34 = vld [vmem:[%s15306_s3 + $0xb8] sm:$0xf0] }
 0x51f   : > { %5243 = vst.msk [vmem:[#allocation3 + $0x44] sm:$0xff] %vm10514_vm9, %v5223_v53  ;;  %5387 = vrot.lane.b32.xlu1 %v5358_v24, %s9887_s30  ;;  %5465 = vrot.lane.b32.xlu2 %v5437_v33, %s9886_s17  ;;  %v9620_v13 = vld [vmem:[%s15306_s3 + $0xb4] sm:$0xf]  ;;  %s470_s30 = scalar_lea.vmem %s15314_s11, %s7529_s27 }
 0x520   : > { %5467 = vrot.lane.b32.xlu0 %v5438_v41, %s9886_s17  ;;  %15802 = vst [vmem:[#allocation61_spill] sm:$0xff] %v14499_v44  ;;  %6140 = vmatmul.bf16.gmra.mxu1 %v14485_v52  ;;  %v14513_v41 = vor.u32 %v9604_v10, %v8738_v25  ;;  %v14521_v28 = vor.u32 %v9620_v13, %v8802_v34  ;;  %v5517_v10 = vld [vmem:[#allocation4 + $0x30] sm:$0xf] }
 0x521   : > { %v5120_v24 = vpop.permute.xlu1 %5119  ;;  %v8656_v63 = vld [vmem:[#allocation3 + $0x28] sm:$0xf]  ;;  %v14508_v53 = vpop.permute.xlu2 %5283  ;;  %6301 = vmatpush.bf16.msrb.mxu2 %v14499_v44 }
 0x522   : > { %v5134_v22 = vrot.slane %v5120_v24, 4  ;;  %v5200_v26 = vpop.permute.xlu0 %5199  ;;  %v14510_v33 = vor.u32 %v9585_v17, %v8656_v63  ;;  %6751 = vmatmul.bf16.gmra.mxu3 %v14151_v50  ;;  %v14526_v17 = vpop.f32.mrf.mxu3  ;;  %6233 = vmatpush.bf16.msrb.mxu0 %v14513_v41 }
 0x523   : > { %v5214_v14 = vrot.slane %v5200_v26, 4  ;;  %15804 = vst [vmem:[#allocation64_spill] sm:$0xff] %v14526_v17  ;;  %6267 = vmatpush.bf16.msrb.mxu1 %v14521_v28 }
 0x524   : > { %15803 = vst [vmem:[#allocation63_spill] sm:$0xff] %v14510_v33  ;;  %v5144_v6 = vsel %vm649_vm3, %v5134_v22, %v5120_v24  ;;  %6174 = vmatmul.bf16.gmra.mxu2 %v14510_v33  ;;  %v5518_v24 = vld [vmem:[#allocation4 + $0x34] sm:$0xf]  ;;  %v5215_v22 = vrot.slane %v14469_v21, 4 }
 0x525   : > { %5164 = vst.msk [vmem:[#allocation3 + $0x50] sm:$0xff] %vm10480_vm5, %v5144_v6  ;;  %v5224_v63 = vsel %vm764_vm2, %v5214_v14, %v5200_v26  ;;  %v9634_v6 = vld [vmem:[%s15306_s3 + $0x124] sm:$0xf]  ;;  %v8858_v14 = vld [vmem:[%s15306_s3 + $0x128] sm:$0xf0] }
 0x526   : > { %5244 = vst.msk [vmem:[#allocation3 + $0x54] sm:$0xff] %vm10514_vm9, %v5224_v63  ;;  %v14545_v50 = vor.u32 %v9634_v6, %v8858_v14  ;;  %v8664_v34 = vld [vmem:[#allocation3 + $0x40] sm:$0xf]  ;;  %v5225_v14 = vsel %vm764_vm2, %v5215_v22, %v14469_v21  ;;  %v8730_v21 = vld [vmem:[%s15306_s3 + $0x28] sm:$0xf0] }
 0x527   : > { %5304 = vst.msk [vmem:[#allocation3 + $0x58] sm:$0xf] %vm880_vm8, %v14426_v8  ;;  %5545 = vrot.lane.b32.xlu1 %v5517_v10, %s9889_s26  ;;  %5547 = vrot.lane.b32.xlu2 %v5518_v24, %s9889_s26  ;;  %v9586_v24 = vld [vmem:[#allocation3 + $0x44] sm:$0xf] }
 0x528   : > { %15805 = vst [vmem:[#allocation43_spill] sm:$0xff] %v14545_v50  ;;  %6302 = vmatpush.bf16.msrb.mxu2 %v14545_v50 }
 0x529   : > { %v5278_v25 = vpop.permute.xlu1 %5277  ;;  %v14549_v26 = vpop.permute.xlu2 %5205 }
 0x52a   : > { %5303 = vst.msk [vmem:[#allocation3 + $0x48] sm:$0xf] %vm880_vm8, %v5278_v25  ;;  %v5122_v8 = vpop.permute.xlu0 %5121  ;;  %v14561_v44 = vpop.f32.mrf.mxu3 }
 0x52b   : > { %v5135_v13 = vrot.slane %v5122_v8, 4  ;;  %15808 = vst [vmem:[#allocation69_spill] sm:$0xff] %v14561_v44 }
 0x52c   : > { %v9588_v63 = vld [vmem:[#allocation3 + $0x4c] sm:$0xf0] }
 0x52d   : > { %v5145_v10 = vsel %vm649_vm3, %v5135_v13, %v5122_v8  ;;  %v14553_v17 = vor.u32 %v9588_v63, %v8664_v34  ;;  %v8666_v6 = vld [vmem:[#allocation3 + $0x50] sm:$0xf0]  ;;  %v9602_v8 = vld [vmem:[%s15306_s3 + $0x24] sm:$0xf]  ;;  %v8794_v63 = vld [vmem:[%s15306_s3 + $0xa8] sm:$0xf0] }
 0x52e   : > { %5165 = vst.msk [vmem:[#allocation3 + $0x60] sm:$0xff] %vm10480_vm5, %v5145_v10  ;;  %v14559_v25 = vor.u32 %v9586_v24, %v8666_v6  ;;  %v9589_v22 = vld [vmem:[#allocation3 + $0x54] sm:$0xf0]  ;;  %v14572_v13 = vor.u32 %v9602_v8, %v8730_v21  ;;  %v9618_v34 = vld [vmem:[%s15306_s3 + $0xa4] sm:$0xf] }
 0x52f   : > { %15806 = vst [vmem:[#allocation44_spill] sm:$0xff] %v14553_v17  ;;  %6111 = vmatmul.bf16.gmra.mxu0 %v14553_v17  ;;  %v14581_v6 = vor.u32 %v9618_v34, %v8794_v63  ;;  %v8850_v8 = vld [vmem:[%s15306_s3 + $0x118] sm:$0xf0] }
 0x530   : > { %15807 = vst [vmem:[#allocation67_spill] sm:$0xff] %v14559_v25  ;;  %6145 = vmatmul.bf16.gmra.mxu1 %v14559_v25  ;;  %6234 = vmatpush.bf16.msrb.mxu0 %v14572_v13 }
 0x531   : > { %5245 = vst.msk [vmem:[#allocation3 + $0x64] sm:$0xff] %vm10514_vm9, %v5225_v14  ;;  %v5124_v10 = vpop.permute.xlu1 %5123  ;;  %v8672_v24 = vld [vmem:[#allocation3 + $0x48] sm:$0xf]  ;;  %v9632_v14 = vld [vmem:[%s15306_s3 + $0x114] sm:$0xf]  ;;  %v14589_v17 = vpop.permute.xlu2 %5287  ;;  %6268 = vmatpush.bf16.msrb.mxu1 %v14581_v6 }
 0x532   : > { %15809 = vst [vmem:[#allocation55_spill] sm:$0xff] %v14572_v13  ;;  %v5136_v21 = vrot.slane %v5124_v10, 4  ;;  %v5204_v44 = vpop.permute.xlu0 %5203  ;;  %v14591_v50 = vor.u32 %v9589_v22, %v8672_v24  ;;  %v14594_v25 = vor.u32 %v9632_v14, %v8850_v8  ;;  %6756 = vmatmul.bf16.gmra.mxu3 %v14198_v47  ;;  %v9600_v22 = vld [vmem:[%s15306_s3 + $0x14] sm:$0xf]  ;;  %v8722_v47 = vld [vmem:[%s15306_s3 + $0x18] sm:$0xf0]  ;;  %v14622_v24 = vpop.f32.mrf.mxu3 }
 0x533   : > { %15810 = vst [vmem:[#allocation74_spill] sm:$0xff] %v14581_v6  ;;  %v5216_v34 = vrot.slane %v5204_v44, 4  ;;  %v5217_v8 = vrot.slane %v14549_v26, 4 }
 0x534   : > { %15811 = vst [vmem:[#allocation70_spill] sm:$0xff] %v14591_v50  ;;  %v5146_v63 = vsel %vm649_vm3, %v5136_v21, %v5124_v10  ;;  %6179 = vmatmul.bf16.gmra.mxu2 %v14591_v50  ;;  %v14614_v10 = vor.u32 %v9600_v22, %v8722_v47 }
 0x535   : > { %15812 = vst [vmem:[#allocation75_spill] sm:$0xff] %v14594_v25  ;;  %v5226_v33 = vsel %vm764_vm2, %v5216_v34, %v5204_v44  ;;  %6303 = vmatpush.bf16.msrb.mxu2 %v14594_v25  ;;  %v9616_v44 = vld [vmem:[%s15306_s3 + $0x94] sm:$0xf]  ;;  %v8680_v22 = vld [vmem:[#allocation3 + $0x60] sm:$0xf]  ;;  %v5227_v25 = vsel %vm764_vm2, %v5217_v8, %v14549_v26 }
 0x536   : > { %5166 = vst.msk [vmem:[#allocation3 + $0x70] sm:$0xff] %vm10480_vm5, %v5146_v63  ;;  %6235 = vmatpush.bf16.msrb.mxu0 %v14614_v10  ;;  %v8714_v26 = vld [vmem:[%s15306_s3 + $0x8] sm:$0xf0] }
 0x537   : > { %5246 = vst.msk [vmem:[#allocation3 + $0x74] sm:$0xff] %vm10514_vm9, %v5226_v33  ;;  %v8786_v33 = vld [vmem:[%s15306_s3 + $0x98] sm:$0xf0] }
 0x538   : > { %5306 = vst.msk [vmem:[#allocation3 + $0x78] sm:$0xf] %vm880_vm8, %v14508_v53  ;;  %v14624_v14 = vor.u32 %v9616_v44, %v8786_v33  ;;  %v9590_v44 = vld [vmem:[#allocation3 + $0x64] sm:$0xf] }
 0x539   : > { %15813 = vst [vmem:[#allocation81_spill] sm:$0xff] %v14614_v10  ;;  %v5282_v53 = vpop.permute.xlu1 %5281  ;;  %v14628_v34 = vpop.permute.xlu2 %5449 }
 0x53a   : > { %15814 = vst [vmem:[#allocation8_spill] sm:$0xff] %v14622_v24  ;;  %v5126_v21 = vpop.permute.xlu0 %5125  ;;  %6269 = vmatpush.bf16.msrb.mxu1 %v14624_v14 }
 0x53b   : > { %15815 = vst [vmem:[#allocation48_spill] sm:$0xff] %v14624_v14  ;;  %v5137_v63 = vrot.slane %v5126_v21, 4 }
 0x53c   : > { %5305 = vst.msk [vmem:[#allocation3 + $0x68] sm:$0xf] %vm880_vm8, %v5282_v53 }
 0x53d   : > { %v9592_v47 = vld [vmem:[#allocation3 + $0x6c] sm:$0xf0]  ;;  %v5147_v50 = vsel %vm649_vm3, %v5137_v63, %v5126_v21  ;;  %v9630_v21 = vld [vmem:[%s15306_s3 + $0x104] sm:$0xf]  ;;  %v8842_v63 = vld [vmem:[%s15306_s3 + $0x108] sm:$0xf0] }
 0x53e   : > { %v14633_v24 = vor.u32 %v9592_v47, %v8680_v22  ;;  %v8682_v33 = vld [vmem:[#allocation3 + $0x70] sm:$0xf0]  ;;  %5167 = vst.msk [vmem:[#allocation3 + $0x80] sm:$0xff] %vm10480_vm5, %v5147_v50  ;;  %v14650_v22 = vor.u32 %v9630_v21, %v8842_v63  ;;  %v9598_v50 = vld [vmem:[%s15306_s3 + $0x4] sm:$0xf] }
 0x53f   : > { %v14639_v53 = vor.u32 %v9590_v44, %v8682_v33  ;;  %5247 = vst.msk [vmem:[#allocation3 + $0x84] sm:$0xff] %vm10514_vm9, %v5227_v25  ;;  %v9614_v25 = vld [vmem:[%s15306_s3 + $0x84] sm:$0xf]  ;;  %v9593_v44 = vld [vmem:[#allocation3 + $0x74] sm:$0xf0]  ;;  %v14662_v33 = vor.u32 %v9598_v50, %v8714_v26  ;;  %v14674_v50 = vpop.f32.mrf.mxu3 }
 0x540   : > { %15816 = vst [vmem:[#allocation82_spill] sm:$0xff] %v14633_v24  ;;  %6116 = vmatmul.bf16.gmra.mxu0 %v14633_v24  ;;  %v8778_v21 = vld [vmem:[%s15306_s3 + $0x88] sm:$0xf0]  ;;  %6304 = vmatpush.bf16.msrb.mxu2 %v14650_v22 }
 0x541   : > { %6150 = vmatmul.bf16.gmra.mxu1 %v14639_v53  ;;  %v5128_v8 = vpop.permute.xlu1 %5127  ;;  %v5532_v14 = vpop.permute.xlu2 %5531  ;;  %v14670_v6 = vor.u32 %v9614_v25, %v8778_v21  ;;  %6236 = vmatpush.bf16.msrb.mxu0 %v14662_v33 }
 0x542   : > { %v5138_v63 = vrot.slane %v5128_v8, 4  ;;  %v5208_v24 = vpop.permute.xlu0 %5207  ;;  %6761 = vmatmul.bf16.gmra.mxu3 %v14246_v49  ;;  %v5469_v49 = vrot.slane %v14628_v34, 4 }
 0x543   : > { %v8688_v47 = vld [vmem:[#allocation3 + $0x68] sm:$0xf]  ;;  %v5218_v13 = vrot.slane %v5208_v24, 4  ;;  %6270 = vmatpush.bf16.msrb.mxu1 %v14670_v6 }
 0x544   : > { %v14667_v10 = vor.u32 %v9593_v44, %v8688_v47  ;;  %6563 = vmatpush.bf16.msra.mxu2 %v13932_v9  ;;  %v5148_v26 = vsel %vm649_vm3, %v5138_v63, %v5128_v8 }
 0x545   : > { %5168 = vst.msk [vmem:[#allocation3 + $0x90] sm:$0xff] %vm10480_vm5, %v5148_v26  ;;  %v5228_v47 = vsel %vm764_vm2, %v5218_v13, %v5208_v24  ;;  %6495 = vmatpush.bf16.msra.mxu0 %v13956_v58 }
 0x546   : > { %6184 = vmatmul.bf16.gmra.mxu2 %v14667_v10  ;;  %5248 = vst.msk [vmem:[#allocation3 + $0x94] sm:$0xff] %vm10514_vm9, %v5228_v47 }
 0x547   : > { %6529 = vmatpush.bf16.msra.mxu1 %v13964_v46  ;;  %5308 = vst.msk [vmem:[#allocation3 + $0x98] sm:$0xf] %vm880_vm8, %v14589_v17  ;;  %v8696_v46 = vld [vmem:[#allocation3 + $0x80] sm:$0xf] }
 0x548   : > { %6564 = vmatpush.bf16.msra.mxu2 %v13988_v36  ;;  %v9594_v36 = vld [vmem:[#allocation3 + $0x84] sm:$0xf] }
 0x549   : > { %v5286_v9 = vpop.permute.xlu1 %5285  ;;  %6496 = vmatpush.bf16.msra.mxu0 %v14018_v30  ;;  %v5454_v24 = vpop.permute.xlu2 %5453  ;;  %v5479_v30 = vsel %vm764_vm2, %v5469_v49, %v14628_v34 }
 0x54a   : > { %5307 = vst.msk [vmem:[#allocation3 + $0x88] sm:$0xf] %vm880_vm8, %v5286_v9  ;;  %v5370_v13 = vpop.permute.xlu0 %5369 }
 0x54b   : > { %6530 = vmatpush.bf16.msra.mxu1 %v14024_v42  ;;  %v5389_v58 = vrot.slane %v5370_v13, 4 }
 0x54c   : > { %6565 = vmatpush.bf16.msra.mxu2 %v14045_v55  ;;  %v9596_v25 = vld [vmem:[#allocation3 + $0x8c] sm:$0xf0] }
 0x54d   : > { %v5399_v17 = vsel %vm649_vm3, %v5389_v58, %v5370_v13  ;;  %v14696_v8 = vor.u32 %v9596_v25, %v8696_v46  ;;  %v8698_v44 = vld [vmem:[#allocation3 + $0x90] sm:$0xf0]  ;;  %6497 = vmatpush.bf16.msra.mxu0 %v14062_v61  ;;  %v15822_v13 = vld [vmem:[#allocation81_spill] sm:$0xff] }
 0x54e   : > { %5419 = vst.msk [vmem:[#allocation3 + $0xa0] sm:$0xff] %vm10480_vm5, %v5399_v17  ;;  %v14703_v42 = vor.u32 %v9594_v36, %v8698_v44  ;;  %v9597_v21 = vld [vmem:[#allocation3 + $0x94] sm:$0xf0]  ;;  %v15825_v44 = vld [vmem:[#allocation44_spill] sm:$0xff] }
 0x54f   : > { %6531 = vmatpush.bf16.msra.mxu1 %v14068_v60  ;;  %5499 = vst.msk [vmem:[#allocation3 + $0xa4] sm:$0xff] %vm10514_vm9, %v5479_v30  ;;  %v15824_v17 = vld [vmem:[#allocation75_spill] sm:$0xff] }
 0x550   : > { %6121 = vmatmul.bf16.gmra.mxu0 %v14696_v8  ;;  %6566 = vmatpush.bf16.msra.mxu2 %v14103_v39  ;;  %v15826_v30 = vld [vmem:[#allocation67_spill] sm:$0xff] }
 0x551   : > { %6155 = vmatmul.bf16.gmra.mxu1 %v14703_v42  ;;  %v5372_v55 = vpop.permute.xlu1 %5371  ;;  %v8704_v61 = vld [vmem:[#allocation3 + $0x88] sm:$0xf]  ;;  %6498 = vmatpush.bf16.msra.mxu0 %v14122_v35  ;;  %v5536_v9 = vpop.permute.xlu2 %5535 }
 0x552   : > { %v5390_v34 = vrot.slane %v5372_v55, 4  ;;  %v5452_v63 = vpop.permute.xlu0 %5451  ;;  %v14712_v26 = vor.u32 %v9597_v21, %v8704_v61 }
 0x553   : > { %6532 = vmatpush.bf16.msra.mxu1 %v14128_v56  ;;  %v5470_v60 = vrot.slane %v5452_v63, 4  ;;  %v5471_v56 = vrot.slane %v5454_v24, 4 }
 0x554   : > { %6567 = vmatpush.bf16.msra.mxu2 %v14149_v23  ;;  %v5400_v47 = vsel %vm649_vm3, %v5390_v34, %v5372_v55 }
 0x555   : > { %5420 = vst.msk [vmem:[#allocation3 + $0xb0] sm:$0xff] %vm10480_vm5, %v5400_v47  ;;  %v5480_v39 = vsel %vm764_vm2, %v5470_v60, %v5452_v63  ;;  %6499 = vmatpush.bf16.msra.mxu0 %v14175_v40  ;;  %v15827_v60 = vld [vmem:[#allocation70_spill] sm:$0xff] }
 0x556   : > { %6189 = vmatmul.bf16.gmra.mxu2 %v14712_v26  ;;  %5500 = vst.msk [vmem:[#allocation3 + $0xb4] sm:$0xff] %vm10514_vm9, %v5480_v39 }
 0x557   : > { %6533 = vmatpush.bf16.msra.mxu1 %v14182_v48  ;;  %5560 = vst.msk [vmem:[#allocation3 + $0xb8] sm:$0xf] %vm880_vm8, %v5532_v14  ;;  %v5481_v48 = vsel %vm764_vm2, %v5471_v56, %v5454_v24  ;;  %v15823_v24 = vld [vmem:[#allocation48_spill] sm:$0xff] }
 0x558   : > { %6568 = vmatpush.bf16.msra.mxu2 %v14200_v1 }
 0x559   : > { %v5530_v35 = vpop.permute.xlu1 %5529  ;;  %6500 = vmatpush.bf16.msra.mxu0 %v14218_v4  ;;  %v5458_v1 = vpop.permute.xlu2 %5457 }
 0x55a   : > { %5559 = vst.msk [vmem:[#allocation3 + $0xa8] sm:$0xf] %vm880_vm8, %v5530_v35  ;;  %v5374_v23 = vpop.permute.xlu0 %5373 }
 0x55b   : > { %6534 = vmatpush.bf16.msra.mxu1 %v14224_v19  ;;  %v5391_v49 = vrot.slane %v5374_v23, 4 }
 0x55c   : > { %6569 = vmatpush.bf16.msra.mxu2 %v14238_v0 }
 0x55d   : > { %v5401_v40 = vsel %vm649_vm3, %v5391_v49, %v5374_v23  ;;  %6501 = vmatpush.bf16.msra.mxu0 %v14248_v31 }
 0x55e   : > { %5421 = vst.msk [vmem:[#allocation3 + $0xc0] sm:$0xff] %vm10480_vm5, %v5401_v40 }
 0x55f   : > { %6535 = vmatpush.bf16.msra.mxu1 %v14261_v43  ;;  %5501 = vst.msk [vmem:[#allocation3 + $0xc4] sm:$0xff] %vm10514_vm9, %v5481_v48  ;;  %v15828_v48 = vld [vmem:[#allocation82_spill] sm:$0xff] }
 0x560   : > { %6237 = vmatmul.bf16.vlgmr.msrb.gmra.mxu0 %v14356_v18  ;;  %6570 = vmatpush.bf16.msra.mxu2 %v14300_v16 }
 0x561   : > { %6271 = vmatmul.bf16.vlgmr.msrb.gmra.mxu1 %v14399_v11  ;;  %v5376_v4 = vpop.permute.xlu1 %5375  ;;  %6502 = vmatpush.bf16.msra.mxu0 %v14275_v59  ;;  %v5540_v59 = vpop.permute.xlu2 %5539 }
 0x562   : > { %v5392_v19 = vrot.slane %v5376_v4, 4  ;;  %v5456_v0 = vpop.permute.xlu0 %5455 }
 0x563   : > { %6536 = vmatpush.bf16.msra.mxu1 %v14308_v27  ;;  %v5472_v31 = vrot.slane %v5456_v0, 4 }
 0x564   : > { %v5402_v43 = vsel %vm649_vm3, %v5392_v19, %v5376_v4 }
 0x565   : > { %6631 = vmatpush.bf16.msrb.mxu0 %v14331_v12  ;;  %5422 = vst.msk [vmem:[#allocation3 + $0xd0] sm:$0xff] %vm10480_vm5, %v5402_v43  ;;  %v5482_v16 = vsel %vm764_vm2, %v5472_v31, %v5456_v0 }
 0x566   : > { %6305 = vmatmul.bf16.vlgmr.msrb.gmra.mxu2 %v14428_v15  ;;  %5502 = vst.msk [vmem:[#allocation3 + $0xd4] sm:$0xff] %vm10514_vm9, %v5482_v16  ;;  %v5473_v15 = vrot.slane %v5458_v1, 4 }
 0x567   : > { %6665 = vmatpush.bf16.msrb.mxu1 %v14345_v20  ;;  %6699 = vmatpush.bf16.msrb.mxu2 %v14322_v54  ;;  %5562 = vst.msk [vmem:[#allocation3 + $0xd8] sm:$0xf] %vm880_vm8, %v5536_v9 }
 0x568   : > { %v5483_v18 = vsel %vm764_vm2, %v5473_v15, %v5458_v1 }
 0x569   : > { %6632 = vmatpush.bf16.msrb.mxu0 %v14371_v62  ;;  %v5534_v27 = vpop.permute.xlu1 %5533 }
 0x56a   : > { %5561 = vst.msk [vmem:[#allocation3 + $0xc8] sm:$0xf] %vm880_vm8, %v5534_v27  ;;  %v5378_v12 = vpop.permute.xlu0 %5377 }
 0x56b   : > { %6666 = vmatpush.bf16.msrb.mxu1 %v14382_v5  ;;  %6700 = vmatpush.bf16.msrb.mxu2 %v14350_v45  ;;  %v5393_v54 = vrot.slane %v5378_v12, 4 }
 0x56d   : > { %6633 = vmatpush.bf16.msrb.mxu0 %v14419_v2  ;;  %v5403_v20 = vsel %vm649_vm3, %v5393_v54, %v5378_v12 }
 0x56e   : > { %5423 = vst.msk [vmem:[#allocation3 + $0xe0] sm:$0xff] %vm10480_vm5, %v5403_v20 }
 0x56f   : > { %6667 = vmatpush.bf16.msrb.mxu1 %v14424_v51  ;;  %6701 = vmatpush.bf16.msrb.mxu2 %v14391_v37  ;;  %5503 = vst.msk [vmem:[#allocation3 + $0xe4] sm:$0xff] %vm10514_vm9, %v5483_v18  ;;  %v5462_v37 = vpop.permute.xlu2 %5461  ;;  %v15817_v51 = vld [vmem:[#allocation63_spill] sm:$0xff] }
 0x570   : > { %6242 = vmatmul.bf16.gmra.mxu0 %v14479_v7  ;;  %v15821_v7 = vld [vmem:[#allocation43_spill] sm:$0xff] }
 0x571   : > { %6634 = vmatpush.bf16.msrb.mxu0 %v14459_v38  ;;  %6276 = vmatmul.bf16.gmra.mxu1 %v14485_v52  ;;  %v5380_v45 = vpop.permute.xlu1 %5379  ;;  %v15820_v52 = vld [vmem:[#allocation74_spill] sm:$0xff] }
 0x572   : > { %v5394_v62 = vrot.slane %v5380_v45, 4  ;;  %v5460_v5 = vpop.permute.xlu0 %5459 }
 0x573   : > { %6668 = vmatpush.bf16.msrb.mxu1 %v14472_v57  ;;  %6702 = vmatpush.bf16.msrb.mxu2 %v14451_v3  ;;  %v5474_v11 = vrot.slane %v5460_v5, 4  ;;  %v15818_v57 = vld [vmem:[#allocation61_spill] sm:$0xff]  ;;  %v15819_v3 = vld [vmem:[#allocation55_spill] sm:$0xff] }
 0x574   : > { %v5404_v2 = vsel %vm649_vm3, %v5394_v62, %v5380_v45 }
 0x575   : > { %6635 = vmatpush.bf16.msrb.mxu0 %v14513_v41  ;;  %5424 = vst.msk [vmem:[#allocation3 + $0xf0] sm:$0xff] %vm10480_vm5, %v5404_v2  ;;  %v5484_v38 = vsel %vm764_vm2, %v5474_v11, %v5460_v5  ;;  %v5475_v41 = vrot.slane %v5462_v37, 4  ;;  %v9664_v2 = vld [vmem:[#allocation3 + $0xac] sm:$0xf0] }
 0x576   : > { %6310 = vmatmul.bf16.gmra.mxu2 %v15817_v51  ;;  %5504 = vst.msk [vmem:[#allocation3 + $0xf4] sm:$0xff] %vm10514_vm9, %v5484_v38  ;;  %v8968_v38 = vld [vmem:[#allocation3 + $0xa0] sm:$0xf] }
 0x577   : > { %6669 = vmatpush.bf16.msrb.mxu1 %v14521_v28  ;;  %6703 = vmatpush.bf16.msrb.mxu2 %v15818_v57  ;;  %5564 = vst.msk [vmem:[#allocation3 + $0xf8] sm:$0xf] %vm880_vm8, %v5540_v59  ;;  %v5544_v46 = vpop.permute.xlu2 %5543  ;;  %v5485_v36 = vsel %vm764_vm2, %v5475_v41, %v5462_v37  ;;  %v8970_v57 = vld [vmem:[#allocation3 + $0xb0] sm:$0xf0] }
 0x579   : > { %6636 = vmatpush.bf16.msrb.mxu0 %v15819_v3  ;;  %v5538_v28 = vpop.permute.xlu1 %5537  ;;  %v14837_v3 = vor.u32 %v9664_v2, %v8968_v38 }
 0x57a   : > { %5563 = vst.msk [vmem:[#allocation3 + $0xe8] sm:$0xf] %vm880_vm8, %v5538_v28  ;;  %v5382_v14 = vpop.permute.xlu0 %5381 }
 0x57b   : > { %6670 = vmatpush.bf16.msrb.mxu1 %v15820_v52  ;;  %6704 = vmatpush.bf16.msrb.mxu2 %v15821_v7  ;;  %v5395_v58 = vrot.slane %v5382_v14, 4 }
 0x57d   : > { %6637 = vmatpush.bf16.msrb.mxu0 %v15822_v13  ;;  %v5405_v25 = vsel %vm649_vm3, %v5395_v58, %v5382_v14  ;;  %v9665_v14 = vld [vmem:[#allocation3 + $0xb4] sm:$0xf0] }
 0x57e   : > { %5425 = vst.msk [vmem:[#allocation3 + $0x100] sm:$0xff] %vm10480_vm5, %v5405_v25 }
 0x57f   : > { %6671 = vmatpush.bf16.msrb.mxu1 %v15823_v24  ;;  %6705 = vmatpush.bf16.msrb.mxu2 %v15824_v17  ;;  %5505 = vst.msk [vmem:[#allocation3 + $0x104] sm:$0xff] %vm10514_vm9, %v5485_v36  ;;  %v9668_v36 = vld [vmem:[#allocation3 + $0xcc] sm:$0xf0] }
 0x580   : > { %6247 = vmatmul.bf16.gmra.mxu0 %v15825_v44 }
 0x581   : > { %6638 = vmatpush.bf16.msrb.mxu0 %v14662_v33  ;;  %6281 = vmatmul.bf16.gmra.mxu1 %v15826_v30  ;;  %v5384_v55 = vpop.permute.xlu1 %5383  ;;  %v8984_v30 = vld [vmem:[#allocation3 + $0xc0] sm:$0xf] }
 0x582   : > { %v5396_v61 = vrot.slane %v5384_v55, 4  ;;  %v5464_v21 = vpop.permute.xlu0 %5463 }
 0x583   : > { %6672 = vmatpush.bf16.msrb.mxu1 %v14670_v6  ;;  %6706 = vmatpush.bf16.msrb.mxu2 %v14650_v22  ;;  %v5476_v34 = vrot.slane %v5464_v21, 4  ;;  %v5466_v6 = vpop.permute.xlu2 %5465 }
 0x584   : > { %v5406_v63 = vsel %vm649_vm3, %v5396_v61, %v5384_v55  ;;  %v5477_v22 = vrot.slane %v5466_v6, 4  ;;  %v8986_v55 = vld [vmem:[#allocation3 + $0xd0] sm:$0xf0]  ;;  %v14850_v61 = vor.u32 %v9668_v36, %v8984_v30  ;;  %v15829_v30 = vld [vmem:[#allocation49_spill] sm:$0xff] }
 0x585   : > { %5426 = vst.msk [vmem:[#allocation3 + $0x110] sm:$0xff] %vm10480_vm5, %v5406_v63  ;;  %v5486_v33 = vsel %vm764_vm2, %v5476_v34, %v5464_v21  ;;  %v6102_v39 = vpop.f32.mrf.mxu0  ;;  %v9666_v34 = vld [vmem:[#allocation3 + $0xc4] sm:$0xf] }
 0x586   : > { %6315 = vmatmul.bf16.gmra.mxu2 %v15827_v60  ;;  %5506 = vst.msk [vmem:[#allocation3 + $0x114] sm:$0xff] %vm10514_vm9, %v5486_v33  ;;  %v5487_v40 = vsel %vm764_vm2, %v5477_v22, %v5466_v6  ;;  %v14853_v33 = vor.u32 %v9666_v34, %v8986_v55  ;;  %v8992_v6 = vld [vmem:[#allocation3 + $0xc8] sm:$0xf]  ;;  %v9669_v22 = vld [vmem:[#allocation3 + $0xd4] sm:$0xf0] }
 0x587   : > { %5566 = vst.msk [vmem:[#allocation3 + $0x118] sm:$0xf] %vm880_vm8, %v5544_v46 }
 0x589   : > { %v5542_v47 = vpop.permute.xlu1 %5541 }
 0x58a   : > { %5565 = vst.msk [vmem:[#allocation3 + $0x108] sm:$0xf] %vm880_vm8, %v5542_v47  ;;  %v5386_v9 = vpop.permute.xlu0 %5385 }
 0x58b   : > { %v5397_v35 = vrot.slane %v5386_v9, 4  ;;  %v6136_v56 = vpop.f32.mrf.mxu1  ;;  %v5548_v15 = vpop.permute.xlu2 %5547 }
 0x58c   : > { %v6137_v49 = vadd.f32 %v6136_v56, %v6102_v39  ;;  %v14858_v39 = vor.u32 %v9669_v22, %v8992_v6 }
 0x58d   : > { %v5407_v23 = vsel %vm649_vm3, %v5397_v35, %v5386_v9  ;;  %v6104_v31 = vpop.f32.mrf.mxu0  ;;  %v9018_v2 = vld [vmem:[#allocation3 + $0x110] sm:$0xf0] }
 0x58e   : > { %5427 = vst.msk [vmem:[#allocation3 + $0x120] sm:$0xff] %vm10480_vm5, %v5407_v23 }
 0x58f   : > { %5507 = vst.msk [vmem:[#allocation3 + $0x124] sm:$0xff] %vm10514_vm9, %v5487_v40  ;;  %v9672_v40 = vld [vmem:[#allocation3 + $0xec] sm:$0xf0] }
 0x590   : > { %6252 = vmatmul.bf16.gmra.mxu0 %v15828_v48 }
 0x591   : > { %6286 = vmatmul.bf16.gmra.mxu1 %v14639_v53  ;;  %v5388_v1 = vpop.permute.xlu1 %5387 }
 0x592   : > { %v5398_v4 = vrot.slane %v5388_v1, 4  ;;  %v5468_v19 = vpop.permute.xlu0 %5467 }
 0x593   : > { %v5478_v0 = vrot.slane %v5468_v19, 4  ;;  %v6138_v16 = vpop.f32.mrf.mxu1 }
 0x594   : > { %v5408_v43 = vsel %vm649_vm3, %v5398_v4, %v5388_v1  ;;  %v6139_v27 = vadd.f32 %v6138_v16, %v6104_v31  ;;  %v9000_v1 = vld [vmem:[#allocation3 + $0xe0] sm:$0xf]  ;;  %v9002_v4 = vld [vmem:[#allocation3 + $0xf0] sm:$0xf0]  ;;  %v9670_v31 = vld [vmem:[#allocation3 + $0xe4] sm:$0xf] }
 0x595   : > { %5428 = vst.msk [vmem:[#allocation3 + $0x130] sm:$0xff] %vm10480_vm5, %v5408_v43  ;;  %v5488_v59 = vsel %vm764_vm2, %v5478_v0, %v5468_v19  ;;  %v14863_v19 = vor.u32 %v9672_v40, %v9000_v1  ;;  %v9032_v22 = vld [vmem:[#allocation3 + $0x120] sm:$0xf] }
 0x596   : > { %6320 = vmatmul.bf16.gmra.mxu2 %v14667_v10  ;;  %5508 = vst.msk [vmem:[#allocation3 + $0x134] sm:$0xff] %vm10514_vm9, %v5488_v59  ;;  %v6170_v53 = vpop.f32.mrf.mxu2  ;;  %v14866_v59 = vor.u32 %v9670_v31, %v9002_v4  ;;  %v9678_v40 = vld [vmem:[#allocation3 + $0x124] sm:$0xf] }
 0x597   : > { %5568 = vst.msk [vmem:[#allocation3 + $0x138] sm:$0xf] %vm880_vm8, %v5548_v15  ;;  %v14827_v12 = vadd.f32 %v6170_v53, %v6137_v49  ;;  %v9673_v53 = vld [vmem:[#allocation3 + $0xf4] sm:$0xf0] }
 0x599   : > { %v5546_v54 = vpop.permute.xlu1 %5545  ;;  %v14889_v55 = vadd.f32 %v15829_v30, %v14827_v12  ;;  %v15836_v30 = vld [vmem:[#allocation69_spill] sm:$0xff] }
 0x59a   : > { %5567 = vst.msk [vmem:[#allocation3 + $0x128] sm:$0xf] %vm880_vm8, %v5546_v54 }
 0x59b   : > { %v6107_v20 = vpop.f32.mrf.mxu0 }
 0x59d   : > { %v6141_v10 = vpop.f32.mrf.mxu1 }
 0x59e   : > { %v6142_v18 = vadd.f32 %v6141_v10, %v6107_v20  ;;  %v6172_v29 = vpop.f32.mrf.mxu2  ;;  %v9681_v31 = vld [vmem:[#allocation3 + $0x134] sm:$0xf0] }
 0x59f   : > { %v14831_v45 = vadd.f32 %v6172_v29, %v6139_v27  ;;  %v9008_v27 = vld [vmem:[#allocation3 + $0xe8] sm:$0xf] }
 0x5a0   : > { %6257 = vmatmul.bf16.gmra.mxu0 %v14696_v8  ;;  %v9662_v8 = vld [vmem:[#allocation3 + $0xa4] sm:$0xf]  ;;  %v14871_v54 = vor.u32 %v9673_v53, %v9008_v27  ;;  %v15832_v27 = vld [vmem:[#allocation51_spill] sm:$0xff] }
 0x5a1   : > { %6291 = vmatmul.bf16.gmra.mxu1 %v14703_v42  ;;  %v14840_v42 = vor.u32 %v9662_v8, %v8970_v57  ;;  %v9674_v57 = vld [vmem:[#allocation3 + $0x104] sm:$0xf]  ;;  %v9040_v4 = vld [vmem:[#allocation3 + $0x128] sm:$0xf] }
 0x5a3   : > { %v6109_v32 = vpop.f32.mrf.mxu0 }
 0x5a5   : > { %v6143_v62 = vpop.f32.mrf.mxu1 }
 0x5a6   : > { %6325 = vmatmul.bf16.gmra.mxu2 %v14712_v26  ;;  %v6144_v5 = vadd.f32 %v6143_v62, %v6109_v32  ;;  %v8976_v26 = vld [vmem:[#allocation3 + $0xa8] sm:$0xf]  ;;  %v9676_v62 = vld [vmem:[#allocation3 + $0x10c] sm:$0xf0] }
 0x5a7   : > { %v6175_v37 = vpop.f32.mrf.mxu2  ;;  %v14845_v13 = vor.u32 %v9665_v14, %v8976_v26  ;;  %v9677_v14 = vld [vmem:[#allocation3 + $0x114] sm:$0xf0] }
 0x5a8   : > { %v14835_v11 = vadd.f32 %v6175_v37, %v6142_v18  ;;  %v9016_v37 = vld [vmem:[#allocation3 + $0x100] sm:$0xf] }
 0x5ac   : > { %v6112_v51 = vpop.f32.mrf.mxu0 }
 0x5ad   : > { %v6146_v52 = vpop.f32.mrf.mxu1 }
 0x5ae   : > { %v6147_v28 = vadd.f32 %v6146_v52, %v6112_v51  ;;  %v14876_v51 = vor.u32 %v9676_v62, %v9016_v37 }
 0x5af   : > { %v6177_v7 = vpop.f32.mrf.mxu2 }
 0x5b0   : > { %6503 = vmatmul.bf16.vlgmr.msra.gmra.mxu0 %v14837_v3  ;;  %v14842_v41 = vadd.f32 %v6177_v7, %v6144_v5  ;;  %v9024_v7 = vld [vmem:[#allocation3 + $0x108] sm:$0xf] }
 0x5b1   : > { %6537 = vmatmul.bf16.vlgmr.msra.gmra.mxu1 %v14840_v42 }
 0x5b4   : > { %v6114_v58 = vpop.f32.mrf.mxu0 }
 0x5b5   : > { %v6148_v24 = vpop.f32.mrf.mxu1 }
 0x5b6   : > { %6571 = vmatmul.bf16.vlgmr.msra.gmra.mxu2 %v14845_v13  ;;  %v6149_v46 = vadd.f32 %v6148_v24, %v6114_v58  ;;  %v14884_v58 = vor.u32 %v9677_v14, %v9024_v7 }
 0x5b7   : > { %v6180_v25 = vpop.f32.mrf.mxu2 }
 0x5b8   : > { %v14848_v17 = vadd.f32 %v6180_v25, %v6147_v28  ;;  %v14879_v28 = vor.u32 %v9674_v57, %v9018_v2  ;;  %v15834_v57 = vld [vmem:[#allocation64_spill] sm:$0xff] }
 0x5bd   : > { %v6117_v44 = vpop.f32.mrf.mxu0 }
 0x5be   : > { %v6151_v21 = vpop.f32.mrf.mxu1 }
 0x5bf   : > { %v6152_v63 = vadd.f32 %v6151_v21, %v6117_v44  ;;  %v6182_v60 = vpop.f32.mrf.mxu2  ;;  %v15830_v21 = vld [vmem:[#allocation58_spill] sm:$0xff] }
 0x5c0   : > { %6508 = vmatmul.bf16.gmra.mxu0 %v14850_v61  ;;  %v14855_v47 = vadd.f32 %v6182_v60, %v6149_v46 }
 0x5c1   : > { %6542 = vmatmul.bf16.gmra.mxu1 %v14853_v33 }
 0x5c5   : > { %v6119_v9 = vpop.f32.mrf.mxu0 }
 0x5c6   : > { %6576 = vmatmul.bf16.gmra.mxu2 %v14858_v39  ;;  %v6153_v35 = vpop.f32.mrf.mxu1 }
 0x5c7   : > { %v6154_v56 = vadd.f32 %v6153_v35, %v6119_v9  ;;  %v9034_v9 = vld [vmem:[#allocation3 + $0x130] sm:$0xf0]  ;;  %v14896_v35 = vpop.f32.mrf.mxu3 }
 0x5c8   : > { %v14901_v12 = vor.u32 %v9678_v40, %v9034_v9  ;;  %v15837_v40 = vld [vmem:[#allocation53_spill] sm:$0xff] }
 0x5c9   : > { %v6185_v23 = vpop.f32.mrf.mxu2 }
 0x5ca   : > { %v14861_v49 = vadd.f32 %v6185_v23, %v6152_v63  ;;  %v9680_v63 = vld [vmem:[#allocation3 + $0x12c] sm:$0xf0] }
 0x5cd   : > { %v6122_v48 = vpop.f32.mrf.mxu0 }
 0x5ce   : > { %v6156_v0 = vpop.f32.mrf.mxu1 }
 0x5cf   : > { %v6157_v43 = vadd.f32 %v6156_v0, %v6122_v48  ;;  %v14916_v62 = vpop.f32.mrf.mxu3 }
 0x5d0   : > { %6513 = vmatmul.bf16.gmra.mxu0 %v14863_v19 }
 0x5d1   : > { %v6187_v16 = vpop.f32.mrf.mxu2  ;;  %6547 = vmatmul.bf16.gmra.mxu1 %v14866_v59 }
 0x5d2   : > { %v14868_v15 = vadd.f32 %v6187_v16, %v6154_v56  ;;  %v14898_v56 = vor.u32 %v9680_v63, %v9032_v22  ;;  %v9684_v63 = vld [vmem:[%s15308_s5 + $0x10] sm:$0xff] }
 0x5d5   : > { %v6124_v20 = vpop.f32.mrf.mxu0 }
 0x5d6   : > { %6581 = vmatmul.bf16.gmra.mxu2 %v14871_v54  ;;  %v6158_v10 = vpop.f32.mrf.mxu1 }
 0x5d7   : > { %v6159_v18 = vadd.f32 %v6158_v10, %v6124_v20  ;;  %v14911_v20 = vor.u32 %v9681_v31, %v9040_v4 }
 0x5d9   : > { %v6190_v29 = vpop.f32.mrf.mxu2 }
 0x5da   : > { %v14874_v32 = vadd.f32 %v6190_v29, %v6157_v43  ;;  %v15831_v43 = vld [vmem:[#allocation50_spill] sm:$0xff] }
 0x5db   : > { %v14906_v16 = vadd.f32 %v15831_v43, %v14831_v45  ;;  %v15833_v45 = vld [vmem:[#allocation10_spill] sm:$0xff] }
 0x5dd   : > { %v6238_v5 = vpop.f32.mrf.mxu0 }
 0x5de   : > { %v6272_v38 = vpop.f32.mrf.mxu1 }
 0x5df   : > { %v6273_v52 = vadd.f32 %v6272_v38, %v6238_v5  ;;  %v14920_v38 = vadd.f32 %v15833_v45, %v14835_v11 }
 0x5e0   : > { %6518 = vmatmul.bf16.gmra.mxu0 %v14876_v51 }
 0x5e1   : > { %v6192_v8 = vpop.f32.mrf.mxu2  ;;  %6552 = vmatmul.bf16.gmra.mxu1 %v14879_v28 }
 0x5e2   : > { %v14881_v26 = vadd.f32 %v6192_v8, %v6159_v18 }
 0x5e5   : > { %v6240_v24 = vpop.f32.mrf.mxu0 }
 0x5e6   : > { %6586 = vmatmul.bf16.gmra.mxu2 %v14884_v58  ;;  %v6274_v46 = vpop.f32.mrf.mxu1 }
 0x5e7   : > { %v6275_v25 = vadd.f32 %v6274_v46, %v6240_v24 }
 0x5e9   : > { %v6306_v36 = vpop.f32.mrf.mxu2 }
 0x5ea   : > { %v6307_v44 = vadd.f32 %v6306_v36, %v6273_v52  ;;  %v6360_v36 = vpop.f32.mrf.mxu3 }
 0x5ec   : > { %v14892_v34 = vadd.f32 %v15830_v21, %v6307_v44  ;;  %v15835_v44 = vld [vmem:[#allocation52_spill] sm:$0xff] }
 0x5ed   : > { %v6243_v6 = vpop.f32.mrf.mxu0  ;;  %v14931_v11 = vadd.f32 %v15835_v44, %v14842_v41 }
 0x5ee   : > { %v6365_v60 = vmax.f32 %v14889_v55, %v14892_v34  ;;  %v6277_v23 = vpop.f32.mrf.mxu1  ;;  %v9702_v55 = vld [vmem:[%s15308_s5 + $0xa0] sm:$0xff] }
 0x5ef   : > { %v6278_v48 = vadd.f32 %v6277_v23, %v6243_v6 }
 0x5f0   : > { %6523 = vmatmul.bf16.gmra.mxu0 %v14898_v56 }
 0x5f1   : > { %v6308_v1 = vpop.f32.mrf.mxu2  ;;  %6557 = vmatmul.bf16.gmra.mxu1 %v14901_v12 }
 0x5f2   : > { %v6309_v0 = vadd.f32 %v6308_v1, %v6275_v25  ;;  %v14946_v1 = vpop.f32.mrf.mxu3 }
 0x5f4   : > { %v14909_v53 = vadd.f32 %v15832_v27, %v6309_v0 }
 0x5f5   : > { %v6245_v18 = vpop.f32.mrf.mxu0 }
 0x5f6   : > { %6591 = vmatmul.bf16.gmra.mxu2 %v14911_v20  ;;  %v6279_v29 = vpop.f32.mrf.mxu1 }
 0x5f7   : > { %v6280_v5 = vadd.f32 %v6279_v29, %v6245_v18 }
 0x5f9   : > { %v6311_v37 = vpop.f32.mrf.mxu2 }
 0x5fa   : > { %v6312_v2 = vadd.f32 %v6311_v37, %v6278_v48  ;;  %v15838_v48 = vld [vmem:[#allocation8_spill] sm:$0xff] }
 0x5fc   : > { %v14923_v52 = vadd.f32 %v15834_v57, %v6312_v2  ;;  %v15840_v57 = vld [vmem:[#allocation39_spill] sm:$0xff] }
 0x5fd   : > { %v6248_v7 = vpop.f32.mrf.mxu0 }
 0x5fe   : > { %v6282_v14 = vpop.f32.mrf.mxu1 }
 0x5ff   : > { %v6283_v24 = vadd.f32 %v6282_v14, %v6248_v7 }
 0x600   : > { %6639 = vmatmul.bf16.vlgmr.msrb.gmra.mxu0 %v14837_v3 }
 0x601   : > { %v6313_v46 = vpop.f32.mrf.mxu2  ;;  %6673 = vmatmul.bf16.vlgmr.msrb.gmra.mxu1 %v14840_v42  ;;  %v14941_v42 = vadd.f32 %v15837_v40, %v14848_v17  ;;  %v15839_v17 = vld [vmem:[#allocation54_spill] sm:$0xff] }
 0x602   : > { %v6314_v25 = vadd.f32 %v6313_v46, %v6280_v5  ;;  %v14954_v18 = vadd.f32 %v15839_v17, %v14855_v47  ;;  %v14959_v5 = vpop.f32.mrf.mxu3  ;;  %v14970_v47 = vadd.f32 %v15840_v57, %v14861_v49 }
 0x604   : > { %v14934_v21 = vadd.f32 %v15836_v30, %v6314_v25 }
 0x605   : > { %v6250_v6 = vpop.f32.mrf.mxu0 }
 0x606   : > { %6707 = vmatmul.bf16.vlgmr.msrb.gmra.mxu2 %v14845_v13  ;;  %v6284_v22 = vpop.f32.mrf.mxu1 }
 0x607   : > { %v6285_v9 = vadd.f32 %v6284_v22, %v6250_v6  ;;  %v15841_v22 = vld [vmem:[#allocation56_spill] sm:$0xff] }
 0x609   : > { %v6316_v3 = vpop.f32.mrf.mxu2 }
 0x60a   : > { %v6317_v23 = vadd.f32 %v6316_v3, %v6283_v24  ;;  %v14977_v24 = vpop.f32.mrf.mxu3 }
 0x60c   : > { %v14944_v41 = vadd.f32 %v15838_v48, %v6317_v23 }
 0x60d   : > { %v6253_v0 = vpop.f32.mrf.mxu0 }
 0x60e   : > { %v6287_v31 = vpop.f32.mrf.mxu1 }
 0x60f   : > { %v6288_v43 = vadd.f32 %v6287_v31, %v6253_v0 }
 0x610   : > { %6644 = vmatmul.bf16.gmra.mxu0 %v14850_v61 }
 0x611   : > { %v6318_v13 = vpop.f32.mrf.mxu2  ;;  %6678 = vmatmul.bf16.gmra.mxu1 %v14853_v33 }
 0x612   : > { %v6319_v27 = vadd.f32 %v6318_v13, %v6285_v9  ;;  %v14992_v9 = vadd.f32 %v15841_v22, %v14874_v32 }
 0x614   : > { %v14957_v29 = vadd.f32 %v14674_v50, %v6319_v27 }
 0x615   : > { %v14963_v2 = vpop.f32.mrf.mxu0 }
 0x616   : > { %6712 = vmatmul.bf16.gmra.mxu2 %v14858_v39  ;;  %v14966_v61 = vpop.f32.mrf.mxu1 }
 0x619   : > { %v6321_v45 = vpop.f32.mrf.mxu2 }
 0x61a   : > { %v6322_v33 = vadd.f32 %v6321_v45, %v6288_v43 }
 0x61c   : > { %v14973_v50 = vadd.f32 %v14896_v35, %v6322_v33  ;;  %v14988_v35 = vpop.f32.mrf.mxu3 }
 0x61d   : > { %v6258_v14 = vpop.f32.mrf.mxu0 }
 0x61e   : > { %v6292_v46 = vpop.f32.mrf.mxu1 }
 0x61f   : > { %v6293_v25 = vadd.f32 %v6292_v46, %v6258_v14 }
 0x620   : > { %6649 = vmatmul.bf16.gmra.mxu0 %v14863_v19 }
 0x621   : > { %v14979_v39 = vpop.f32.mrf.mxu2  ;;  %6683 = vmatmul.bf16.gmra.mxu1 %v14866_v59 }
 0x625   : > { %v14983_v44 = vpop.f32.mrf.mxu0 }
 0x626   : > { %6717 = vmatmul.bf16.gmra.mxu2 %v14871_v54  ;;  %v14986_v49 = vpop.f32.mrf.mxu1  ;;  %v15001_v54 = vpop.f32.mrf.mxu3 }
 0x629   : > { %v6326_v30 = vpop.f32.mrf.mxu2 }
 0x62a   : > { %v6327_v6 = vadd.f32 %v6326_v30, %v6293_v25 }
 0x62c   : > { %v14994_v3 = vadd.f32 %v6360_v36, %v6327_v6 }
 0x62d   : > { %v6504_v59 = vpop.f32.mrf.mxu0 }
 0x62e   : > { %v6538_v23 = vpop.f32.mrf.mxu1  ;;  %v15007_v13 = vpop.f32.mrf.mxu3 }
 0x62f   : > { %v6539_v40 = vadd.f32 %v6538_v23, %v6504_v59 }
 0x630   : > { %6654 = vmatmul.bf16.gmra.mxu0 %v14876_v51 }
 0x631   : > { %v14998_v48 = vpop.f32.mrf.mxu2  ;;  %6688 = vmatmul.bf16.gmra.mxu1 %v14879_v28 }
 0x635   : > { %v6506_v0 = vpop.f32.mrf.mxu0 }
 0x636   : > { %6722 = vmatmul.bf16.gmra.mxu2 %v14884_v58  ;;  %v6540_v32 = vpop.f32.mrf.mxu1  ;;  %v15014_v58 = vpop.f32.mrf.mxu3 }
 0x637   : > { %v6541_v36 = vadd.f32 %v6540_v32, %v6506_v0 }
 0x639   : > { %v6572_v31 = vpop.f32.mrf.mxu2 }
 0x63a   : > { %v15005_v43 = vadd.f32 %v6572_v31, %v6539_v40 }
 0x63d   : > { %v6509_v27 = vpop.f32.mrf.mxu0 }
 0x63e   : > { %v6543_v17 = vpop.f32.mrf.mxu1  ;;  %v15018_v22 = vpop.f32.mrf.mxu3 }
 0x63f   : > { %v6544_v45 = vadd.f32 %v6543_v17, %v6509_v27 }
 0x640   : > { %6659 = vmatmul.bf16.gmra.mxu0 %v14898_v56 }
 0x641   : > { %v6574_v33 = vpop.f32.mrf.mxu2  ;;  %6693 = vmatmul.bf16.gmra.mxu1 %v14901_v12 }
 0x642   : > { %v15010_v51 = vadd.f32 %v6574_v33, %v6541_v36 }
 0x645   : > { %v6511_v28 = vpop.f32.mrf.mxu0 }
 0x646   : > { %6727 = vmatmul.bf16.gmra.mxu2 %v14911_v20  ;;  %v6545_v57 = vpop.f32.mrf.mxu1  ;;  %v15024_v36 = vpop.f32.mrf.mxu3 }
 0x647   : > { %v6546_v14 = vadd.f32 %v6545_v57, %v6511_v28  ;;  %v9697_v28 = vld [vmem:[%s15308_s5 + $0x78] sm:$0xff] }
 0x648   : > { %v9689_v57 = vld [vmem:[%s15308_s5 + $0x38] sm:$0xff]  ;;  %6908 = vmatpush.bf16.msra.mxu0 %v9697_v28  ;;  %v9688_v28 = vld [vmem:[%s15308_s5 + $0x30] sm:$0xff] }
 0x649   : > { %v6577_v46 = vpop.f32.mrf.mxu2  ;;  %6976 = vmatpush.bf16.msra.mxu1 %v9689_v57  ;;  %v9705_v57 = vld [vmem:[%s15308_s5 + $0xb8] sm:$0xff] }
 0x64a   : > { %v15016_v25 = vadd.f32 %v6577_v46, %v6544_v45  ;;  %7061 = vmatpush.bf16.msra.mxu2 %v9705_v57  ;;  %v9695_v57 = vld [vmem:[%s15308_s5 + $0x68] sm:$0xff] }
 0x64d   : > { %v6514_v30 = vpop.f32.mrf.mxu0  ;;  %6977 = vmatpush.bf16.msra.mxu1 %v9688_v28  ;;  %v9712_v28 = vld [vmem:[%s15308_s5 + $0xf0] sm:$0xff] }
 0x64e   : > { %v6548_v6 = vpop.f32.mrf.mxu1 }
 0x64f   : > { %v6549_v59 = vadd.f32 %v6548_v6, %v6514_v30 }
 0x651   : > { %v6579_v56 = vpop.f32.mrf.mxu2 }
 0x652   : > { %v15020_v23 = vadd.f32 %v6579_v56, %v6546_v14  ;;  %v15034_v14 = vpop.f32.mrf.mxu3 }
 0x655   : > { %v6516_v40 = vpop.f32.mrf.mxu0 }
 0x656   : > { %v6550_v12 = vpop.f32.mrf.mxu1 }
 0x657   : > { %v6551_v0 = vadd.f32 %v6550_v12, %v6516_v40 }
 0x659   : > { %v6582_v32 = vpop.f32.mrf.mxu2 }
 0x65a   : > { %v15022_v20 = vadd.f32 %v6582_v32, %v6549_v59  ;;  %v15038_v12 = vpop.f32.mrf.mxu3 }
 0x65d   : > { %v6519_v31 = vpop.f32.mrf.mxu0 }
 0x65e   : > { %v6553_v27 = vpop.f32.mrf.mxu1 }
 0x65f   : > { %v6554_v17 = vadd.f32 %v6553_v27, %v6519_v31 }
 0x661   : > { %v6584_v45 = vpop.f32.mrf.mxu2 }
 0x662   : > { %v15026_v33 = vadd.f32 %v6584_v45, %v6551_v0 }
 0x665   : > { %v6521_v46 = vpop.f32.mrf.mxu0 }
 0x666   : > { %v6555_v30 = vpop.f32.mrf.mxu1 }
 0x667   : > { %v6556_v6 = vadd.f32 %v6555_v30, %v6521_v46  ;;  %v6742_v46 = vpop.f32.mrf.mxu3 }
 0x669   : > { %v6587_v59 = vpop.f32.mrf.mxu2 }
 0x66a   : > { %v15036_v56 = vadd.f32 %v6587_v59, %v6554_v17  ;;  %v9713_v17 = vld [vmem:[%s15308_s5 + $0xf8] sm:$0xff] }
 0x66b   : > { %7148 = vmatpush.bf16.msra.mxu3 %v9713_v17 }
 0x66d   : > { %v6524_v40 = vpop.f32.mrf.mxu0 }
 0x66e   : > { %v6558_v0 = vpop.f32.mrf.mxu1 }
 0x66f   : > { %v6559_v32 = vadd.f32 %v6558_v0, %v6524_v40  ;;  %v9687_v0 = vld [vmem:[%s15308_s5 + $0x28] sm:$0xff]  ;;  %7149 = vmatpush.bf16.msra.mxu3 %v9712_v28 }
 0x670   : > { %6978 = vmatpush.bf16.msra.mxu1 %v9687_v0 }
 0x671   : > { %v6589_v31 = vpop.f32.mrf.mxu2 }
 0x672   : > { %v15040_v27 = vadd.f32 %v6589_v31, %v6556_v6  ;;  %v9696_v6 = vld [vmem:[%s15308_s5 + $0x70] sm:$0xff] }
 0x673   : > { %6909 = vmatpush.bf16.msra.mxu0 %v9696_v6  ;;  %v6744_v6 = vpop.f32.mrf.mxu3 }
 0x675   : > { %v6526_v45 = vpop.f32.mrf.mxu0 }
 0x676   : > { %v6560_v19 = vpop.f32.mrf.mxu1 }
 0x677   : > { %v6561_v30 = vadd.f32 %v6560_v19, %v6526_v45  ;;  %v9686_v19 = vld [vmem:[%s15308_s5 + $0x20] sm:$0xff]  ;;  %6910 = vmatpush.bf16.msra.mxu0 %v9695_v57 }
 0x678   : > { %6979 = vmatpush.bf16.msra.mxu1 %v9686_v19 }
 0x679   : > { %v6592_v59 = vpop.f32.mrf.mxu2 }
 0x67a   : > { %v15054_v40 = vadd.f32 %v6592_v59, %v6559_v32  ;;  %v9704_v32 = vld [vmem:[%s15308_s5 + $0xb0] sm:$0xff]  ;;  %v9685_v59 = vld [vmem:[%s15308_s5 + $0x18] sm:$0xff] }
 0x67b   : > { %7062 = vmatpush.bf16.msra.mxu2 %v9704_v32  ;;  %v9711_v32 = vld [vmem:[%s15308_s5 + $0xe8] sm:$0xff]  ;;  %v6747_v57 = vpop.f32.mrf.mxu3 }
 0x67c   : > { %6980 = vmatpush.bf16.msra.mxu1 %v9685_v59  ;;  %7150 = vmatpush.bf16.msra.mxu3 %v9711_v32 }
 0x67d   : > { %v6640_v31 = vpop.f32.mrf.mxu0 }
 0x67e   : > { %v6674_v7 = vpop.f32.mrf.mxu1 }
 0x67f   : > { %v6675_v37 = vadd.f32 %v6674_v7, %v6640_v31  ;;  %v9683_v7 = vld [vmem:[%s15308_s5 + $0x8] sm:$0xff]  ;;  %v6607_v31 = vadd.f32 %v14959_v5, %v15005_v43  ;;  %v9694_v5 = vld [vmem:[%s15308_s5 + $0x60] sm:$0xff] }
 0x680   : > { %6981 = vmatpush.bf16.msra.mxu1 %v9684_v63  ;;  %v15096_v63 = vld [vmem:[%s15307_s4] ss:$0 sm:$0xff]  ;;  %6911 = vmatpush.bf16.msra.mxu0 %v9694_v5 }
 0x681   : > { %v6594_v45 = vpop.f32.mrf.mxu2  ;;  %v9682_v43 = vld [vmem:[%s15308_s5] sm:$0xff] }
 0x682   : > { %v15071_v17 = vadd.f32 %v6594_v45, %v6561_v30  ;;  %v9703_v30 = vld [vmem:[%s15308_s5 + $0xa8] sm:$0xff] }
 0x683   : > { %7063 = vmatpush.bf16.msra.mxu2 %v9703_v30 }
 0x684   : > { %6982 = vmatpush.bf16.msra.mxu1 %v9683_v7  ;;  %v6749_v7 = vpop.f32.mrf.mxu3 }
 0x685   : > { %v6642_v0 = vpop.f32.mrf.mxu0 }
 0x686   : > { %v6676_v4 = vpop.f32.mrf.mxu1 }
 0x687   : > { %v6677_v10 = vadd.f32 %v6676_v4, %v6642_v0  ;;  %7064 = vmatpush.bf16.msra.mxu2 %v9702_v55  ;;  %v6609_v4 = vadd.f32 %v14977_v24, %v15010_v51  ;;  %v9710_v24 = vld [vmem:[%s15308_s5 + $0xe0] sm:$0xff] }
 0x688   : > { %6983 = vmatpush.bf16.msra.mxu1 %v9682_v43  ;;  %v9692_v43 = vld [vmem:[%s15308_s5 + $0x50] sm:$0xff]  ;;  %7151 = vmatpush.bf16.msra.mxu3 %v9710_v24 }
 0x689   : > { %v6708_v19 = vpop.f32.mrf.mxu2 }
 0x68a   : > { %v6709_v45 = vadd.f32 %v6708_v19, %v6675_v37 }
 0x68c   : > { %v6743_v28 = vadd.f32 %v6742_v46, %v6709_v45 }
 0x68d   : > { %v6645_v8 = vpop.f32.mrf.mxu0 }
 0x68e   : > { %v6767_v59 = vmax.f32 %v6607_v31, %v6743_v28  ;;  %v6679_v30 = vpop.f32.mrf.mxu1 }
 0x68f   : > { %v6680_v28 = vadd.f32 %v6679_v30, %v6645_v8 }
 0x690   : > { %v6777_v37 = vmax.f32 %v6365_v60, %v6767_v59  ;;  %v9693_v60 = vld [vmem:[%s15308_s5 + $0x58] sm:$0xff] }
 0x691   : > { %v6710_v46 = vpop.f32.mrf.mxu2  ;;  %6912 = vmatpush.bf16.msra.mxu0 %v9693_v60 }
 0x692   : > { %v6711_v34 = vadd.f32 %v6710_v46, %v6677_v10  ;;  %v6791_v0 = vadd.f32 %v15096_v63, %v6777_v37  ;;  %v15842_v10 = vmax.f32 %v14906_v16, %v14909_v53  ;;  %v9691_v16 = vld [vmem:[%s15308_s5 + $0x48] sm:$0xff]  ;;  %v6612_v53 = vadd.f32 %v14988_v35, %v15016_v25  ;;  %v9701_v35 = vld [vmem:[%s15308_s5 + $0x98] sm:$0xff] }
 0x693   : > { %v9709_v25 = vld [vmem:[%s15308_s5 + $0xd8] sm:$0xff]  ;;  %7065 = vmatpush.bf16.msra.mxu2 %v9701_v35  ;;  %v15845_v35 = vmax.f32 %v14941_v42, %v14944_v41  ;;  %v6619_v42 = vadd.f32 %v15014_v58, %v15026_v33 }
 0x694   : > { %v6745_v19 = vadd.f32 %v6744_v6, %v6711_v34  ;;  %v6801_v31 = vmax.f32 %v6791_v0, 0.0  ;;  %7152 = vmatpush.bf16.msra.mxu3 %v9709_v25 }
 0x695   : > { %v6647_v45 = vpop.f32.mrf.mxu0  ;;  %6913 = vmatpush.bf16.msra.mxu0 %v9692_v43 }
 0x696   : > { %v6768_v32 = vmax.f32 %v6609_v4, %v6745_v19  ;;  %v6681_v5 = vpop.f32.mrf.mxu1  ;;  %v6811_v8 = vpack.c.bf16 %v6801_v31, %v6801_v31 }
 0x697   : > { %v6682_v19 = vadd.f32 %v6681_v5, %v6647_v45 }
 0x698   : > { %v6778_v59 = vmax.f32 %v15842_v10, %v6768_v32  ;;  %v6924_v4 = vunpack.c.l.b16 %v6811_v8  ;;  %v15843_v32 = vmax.f32 %v14920_v38, %v14923_v52  ;;  %v6614_v38 = vadd.f32 %v15001_v54, %v15020_v23  ;;  %v9708_v54 = vld [vmem:[%s15308_s5 + $0xd0] sm:$0xff] }
 0x699   : > { %v6713_v51 = vpop.f32.mrf.mxu2  ;;  %6914 = vmatpush.bf16.msra.mxu0 %v9691_v16  ;;  %v15844_v16 = vmax.f32 %v14931_v11, %v14934_v21  ;;  %7153 = vmatpush.bf16.msra.mxu3 %v9708_v54  ;;  %v6617_v21 = vadd.f32 %v15007_v13, %v15022_v20  ;;  %v9721_v13 = vld [vmem:[%s15308_s5 + $0x138] sm:$0xff]  ;;  %v9707_v20 = vld [vmem:[%s15308_s5 + $0xc8] sm:$0xff] }
 0x69a   : > { %v6792_v6 = vadd.f32 %v15096_v63, %v6778_v59  ;;  %v6714_v37 = vadd.f32 %v6713_v51, %v6680_v28  ;;  %v9690_v59 = vld [vmem:[%s15308_s5 + $0x40] sm:$0xff] }
 0x69c   : > { %v6802_v30 = vmax.f32 %v6792_v6, 0.0  ;;  %v6748_v46 = vadd.f32 %v6747_v57, %v6714_v37  ;;  %v6752_v57 = vpop.f32.mrf.mxu3 }
 0x69d   : > { %v6650_v60 = vpop.f32.mrf.mxu0  ;;  %6915 = vmatpush.bf16.msra.mxu0 %v9690_v59  ;;  %7154 = vmatpush.bf16.msra.mxu3 %v9707_v20 }
 0x69e   : > { %v6812_v55 = vpack.c.bf16 %v6802_v30, %v6802_v30  ;;  %v6769_v34 = vmax.f32 %v6612_v53, %v6748_v46  ;;  %v6684_v10 = vpop.f32.mrf.mxu1  ;;  %v9700_v30 = vld [vmem:[%s15308_s5 + $0x90] sm:$0xff] }
 0x69f   : > { %v6685_v37 = vadd.f32 %v6684_v10, %v6650_v60  ;;  %7066 = vmatpush.bf16.msra.mxu2 %v9700_v30 }
 0x6a0   : > { %v6925_v0 = vunpack.c.l.b16 %v6812_v55  ;;  %v6779_v28 = vmax.f32 %v15843_v32, %v6769_v34  ;;  %v9699_v55 = vld [vmem:[%s15308_s5 + $0x88] sm:$0xff] }
 0x6a1   : > { %v6715_v31 = vpop.f32.mrf.mxu2  ;;  %7235 = vmatpush.bf16.msrb.mxu0 %v9721_v13 }
 0x6a2   : > { %v6716_v45 = vadd.f32 %v6715_v31, %v6682_v19  ;;  %v6926_v5 = vpack.c.b16 %v6925_v0, %v6924_v4  ;;  %v6793_v52 = vadd.f32 %v15096_v63, %v6779_v28 }
 0x6a3   : > { %7067 = vmatpush.bf16.msra.mxu2 %v9699_v55 }
 0x6a4   : > { %v6750_v43 = vadd.f32 %v6749_v7, %v6716_v45  ;;  %6984 = vmatmul.bf16.vlgmr.msra.gmra.mxu1 %v6926_v5  ;;  %v6803_v6 = vmax.f32 %v6793_v52, 0.0  ;;  %v6754_v11 = vpop.f32.mrf.mxu3  ;;  %v9698_v45 = vld [vmem:[%s15308_s5 + $0x80] sm:$0xff] }
 0x6a5   : > { %v6652_v51 = vpop.f32.mrf.mxu0 }
 0x6a6   : > { %v6770_v24 = vmax.f32 %v6614_v38, %v6750_v43  ;;  %v6686_v8 = vpop.f32.mrf.mxu1  ;;  %v6813_v34 = vpack.c.bf16 %v6803_v6, %v6803_v6 }
 0x6a7   : > { %v6687_v59 = vadd.f32 %v6686_v8, %v6652_v51  ;;  %7068 = vmatpush.bf16.msra.mxu2 %v9698_v45  ;;  %v9720_v8 = vld [vmem:[%s15308_s5 + $0x130] sm:$0xff] }
 0x6a8   : > { %v6780_v53 = vmax.f32 %v15844_v16, %v6770_v24  ;;  %v6856_v28 = vunpack.c.l.b16 %v6813_v34  ;;  %7236 = vmatpush.bf16.msrb.mxu0 %v9720_v8 }
 0x6a9   : > { %v6718_v23 = vpop.f32.mrf.mxu2 }
 0x6aa   : > { %v6794_v7 = vadd.f32 %v15096_v63, %v6780_v53  ;;  %v6719_v46 = vadd.f32 %v6718_v23, %v6685_v37  ;;  %v15846_v37 = vmax.f32 %v14954_v18, %v14957_v29  ;;  %v9719_v23 = vld [vmem:[%s15308_s5 + $0x128] sm:$0xff]  ;;  %v6622_v18 = vadd.f32 %v15018_v22, %v15036_v56 }
 0x6ac   : > { %v6804_v60 = vmax.f32 %v6794_v7, 0.0  ;;  %v6753_v4 = vadd.f32 %v6752_v57, %v6719_v46  ;;  %v6757_v43 = vpop.f32.mrf.mxu3  ;;  %v6290_v7 = vadd.f32 %v14966_v61, %v14963_v2  ;;  %7237 = vmatpush.bf16.msrb.mxu0 %v9719_v23  ;;  %v9706_v2 = vld [vmem:[%s15308_s5 + $0xc0] sm:$0xff] }
 0x6ad   : > { %v6655_v32 = vpop.f32.mrf.mxu0  ;;  %v9718_v61 = vld [vmem:[%s15308_s5 + $0x120] sm:$0xff]  ;;  %7155 = vmatpush.bf16.msra.mxu3 %v9706_v2 }
 0x6ae   : > { %v6814_v0 = vpack.c.bf16 %v6804_v60, %v6804_v60  ;;  %v6771_v19 = vmax.f32 %v6617_v21, %v6753_v4  ;;  %v6689_v31 = vpop.f32.mrf.mxu1 }
 0x6af   : > { %v6690_v6 = vadd.f32 %v6689_v31, %v6655_v32  ;;  %v15847_v32 = vmax.f32 %v14970_v47, %v14973_v50  ;;  %v9717_v47 = vld [vmem:[%s15308_s5 + $0x118] sm:$0xff]  ;;  %v6624_v31 = vadd.f32 %v15024_v36, %v15040_v27  ;;  %v9715_v36 = vld [vmem:[%s15308_s5 + $0x108] sm:$0xff]  ;;  %v6295_v27 = vadd.f32 %v14986_v49, %v14983_v44 }
 0x6b0   : > { %v6857_v10 = vunpack.c.l.b16 %v6814_v0  ;;  %v6781_v25 = vmax.f32 %v15845_v35, %v6771_v19  ;;  %7238 = vmatpush.bf16.msrb.mxu0 %v9718_v61  ;;  %v15848_v35 = vld [vmem:[#allocation40_spill] sm:$0xff]  ;;  %v15849_v49 = vmax.f32 %v14992_v9, %v14994_v3 }
 0x6b1   : > { %v6720_v57 = vpop.f32.mrf.mxu2  ;;  %v6329_v8 = vadd.f32 %v14998_v48, %v6295_v27  ;;  %v9851_v27 = vld [vmem:[%s15309_s6] ss:$0 sm:$0xff] }
 0x6b2   : > { %v6721_v5 = vadd.f32 %v6720_v57, %v6687_v59  ;;  %v6858_v38 = vpack.c.b16 %v6857_v10, %v6856_v28  ;;  %v6795_v41 = vadd.f32 %v15096_v63, %v6781_v25  ;;  %v6222_v25 = vadd.f32 %v15848_v35, %v14868_v15  ;;  %v9716_v57 = vld [vmem:[%s15308_s5 + $0x110] sm:$0xff] }
 0x6b4   : > { %v6755_v52 = vadd.f32 %v6754_v11, %v6721_v5  ;;  %6916 = vmatmul.bf16.vlgmr.msra.gmra.mxu0 %v6858_v38  ;;  %v6805_v51 = vmax.f32 %v6795_v41, 0.0  ;;  %v6324_v11 = vadd.f32 %v14979_v39, %v6290_v7  ;;  %v6759_v60 = vpop.f32.mrf.mxu3  ;;  %v6363_v7 = vadd.f32 %v14946_v1, %v6329_v8 }
 0x6b5   : > { %v6657_v53 = vpop.f32.mrf.mxu0  ;;  %7239 = vmatpush.bf16.msrb.mxu0 %v9717_v47  ;;  %v9722_v47 = vld [vmem:[%s15310_s7] sm:$0xff] }
 0x6b6   : > { %v6772_v24 = vmax.f32 %v6619_v42, %v6755_v52  ;;  %v6691_v30 = vpop.f32.mrf.mxu1  ;;  %v6815_v29 = vpack.c.bf16 %v6805_v51, %v6805_v51  ;;  %v6358_v22 = vadd.f32 %v14916_v62, %v6324_v11 }
 0x6b7   : > { %v6692_v19 = vadd.f32 %v6691_v30, %v6657_v53 }
 0x6b8   : > { %v6782_v16 = vmax.f32 %v15846_v37, %v6772_v24  ;;  %v7009_v4 = vunpack.c.l.b16 %v6815_v29  ;;  %v6372_v62 = vmax.f32 %v6222_v25, %v6358_v22  ;;  %v6627_v24 = vadd.f32 %v15034_v14, %v15054_v40  ;;  %v9724_v22 = vld [vmem:[%s15310_s7 + $0x10] sm:$0xff]  ;;  %v9735_v25 = vld [vmem:[%s15312_s9 + $0x28] sm:$0xff] }
 0x6b9   : > { %v6723_v54 = vpop.f32.mrf.mxu2  ;;  %7240 = vmatpush.bf16.msrb.mxu0 %v9716_v57 }
 0x6ba   : > { %v6796_v58 = vadd.f32 %v15096_v63, %v6782_v16  ;;  %v6724_v33 = vadd.f32 %v6723_v54, %v6690_v6 }
 0x6bc   : > { %v6806_v46 = vmax.f32 %v6796_v58, 0.0  ;;  %v6758_v55 = vadd.f32 %v6757_v43, %v6724_v33  ;;  %v6762_v41 = vpop.f32.mrf.mxu3  ;;  %v9714_v58 = vld [vmem:[%s15308_s5 + $0x100] sm:$0xff] }
 0x6bd   : > { %v6660_v50 = vpop.f32.mrf.mxu0  ;;  %7241 = vmatpush.bf16.msrb.mxu0 %v9715_v36 }
 0x6be   : > { %v6816_v21 = vpack.c.bf16 %v6806_v46, %v6806_v46  ;;  %v6773_v34 = vmax.f32 %v6622_v18, %v6758_v55  ;;  %v6694_v59 = vpop.f32.mrf.mxu1  ;;  %v15850_v55 = vld [vmem:[#allocation57_spill] sm:$0xff] }
 0x6bf   : > { %v6695_v38 = vadd.f32 %v6694_v59, %v6660_v50  ;;  %v6227_v11 = vadd.f32 %v15850_v55, %v14881_v26  ;;  %v9729_v26 = vld [vmem:[%s15310_s7 + $0x38] sm:$0xff]  ;;  %v9736_v59 = vld [vmem:[%s15312_s9 + $0x30] sm:$0xff] }
 0x6c0   : > { %v7010_v0 = vunpack.c.l.b16 %v6816_v21  ;;  %v6783_v28 = vmax.f32 %v15847_v32, %v6773_v34  ;;  %v6629_v21 = vadd.f32 %v15038_v12, %v15071_v17  ;;  %7328 = vmatpush.bf16.msrb.mxu1 %v9729_v26  ;;  %v9728_v12 = vld [vmem:[%s15310_s7 + $0x30] sm:$0xff]  ;;  %v9727_v17 = vld [vmem:[%s15310_s7 + $0x28] sm:$0xff]  ;;  %v9737_v50 = vld [vmem:[%s15312_s9 + $0x38] sm:$0xff] }
 0x6c1   : > { %v6725_v39 = vpop.f32.mrf.mxu2  ;;  %7242 = vmatpush.bf16.msrb.mxu0 %v9714_v58  ;;  %7413 = vmatpush.bf16.msrb.mxu2 %v9737_v50  ;;  %v9732_v58 = vld [vmem:[%s15312_s9 + $0x10] sm:$0xff] }
 0x6c2   : > { %v6726_v56 = vadd.f32 %v6725_v39, %v6692_v19  ;;  %v7011_v10 = vpack.c.b16 %v7010_v0, %v7009_v4  ;;  %v6797_v45 = vadd.f32 %v15096_v63, %v6783_v28  ;;  %v9725_v39 = vld [vmem:[%s15310_s7 + $0x18] sm:$0xff] }
 0x6c4   : > { %v6760_v13 = vadd.f32 %v6759_v60, %v6726_v56  ;;  %7069 = vmatmul.bf16.vlgmr.msra.gmra.mxu2 %v7011_v10  ;;  %v6807_v5 = vmax.f32 %v6797_v45, 0.0  ;;  %v6764_v46 = vpop.f32.mrf.mxu3  ;;  %v6374_v60 = vmax.f32 %v6227_v11, %v6363_v7  ;;  %7329 = vmatpush.bf16.msrb.mxu1 %v9728_v12  ;;  %v9723_v10 = vld [vmem:[%s15310_s7 + $0x8] sm:$0xff]  ;;  %v9853_v11 = vld [vmem:[%s15313_s10] ss:$0 sm:$0xff] }
 0x6c5   : > { %v6662_v16 = vpop.f32.mrf.mxu0  ;;  %7414 = vmatpush.bf16.msrb.mxu2 %v9736_v59 }
 0x6c6   : > { %v6774_v20 = vmax.f32 %v6624_v31, %v6760_v13  ;;  %v6817_v51 = vpack.c.bf16 %v6807_v5, %v6807_v5  ;;  %v6696_v53 = vpop.f32.mrf.mxu1 }
 0x6c7   : > { %v6697_v44 = vadd.f32 %v6696_v53, %v6662_v16 }
 0x6c8   : > { %v6784_v42 = vmax.f32 %v6372_v62, %v6774_v20  ;;  %v7096_v33 = vunpack.c.l.b16 %v6817_v51  ;;  %7330 = vmatpush.bf16.msrb.mxu1 %v9727_v17  ;;  %v9734_v62 = vld [vmem:[%s15312_s9 + $0x20] sm:$0xff] }
 0x6c9   : > { %v6728_v52 = vpop.f32.mrf.mxu2  ;;  %7415 = vmatpush.bf16.msrb.mxu2 %v9735_v25 }
 0x6ca   : > { %v6798_v15 = vadd.f32 %v15096_v63, %v6784_v42  ;;  %v6729_v43 = vadd.f32 %v6728_v52, %v6695_v38 }
 0x6cc   : > { %v6808_v6 = vmax.f32 %v6798_v15, 0.0  ;;  %v6763_v37 = vadd.f32 %v6762_v41, %v6729_v43 }
 0x6cd   : > { %7416 = vmatpush.bf16.msrb.mxu2 %v9734_v62 }
 0x6ce   : > { %v6818_v30 = vpack.c.bf16 %v6808_v6, %v6808_v6  ;;  %v6775_v54 = vmax.f32 %v6627_v24, %v6763_v37 }
 0x6d0   : > { %v7097_v23 = vunpack.c.l.b16 %v6818_v30  ;;  %v6785_v14 = vmax.f32 %v15849_v49, %v6775_v54  ;;  %v9733_v54 = vld [vmem:[%s15312_s9 + $0x18] sm:$0xff]  ;;  %v9852_v49 = vld [vmem:[%s15311_s8] ss:$0 sm:$0xff] }
 0x6d1   : > { %v6730_v40 = vpop.f32.mrf.mxu2  ;;  %7417 = vmatpush.bf16.msrb.mxu2 %v9733_v54 }
 0x6d2   : > { %v6799_v18 = vadd.f32 %v15096_v63, %v6785_v14  ;;  %v6731_v48 = vadd.f32 %v6730_v40, %v6697_v44  ;;  %v7098_v29 = vpack.c.b16 %v7097_v23, %v7096_v33  ;;  %v9731_v33 = vld [vmem:[%s15312_s9 + $0x8] sm:$0xff]  ;;  %v9730_v23 = vld [vmem:[%s15312_s9] sm:$0xff] }
 0x6d4   : > { %v6765_v34 = vadd.f32 %v6764_v46, %v6731_v48  ;;  %7156 = vmatmul.bf16.vlgmr.msra.gmra.mxu3 %v7098_v29  ;;  %v6809_v3 = vmax.f32 %v6799_v18, 0.0  ;;  %v7427_v46 = vlaneseq }
 0x6d5   : > { %7418 = vmatpush.bf16.msrb.mxu2 %v9732_v58 }
 0x6d6   : > { %v6776_v9 = vmax.f32 %v6629_v21, %v6765_v34  ;;  %v6819_v0 = vpack.c.bf16 %v6809_v3, %v6809_v3  ;;  %v7428_v55 = vand.u32 127, %v7427_v46 }
 0x6d8   : > { %v6786_v4 = vmax.f32 %v6374_v60, %v6776_v9  ;;  %v7183_v28 = vunpack.c.l.b16 %v6819_v0  ;;  %vm7429_vm10 = vcmp.lt.s32.totalorder %v7428_v55, 10 }
 0x6d9   : > { %7419 = vmatpush.bf16.msrb.mxu2 %v9731_v33 }
 0x6da   : > { %v6800_v1 = vadd.f32 %v15096_v63, %v6786_v4  ;;  %v9726_v63 = vld [vmem:[%s15310_s7 + $0x20] sm:$0xff] }
 0x6db   : > { %7331 = vmatpush.bf16.msrb.mxu1 %v9726_v63 }
 0x6dc   : > { %v6810_v19 = vmax.f32 %v6800_v1, 0.0 }
 0x6dd   : > { %7420 = vmatpush.bf16.msrb.mxu2 %v9730_v23 }
 0x6de   : > { %v6820_v32 = vpack.c.bf16 %v6810_v19, %v6810_v19 }
 0x6df   : > { %7332 = vmatpush.bf16.msrb.mxu1 %v9725_v39 }
 0x6e0   : > { %v7184_v2 = vunpack.c.l.b16 %v6820_v32 }
 0x6e2   : > { %v7185_v61 = vpack.c.b16 %v7184_v2, %v7183_v28 }
 0x6e3   : > { %7333 = vmatpush.bf16.msrb.mxu1 %v9724_v22 }
 0x6e4   : > { %7243 = vmatmul.bf16.vlgmr.msrb.gmra.mxu0 %v7185_v61 }
 0x6e7   : > { %7334 = vmatpush.bf16.msrb.mxu1 %v9723_v10 }
 0x6eb   : > { %7335 = vmatpush.bf16.msrb.mxu1 %v9722_v47 }
 0x721   : > { %v6985_v35 = vpop.f32.mrf.mxu1 }
 0x729   : > { %v6987_v38 = vpop.f32.mrf.mxu1 }
 0x731   : > { %v6917_v56 = vpop.f32.mrf.mxu0 }
 0x732   : > { %v6986_v20 = vadd.f32 %v6985_v35, %v6917_v56 }
 0x739   : > { %v6919_v31 = vpop.f32.mrf.mxu0 }
 0x73a   : > { %v6988_v41 = vadd.f32 %v6987_v38, %v6919_v31 }
 0x747   : > { %v7070_v45 = vpop.f32.mrf.mxu2 }
 0x748   : > { %v7075_v5 = vadd.f32 %v7070_v45, %v6986_v20 }
 0x74f   : > { %v7072_v42 = vpop.f32.mrf.mxu2 }
 0x750   : > { %v7076_v43 = vadd.f32 %v7072_v42, %v6988_v41 }
 0x757   : > { %v7157_v13 = vpop.f32.mrf.mxu3 }
 0x758   : > { %v7162_v52 = vadd.f32 %v7157_v13, %v7075_v5 }
 0x75f   : > { %v7159_v15 = vpop.f32.mrf.mxu3 }
 0x760   : > { %v7163_v24 = vadd.f32 %v7159_v15, %v7076_v43 }
 0x761   : > { %v7244_v57 = vpop.f32.mrf.mxu0 }
 0x762   : > { %v7249_v36 = vadd.f32 %v7244_v57, %v7162_v52 }
 0x764   : > { %v7255_v6 = vadd.f32 %v9851_v27, %v7249_v36 }
 0x766   : > { %v7257_v53 = vmax.f32 %v7255_v6, 0.0 }
 0x769   : > { %v7246_v51 = vpop.f32.mrf.mxu0 }
 0x76a   : > { %v7250_v37 = vadd.f32 %v7246_v51, %v7163_v24 }
 0x76c   : > { %v7256_v16 = vadd.f32 %v9851_v27, %v7250_v37 }
 0x76e   : > { %v7258_v8 = vmax.f32 %v7256_v16, 0.0 }
 0x770   : > { %v7259_v30 = vpack.c.bf16 %v7258_v8, %v7257_v53 }
 0x772   : > { %7336 = vmatmul.bf16.vlgmr.msrb.gmra.mxu1 %v7259_v30 }
 0x7ef   : > { %v7337_v44 = vpop.f32.mrf.mxu1 }
 0x7f0   : > { %v7338_v14 = vadd.f32 %v9852_v49, %v7337_v44 }
 0x7f2   : > { %v7342_v18 = vmax.f32 %v7338_v14, 0.0 }
 0x7f7   : > { %v7339_v40 = vpop.f32.mrf.mxu1 }
 0x7f8   : > { %v7340_v7 = vadd.f32 %v9852_v49, %v7339_v40 }
 0x7fa   : > { %v7343_v48 = vmax.f32 %v7340_v7, 0.0 }
 0x7fc   : > { %v7344_v29 = vpack.c.bf16 %v7343_v48, %v7342_v18 }
 0x7fe   : > { %7421 = vmatmul.bf16.vlgmr.msrb.gmra.mxu2 %v7344_v29 }
 0x881   : > { %v7422_v21 = vpop.f32.mrf.mxu2 }
 0x882   : > { %v7423_v34 = vadd.f32 %v9853_v11, %v7422_v21 }
 0x884   : > { %v7430_v60 = vsel %vm7429_vm10, %v7423_v34, -1e+30 }
 0x885   : > { %7432 = vmax.xlane.f32.xlu0 %v7430_v60 }
 0x889   : > { %v7424_v9 = vpop.f32.mrf.mxu2 }
 0x88a   : > { %v7425_v3 = vadd.f32 %v9853_v11, %v7424_v9 }
 0x88c   : > { %v7431_v4 = vsel %vm7429_vm10, %v7425_v3, -1e+30 }
 0x88d   : > { %7434 = vmax.xlane.f32.xlu1 %v7431_v4 }
 0x8f8   : > { %v7433_v1 = vpop.xlane.xlu0 %7432 }
 0x8f9   : > { %v7436_v0 = vsub.f32 %v7423_v34, %v7433_v1 }
 0x8fb   : > { %v7438_v19 = vsel %vm7429_vm10, %v7436_v0, -1e+30 }
 0x8fc   : > { %v7440_v32 = vmul.f32 1.442695, %v7438_v19 }
 0x8fe   : > { %9854 = vpow2.f32 %v7440_v32 }
 0x900   : > { %v7435_v28 = vpop.xlane.xlu1 %7434 }
 0x901   : > { %v7437_v2 = vsub.f32 %v7425_v3, %v7435_v28 }
 0x903   : > { %v7439_v61 = vsel %vm7429_vm10, %v7437_v2, -1e+30 }
 0x904   : > { %v9855_v26 = vpop.eup %9854  ;;  %v7442_v12 = vmul.f32 1.442695, %v7439_v61 }
 0x905   : > { %7444 = vadd.xlane.f32.xlu2 %v9855_v26 }
 0x906   : > { %9856 = vpow2.f32 %v7442_v12 }
 0x90c   : > { %v9857_v17 = vpop.eup %9856 }
 0x90d   : > { %7446 = vadd.xlane.f32.xlu2 %v9857_v17 }
 0x978   : > { %v7445_v63 = vpop.xlane.xlu2 %7444 }
 0x979   : > { %9858 = vlog2.f32 %v7445_v63 }
 0x97f   : > { %v9859_v39 = vpop.eup %9858 }
 0x980   : > { %v7449_v22 = vmul.f32 0.6931472, %v9859_v39  ;;  %v7447_v56 = vpop.xlane.xlu2 %7446 }
 0x981   : > { %9860 = vlog2.f32 %v7447_v56 }
 0x982   : > { %v7452_v10 = vsub.f32 %v7436_v0, %v7449_v22 }
 0x984   : > { %7454 = vst [vmem:[%s470_s30] sm:$0xff] %v7452_v10 }
 0x987   : > { %v9861_v47 = vpop.eup %9860 }
 0x988   : > { %v7451_v50 = vmul.f32 0.6931472, %v9861_v47 }
 0x98a   : > { %v7453_v59 = vsub.f32 %v7437_v2, %v7451_v50 }
 0x98c   : > { %7455 = vst [vmem:[%s470_s30 + $0x8] sm:$0xff] %v7453_v59 }
 0x98d PF: > { %p18_p9 = scmp.ge.s32.totalorder %s9967_s21, 4   ;;  %s15851_s17 = smov %s9880_s18 }
 0x98e   : > { %s15852_s18 = smov %s9976_s24  ;;  %s15853_s19 = smov %s9967_s21 }
 0x98f   :  { %20 = sbr.rel (!%p18_p9) target bundleno = 2 (0x2), region = 128 }

</bundles_post_ra>
